<compile_context>
chip_gen: v7x
topology: tpu7x:2x2x1
jax: 0.10.0
libtpu: 0.0.40
codegen_flags: <defaults>
</compile_context>

<pallas_src>
import functools

import jax
import jax.numpy as jnp
from jax.experimental import pallas as pl
from jax.experimental.pallas import tpu as pltpu


# ---------------------------------------------------------------------------
# Synthetic decoder architecture (stand-in for the injected `autoencoder`).
# ---------------------------------------------------------------------------
LATENT_DIM = 8     # channels of the sampled latent
HIDDEN = 32        # decoder hidden width
OUT_CH = 2         # stereo audio
K_IN = 7           # Conv1d kernel (pad 3 -> "same")
K_UP = 4           # ConvTranspose1d kernel (stride 2, pad 1 -> exact 2x)
K_OUT = 7          # Conv1d kernel (pad 3 -> "same")
UPSAMPLE = 4       # total time upsampling (two 2x stages)
HALO = 6           # latent frames of halo per side of a time tile (receptive field)


def init_decoder_params(key):
    ks = jax.random.split(key, 8)
    s = 0.1
    return {
        # Conv1d(latent -> hidden, K=7, pad=3); stored as (K, Cin, Cout)
        "w_in": s * jax.random.normal(ks[0], (K_IN, LATENT_DIM, HIDDEN), jnp.float32),
        "b_in": s * jax.random.normal(ks[1], (HIDDEN,), jnp.float32),
        # ConvTranspose1d(hidden -> hidden//2, K=4, s=2, p=1); PyTorch (Cin, Cout, K)
        "w_up1": s * jax.random.normal(ks[2], (HIDDEN, HIDDEN // 2, K_UP), jnp.float32),
        "b_up1": s * jax.random.normal(ks[3], (HIDDEN // 2,), jnp.float32),
        # ConvTranspose1d(hidden//2 -> hidden//4, K=4, s=2, p=1)
        "w_up2": s * jax.random.normal(ks[4], (HIDDEN // 2, HIDDEN // 4, K_UP), jnp.float32),
        "b_up2": s * jax.random.normal(ks[5], (HIDDEN // 4,), jnp.float32),
        # Conv1d(hidden//4 -> out_ch, K=7, pad=3) + tanh; (K, Cin, Cout)
        "w_out": s * jax.random.normal(ks[6], (K_OUT, HIDDEN // 4, OUT_CH), jnp.float32),
        "b_out": s * jax.random.normal(ks[7], (OUT_CH,), jnp.float32),
    }


# ---------------------------------------------------------------------------
# In-kernel helpers.
# ---------------------------------------------------------------------------
def _snake(x):
    # Snake activation with alpha = 1: x + sin(x)^2.
    # TODO(synk): real Oobleck decoders use a learnable per-channel alpha.
    return x + jnp.sin(x) ** 2


def _valid_mask(ncols, first, stride, total):
    """(1, ncols) float mask; column c is valid iff first + stride*c in [0, total).

    Built from a lane iota so it broadcasts over the channel (sublane) axis of
    the lane-dense (C, T) activations.
    # TODO(synk): skip this for interior tiles (only the first/last time tile
    # can have out-of-range frames); kept unconditional to stay branch-free.
    """
    f = first + stride * jax.lax.broadcasted_iota(jnp.int32, (1, ncols), 1)
    return jnp.logical_and(f >= 0, f < total).astype(jnp.float32)


# ---------------------------------------------------------------------------
# Fused decoder kernel: one (batch, time-tile) grid step = one audio tile.
# All activations are (channels, time) with time on lanes; the two transposed
# convolutions are computed in polyphase form and NEVER interleaved - the
# audio leaves the kernel as 4 phase slabs (phase, channel, time/4).
# ---------------------------------------------------------------------------
def _fused_decoder_kernel(x_ref, w_in_ref, b_in_ref,
                          w1_ref, b1_ref, w2_ref, b2_ref,
                          w_out_ref, b_out_ref, o_ref,
                          *, tile_n, n_latent):
    t0 = pl.program_id(1) * tile_n            # first latent frame of this tile
    start = pl.multiple_of(t0, 8)             # sublane-aligned window start

    tile_w = tile_n + 2 * HALO                # latent window incl. halo
    l1 = tile_n + 6                           # h1 frames  [t0-3, t0+tile_n+3)
    ly = tile_n + 4                           # y  columns (per phase)
    lz = tile_n + 2                           # z  columns (per phase)

    # Halo'd latent window (time, chan) sliced from the resident per-batch
    # latent, then transposed to lane-dense (chan, time) with a tiny identity
    # matmul (MXU) instead of an explicit relayout.
    xw_tc = x_ref[0, pl.ds(start, tile_w), :]                     # (tile_w, 8)
    eye = jnp.eye(LATENT_DIM, dtype=jnp.float32)
    xw = jax.lax.dot_general(eye, xw_tc, (((1,), (1,)), ((), ())),
                             preferred_element_type=jnp.float32)  # (8, tile_w)

    # ---- layer 1: Conv1d(8->32, K=7, pad=3) + snake; per-tap accumulation --
    h1 = jnp.zeros((HIDDEN, l1), jnp.float32)
    for k in range(K_IN):
        h1 = h1 + jnp.dot(w_in_ref[k], xw[:, k:k + l1],
                          preferred_element_type=jnp.float32)
    h1 = _snake(h1 + b_in_ref[...])
    h1 = h1 * _valid_mask(l1, t0 - 3, 1, n_latent)      # col j <-> frame t0-3+j

    # ---- layer 2: ConvT(32->16, K=4, s=2, p=1) + snake; 2 phases, no stuff --
    # y_e col v <-> frame 2*(t0-2+v), y_o col v <-> frame 2*(t0-2+v)+1
    y_e = (jnp.dot(w1_ref[1], h1[:, 1:1 + ly], preferred_element_type=jnp.float32)
           + jnp.dot(w1_ref[3], h1[:, 0:ly], preferred_element_type=jnp.float32)
           + b1_ref[...])
    y_o = (jnp.dot(w1_ref[0], h1[:, 2:2 + ly], preferred_element_type=jnp.float32)
           + jnp.dot(w1_ref[2], h1[:, 1:1 + ly], preferred_element_type=jnp.float32)
           + b1_ref[...])
    y_e = _snake(y_e) * _valid_mask(ly, 2 * t0 - 4, 2, 2 * n_latent)
    y_o = _snake(y_o) * _valid_mask(ly, 2 * t0 - 3, 2, 2 * n_latent)

    # ---- layer 3: ConvT(16->8, K=4, s=2, p=1) + snake; 4 phases -------------
    # z_p col m <-> frame 4*(t0-1+m) + p
    z0 = (jnp.dot(w2_ref[1], y_e[:, 1:1 + lz], preferred_element_type=jnp.float32)
          + jnp.dot(w2_ref[3], y_o[:, 0:lz], preferred_element_type=jnp.float32)
          + b2_ref[...])
    z1 = (jnp.dot(w2_ref[0], y_o[:, 1:1 + lz], preferred_element_type=jnp.float32)
          + jnp.dot(w2_ref[2], y_e[:, 1:1 + lz], preferred_element_type=jnp.float32)
          + b2_ref[...])
    z2 = (jnp.dot(w2_ref[1], y_o[:, 1:1 + lz], preferred_element_type=jnp.float32)
          + jnp.dot(w2_ref[3], y_e[:, 1:1 + lz], preferred_element_type=jnp.float32)
          + b2_ref[...])
    z3 = (jnp.dot(w2_ref[0], y_e[:, 2:2 + lz], preferred_element_type=jnp.float32)
          + jnp.dot(w2_ref[2], y_o[:, 1:1 + lz], preferred_element_type=jnp.float32)
          + b2_ref[...])
    zs = []
    for p, zp in enumerate((z0, z1, z2, z3)):
        zp = _snake(zp) * _valid_mask(lz, 4 * (t0 - 1) + p, 4, 4 * n_latent)
        zs.append(zp)

    # ---- layer 4: Conv1d(8->2, K=7, pad=3) + tanh; phase-separated output --
    # audio phase q, col m <-> sample 4*(t0+m)+q of this batch row.
    for q in range(UPSAMPLE):
        acc = None
        for k in range(K_OUT):
            d = q + k - 3
            p = d % 4
            off = (d - p) // 4 + 1            # 0, 1 or 2 - static per (q, k)
            term = jnp.dot(w_out_ref[k], zs[p][:, off:off + tile_n],
                           preferred_element_type=jnp.float32)
            acc = term if acc is None else acc + term
        o_ref[q] = jnp.tanh(acc + b_out_ref[...]).astype(o_ref.dtype)


def _pick_tile_n(n_latent, batch, target=1024):
    """Largest multiple-of-128 divisor of n_latent (<= target), keeping at
    least two total grid steps so v7x's two TensorCores both get work."""
    divs = [d for d in range(128, min(n_latent, target) + 1, 128)
            if n_latent % d == 0]
    if not divs:
        return None
    for d in sorted(divs, reverse=True):
        if batch * (n_latent // d) >= 2:
            return d
    return max(divs)


def autoencoder_module_forward(params, sampled, *, tile_n=None):
    """Pallas equivalent of AutoEncoderModule.forward:
       audio = rearrange(decode(sampled.float()), 'b d n -> d (b n)')."""
    batch, c_lat, n_latent = sampled.shape
    assert c_lat == LATENT_DIM
    if tile_n is None:
        tile_n = _pick_tile_n(n_latent, batch)
    if tile_n is None or n_latent % tile_n != 0 or tile_n % 128 != 0:
        raise ValueError("latent length must admit a multiple-of-128 time tile")
    num_tiles = n_latent // tile_n

    # Channels-last padded latent.  Only this (smallest) tensor is padded; the
    # halo'd windows are sliced on-chip, so no duplicated window tensor ever
    # touches HBM.
    x = jnp.transpose(sampled.astype(jnp.float32), (0, 2, 1))     # (B, N, 8)
    x = jnp.pad(x, ((0, 0), (HALO, HALO), (0, 0)))                # (B, N+12, 8)

    # Per-tap weight matrices in (Cout, Cin) orientation (lane-dense compute).
    w_in = jnp.transpose(params["w_in"], (0, 2, 1))               # (7, 32, 8)
    b_in = params["b_in"].reshape(HIDDEN, 1)
    w1 = jnp.transpose(params["w_up1"], (2, 1, 0))                # (4, 16, 32)
    b1 = params["b_up1"].reshape(HIDDEN // 2, 1)
    w2 = jnp.transpose(params["w_up2"], (2, 1, 0))                # (4, 8, 16)
    b2 = params["b_up2"].reshape(HIDDEN // 4, 1)
    w_out = jnp.transpose(params["w_out"], (0, 2, 1))             # (7, 2, 8)
    b_out = params["b_out"].reshape(OUT_CH, 1)

    kernel = functools.partial(_fused_decoder_kernel, tile_n=tile_n,
                               n_latent=n_latent)

    def full(a):
        nd = a.ndim
        return pl.BlockSpec(a.shape, lambda b, i, nd=nd: (0,) * nd)

    phased = pl.pallas_call(
        kernel,
        out_shape=jax.ShapeDtypeStruct((UPSAMPLE, OUT_CH, batch * n_latent),
                                       jnp.float32),
        grid_spec=pltpu.PrefetchScalarGridSpec(
            num_scalar_prefetch=0,
            grid=(batch, num_tiles),
            in_specs=[
                # Whole padded latent of one batch row: the block index is
                # constant in the time-tile axis, so it is DMA'd once per
                # batch row and stays resident in VMEM across its tiles.
                pl.BlockSpec((1, n_latent + 2 * HALO, LATENT_DIM),
                             lambda b, i: (b, 0, 0)),
                full(w_in), full(b_in), full(w1), full(b1),
                full(w2), full(b2), full(w_out), full(b_out),
            ],
            # Lane-dense (>=128-lane) output stores; one (4, 2, tile_n) slab
            # of audio phases per grid step.
            out_specs=pl.BlockSpec((UPSAMPLE, OUT_CH, tile_n),
                                   lambda b, i: (0, 0, b * num_tiles + i)),
        ),
        compiler_params=pltpu.CompilerParams(
            dimension_semantics=("parallel", "parallel"),
            # Well within v7x's 64 MiB physical VMEM; ample on v5e/v6e.
            vmem_limit_bytes=48 * 1024 * 1024,
        ),
    )(x, w_in, b_in, w1, b1, w2, b2, w_out, b_out)

    # Cheap epilogue touching only the final audio once: interleave the 4
    # polyphase outputs back into time order and the 'b d n -> d (b n)' layout.
    audio = jnp.transpose(phased, (1, 2, 0)).reshape(
        OUT_CH, batch * UPSAMPLE * n_latent)
    return audio


# ---------------------------------------------------------------------------
# Pure-JAX reference (XLA convs) for a numerical self-check.
# ---------------------------------------------------------------------------
def reference_module_forward(params, sampled):
    x = jnp.transpose(sampled.astype(jnp.float32), (0, 2, 1))     # (B, N, C)
    dn = ("NWC", "WIO", "NWC")

    def conv(v, w, b, pad):
        return jax.lax.conv_general_dilated(v, w, (1,), [(pad, pad)],
                                            dimension_numbers=dn) + b

    def conv_t(v, w_t, b, stride, pad):
        k = w_t.shape[2]
        w = jnp.transpose(w_t, (2, 0, 1))[::-1]                   # flip taps
        return jax.lax.conv_general_dilated(v, w, (1,), [(k - 1 - pad,) * 2],
                                            lhs_dilation=(stride,),
                                            dimension_numbers=dn) + b

    h = _snake(conv(x, params["w_in"], params["b_in"], 3))
    h = _snake(conv_t(h, params["w_up1"], params["b_up1"], 2, 1))
    h = _snake(conv_t(h, params["w_up2"], params["b_up2"], 2, 1))
    h = jnp.tanh(conv(h, params["w_out"], params["b_out"], 3))
    audio = jnp.transpose(h, (0, 2, 1))                           # (B, D, 4N)
    b, d, t = audio.shape
    return jnp.transpose(audio, (1, 0, 2)).reshape(d, b * t)      # 'b d n -> d (b n)'


if __name__ == "__main__":
    key = jax.random.PRNGKey(0)
    k_param, k_inp = jax.random.split(key)
    params = init_decoder_params(k_param)

    B, N = 2, 256                               # small demo: latent (2, 8, 256)
    sampled = jax.random.normal(k_inp, (B, LATENT_DIM, N), jnp.float32)

    fwd = jax.jit(autoencoder_module_forward)
    audio = jax.block_until_ready(fwd(params, sampled))

    assert audio.shape == (OUT_CH, B * UPSAMPLE * N), audio.shape
    assert audio.dtype == jnp.float32

    ref = jax.block_until_ready(jax.jit(reference_module_forward)(params, sampled))
    err = float(jnp.max(jnp.abs(audio - ref)))
    assert err < 1e-3, f"kernel/reference mismatch: max abs err = {err}"

    print("KERNEL_OK")
</pallas_src>

<mosaic_0001>
module attributes {stable_mosaic.version = 11 : i64} {
  func.func @_fused_decoder_kernel(%arg0: i32, %arg1: i32, %arg2: memref<1x268x8xf32, #tpu.memory_space<vmem>>, %arg3: memref<7x32x8xf32, #tpu.memory_space<vmem>>, %arg4: memref<32x1xf32, #tpu.memory_space<vmem>>, %arg5: memref<4x16x32xf32, #tpu.memory_space<vmem>>, %arg6: memref<16x1xf32, #tpu.memory_space<vmem>>, %arg7: memref<4x8x16xf32, #tpu.memory_space<vmem>>, %arg8: memref<8x1xf32, #tpu.memory_space<vmem>>, %arg9: memref<7x2x8xf32, #tpu.memory_space<vmem>>, %arg10: memref<2x1xf32, #tpu.memory_space<vmem>>, %arg11: memref<4x2x256xf32, #tpu.memory_space<vmem>>) attributes {dimension_semantics = [#tpu.dimension_semantics<parallel>, #tpu.dimension_semantics<parallel>], iteration_bounds = array<i64: 2, 1>, scalar_prefetch = 0 : i64, scratch_operands = 0 : i64, tpu.core_type = #tpu.core_type<tc>, window_params = [{transform_indices = @transform_0, window_bounds = array<i64: 1, 268, 8>}, {pipeline_mode = #tpu.pipeline_mode<synchronous>, transform_indices = @transform_1, window_bounds = array<i64: 7, 32, 8>}, {pipeline_mode = #tpu.pipeline_mode<synchronous>, transform_indices = @transform_2, window_bounds = array<i64: 32, 1>}, {pipeline_mode = #tpu.pipeline_mode<synchronous>, transform_indices = @transform_3, window_bounds = array<i64: 4, 16, 32>}, {pipeline_mode = #tpu.pipeline_mode<synchronous>, transform_indices = @transform_4, window_bounds = array<i64: 16, 1>}, {pipeline_mode = #tpu.pipeline_mode<synchronous>, transform_indices = @transform_5, window_bounds = array<i64: 4, 8, 16>}, {pipeline_mode = #tpu.pipeline_mode<synchronous>, transform_indices = @transform_6, window_bounds = array<i64: 8, 1>}, {pipeline_mode = #tpu.pipeline_mode<synchronous>, transform_indices = @transform_7, window_bounds = array<i64: 7, 2, 8>}, {pipeline_mode = #tpu.pipeline_mode<synchronous>, transform_indices = @transform_8, window_bounds = array<i64: 2, 1>}, {transform_indices = @transform_9, window_bounds = array<i64: 4, 2, 256>}]} {
    %c256_i32 = arith.constant 256 : i32
    %0 = arith.muli %arg1, %c256_i32 : i32
    %1 = tpu.assume_multiple %0, 8 : i32
    %c0 = arith.constant 0 : index
    %2 = arith.index_cast %1 : i32 to index
    %c0_0 = arith.constant 0 : index
    %3 = vector.load %arg2[%c0, %2, %c0_0] : memref<1x268x8xf32, #tpu.memory_space<vmem>>, vector<1x268x8xf32>
    %4 = vector.shape_cast %3 : vector<1x268x8xf32> to vector<268x8xf32>
    %5 = tpu.iota {dimensions = array<i32: 0>} : vector<8x8xi32>
    %6 = tpu.iota {dimensions = array<i32: 1>} : vector<8x8xi32>
    %c0_i32 = arith.constant 0 : i32
    %7 = vector.broadcast %c0_i32 : i32 to vector<8x8xi32>
    %8 = arith.addi %5, %7 : vector<8x8xi32>
    %9 = arith.cmpi eq, %8, %6 : vector<8x8xi32>
    %10 = arith.extui %9 : vector<8x8xi1> to vector<8x8xi32>
    %11 = arith.sitofp %10 : vector<8x8xi32> to vector<8x8xf32>
    %cst = arith.constant dense<0.000000e+00> : vector<8x268xf32>
    %12 = tpu.matmul %11, %4, %cst {dimension_numbers = #tpu.dot_dimension_numbers<[1], [1], [0], [0], [0, 0, 1, 0], [], []>} : vector<8x8xf32>, vector<268x8xf32>, vector<8x268xf32> -> vector<8x268xf32>
    %cst_1 = arith.constant 0.000000e+00 : f32
    %13 = vector.broadcast %cst_1 : f32 to vector<32x262xf32>
    %c0_2 = arith.constant 0 : index
    %c0_3 = arith.constant 0 : index
    %c0_4 = arith.constant 0 : index
    %14 = vector.load %arg3[%c0_2, %c0_3, %c0_4] : memref<7x32x8xf32, #tpu.memory_space<vmem>>, vector<1x32x8xf32>
    %15 = vector.shape_cast %14 : vector<1x32x8xf32> to vector<32x8xf32>
    %16 = vector.extract_strided_slice %12 {offsets = [0, 0], sizes = [8, 262], strides = [1, 1]} : vector<8x268xf32> to vector<8x262xf32>
    %cst_5 = arith.constant dense<0.000000e+00> : vector<32x262xf32>
    %17 = tpu.matmul %15, %16, %cst_5 {dimension_numbers = #tpu.dot_dimension_numbers<[1], [0], [0], [1], [0, 0, 1, 1], [], []>} : vector<32x8xf32>, vector<8x262xf32>, vector<32x262xf32> -> vector<32x262xf32>
    %18 = arith.addf %13, %17 : vector<32x262xf32>
    %c1 = arith.constant 1 : index
    %c0_6 = arith.constant 0 : index
    %c0_7 = arith.constant 0 : index
    %19 = vector.load %arg3[%c1, %c0_6, %c0_7] : memref<7x32x8xf32, #tpu.memory_space<vmem>>, vector<1x32x8xf32>
    %20 = vector.shape_cast %19 : vector<1x32x8xf32> to vector<32x8xf32>
    %21 = vector.extract_strided_slice %12 {offsets = [0, 1], sizes = [8, 262], strides = [1, 1]} : vector<8x268xf32> to vector<8x262xf32>
    %cst_8 = arith.constant dense<0.000000e+00> : vector<32x262xf32>
    %22 = tpu.matmul %20, %21, %cst_8 {dimension_numbers = #tpu.dot_dimension_numbers<[1], [0], [0], [1], [0, 0, 1, 1], [], []>} : vector<32x8xf32>, vector<8x262xf32>, vector<32x262xf32> -> vector<32x262xf32>
    %23 = arith.addf %18, %22 : vector<32x262xf32>
    %c2 = arith.constant 2 : index
    %c0_9 = arith.constant 0 : index
    %c0_10 = arith.constant 0 : index
    %24 = vector.load %arg3[%c2, %c0_9, %c0_10] : memref<7x32x8xf32, #tpu.memory_space<vmem>>, vector<1x32x8xf32>
    %25 = vector.shape_cast %24 : vector<1x32x8xf32> to vector<32x8xf32>
    %26 = vector.extract_strided_slice %12 {offsets = [0, 2], sizes = [8, 262], strides = [1, 1]} : vector<8x268xf32> to vector<8x262xf32>
    %cst_11 = arith.constant dense<0.000000e+00> : vector<32x262xf32>
    %27 = tpu.matmul %25, %26, %cst_11 {dimension_numbers = #tpu.dot_dimension_numbers<[1], [0], [0], [1], [0, 0, 1, 1], [], []>} : vector<32x8xf32>, vector<8x262xf32>, vector<32x262xf32> -> vector<32x262xf32>
    %28 = arith.addf %23, %27 : vector<32x262xf32>
    %c3 = arith.constant 3 : index
    %c0_12 = arith.constant 0 : index
    %c0_13 = arith.constant 0 : index
    %29 = vector.load %arg3[%c3, %c0_12, %c0_13] : memref<7x32x8xf32, #tpu.memory_space<vmem>>, vector<1x32x8xf32>
    %30 = vector.shape_cast %29 : vector<1x32x8xf32> to vector<32x8xf32>
    %31 = vector.extract_strided_slice %12 {offsets = [0, 3], sizes = [8, 262], strides = [1, 1]} : vector<8x268xf32> to vector<8x262xf32>
    %cst_14 = arith.constant dense<0.000000e+00> : vector<32x262xf32>
    %32 = tpu.matmul %30, %31, %cst_14 {dimension_numbers = #tpu.dot_dimension_numbers<[1], [0], [0], [1], [0, 0, 1, 1], [], []>} : vector<32x8xf32>, vector<8x262xf32>, vector<32x262xf32> -> vector<32x262xf32>
    %33 = arith.addf %28, %32 : vector<32x262xf32>
    %c4 = arith.constant 4 : index
    %c0_15 = arith.constant 0 : index
    %c0_16 = arith.constant 0 : index
    %34 = vector.load %arg3[%c4, %c0_15, %c0_16] : memref<7x32x8xf32, #tpu.memory_space<vmem>>, vector<1x32x8xf32>
    %35 = vector.shape_cast %34 : vector<1x32x8xf32> to vector<32x8xf32>
    %36 = vector.extract_strided_slice %12 {offsets = [0, 4], sizes = [8, 262], strides = [1, 1]} : vector<8x268xf32> to vector<8x262xf32>
    %cst_17 = arith.constant dense<0.000000e+00> : vector<32x262xf32>
    %37 = tpu.matmul %35, %36, %cst_17 {dimension_numbers = #tpu.dot_dimension_numbers<[1], [0], [0], [1], [0, 0, 1, 1], [], []>} : vector<32x8xf32>, vector<8x262xf32>, vector<32x262xf32> -> vector<32x262xf32>
    %38 = arith.addf %33, %37 : vector<32x262xf32>
    %c5 = arith.constant 5 : index
    %c0_18 = arith.constant 0 : index
    %c0_19 = arith.constant 0 : index
    %39 = vector.load %arg3[%c5, %c0_18, %c0_19] : memref<7x32x8xf32, #tpu.memory_space<vmem>>, vector<1x32x8xf32>
    %40 = vector.shape_cast %39 : vector<1x32x8xf32> to vector<32x8xf32>
    %41 = vector.extract_strided_slice %12 {offsets = [0, 5], sizes = [8, 262], strides = [1, 1]} : vector<8x268xf32> to vector<8x262xf32>
    %cst_20 = arith.constant dense<0.000000e+00> : vector<32x262xf32>
    %42 = tpu.matmul %40, %41, %cst_20 {dimension_numbers = #tpu.dot_dimension_numbers<[1], [0], [0], [1], [0, 0, 1, 1], [], []>} : vector<32x8xf32>, vector<8x262xf32>, vector<32x262xf32> -> vector<32x262xf32>
    %43 = arith.addf %38, %42 : vector<32x262xf32>
    %c6 = arith.constant 6 : index
    %c0_21 = arith.constant 0 : index
    %c0_22 = arith.constant 0 : index
    %44 = vector.load %arg3[%c6, %c0_21, %c0_22] : memref<7x32x8xf32, #tpu.memory_space<vmem>>, vector<1x32x8xf32>
    %45 = vector.shape_cast %44 : vector<1x32x8xf32> to vector<32x8xf32>
    %46 = vector.extract_strided_slice %12 {offsets = [0, 6], sizes = [8, 262], strides = [1, 1]} : vector<8x268xf32> to vector<8x262xf32>
    %cst_23 = arith.constant dense<0.000000e+00> : vector<32x262xf32>
    %47 = tpu.matmul %45, %46, %cst_23 {dimension_numbers = #tpu.dot_dimension_numbers<[1], [0], [0], [1], [0, 0, 1, 1], [], []>} : vector<32x8xf32>, vector<8x262xf32>, vector<32x262xf32> -> vector<32x262xf32>
    %48 = arith.addf %43, %47 : vector<32x262xf32>
    %c0_24 = arith.constant 0 : index
    %c0_25 = arith.constant 0 : index
    %49 = vector.load %arg4[%c0_24, %c0_25] : memref<32x1xf32, #tpu.memory_space<vmem>>, vector<32x1xf32>
    %50 = vector.broadcast %49 : vector<32x1xf32> to vector<32x262xf32>
    %51 = arith.addf %48, %50 : vector<32x262xf32>
    %52 = math.sin %51 : vector<32x262xf32>
    %53 = arith.mulf %52, %52 : vector<32x262xf32>
    %54 = arith.addf %51, %53 : vector<32x262xf32>
    %c3_i32 = arith.constant 3 : i32
    %55 = arith.subi %0, %c3_i32 : i32
    %56 = tpu.iota {dimensions = array<i32: 1>} : vector<1x262xi32>
    %c1_i32 = arith.constant 1 : i32
    %57 = vector.broadcast %c1_i32 : i32 to vector<1x262xi32>
    %58 = arith.muli %57, %56 : vector<1x262xi32>
    %59 = vector.broadcast %55 : i32 to vector<1x262xi32>
    %60 = arith.addi %59, %58 : vector<1x262xi32>
    %c0_i32_26 = arith.constant 0 : i32
    %61 = vector.broadcast %c0_i32_26 : i32 to vector<1x262xi32>
    %62 = arith.cmpi sge, %60, %61 : vector<1x262xi32>
    %c256_i32_27 = arith.constant 256 : i32
    %63 = vector.broadcast %c256_i32_27 : i32 to vector<1x262xi32>
    %64 = arith.cmpi slt, %60, %63 : vector<1x262xi32>
    %65 = arith.andi %62, %64 : vector<1x262xi1>
    %66 = arith.extui %65 : vector<1x262xi1> to vector<1x262xi32>
    %67 = arith.sitofp %66 : vector<1x262xi32> to vector<1x262xf32>
    %68 = vector.broadcast %67 : vector<1x262xf32> to vector<32x262xf32>
    %69 = arith.mulf %54, %68 : vector<32x262xf32>
    %c1_28 = arith.constant 1 : index
    %c0_29 = arith.constant 0 : index
    %c0_30 = arith.constant 0 : index
    %70 = vector.load %arg5[%c1_28, %c0_29, %c0_30] : memref<4x16x32xf32, #tpu.memory_space<vmem>>, vector<1x16x32xf32>
    %71 = vector.shape_cast %70 : vector<1x16x32xf32> to vector<16x32xf32>
    %72 = vector.extract_strided_slice %69 {offsets = [0, 1], sizes = [32, 260], strides = [1, 1]} : vector<32x262xf32> to vector<32x260xf32>
    %cst_31 = arith.constant dense<0.000000e+00> : vector<16x260xf32>
    %73 = tpu.matmul %71, %72, %cst_31 {dimension_numbers = #tpu.dot_dimension_numbers<[1], [0], [0], [1], [0, 0, 1, 1], [], []>} : vector<16x32xf32>, vector<32x260xf32>, vector<16x260xf32> -> vector<16x260xf32>
    %c3_32 = arith.constant 3 : index
    %c0_33 = arith.constant 0 : index
    %c0_34 = arith.constant 0 : index
    %74 = vector.load %arg5[%c3_32, %c0_33, %c0_34] : memref<4x16x32xf32, #tpu.memory_space<vmem>>, vector<1x16x32xf32>
    %75 = vector.shape_cast %74 : vector<1x16x32xf32> to vector<16x32xf32>
    %76 = vector.extract_strided_slice %69 {offsets = [0, 0], sizes = [32, 260], strides = [1, 1]} : vector<32x262xf32> to vector<32x260xf32>
    %cst_35 = arith.constant dense<0.000000e+00> : vector<16x260xf32>
    %77 = tpu.matmul %75, %76, %cst_35 {dimension_numbers = #tpu.dot_dimension_numbers<[1], [0], [0], [1], [0, 0, 1, 1], [], []>} : vector<16x32xf32>, vector<32x260xf32>, vector<16x260xf32> -> vector<16x260xf32>
    %78 = arith.addf %73, %77 : vector<16x260xf32>
    %c0_36 = arith.constant 0 : index
    %c0_37 = arith.constant 0 : index
    %79 = vector.load %arg6[%c0_36, %c0_37] : memref<16x1xf32, #tpu.memory_space<vmem>>, vector<16x1xf32>
    %80 = vector.broadcast %79 : vector<16x1xf32> to vector<16x260xf32>
    %81 = arith.addf %78, %80 : vector<16x260xf32>
    %c0_38 = arith.constant 0 : index
    %c0_39 = arith.constant 0 : index
    %c0_40 = arith.constant 0 : index
    %82 = vector.load %arg5[%c0_38, %c0_39, %c0_40] : memref<4x16x32xf32, #tpu.memory_space<vmem>>, vector<1x16x32xf32>
    %83 = vector.shape_cast %82 : vector<1x16x32xf32> to vector<16x32xf32>
    %84 = vector.extract_strided_slice %69 {offsets = [0, 2], sizes = [32, 260], strides = [1, 1]} : vector<32x262xf32> to vector<32x260xf32>
    %cst_41 = arith.constant dense<0.000000e+00> : vector<16x260xf32>
    %85 = tpu.matmul %83, %84, %cst_41 {dimension_numbers = #tpu.dot_dimension_numbers<[1], [0], [0], [1], [0, 0, 1, 1], [], []>} : vector<16x32xf32>, vector<32x260xf32>, vector<16x260xf32> -> vector<16x260xf32>
    %c2_42 = arith.constant 2 : index
    %c0_43 = arith.constant 0 : index
    %c0_44 = arith.constant 0 : index
    %86 = vector.load %arg5[%c2_42, %c0_43, %c0_44] : memref<4x16x32xf32, #tpu.memory_space<vmem>>, vector<1x16x32xf32>
    %87 = vector.shape_cast %86 : vector<1x16x32xf32> to vector<16x32xf32>
    %88 = vector.extract_strided_slice %69 {offsets = [0, 1], sizes = [32, 260], strides = [1, 1]} : vector<32x262xf32> to vector<32x260xf32>
    %cst_45 = arith.constant dense<0.000000e+00> : vector<16x260xf32>
    %89 = tpu.matmul %87, %88, %cst_45 {dimension_numbers = #tpu.dot_dimension_numbers<[1], [0], [0], [1], [0, 0, 1, 1], [], []>} : vector<16x32xf32>, vector<32x260xf32>, vector<16x260xf32> -> vector<16x260xf32>
    %90 = arith.addf %85, %89 : vector<16x260xf32>
    %c0_46 = arith.constant 0 : index
    %c0_47 = arith.constant 0 : index
    %91 = vector.load %arg6[%c0_46, %c0_47] : memref<16x1xf32, #tpu.memory_space<vmem>>, vector<16x1xf32>
    %92 = vector.broadcast %91 : vector<16x1xf32> to vector<16x260xf32>
    %93 = arith.addf %90, %92 : vector<16x260xf32>
    %94 = math.sin %81 : vector<16x260xf32>
    %95 = arith.mulf %94, %94 : vector<16x260xf32>
    %96 = arith.addf %81, %95 : vector<16x260xf32>
    %c2_i32 = arith.constant 2 : i32
    %97 = arith.muli %c2_i32, %0 : i32
    %c4_i32 = arith.constant 4 : i32
    %98 = arith.subi %97, %c4_i32 : i32
    %99 = tpu.iota {dimensions = array<i32: 1>} : vector<1x260xi32>
    %c2_i32_48 = arith.constant 2 : i32
    %100 = vector.broadcast %c2_i32_48 : i32 to vector<1x260xi32>
    %101 = arith.muli %100, %99 : vector<1x260xi32>
    %102 = vector.broadcast %98 : i32 to vector<1x260xi32>
    %103 = arith.addi %102, %101 : vector<1x260xi32>
    %c0_i32_49 = arith.constant 0 : i32
    %104 = vector.broadcast %c0_i32_49 : i32 to vector<1x260xi32>
    %105 = arith.cmpi sge, %103, %104 : vector<1x260xi32>
    %c512_i32 = arith.constant 512 : i32
    %106 = vector.broadcast %c512_i32 : i32 to vector<1x260xi32>
    %107 = arith.cmpi slt, %103, %106 : vector<1x260xi32>
    %108 = arith.andi %105, %107 : vector<1x260xi1>
    %109 = arith.extui %108 : vector<1x260xi1> to vector<1x260xi32>
    %110 = arith.sitofp %109 : vector<1x260xi32> to vector<1x260xf32>
    %111 = vector.broadcast %110 : vector<1x260xf32> to vector<16x260xf32>
    %112 = arith.mulf %96, %111 : vector<16x260xf32>
    %113 = math.sin %93 : vector<16x260xf32>
    %114 = arith.mulf %113, %113 : vector<16x260xf32>
    %115 = arith.addf %93, %114 : vector<16x260xf32>
    %c2_i32_50 = arith.constant 2 : i32
    %116 = arith.muli %c2_i32_50, %0 : i32
    %c3_i32_51 = arith.constant 3 : i32
    %117 = arith.subi %116, %c3_i32_51 : i32
    %118 = tpu.iota {dimensions = array<i32: 1>} : vector<1x260xi32>
    %c2_i32_52 = arith.constant 2 : i32
    %119 = vector.broadcast %c2_i32_52 : i32 to vector<1x260xi32>
    %120 = arith.muli %119, %118 : vector<1x260xi32>
    %121 = vector.broadcast %117 : i32 to vector<1x260xi32>
    %122 = arith.addi %121, %120 : vector<1x260xi32>
    %c0_i32_53 = arith.constant 0 : i32
    %123 = vector.broadcast %c0_i32_53 : i32 to vector<1x260xi32>
    %124 = arith.cmpi sge, %122, %123 : vector<1x260xi32>
    %c512_i32_54 = arith.constant 512 : i32
    %125 = vector.broadcast %c512_i32_54 : i32 to vector<1x260xi32>
    %126 = arith.cmpi slt, %122, %125 : vector<1x260xi32>
    %127 = arith.andi %124, %126 : vector<1x260xi1>
    %128 = arith.extui %127 : vector<1x260xi1> to vector<1x260xi32>
    %129 = arith.sitofp %128 : vector<1x260xi32> to vector<1x260xf32>
    %130 = vector.broadcast %129 : vector<1x260xf32> to vector<16x260xf32>
    %131 = arith.mulf %115, %130 : vector<16x260xf32>
    %c1_55 = arith.constant 1 : index
    %c0_56 = arith.constant 0 : index
    %c0_57 = arith.constant 0 : index
    %132 = vector.load %arg7[%c1_55, %c0_56, %c0_57] : memref<4x8x16xf32, #tpu.memory_space<vmem>>, vector<1x8x16xf32>
    %133 = vector.shape_cast %132 : vector<1x8x16xf32> to vector<8x16xf32>
    %134 = vector.extract_strided_slice %112 {offsets = [0, 1], sizes = [16, 258], strides = [1, 1]} : vector<16x260xf32> to vector<16x258xf32>
    %cst_58 = arith.constant dense<0.000000e+00> : vector<8x258xf32>
    %135 = tpu.matmul %133, %134, %cst_58 {dimension_numbers = #tpu.dot_dimension_numbers<[1], [0], [0], [1], [0, 0, 1, 1], [], []>} : vector<8x16xf32>, vector<16x258xf32>, vector<8x258xf32> -> vector<8x258xf32>
    %c3_59 = arith.constant 3 : index
    %c0_60 = arith.constant 0 : index
    %c0_61 = arith.constant 0 : index
    %136 = vector.load %arg7[%c3_59, %c0_60, %c0_61] : memref<4x8x16xf32, #tpu.memory_space<vmem>>, vector<1x8x16xf32>
    %137 = vector.shape_cast %136 : vector<1x8x16xf32> to vector<8x16xf32>
    %138 = vector.extract_strided_slice %131 {offsets = [0, 0], sizes = [16, 258], strides = [1, 1]} : vector<16x260xf32> to vector<16x258xf32>
    %cst_62 = arith.constant dense<0.000000e+00> : vector<8x258xf32>
    %139 = tpu.matmul %137, %138, %cst_62 {dimension_numbers = #tpu.dot_dimension_numbers<[1], [0], [0], [1], [0, 0, 1, 1], [], []>} : vector<8x16xf32>, vector<16x258xf32>, vector<8x258xf32> -> vector<8x258xf32>
    %140 = arith.addf %135, %139 : vector<8x258xf32>
    %c0_63 = arith.constant 0 : index
    %c0_64 = arith.constant 0 : index
    %141 = vector.load %arg8[%c0_63, %c0_64] : memref<8x1xf32, #tpu.memory_space<vmem>>, vector<8x1xf32>
    %142 = vector.broadcast %141 : vector<8x1xf32> to vector<8x258xf32>
    %143 = arith.addf %140, %142 : vector<8x258xf32>
    %c0_65 = arith.constant 0 : index
    %c0_66 = arith.constant 0 : index
    %c0_67 = arith.constant 0 : index
    %144 = vector.load %arg7[%c0_65, %c0_66, %c0_67] : memref<4x8x16xf32, #tpu.memory_space<vmem>>, vector<1x8x16xf32>
    %145 = vector.shape_cast %144 : vector<1x8x16xf32> to vector<8x16xf32>
    %146 = vector.extract_strided_slice %131 {offsets = [0, 1], sizes = [16, 258], strides = [1, 1]} : vector<16x260xf32> to vector<16x258xf32>
    %cst_68 = arith.constant dense<0.000000e+00> : vector<8x258xf32>
    %147 = tpu.matmul %145, %146, %cst_68 {dimension_numbers = #tpu.dot_dimension_numbers<[1], [0], [0], [1], [0, 0, 1, 1], [], []>} : vector<8x16xf32>, vector<16x258xf32>, vector<8x258xf32> -> vector<8x258xf32>
    %c2_69 = arith.constant 2 : index
    %c0_70 = arith.constant 0 : index
    %c0_71 = arith.constant 0 : index
    %148 = vector.load %arg7[%c2_69, %c0_70, %c0_71] : memref<4x8x16xf32, #tpu.memory_space<vmem>>, vector<1x8x16xf32>
    %149 = vector.shape_cast %148 : vector<1x8x16xf32> to vector<8x16xf32>
    %150 = vector.extract_strided_slice %112 {offsets = [0, 1], sizes = [16, 258], strides = [1, 1]} : vector<16x260xf32> to vector<16x258xf32>
    %cst_72 = arith.constant dense<0.000000e+00> : vector<8x258xf32>
    %151 = tpu.matmul %149, %150, %cst_72 {dimension_numbers = #tpu.dot_dimension_numbers<[1], [0], [0], [1], [0, 0, 1, 1], [], []>} : vector<8x16xf32>, vector<16x258xf32>, vector<8x258xf32> -> vector<8x258xf32>
    %152 = arith.addf %147, %151 : vector<8x258xf32>
    %c0_73 = arith.constant 0 : index
    %c0_74 = arith.constant 0 : index
    %153 = vector.load %arg8[%c0_73, %c0_74] : memref<8x1xf32, #tpu.memory_space<vmem>>, vector<8x1xf32>
    %154 = vector.broadcast %153 : vector<8x1xf32> to vector<8x258xf32>
    %155 = arith.addf %152, %154 : vector<8x258xf32>
    %c1_75 = arith.constant 1 : index
    %c0_76 = arith.constant 0 : index
    %c0_77 = arith.constant 0 : index
    %156 = vector.load %arg7[%c1_75, %c0_76, %c0_77] : memref<4x8x16xf32, #tpu.memory_space<vmem>>, vector<1x8x16xf32>
    %157 = vector.shape_cast %156 : vector<1x8x16xf32> to vector<8x16xf32>
    %158 = vector.extract_strided_slice %131 {offsets = [0, 1], sizes = [16, 258], strides = [1, 1]} : vector<16x260xf32> to vector<16x258xf32>
    %cst_78 = arith.constant dense<0.000000e+00> : vector<8x258xf32>
    %159 = tpu.matmul %157, %158, %cst_78 {dimension_numbers = #tpu.dot_dimension_numbers<[1], [0], [0], [1], [0, 0, 1, 1], [], []>} : vector<8x16xf32>, vector<16x258xf32>, vector<8x258xf32> -> vector<8x258xf32>
    %c3_79 = arith.constant 3 : index
    %c0_80 = arith.constant 0 : index
    %c0_81 = arith.constant 0 : index
    %160 = vector.load %arg7[%c3_79, %c0_80, %c0_81] : memref<4x8x16xf32, #tpu.memory_space<vmem>>, vector<1x8x16xf32>
    %161 = vector.shape_cast %160 : vector<1x8x16xf32> to vector<8x16xf32>
    %162 = vector.extract_strided_slice %112 {offsets = [0, 1], sizes = [16, 258], strides = [1, 1]} : vector<16x260xf32> to vector<16x258xf32>
    %cst_82 = arith.constant dense<0.000000e+00> : vector<8x258xf32>
    %163 = tpu.matmul %161, %162, %cst_82 {dimension_numbers = #tpu.dot_dimension_numbers<[1], [0], [0], [1], [0, 0, 1, 1], [], []>} : vector<8x16xf32>, vector<16x258xf32>, vector<8x258xf32> -> vector<8x258xf32>
    %164 = arith.addf %159, %163 : vector<8x258xf32>
    %c0_83 = arith.constant 0 : index
    %c0_84 = arith.constant 0 : index
    %165 = vector.load %arg8[%c0_83, %c0_84] : memref<8x1xf32, #tpu.memory_space<vmem>>, vector<8x1xf32>
    %166 = vector.broadcast %165 : vector<8x1xf32> to vector<8x258xf32>
    %167 = arith.addf %164, %166 : vector<8x258xf32>
    %c0_85 = arith.constant 0 : index
    %c0_86 = arith.constant 0 : index
    %c0_87 = arith.constant 0 : index
    %168 = vector.load %arg7[%c0_85, %c0_86, %c0_87] : memref<4x8x16xf32, #tpu.memory_space<vmem>>, vector<1x8x16xf32>
    %169 = vector.shape_cast %168 : vector<1x8x16xf32> to vector<8x16xf32>
    %170 = vector.extract_strided_slice %112 {offsets = [0, 2], sizes = [16, 258], strides = [1, 1]} : vector<16x260xf32> to vector<16x258xf32>
    %cst_88 = arith.constant dense<0.000000e+00> : vector<8x258xf32>
    %171 = tpu.matmul %169, %170, %cst_88 {dimension_numbers = #tpu.dot_dimension_numbers<[1], [0], [0], [1], [0, 0, 1, 1], [], []>} : vector<8x16xf32>, vector<16x258xf32>, vector<8x258xf32> -> vector<8x258xf32>
    %c2_89 = arith.constant 2 : index
    %c0_90 = arith.constant 0 : index
    %c0_91 = arith.constant 0 : index
    %172 = vector.load %arg7[%c2_89, %c0_90, %c0_91] : memref<4x8x16xf32, #tpu.memory_space<vmem>>, vector<1x8x16xf32>
    %173 = vector.shape_cast %172 : vector<1x8x16xf32> to vector<8x16xf32>
    %174 = vector.extract_strided_slice %131 {offsets = [0, 1], sizes = [16, 258], strides = [1, 1]} : vector<16x260xf32> to vector<16x258xf32>
    %cst_92 = arith.constant dense<0.000000e+00> : vector<8x258xf32>
    %175 = tpu.matmul %173, %174, %cst_92 {dimension_numbers = #tpu.dot_dimension_numbers<[1], [0], [0], [1], [0, 0, 1, 1], [], []>} : vector<8x16xf32>, vector<16x258xf32>, vector<8x258xf32> -> vector<8x258xf32>
    %176 = arith.addf %171, %175 : vector<8x258xf32>
    %c0_93 = arith.constant 0 : index
    %c0_94 = arith.constant 0 : index
    %177 = vector.load %arg8[%c0_93, %c0_94] : memref<8x1xf32, #tpu.memory_space<vmem>>, vector<8x1xf32>
    %178 = vector.broadcast %177 : vector<8x1xf32> to vector<8x258xf32>
    %179 = arith.addf %176, %178 : vector<8x258xf32>
    %180 = math.sin %143 : vector<8x258xf32>
    %181 = arith.mulf %180, %180 : vector<8x258xf32>
    %182 = arith.addf %143, %181 : vector<8x258xf32>
    %c1_i32_95 = arith.constant 1 : i32
    %183 = arith.subi %0, %c1_i32_95 : i32
    %c4_i32_96 = arith.constant 4 : i32
    %184 = arith.muli %c4_i32_96, %183 : i32
    %c0_i32_97 = arith.constant 0 : i32
    %185 = arith.addi %184, %c0_i32_97 : i32
    %186 = tpu.iota {dimensions = array<i32: 1>} : vector<1x258xi32>
    %c4_i32_98 = arith.constant 4 : i32
    %187 = vector.broadcast %c4_i32_98 : i32 to vector<1x258xi32>
    %188 = arith.muli %187, %186 : vector<1x258xi32>
    %189 = vector.broadcast %185 : i32 to vector<1x258xi32>
    %190 = arith.addi %189, %188 : vector<1x258xi32>
    %c0_i32_99 = arith.constant 0 : i32
    %191 = vector.broadcast %c0_i32_99 : i32 to vector<1x258xi32>
    %192 = arith.cmpi sge, %190, %191 : vector<1x258xi32>
    %c1024_i32 = arith.constant 1024 : i32
    %193 = vector.broadcast %c1024_i32 : i32 to vector<1x258xi32>
    %194 = arith.cmpi slt, %190, %193 : vector<1x258xi32>
    %195 = arith.andi %192, %194 : vector<1x258xi1>
    %196 = arith.extui %195 : vector<1x258xi1> to vector<1x258xi32>
    %197 = arith.sitofp %196 : vector<1x258xi32> to vector<1x258xf32>
    %198 = vector.broadcast %197 : vector<1x258xf32> to vector<8x258xf32>
    %199 = arith.mulf %182, %198 : vector<8x258xf32>
    %200 = math.sin %155 : vector<8x258xf32>
    %201 = arith.mulf %200, %200 : vector<8x258xf32>
    %202 = arith.addf %155, %201 : vector<8x258xf32>
    %c1_i32_100 = arith.constant 1 : i32
    %203 = arith.subi %0, %c1_i32_100 : i32
    %c4_i32_101 = arith.constant 4 : i32
    %204 = arith.muli %c4_i32_101, %203 : i32
    %c1_i32_102 = arith.constant 1 : i32
    %205 = arith.addi %204, %c1_i32_102 : i32
    %206 = tpu.iota {dimensions = array<i32: 1>} : vector<1x258xi32>
    %c4_i32_103 = arith.constant 4 : i32
    %207 = vector.broadcast %c4_i32_103 : i32 to vector<1x258xi32>
    %208 = arith.muli %207, %206 : vector<1x258xi32>
    %209 = vector.broadcast %205 : i32 to vector<1x258xi32>
    %210 = arith.addi %209, %208 : vector<1x258xi32>
    %c0_i32_104 = arith.constant 0 : i32
    %211 = vector.broadcast %c0_i32_104 : i32 to vector<1x258xi32>
    %212 = arith.cmpi sge, %210, %211 : vector<1x258xi32>
    %c1024_i32_105 = arith.constant 1024 : i32
    %213 = vector.broadcast %c1024_i32_105 : i32 to vector<1x258xi32>
    %214 = arith.cmpi slt, %210, %213 : vector<1x258xi32>
    %215 = arith.andi %212, %214 : vector<1x258xi1>
    %216 = arith.extui %215 : vector<1x258xi1> to vector<1x258xi32>
    %217 = arith.sitofp %216 : vector<1x258xi32> to vector<1x258xf32>
    %218 = vector.broadcast %217 : vector<1x258xf32> to vector<8x258xf32>
    %219 = arith.mulf %202, %218 : vector<8x258xf32>
    %220 = math.sin %167 : vector<8x258xf32>
    %221 = arith.mulf %220, %220 : vector<8x258xf32>
    %222 = arith.addf %167, %221 : vector<8x258xf32>
    %c1_i32_106 = arith.constant 1 : i32
    %223 = arith.subi %0, %c1_i32_106 : i32
    %c4_i32_107 = arith.constant 4 : i32
    %224 = arith.muli %c4_i32_107, %223 : i32
    %c2_i32_108 = arith.constant 2 : i32
    %225 = arith.addi %224, %c2_i32_108 : i32
    %226 = tpu.iota {dimensions = array<i32: 1>} : vector<1x258xi32>
    %c4_i32_109 = arith.constant 4 : i32
    %227 = vector.broadcast %c4_i32_109 : i32 to vector<1x258xi32>
    %228 = arith.muli %227, %226 : vector<1x258xi32>
    %229 = vector.broadcast %225 : i32 to vector<1x258xi32>
    %230 = arith.addi %229, %228 : vector<1x258xi32>
    %c0_i32_110 = arith.constant 0 : i32
    %231 = vector.broadcast %c0_i32_110 : i32 to vector<1x258xi32>
    %232 = arith.cmpi sge, %230, %231 : vector<1x258xi32>
    %c1024_i32_111 = arith.constant 1024 : i32
    %233 = vector.broadcast %c1024_i32_111 : i32 to vector<1x258xi32>
    %234 = arith.cmpi slt, %230, %233 : vector<1x258xi32>
    %235 = arith.andi %232, %234 : vector<1x258xi1>
    %236 = arith.extui %235 : vector<1x258xi1> to vector<1x258xi32>
    %237 = arith.sitofp %236 : vector<1x258xi32> to vector<1x258xf32>
    %238 = vector.broadcast %237 : vector<1x258xf32> to vector<8x258xf32>
    %239 = arith.mulf %222, %238 : vector<8x258xf32>
    %240 = math.sin %179 : vector<8x258xf32>
    %241 = arith.mulf %240, %240 : vector<8x258xf32>
    %242 = arith.addf %179, %241 : vector<8x258xf32>
    %c1_i32_112 = arith.constant 1 : i32
    %243 = arith.subi %0, %c1_i32_112 : i32
    %c4_i32_113 = arith.constant 4 : i32
    %244 = arith.muli %c4_i32_113, %243 : i32
    %c3_i32_114 = arith.constant 3 : i32
    %245 = arith.addi %244, %c3_i32_114 : i32
    %246 = tpu.iota {dimensions = array<i32: 1>} : vector<1x258xi32>
    %c4_i32_115 = arith.constant 4 : i32
    %247 = vector.broadcast %c4_i32_115 : i32 to vector<1x258xi32>
    %248 = arith.muli %247, %246 : vector<1x258xi32>
    %249 = vector.broadcast %245 : i32 to vector<1x258xi32>
    %250 = arith.addi %249, %248 : vector<1x258xi32>
    %c0_i32_116 = arith.constant 0 : i32
    %251 = vector.broadcast %c0_i32_116 : i32 to vector<1x258xi32>
    %252 = arith.cmpi sge, %250, %251 : vector<1x258xi32>
    %c1024_i32_117 = arith.constant 1024 : i32
    %253 = vector.broadcast %c1024_i32_117 : i32 to vector<1x258xi32>
    %254 = arith.cmpi slt, %250, %253 : vector<1x258xi32>
    %255 = arith.andi %252, %254 : vector<1x258xi1>
    %256 = arith.extui %255 : vector<1x258xi1> to vector<1x258xi32>
    %257 = arith.sitofp %256 : vector<1x258xi32> to vector<1x258xf32>
    %258 = vector.broadcast %257 : vector<1x258xf32> to vector<8x258xf32>
    %259 = arith.mulf %242, %258 : vector<8x258xf32>
    %c0_118 = arith.constant 0 : index
    %c0_119 = arith.constant 0 : index
    %c0_120 = arith.constant 0 : index
    %260 = vector.load %arg9[%c0_118, %c0_119, %c0_120] : memref<7x2x8xf32, #tpu.memory_space<vmem>>, vector<1x2x8xf32>
    %261 = vector.shape_cast %260 : vector<1x2x8xf32> to vector<2x8xf32>
    %262 = vector.extract_strided_slice %219 {offsets = [0, 0], sizes = [8, 256], strides = [1, 1]} : vector<8x258xf32> to vector<8x256xf32>
    %cst_121 = arith.constant dense<0.000000e+00> : vector<2x256xf32>
    %263 = tpu.matmul %261, %262, %cst_121 {dimension_numbers = #tpu.dot_dimension_numbers<[1], [0], [0], [1], [0, 0, 1, 1], [], []>} : vector<2x8xf32>, vector<8x256xf32>, vector<2x256xf32> -> vector<2x256xf32>
    %c1_122 = arith.constant 1 : index
    %c0_123 = arith.constant 0 : index
    %c0_124 = arith.constant 0 : index
    %264 = vector.load %arg9[%c1_122, %c0_123, %c0_124] : memref<7x2x8xf32, #tpu.memory_space<vmem>>, vector<1x2x8xf32>
    %265 = vector.shape_cast %264 : vector<1x2x8xf32> to vector<2x8xf32>
    %266 = vector.extract_strided_slice %239 {offsets = [0, 0], sizes = [8, 256], strides = [1, 1]} : vector<8x258xf32> to vector<8x256xf32>
    %cst_125 = arith.constant dense<0.000000e+00> : vector<2x256xf32>
    %267 = tpu.matmul %265, %266, %cst_125 {dimension_numbers = #tpu.dot_dimension_numbers<[1], [0], [0], [1], [0, 0, 1, 1], [], []>} : vector<2x8xf32>, vector<8x256xf32>, vector<2x256xf32> -> vector<2x256xf32>
    %268 = arith.addf %263, %267 : vector<2x256xf32>
    %c2_126 = arith.constant 2 : index
    %c0_127 = arith.constant 0 : index
    %c0_128 = arith.constant 0 : index
    %269 = vector.load %arg9[%c2_126, %c0_127, %c0_128] : memref<7x2x8xf32, #tpu.memory_space<vmem>>, vector<1x2x8xf32>
    %270 = vector.shape_cast %269 : vector<1x2x8xf32> to vector<2x8xf32>
    %271 = vector.extract_strided_slice %259 {offsets = [0, 0], sizes = [8, 256], strides = [1, 1]} : vector<8x258xf32> to vector<8x256xf32>
    %cst_129 = arith.constant dense<0.000000e+00> : vector<2x256xf32>
    %272 = tpu.matmul %270, %271, %cst_129 {dimension_numbers = #tpu.dot_dimension_numbers<[1], [0], [0], [1], [0, 0, 1, 1], [], []>} : vector<2x8xf32>, vector<8x256xf32>, vector<2x256xf32> -> vector<2x256xf32>
    %273 = arith.addf %268, %272 : vector<2x256xf32>
    %c3_130 = arith.constant 3 : index
    %c0_131 = arith.constant 0 : index
    %c0_132 = arith.constant 0 : index
    %274 = vector.load %arg9[%c3_130, %c0_131, %c0_132] : memref<7x2x8xf32, #tpu.memory_space<vmem>>, vector<1x2x8xf32>
    %275 = vector.shape_cast %274 : vector<1x2x8xf32> to vector<2x8xf32>
    %276 = vector.extract_strided_slice %199 {offsets = [0, 1], sizes = [8, 256], strides = [1, 1]} : vector<8x258xf32> to vector<8x256xf32>
    %cst_133 = arith.constant dense<0.000000e+00> : vector<2x256xf32>
    %277 = tpu.matmul %275, %276, %cst_133 {dimension_numbers = #tpu.dot_dimension_numbers<[1], [0], [0], [1], [0, 0, 1, 1], [], []>} : vector<2x8xf32>, vector<8x256xf32>, vector<2x256xf32> -> vector<2x256xf32>
    %278 = arith.addf %273, %277 : vector<2x256xf32>
    %c4_134 = arith.constant 4 : index
    %c0_135 = arith.constant 0 : index
    %c0_136 = arith.constant 0 : index
    %279 = vector.load %arg9[%c4_134, %c0_135, %c0_136] : memref<7x2x8xf32, #tpu.memory_space<vmem>>, vector<1x2x8xf32>
    %280 = vector.shape_cast %279 : vector<1x2x8xf32> to vector<2x8xf32>
    %281 = vector.extract_strided_slice %219 {offsets = [0, 1], sizes = [8, 256], strides = [1, 1]} : vector<8x258xf32> to vector<8x256xf32>
    %cst_137 = arith.constant dense<0.000000e+00> : vector<2x256xf32>
    %282 = tpu.matmul %280, %281, %cst_137 {dimension_numbers = #tpu.dot_dimension_numbers<[1], [0], [0], [1], [0, 0, 1, 1], [], []>} : vector<2x8xf32>, vector<8x256xf32>, vector<2x256xf32> -> vector<2x256xf32>
    %283 = arith.addf %278, %282 : vector<2x256xf32>
    %c5_138 = arith.constant 5 : index
    %c0_139 = arith.constant 0 : index
    %c0_140 = arith.constant 0 : index
    %284 = vector.load %arg9[%c5_138, %c0_139, %c0_140] : memref<7x2x8xf32, #tpu.memory_space<vmem>>, vector<1x2x8xf32>
    %285 = vector.shape_cast %284 : vector<1x2x8xf32> to vector<2x8xf32>
    %286 = vector.extract_strided_slice %239 {offsets = [0, 1], sizes = [8, 256], strides = [1, 1]} : vector<8x258xf32> to vector<8x256xf32>
    %cst_141 = arith.constant dense<0.000000e+00> : vector<2x256xf32>
    %287 = tpu.matmul %285, %286, %cst_141 {dimension_numbers = #tpu.dot_dimension_numbers<[1], [0], [0], [1], [0, 0, 1, 1], [], []>} : vector<2x8xf32>, vector<8x256xf32>, vector<2x256xf32> -> vector<2x256xf32>
    %288 = arith.addf %283, %287 : vector<2x256xf32>
    %c6_142 = arith.constant 6 : index
    %c0_143 = arith.constant 0 : index
    %c0_144 = arith.constant 0 : index
    %289 = vector.load %arg9[%c6_142, %c0_143, %c0_144] : memref<7x2x8xf32, #tpu.memory_space<vmem>>, vector<1x2x8xf32>
    %290 = vector.shape_cast %289 : vector<1x2x8xf32> to vector<2x8xf32>
    %291 = vector.extract_strided_slice %259 {offsets = [0, 1], sizes = [8, 256], strides = [1, 1]} : vector<8x258xf32> to vector<8x256xf32>
    %cst_145 = arith.constant dense<0.000000e+00> : vector<2x256xf32>
    %292 = tpu.matmul %290, %291, %cst_145 {dimension_numbers = #tpu.dot_dimension_numbers<[1], [0], [0], [1], [0, 0, 1, 1], [], []>} : vector<2x8xf32>, vector<8x256xf32>, vector<2x256xf32> -> vector<2x256xf32>
    %293 = arith.addf %288, %292 : vector<2x256xf32>
    %c0_146 = arith.constant 0 : index
    %c0_147 = arith.constant 0 : index
    %294 = vector.load %arg10[%c0_146, %c0_147] : memref<2x1xf32, #tpu.memory_space<vmem>>, vector<2x1xf32>
    %295 = vector.broadcast %294 : vector<2x1xf32> to vector<2x256xf32>
    %296 = arith.addf %293, %295 : vector<2x256xf32>
    %297 = math.tanh %296 : vector<2x256xf32>
    %c0_148 = arith.constant 0 : index
    %c0_149 = arith.constant 0 : index
    %c0_150 = arith.constant 0 : index
    %298 = vector.load %arg11[%c0_148, %c0_149, %c0_150] : memref<4x2x256xf32, #tpu.memory_space<vmem>>, vector<1x2x256xf32>
    %299 = vector.shape_cast %298 : vector<1x2x256xf32> to vector<2x256xf32>
    %300 = vector.shape_cast %297 : vector<2x256xf32> to vector<1x2x256xf32>
    tpu.vector_store %arg11[%c0_148, %c0_149, %c0_150], %300 {strides = array<i32>} : memref<4x2x256xf32, #tpu.memory_space<vmem>>, vector<1x2x256xf32>,
    %c0_151 = arith.constant 0 : index
    %c0_152 = arith.constant 0 : index
    %c0_153 = arith.constant 0 : index
    %301 = vector.load %arg9[%c0_151, %c0_152, %c0_153] : memref<7x2x8xf32, #tpu.memory_space<vmem>>, vector<1x2x8xf32>
    %302 = vector.shape_cast %301 : vector<1x2x8xf32> to vector<2x8xf32>
    %303 = vector.extract_strided_slice %239 {offsets = [0, 0], sizes = [8, 256], strides = [1, 1]} : vector<8x258xf32> to vector<8x256xf32>
    %cst_154 = arith.constant dense<0.000000e+00> : vector<2x256xf32>
    %304 = tpu.matmul %302, %303, %cst_154 {dimension_numbers = #tpu.dot_dimension_numbers<[1], [0], [0], [1], [0, 0, 1, 1], [], []>} : vector<2x8xf32>, vector<8x256xf32>, vector<2x256xf32> -> vector<2x256xf32>
    %c1_155 = arith.constant 1 : index
    %c0_156 = arith.constant 0 : index
    %c0_157 = arith.constant 0 : index
    %305 = vector.load %arg9[%c1_155, %c0_156, %c0_157] : memref<7x2x8xf32, #tpu.memory_space<vmem>>, vector<1x2x8xf32>
    %306 = vector.shape_cast %305 : vector<1x2x8xf32> to vector<2x8xf32>
    %307 = vector.extract_strided_slice %259 {offsets = [0, 0], sizes = [8, 256], strides = [1, 1]} : vector<8x258xf32> to vector<8x256xf32>
    %cst_158 = arith.constant dense<0.000000e+00> : vector<2x256xf32>
    %308 = tpu.matmul %306, %307, %cst_158 {dimension_numbers = #tpu.dot_dimension_numbers<[1], [0], [0], [1], [0, 0, 1, 1], [], []>} : vector<2x8xf32>, vector<8x256xf32>, vector<2x256xf32> -> vector<2x256xf32>
    %309 = arith.addf %304, %308 : vector<2x256xf32>
    %c2_159 = arith.constant 2 : index
    %c0_160 = arith.constant 0 : index
    %c0_161 = arith.constant 0 : index
    %310 = vector.load %arg9[%c2_159, %c0_160, %c0_161] : memref<7x2x8xf32, #tpu.memory_space<vmem>>, vector<1x2x8xf32>
    %311 = vector.shape_cast %310 : vector<1x2x8xf32> to vector<2x8xf32>
    %312 = vector.extract_strided_slice %199 {offsets = [0, 1], sizes = [8, 256], strides = [1, 1]} : vector<8x258xf32> to vector<8x256xf32>
    %cst_162 = arith.constant dense<0.000000e+00> : vector<2x256xf32>
    %313 = tpu.matmul %311, %312, %cst_162 {dimension_numbers = #tpu.dot_dimension_numbers<[1], [0], [0], [1], [0, 0, 1, 1], [], []>} : vector<2x8xf32>, vector<8x256xf32>, vector<2x256xf32> -> vector<2x256xf32>
    %314 = arith.addf %309, %313 : vector<2x256xf32>
    %c3_163 = arith.constant 3 : index
    %c0_164 = arith.constant 0 : index
    %c0_165 = arith.constant 0 : index
    %315 = vector.load %arg9[%c3_163, %c0_164, %c0_165] : memref<7x2x8xf32, #tpu.memory_space<vmem>>, vector<1x2x8xf32>
    %316 = vector.shape_cast %315 : vector<1x2x8xf32> to vector<2x8xf32>
    %317 = vector.extract_strided_slice %219 {offsets = [0, 1], sizes = [8, 256], strides = [1, 1]} : vector<8x258xf32> to vector<8x256xf32>
    %cst_166 = arith.constant dense<0.000000e+00> : vector<2x256xf32>
    %318 = tpu.matmul %316, %317, %cst_166 {dimension_numbers = #tpu.dot_dimension_numbers<[1], [0], [0], [1], [0, 0, 1, 1], [], []>} : vector<2x8xf32>, vector<8x256xf32>, vector<2x256xf32> -> vector<2x256xf32>
    %319 = arith.addf %314, %318 : vector<2x256xf32>
    %c4_167 = arith.constant 4 : index
    %c0_168 = arith.constant 0 : index
    %c0_169 = arith.constant 0 : index
    %320 = vector.load %arg9[%c4_167, %c0_168, %c0_169] : memref<7x2x8xf32, #tpu.memory_space<vmem>>, vector<1x2x8xf32>
    %321 = vector.shape_cast %320 : vector<1x2x8xf32> to vector<2x8xf32>
    %322 = vector.extract_strided_slice %239 {offsets = [0, 1], sizes = [8, 256], strides = [1, 1]} : vector<8x258xf32> to vector<8x256xf32>
    %cst_170 = arith.constant dense<0.000000e+00> : vector<2x256xf32>
    %323 = tpu.matmul %321, %322, %cst_170 {dimension_numbers = #tpu.dot_dimension_numbers<[1], [0], [0], [1], [0, 0, 1, 1], [], []>} : vector<2x8xf32>, vector<8x256xf32>, vector<2x256xf32> -> vector<2x256xf32>
    %324 = arith.addf %319, %323 : vector<2x256xf32>
    %c5_171 = arith.constant 5 : index
    %c0_172 = arith.constant 0 : index
    %c0_173 = arith.constant 0 : index
    %325 = vector.load %arg9[%c5_171, %c0_172, %c0_173] : memref<7x2x8xf32, #tpu.memory_space<vmem>>, vector<1x2x8xf32>
    %326 = vector.shape_cast %325 : vector<1x2x8xf32> to vector<2x8xf32>
    %327 = vector.extract_strided_slice %259 {offsets = [0, 1], sizes = [8, 256], strides = [1, 1]} : vector<8x258xf32> to vector<8x256xf32>
    %cst_174 = arith.constant dense<0.000000e+00> : vector<2x256xf32>
    %328 = tpu.matmul %326, %327, %cst_174 {dimension_numbers = #tpu.dot_dimension_numbers<[1], [0], [0], [1], [0, 0, 1, 1], [], []>} : vector<2x8xf32>, vector<8x256xf32>, vector<2x256xf32> -> vector<2x256xf32>
    %329 = arith.addf %324, %328 : vector<2x256xf32>
    %c6_175 = arith.constant 6 : index
    %c0_176 = arith.constant 0 : index
    %c0_177 = arith.constant 0 : index
    %330 = vector.load %arg9[%c6_175, %c0_176, %c0_177] : memref<7x2x8xf32, #tpu.memory_space<vmem>>, vector<1x2x8xf32>
    %331 = vector.shape_cast %330 : vector<1x2x8xf32> to vector<2x8xf32>
    %332 = vector.extract_strided_slice %199 {offsets = [0, 2], sizes = [8, 256], strides = [1, 1]} : vector<8x258xf32> to vector<8x256xf32>
    %cst_178 = arith.constant dense<0.000000e+00> : vector<2x256xf32>
    %333 = tpu.matmul %331, %332, %cst_178 {dimension_numbers = #tpu.dot_dimension_numbers<[1], [0], [0], [1], [0, 0, 1, 1], [], []>} : vector<2x8xf32>, vector<8x256xf32>, vector<2x256xf32> -> vector<2x256xf32>
    %334 = arith.addf %329, %333 : vector<2x256xf32>
    %c0_179 = arith.constant 0 : index
    %c0_180 = arith.constant 0 : index
    %335 = vector.load %arg10[%c0_179, %c0_180] : memref<2x1xf32, #tpu.memory_space<vmem>>, vector<2x1xf32>
    %336 = vector.broadcast %335 : vector<2x1xf32> to vector<2x256xf32>
    %337 = arith.addf %334, %336 : vector<2x256xf32>
    %338 = math.tanh %337 : vector<2x256xf32>
    %c1_181 = arith.constant 1 : index
    %c0_182 = arith.constant 0 : index
    %c0_183 = arith.constant 0 : index
    %339 = vector.load %arg11[%c1_181, %c0_182, %c0_183] : memref<4x2x256xf32, #tpu.memory_space<vmem>>, vector<1x2x256xf32>
    %340 = vector.shape_cast %339 : vector<1x2x256xf32> to vector<2x256xf32>
    %341 = vector.shape_cast %338 : vector<2x256xf32> to vector<1x2x256xf32>
    tpu.vector_store %arg11[%c1_181, %c0_182, %c0_183], %341 {strides = array<i32>} : memref<4x2x256xf32, #tpu.memory_space<vmem>>, vector<1x2x256xf32>,
    %c0_184 = arith.constant 0 : index
    %c0_185 = arith.constant 0 : index
    %c0_186 = arith.constant 0 : index
    %342 = vector.load %arg9[%c0_184, %c0_185, %c0_186] : memref<7x2x8xf32, #tpu.memory_space<vmem>>, vector<1x2x8xf32>
    %343 = vector.shape_cast %342 : vector<1x2x8xf32> to vector<2x8xf32>
    %344 = vector.extract_strided_slice %259 {offsets = [0, 0], sizes = [8, 256], strides = [1, 1]} : vector<8x258xf32> to vector<8x256xf32>
    %cst_187 = arith.constant dense<0.000000e+00> : vector<2x256xf32>
    %345 = tpu.matmul %343, %344, %cst_187 {dimension_numbers = #tpu.dot_dimension_numbers<[1], [0], [0], [1], [0, 0, 1, 1], [], []>} : vector<2x8xf32>, vector<8x256xf32>, vector<2x256xf32> -> vector<2x256xf32>
    %c1_188 = arith.constant 1 : index
    %c0_189 = arith.constant 0 : index
    %c0_190 = arith.constant 0 : index
    %346 = vector.load %arg9[%c1_188, %c0_189, %c0_190] : memref<7x2x8xf32, #tpu.memory_space<vmem>>, vector<1x2x8xf32>
    %347 = vector.shape_cast %346 : vector<1x2x8xf32> to vector<2x8xf32>
    %348 = vector.extract_strided_slice %199 {offsets = [0, 1], sizes = [8, 256], strides = [1, 1]} : vector<8x258xf32> to vector<8x256xf32>
    %cst_191 = arith.constant dense<0.000000e+00> : vector<2x256xf32>
    %349 = tpu.matmul %347, %348, %cst_191 {dimension_numbers = #tpu.dot_dimension_numbers<[1], [0], [0], [1], [0, 0, 1, 1], [], []>} : vector<2x8xf32>, vector<8x256xf32>, vector<2x256xf32> -> vector<2x256xf32>
    %350 = arith.addf %345, %349 : vector<2x256xf32>
    %c2_192 = arith.constant 2 : index
    %c0_193 = arith.constant 0 : index
    %c0_194 = arith.constant 0 : index
    %351 = vector.load %arg9[%c2_192, %c0_193, %c0_194] : memref<7x2x8xf32, #tpu.memory_space<vmem>>, vector<1x2x8xf32>
    %352 = vector.shape_cast %351 : vector<1x2x8xf32> to vector<2x8xf32>
    %353 = vector.extract_strided_slice %219 {offsets = [0, 1], sizes = [8, 256], strides = [1, 1]} : vector<8x258xf32> to vector<8x256xf32>
    %cst_195 = arith.constant dense<0.000000e+00> : vector<2x256xf32>
    %354 = tpu.matmul %352, %353, %cst_195 {dimension_numbers = #tpu.dot_dimension_numbers<[1], [0], [0], [1], [0, 0, 1, 1], [], []>} : vector<2x8xf32>, vector<8x256xf32>, vector<2x256xf32> -> vector<2x256xf32>
    %355 = arith.addf %350, %354 : vector<2x256xf32>
    %c3_196 = arith.constant 3 : index
    %c0_197 = arith.constant 0 : index
    %c0_198 = arith.constant 0 : index
    %356 = vector.load %arg9[%c3_196, %c0_197, %c0_198] : memref<7x2x8xf32, #tpu.memory_space<vmem>>, vector<1x2x8xf32>
    %357 = vector.shape_cast %356 : vector<1x2x8xf32> to vector<2x8xf32>
    %358 = vector.extract_strided_slice %239 {offsets = [0, 1], sizes = [8, 256], strides = [1, 1]} : vector<8x258xf32> to vector<8x256xf32>
    %cst_199 = arith.constant dense<0.000000e+00> : vector<2x256xf32>
    %359 = tpu.matmul %357, %358, %cst_199 {dimension_numbers = #tpu.dot_dimension_numbers<[1], [0], [0], [1], [0, 0, 1, 1], [], []>} : vector<2x8xf32>, vector<8x256xf32>, vector<2x256xf32> -> vector<2x256xf32>
    %360 = arith.addf %355, %359 : vector<2x256xf32>
    %c4_200 = arith.constant 4 : index
    %c0_201 = arith.constant 0 : index
    %c0_202 = arith.constant 0 : index
    %361 = vector.load %arg9[%c4_200, %c0_201, %c0_202] : memref<7x2x8xf32, #tpu.memory_space<vmem>>, vector<1x2x8xf32>
    %362 = vector.shape_cast %361 : vector<1x2x8xf32> to vector<2x8xf32>
    %363 = vector.extract_strided_slice %259 {offsets = [0, 1], sizes = [8, 256], strides = [1, 1]} : vector<8x258xf32> to vector<8x256xf32>
    %cst_203 = arith.constant dense<0.000000e+00> : vector<2x256xf32>
    %364 = tpu.matmul %362, %363, %cst_203 {dimension_numbers = #tpu.dot_dimension_numbers<[1], [0], [0], [1], [0, 0, 1, 1], [], []>} : vector<2x8xf32>, vector<8x256xf32>, vector<2x256xf32> -> vector<2x256xf32>
    %365 = arith.addf %360, %364 : vector<2x256xf32>
    %c5_204 = arith.constant 5 : index
    %c0_205 = arith.constant 0 : index
    %c0_206 = arith.constant 0 : index
    %366 = vector.load %arg9[%c5_204, %c0_205, %c0_206] : memref<7x2x8xf32, #tpu.memory_space<vmem>>, vector<1x2x8xf32>
    %367 = vector.shape_cast %366 : vector<1x2x8xf32> to vector<2x8xf32>
    %368 = vector.extract_strided_slice %199 {offsets = [0, 2], sizes = [8, 256], strides = [1, 1]} : vector<8x258xf32> to vector<8x256xf32>
    %cst_207 = arith.constant dense<0.000000e+00> : vector<2x256xf32>
    %369 = tpu.matmul %367, %368, %cst_207 {dimension_numbers = #tpu.dot_dimension_numbers<[1], [0], [0], [1], [0, 0, 1, 1], [], []>} : vector<2x8xf32>, vector<8x256xf32>, vector<2x256xf32> -> vector<2x256xf32>
    %370 = arith.addf %365, %369 : vector<2x256xf32>
    %c6_208 = arith.constant 6 : index
    %c0_209 = arith.constant 0 : index
    %c0_210 = arith.constant 0 : index
    %371 = vector.load %arg9[%c6_208, %c0_209, %c0_210] : memref<7x2x8xf32, #tpu.memory_space<vmem>>, vector<1x2x8xf32>
    %372 = vector.shape_cast %371 : vector<1x2x8xf32> to vector<2x8xf32>
    %373 = vector.extract_strided_slice %219 {offsets = [0, 2], sizes = [8, 256], strides = [1, 1]} : vector<8x258xf32> to vector<8x256xf32>
    %cst_211 = arith.constant dense<0.000000e+00> : vector<2x256xf32>
    %374 = tpu.matmul %372, %373, %cst_211 {dimension_numbers = #tpu.dot_dimension_numbers<[1], [0], [0], [1], [0, 0, 1, 1], [], []>} : vector<2x8xf32>, vector<8x256xf32>, vector<2x256xf32> -> vector<2x256xf32>
    %375 = arith.addf %370, %374 : vector<2x256xf32>
    %c0_212 = arith.constant 0 : index
    %c0_213 = arith.constant 0 : index
    %376 = vector.load %arg10[%c0_212, %c0_213] : memref<2x1xf32, #tpu.memory_space<vmem>>, vector<2x1xf32>
    %377 = vector.broadcast %376 : vector<2x1xf32> to vector<2x256xf32>
    %378 = arith.addf %375, %377 : vector<2x256xf32>
    %379 = math.tanh %378 : vector<2x256xf32>
    %c2_214 = arith.constant 2 : index
    %c0_215 = arith.constant 0 : index
    %c0_216 = arith.constant 0 : index
    %380 = vector.load %arg11[%c2_214, %c0_215, %c0_216] : memref<4x2x256xf32, #tpu.memory_space<vmem>>, vector<1x2x256xf32>
    %381 = vector.shape_cast %380 : vector<1x2x256xf32> to vector<2x256xf32>
    %382 = vector.shape_cast %379 : vector<2x256xf32> to vector<1x2x256xf32>
    tpu.vector_store %arg11[%c2_214, %c0_215, %c0_216], %382 {strides = array<i32>} : memref<4x2x256xf32, #tpu.memory_space<vmem>>, vector<1x2x256xf32>,
    %c0_217 = arith.constant 0 : index
    %c0_218 = arith.constant 0 : index
    %c0_219 = arith.constant 0 : index
    %383 = vector.load %arg9[%c0_217, %c0_218, %c0_219] : memref<7x2x8xf32, #tpu.memory_space<vmem>>, vector<1x2x8xf32>
    %384 = vector.shape_cast %383 : vector<1x2x8xf32> to vector<2x8xf32>
    %385 = vector.extract_strided_slice %199 {offsets = [0, 1], sizes = [8, 256], strides = [1, 1]} : vector<8x258xf32> to vector<8x256xf32>
    %cst_220 = arith.constant dense<0.000000e+00> : vector<2x256xf32>
    %386 = tpu.matmul %384, %385, %cst_220 {dimension_numbers = #tpu.dot_dimension_numbers<[1], [0], [0], [1], [0, 0, 1, 1], [], []>} : vector<2x8xf32>, vector<8x256xf32>, vector<2x256xf32> -> vector<2x256xf32>
    %c1_221 = arith.constant 1 : index
    %c0_222 = arith.constant 0 : index
    %c0_223 = arith.constant 0 : index
    %387 = vector.load %arg9[%c1_221, %c0_222, %c0_223] : memref<7x2x8xf32, #tpu.memory_space<vmem>>, vector<1x2x8xf32>
    %388 = vector.shape_cast %387 : vector<1x2x8xf32> to vector<2x8xf32>
    %389 = vector.extract_strided_slice %219 {offsets = [0, 1], sizes = [8, 256], strides = [1, 1]} : vector<8x258xf32> to vector<8x256xf32>
    %cst_224 = arith.constant dense<0.000000e+00> : vector<2x256xf32>
    %390 = tpu.matmul %388, %389, %cst_224 {dimension_numbers = #tpu.dot_dimension_numbers<[1], [0], [0], [1], [0, 0, 1, 1], [], []>} : vector<2x8xf32>, vector<8x256xf32>, vector<2x256xf32> -> vector<2x256xf32>
    %391 = arith.addf %386, %390 : vector<2x256xf32>
    %c2_225 = arith.constant 2 : index
    %c0_226 = arith.constant 0 : index
    %c0_227 = arith.constant 0 : index
    %392 = vector.load %arg9[%c2_225, %c0_226, %c0_227] : memref<7x2x8xf32, #tpu.memory_space<vmem>>, vector<1x2x8xf32>
    %393 = vector.shape_cast %392 : vector<1x2x8xf32> to vector<2x8xf32>
    %394 = vector.extract_strided_slice %239 {offsets = [0, 1], sizes = [8, 256], strides = [1, 1]} : vector<8x258xf32> to vector<8x256xf32>
    %cst_228 = arith.constant dense<0.000000e+00> : vector<2x256xf32>
    %395 = tpu.matmul %393, %394, %cst_228 {dimension_numbers = #tpu.dot_dimension_numbers<[1], [0], [0], [1], [0, 0, 1, 1], [], []>} : vector<2x8xf32>, vector<8x256xf32>, vector<2x256xf32> -> vector<2x256xf32>
    %396 = arith.addf %391, %395 : vector<2x256xf32>
    %c3_229 = arith.constant 3 : index
    %c0_230 = arith.constant 0 : index
    %c0_231 = arith.constant 0 : index
    %397 = vector.load %arg9[%c3_229, %c0_230, %c0_231] : memref<7x2x8xf32, #tpu.memory_space<vmem>>, vector<1x2x8xf32>
    %398 = vector.shape_cast %397 : vector<1x2x8xf32> to vector<2x8xf32>
    %399 = vector.extract_strided_slice %259 {offsets = [0, 1], sizes = [8, 256], strides = [1, 1]} : vector<8x258xf32> to vector<8x256xf32>
    %cst_232 = arith.constant dense<0.000000e+00> : vector<2x256xf32>
    %400 = tpu.matmul %398, %399, %cst_232 {dimension_numbers = #tpu.dot_dimension_numbers<[1], [0], [0], [1], [0, 0, 1, 1], [], []>} : vector<2x8xf32>, vector<8x256xf32>, vector<2x256xf32> -> vector<2x256xf32>
    %401 = arith.addf %396, %400 : vector<2x256xf32>
    %c4_233 = arith.constant 4 : index
    %c0_234 = arith.constant 0 : index
    %c0_235 = arith.constant 0 : index
    %402 = vector.load %arg9[%c4_233, %c0_234, %c0_235] : memref<7x2x8xf32, #tpu.memory_space<vmem>>, vector<1x2x8xf32>
    %403 = vector.shape_cast %402 : vector<1x2x8xf32> to vector<2x8xf32>
    %404 = vector.extract_strided_slice %199 {offsets = [0, 2], sizes = [8, 256], strides = [1, 1]} : vector<8x258xf32> to vector<8x256xf32>
    %cst_236 = arith.constant dense<0.000000e+00> : vector<2x256xf32>
    %405 = tpu.matmul %403, %404, %cst_236 {dimension_numbers = #tpu.dot_dimension_numbers<[1], [0], [0], [1], [0, 0, 1, 1], [], []>} : vector<2x8xf32>, vector<8x256xf32>, vector<2x256xf32> -> vector<2x256xf32>
    %406 = arith.addf %401, %405 : vector<2x256xf32>
    %c5_237 = arith.constant 5 : index
    %c0_238 = arith.constant 0 : index
    %c0_239 = arith.constant 0 : index
    %407 = vector.load %arg9[%c5_237, %c0_238, %c0_239] : memref<7x2x8xf32, #tpu.memory_space<vmem>>, vector<1x2x8xf32>
    %408 = vector.shape_cast %407 : vector<1x2x8xf32> to vector<2x8xf32>
    %409 = vector.extract_strided_slice %219 {offsets = [0, 2], sizes = [8, 256], strides = [1, 1]} : vector<8x258xf32> to vector<8x256xf32>
    %cst_240 = arith.constant dense<0.000000e+00> : vector<2x256xf32>
    %410 = tpu.matmul %408, %409, %cst_240 {dimension_numbers = #tpu.dot_dimension_numbers<[1], [0], [0], [1], [0, 0, 1, 1], [], []>} : vector<2x8xf32>, vector<8x256xf32>, vector<2x256xf32> -> vector<2x256xf32>
    %411 = arith.addf %406, %410 : vector<2x256xf32>
    %c6_241 = arith.constant 6 : index
    %c0_242 = arith.constant 0 : index
    %c0_243 = arith.constant 0 : index
    %412 = vector.load %arg9[%c6_241, %c0_242, %c0_243] : memref<7x2x8xf32, #tpu.memory_space<vmem>>, vector<1x2x8xf32>
    %413 = vector.shape_cast %412 : vector<1x2x8xf32> to vector<2x8xf32>
    %414 = vector.extract_strided_slice %239 {offsets = [0, 2], sizes = [8, 256], strides = [1, 1]} : vector<8x258xf32> to vector<8x256xf32>
    %cst_244 = arith.constant dense<0.000000e+00> : vector<2x256xf32>
    %415 = tpu.matmul %413, %414, %cst_244 {dimension_numbers = #tpu.dot_dimension_numbers<[1], [0], [0], [1], [0, 0, 1, 1], [], []>} : vector<2x8xf32>, vector<8x256xf32>, vector<2x256xf32> -> vector<2x256xf32>
    %416 = arith.addf %411, %415 : vector<2x256xf32>
    %c0_245 = arith.constant 0 : index
    %c0_246 = arith.constant 0 : index
    %417 = vector.load %arg10[%c0_245, %c0_246] : memref<2x1xf32, #tpu.memory_space<vmem>>, vector<2x1xf32>
    %418 = vector.broadcast %417 : vector<2x1xf32> to vector<2x256xf32>
    %419 = arith.addf %416, %418 : vector<2x256xf32>
    %420 = math.tanh %419 : vector<2x256xf32>
    %c3_247 = arith.constant 3 : index
    %c0_248 = arith.constant 0 : index
    %c0_249 = arith.constant 0 : index
    %421 = vector.load %arg11[%c3_247, %c0_248, %c0_249] : memref<4x2x256xf32, #tpu.memory_space<vmem>>, vector<1x2x256xf32>
    %422 = vector.shape_cast %421 : vector<1x2x256xf32> to vector<2x256xf32>
    %423 = vector.shape_cast %420 : vector<2x256xf32> to vector<1x2x256xf32>
    tpu.vector_store %arg11[%c3_247, %c0_248, %c0_249], %423 {strides = array<i32>} : memref<4x2x256xf32, #tpu.memory_space<vmem>>, vector<1x2x256xf32>,
    return
  }
  func.func @transform_0(%arg0: i32, %arg1: i32) -> (i32, i32, i32) {
    %c0_i32 = arith.constant 0 : i32
    %c0_i32_0 = arith.constant 0 : i32
    %c0_i32_1 = arith.constant 0 : i32
    return %arg0, %c0_i32, %c0_i32_0 : i32, i32, i32
  }
  func.func @transform_1(%arg0: i32, %arg1: i32) -> (i32, i32, i32) {
    %c0_i32 = arith.constant 0 : i32
    %c0_i32_0 = arith.constant 0 : i32
    %c0_i32_1 = arith.constant 0 : i32
    %c0_i32_2 = arith.constant 0 : i32
    return %c0_i32, %c0_i32_0, %c0_i32_1 : i32, i32, i32
  }
  func.func @transform_2(%arg0: i32, %arg1: i32) -> (i32, i32) {
    %c0_i32 = arith.constant 0 : i32
    %c0_i32_0 = arith.constant 0 : i32
    %c0_i32_1 = arith.constant 0 : i32
    return %c0_i32, %c0_i32_0 : i32, i32
  }
  func.func @transform_3(%arg0: i32, %arg1: i32) -> (i32, i32, i32) {
    %c0_i32 = arith.constant 0 : i32
    %c0_i32_0 = arith.constant 0 : i32
    %c0_i32_1 = arith.constant 0 : i32
    %c0_i32_2 = arith.constant 0 : i32
    return %c0_i32, %c0_i32_0, %c0_i32_1 : i32, i32, i32
  }
  func.func @transform_4(%arg0: i32, %arg1: i32) -> (i32, i32) {
    %c0_i32 = arith.constant 0 : i32
    %c0_i32_0 = arith.constant 0 : i32
    %c0_i32_1 = arith.constant 0 : i32
    return %c0_i32, %c0_i32_0 : i32, i32
  }
  func.func @transform_5(%arg0: i32, %arg1: i32) -> (i32, i32, i32) {
    %c0_i32 = arith.constant 0 : i32
    %c0_i32_0 = arith.constant 0 : i32
    %c0_i32_1 = arith.constant 0 : i32
    %c0_i32_2 = arith.constant 0 : i32
    return %c0_i32, %c0_i32_0, %c0_i32_1 : i32, i32, i32
  }
  func.func @transform_6(%arg0: i32, %arg1: i32) -> (i32, i32) {
    %c0_i32 = arith.constant 0 : i32
    %c0_i32_0 = arith.constant 0 : i32
    %c0_i32_1 = arith.constant 0 : i32
    return %c0_i32, %c0_i32_0 : i32, i32
  }
  func.func @transform_7(%arg0: i32, %arg1: i32) -> (i32, i32, i32) {
    %c0_i32 = arith.constant 0 : i32
    %c0_i32_0 = arith.constant 0 : i32
    %c0_i32_1 = arith.constant 0 : i32
    %c0_i32_2 = arith.constant 0 : i32
    return %c0_i32, %c0_i32_0, %c0_i32_1 : i32, i32, i32
  }
  func.func @transform_8(%arg0: i32, %arg1: i32) -> (i32, i32) {
    %c0_i32 = arith.constant 0 : i32
    %c0_i32_0 = arith.constant 0 : i32
    %c0_i32_1 = arith.constant 0 : i32
    return %c0_i32, %c0_i32_0 : i32, i32
  }
  func.func @transform_9(%arg0: i32, %arg1: i32) -> (i32, i32, i32) {
    %c1_i32 = arith.constant 1 : i32
    %0 = arith.muli %arg0, %c1_i32 : i32
    %1 = arith.addi %0, %arg1 : i32
    %c0_i32 = arith.constant 0 : i32
    %c0_i32_0 = arith.constant 0 : i32
    %c0_i32_1 = arith.constant 0 : i32
    return %c0_i32, %c0_i32_0, %1 : i32, i32, i32
  }
}

</mosaic_0001>

<bundles_post_ra>
// kernel: autoencoder_module_forward.1
= control target key start
LH: loop header
LB: loop body
LE: loop exit
PB: predicated region body
PF: predicated region fallthrough
CT: control target
= control target key end

     0   :  { %s12160_s30 = smov 0   ;;  %s12162_s10 = smov 0   ;;  %s16497_s0 = inlined_call_operand.vmem [shape: f32[2,268,8], index: 0, kind: input, shape index: {}]   ;;  %s16498_s1 = inlined_call_operand.vmem [shape: f32[7,32,8], index: 1, kind: input, shape index: {}]   ;;  %s16499_s2 = inlined_call_operand.vmem [shape: f32[32,1], index: 2, kind: input, shape index: {}]   ;;  %s16500_s3 = inlined_call_operand.vmem [shape: f32[4,16,32], index: 3, kind: input, shape index: {}]   ;;  %s16501_s4 = inlined_call_operand.vmem [shape: f32[16,1], index: 4, kind: input, shape index: {}]   ;;  %s16502_s5 = inlined_call_operand.vmem [shape: f32[4,8,16], index: 5, kind: input, shape index: {}]   ;;  %s16503_s6 = inlined_call_operand.vmem [shape: f32[8,1], index: 6, kind: input, shape index: {}]   ;;  %s16504_s7 = inlined_call_operand.vmem [shape: f32[7,2,8], index: 7, kind: input, shape index: {}]   ;;  %s16505_s8 = inlined_call_operand.vmem [shape: f32[2,1], index: 8, kind: input, shape index: {}]   ;;  %s16506_s9 = inlined_call_operand.vmem [shape: f32[4,2,512], index: 9, kind: output, shape index: {}]  }
   0x1   :  { %s12164_s11 = smov 0   ;;  %s12166_s12 = smov 0  }
   0x2   :  { %s12168_s13 = smov 0  }
   0x3 LB: > { %s10597_s14 = sadd.s32 4294967295, %s12092_s13   ;;  %s31_s15 = sadd.s32 1, %s12088_s12  ;;  %s12092_s13 = sphi %s12168_s13, %s19_s13   ;;  %s12088_s12 = sphi %s12166_s12, %s17037_s12   ;;  %s12084_s11 = sphi %s12164_s11, %s17036_s11   ;;  %s12080_s10 = sphi %s12162_s10, %s17035_s10   ;;  %s12076_s30 = sphi %s12160_s30, %s17034_s30  }
   0x4   : > { %p33_p0 = scmp.ge.s32.totalorder %s31_s15, 2  ;;  %s234_s16 = sadd.s32 1, %s12080_s10 }
   0x5   : > { %p244_p1 = scmp.ne.s32.totalorder %s12080_s10, %s12076_s30  ;;  %p245_p2 = scmp.eq.s32.totalorder %s10597_s14, 1 }
   0x6   : > { %s17039_s15 = smov (%p33_p0, %s31_s15), 0  ;;  %p10601_p4 = scmp.ge.s32.totalorder %s12092_s13, 1 }
   0x7   : > { %p12192_p3 = por %p245_p2, %p244_p1  ;;  %s231_s18 = ssub.s32 %s12088_s12, %s17039_s15 }
   0x8   : > { %p301_p5 = scmp.lt.s32.totalorder %s12092_s13, 3  ;;  %p232_p6 = scmp.eq.s32.totalorder %s231_s18, 0 }
   0xa   : > { %p302_p7 = pnand %p10601_p4, %p301_p5 }
   0xb   : > { %s12201_s19 = scalar_select %p232_p6, %s12080_s10, %s234_s16  }
   0xc   : > { %305 = sbr.rel (%p302_p7) target bundleno = 2864 (0xb30), region = 56 }
  0x13   : > { %p336_p8 = scmp.lt.s32.totalorder %s12084_s11, 1  ;;  %v379_v0 = vlaneseq  ;;  %v16507_v1 = vmov 0.0|0.0   ;;  %vm16536_vm0 = vmmov 0   ;;  %v16509_v4 = vmov 0.0   ;;  %s12097_s25 = smov 127  }
  0x14   : > { %11322 = vmatprep.subr.bf16.mxu1 %v16507_v1  ;;  %11115 = vmatprep.mubr.msk.f32.mxu1 %vm16536_vm0, %v16509_v4  ;;  %vm16519_vm1 = vcmask 64512   ;;  %s12098_s26 = smov 126   ;;  %s12099_s27 = smov 125   ;;  %vm16554_vm4 = vcmask 1039360   ;;  %vm16540_vm5 = vcmask 1031168   ;;  %vm1255_vm6 = vcmask 1022976  }
  0x15   : > { %s337_s20 = scalar_select %p336_p8, %s12084_s11, 1  ;;  %v380_v2 = vshrl.u32 %v379_v0, 7  ;;  %v12206_v3 = vand.u32 127, %v379_v0  ;;  %vm12221_vm3 = vmpackc.low %vm16519_vm1, %vm16519_vm1  ;;  %vm1470_vm7 = vcmask 1014784   ;;  %vm1685_vm8 = vcmask 1006592  }
  0x16   : > { %s12100_s28 = smov 124   ;;  %s12101_s29 = smov 123   ;;  %vm1900_vm9 = vcmask 998400  }
  0x17   : > { %16661 = vst [vmem:[#allocation3_spill] sm:$0xff] %v12206_v3  ;;  %s11586_s21 = smul.u32 272, %s337_s20  ;;  %vm383_vm2 = vcmp.eq.s32.totalorder %v380_v2, %v12206_v3  ;;  %s12102_s14 = smov 122  }
  0x18   : > { %v12212_v5 = vsel %vm383_vm2, 1.0, %v16509_v4 }
  0x19   : > { %s12217_s24 = scalar_lea.vmem %s16497_s0, %s11586_s21  ;;  %11023 = vmatprep.mubr.msk.f32.mxu0 %vm16519_vm1, %v12212_v5 }
  0x1a   : > { %v361_v7 = vld [vmem:[%s12217_s24 + $0x80] sm:$0xff]  ;;  %v362_v8 = vld [vmem:[%s12217_s24 + $0x88] sm:$0xff]  ;;  %v363_v12 = vld [vmem:[%s12217_s24 + $0x90] sm:$0xff] }
  0x1b   : > { %v345_v9 = vld [vmem:[%s12217_s24] sm:$0xff]  ;;  %v11274_v10 = vpack.c.bf16 %v362_v8, %v361_v7  ;;  %v346_v11 = vld [vmem:[%s12217_s24 + $0x8] sm:$0xff]  ;;  %v364_v13 = vld [vmem:[%s12217_s24 + $0x98] sm:$0xff] }
  0x1c   : > { %v11277_v14 = vpack.c.bf16 %v346_v11, %v345_v9  ;;  %v11280_v15 = vpack.c.bf16 %v364_v13, %v363_v12  ;;  %v347_v16 = vld [vmem:[%s12217_s24 + $0x10] sm:$0xff]  ;;  %v348_v17 = vld [vmem:[%s12217_s24 + $0x18] sm:$0xff]  ;;  %v365_v18 = vld [vmem:[%s12217_s24 + $0xa0] sm:$0xff] }
  0x1d   : > { %11276 = vmatprep.subr.msk.bf16.mxu0 %vm12221_vm3, %v11274_v10  ;;  %v366_v19 = vld [vmem:[%s12217_s24 + $0xa8] sm:$0xff]  ;;  %v11283_v20 = vpack.c.bf16 %v348_v17, %v347_v16  ;;  %v377_v22 = vld [vmem:[%s12217_s24 + $0x100] sm:$0xff]  ;;  %v367_v27 = vld [vmem:[%s12217_s24 + $0xb0] sm:$0xff] }
  0x1e   : > { %11279 = vmatpush3.bf16.xpose.msk.msra.mxu0 %vm12221_vm3, %v11277_v14  ;;  %v11286_v21 = vpack.c.bf16 %v366_v19, %v365_v18  ;;  %v378_v23 = vld [vmem:[%s12217_s24 + $0x108] sm:$0xf]  ;;  %v349_v25 = vld [vmem:[%s12217_s24 + $0x20] sm:$0xff]  ;;  %v368_v28 = vld [vmem:[%s12217_s24 + $0xb8] sm:$0xff] }
  0x1f   : > { %11282 = vmatprep.subr.msk.bf16.mxu0 %vm12221_vm3, %v11280_v15  ;;  %v11323_v24 = vpack.c.bf16 %v378_v23, %v377_v22  ;;  %v350_v26 = vld [vmem:[%s12217_s24 + $0x28] sm:$0xff]  ;;  %v11292_v30 = vpack.c.bf16 %v368_v28, %v367_v27  ;;  %v351_v31 = vld [vmem:[%s12217_s24 + $0x30] sm:$0xff]  ;;  %v352_v32 = vld [vmem:[%s12217_s24 + $0x38] sm:$0xff] }
  0x20   : > { %v11289_v29 = vpack.c.bf16 %v350_v26, %v349_v25  ;;  %v369_v33 = vld [vmem:[%s12217_s24 + $0xc0] sm:$0xff]  ;;  %v370_v34 = vld [vmem:[%s12217_s24 + $0xc8] sm:$0xff]  ;;  %v11295_v35 = vpack.c.bf16 %v352_v32, %v351_v31  ;;  %v371_v39 = vld [vmem:[%s12217_s24 + $0xd0] sm:$0xff] }
  0x21   : > { %11325 = vmatpush3.bf16.xpose.msk.msra.mxu1 %vm12221_vm3, %v11323_v24  ;;  %v11298_v36 = vpack.c.bf16 %v370_v34, %v369_v33  ;;  %v353_v37 = vld [vmem:[%s12217_s24 + $0x40] sm:$0xff]  ;;  %v354_v38 = vld [vmem:[%s12217_s24 + $0x48] sm:$0xff]  ;;  %v372_v40 = vld [vmem:[%s12217_s24 + $0xd8] sm:$0xff] }
  0x22   : > { %v11301_v41 = vpack.c.bf16 %v354_v38, %v353_v37  ;;  %v11304_v42 = vpack.c.bf16 %v372_v40, %v371_v39  ;;  %v355_v43 = vld [vmem:[%s12217_s24 + $0x50] sm:$0xff]  ;;  %v356_v44 = vld [vmem:[%s12217_s24 + $0x58] sm:$0xff]  ;;  %v373_v45 = vld [vmem:[%s12217_s24 + $0xe0] sm:$0xff] }
  0x23   : > { %v374_v46 = vld [vmem:[%s12217_s24 + $0xe8] sm:$0xff]  ;;  %v11307_v47 = vpack.c.bf16 %v356_v44, %v355_v43  ;;  %v357_v49 = vld [vmem:[%s12217_s24 + $0x60] sm:$0xff]  ;;  %v375_v51 = vld [vmem:[%s12217_s24 + $0xf0] sm:$0xff] }
  0x24   : > { %v11310_v48 = vpack.c.bf16 %v374_v46, %v373_v45  ;;  %v358_v50 = vld [vmem:[%s12217_s24 + $0x68] sm:$0xff]  ;;  %v376_v52 = vld [vmem:[%s12217_s24 + $0xf8] sm:$0xff]  ;;  %v359_v55 = vld [vmem:[%s12217_s24 + $0x70] sm:$0xff] }
  0x25   : > { %v11313_v53 = vpack.c.bf16 %v358_v50, %v357_v49  ;;  %v11316_v54 = vpack.c.bf16 %v376_v52, %v375_v51  ;;  %v360_v56 = vld [vmem:[%s12217_s24 + $0x78] sm:$0xff]  ;;  %v10642_v7 = vld [vmem:[%s16498_s1 + $0x28] sm:$0xff]  ;;  %v10643_v8 = vld [vmem:[%s16498_s1 + $0x30] sm:$0xff] }
  0x26   : > { %11285 = vmatpush3.bf16.xpose.msk.msra.mxu0 %vm12221_vm3, %v11283_v20  ;;  %v11319_v57 = vpack.c.bf16 %v360_v56, %v359_v55  ;;  %v10644_v9 = vld [vmem:[%s16498_s1 + $0x38] sm:$0xff]  ;;  %v633_v10 = vld [vmem:[%s16498_s1] sm:$0xff]  ;;  %v634_v14 = vld [vmem:[%s16498_s1 + $0x8] sm:$0xff]  ;;  %v12103_v20 = vmov 0  }
  0x27   : > { %11288 = vmatprep.subr.msk.bf16.mxu0 %vm12221_vm3, %v11286_v21  ;;  %v635_v15 = vld [vmem:[%s16498_s1 + $0x10] sm:$0xff]  ;;  %v636_v16 = vld [vmem:[%s16498_s1 + $0x18] sm:$0xff]  ;;  %v2104_v17 = vld [vmem:[%s16499_s2] sm:$0xff]  ;;  %11787 = vset.pattern.permute.xlu0 %v12103_v20 }
  0x28   : > { %11116 = vmatmul.mubr.msk.f32.vlgmr.msra.gmra.mrb[0].mxu1 %vm16519_vm1, %v12212_v5  ;;  %v2105_v18 = vld [vmem:[%s16499_s2 + $0x8] sm:$0xff]  ;;  %11788 = vset.pattern.permute.xlu1 %v12103_v20  ;;  %v2107_v21 = vld [vmem:[%s16499_s2 + $0x18] sm:$0xff]  ;;  %v2106_v23 = vld [vmem:[%s16499_s2 + $0x10] sm:$0xff] }
  0x29   : > { %733 = vmatprep.mubr.f32.mxu1 %v16509_v4  ;;  %v10661_v24 = vld [vmem:[%s16498_s1 + $0x40] sm:$0xff]  ;;  %v10662_v28 = vld [vmem:[%s16498_s1 + $0x48] sm:$0xff]  ;;  %v10675_v38 = vld [vmem:[%s16498_s1 + $0x70] sm:$0xff] }
  0x2a   : > { %v10673_v33 = vld [vmem:[%s16498_s1 + $0x60] sm:$0xff]  ;;  %v10674_v37 = vld [vmem:[%s16498_s1 + $0x68] sm:$0xff]  ;;  %v10676_v39 = vld [vmem:[%s16498_s1 + $0x78] sm:$0xff] }
  0x2b   : > { %v10686_v46 = vld [vmem:[%s16498_s1 + $0x88] sm:$0xff]  ;;  %v10697_v51 = vld [vmem:[%s16498_s1 + $0xa0] sm:$0xff]  ;;  %v10699_v56 = vld [vmem:[%s16498_s1 + $0xb0] sm:$0xff] }
  0x2c   : > { %v10698_v55 = vld [vmem:[%s16498_s1 + $0xa8] sm:$0xff] }
  0x2e   : > { %11291 = vmatpush3.bf16.xpose.msk.msra.mxu0 %vm12221_vm3, %v11289_v29  ;;  %v10663_v29 = vld [vmem:[%s16498_s1 + $0x50] sm:$0xff] }
  0x2f   : > { %11294 = vmatprep.subr.msk.bf16.mxu0 %vm12221_vm3, %v11292_v30  ;;  %v10664_v30 = vld [vmem:[%s16498_s1 + $0x58] sm:$0xff] }
  0x36   : > { %11297 = vmatpush3.bf16.xpose.msk.msra.mxu0 %vm12221_vm3, %v11295_v35 }
  0x37   : > { %11300 = vmatprep.subr.msk.bf16.mxu0 %vm12221_vm3, %v11298_v36 }
  0x3e   : > { %11303 = vmatpush3.bf16.xpose.msk.msra.mxu0 %vm12221_vm3, %v11301_v41 }
  0x3f   : > { %11306 = vmatprep.subr.msk.bf16.mxu0 %vm12221_vm3, %v11304_v42  ;;  %v10685_v42 = vld [vmem:[%s16498_s1 + $0x80] sm:$0xff] }
  0x46   : > { %11309 = vmatpush3.bf16.xpose.msk.msra.mxu0 %vm12221_vm3, %v11307_v47  ;;  %v10687_v47 = vld [vmem:[%s16498_s1 + $0x90] sm:$0xff] }
  0x47   : > { %11312 = vmatprep.subr.msk.bf16.mxu0 %vm12221_vm3, %v11310_v48  ;;  %v10688_v48 = vld [vmem:[%s16498_s1 + $0x98] sm:$0xff] }
  0x4e   : > { %11315 = vmatpush3.bf16.xpose.msk.msra.mxu0 %vm12221_vm3, %v11313_v53 }
  0x4f   : > { %11318 = vmatprep.subr.msk.bf16.mxu0 %vm12221_vm3, %v11316_v54 }
  0x56   : > { %11321 = vmatpush3.bf16.xpose.msk.msra.mxu0 %vm12221_vm3, %v11319_v57  ;;  %v10700_v57 = vld [vmem:[%s16498_s1 + $0xb8] sm:$0xff] }
  0x5d   : > { %11024 = vmatmul.mubr.msk.f32.vlgmr.msra.gmra.mrb[0].mxu0 %vm16519_vm1, %v12212_v5  ;;  %v10641_v5 = vld [vmem:[%s16498_s1 + $0x20] sm:$0xff] }
  0x5e   : > { %3523 = vmatprep.mubr.f32.mxu0 %v16509_v4 }
  0xfb   : > { %v629_v58 = vpop.f32.mrb[0].mxu1 }
  0xfc   : > { %v11117_v59 = vpop.f32.mrb[1].mxu1 }
 0x130   : > { %v558_v60 = vpop.f32.mrb[0].mxu0 }
 0x131   : > { %645 = vrot.lane.b32.xlu1 %v558_v60, %s12097_s25  ;;  %v560_v61 = vpop.f32.mrb[1].mxu0 }
 0x132   : > { %647 = vrot.lane.b32.xlu0 %v560_v61, %s12097_s25 }
 0x135   : > { %1036 = vrot.lane.b32.xlu1 %v560_v61, %s12098_s26 }
 0x136   : > { %649 = vrot.lane.b32.xlu0 %v629_v58, %s12097_s25 }
 0x139   : > { %1034 = vrot.lane.b32.xlu1 %v558_v60, %s12098_s26 }
 0x13a   : > { %1038 = vrot.lane.b32.xlu0 %v629_v58, %s12098_s26 }
 0x13d   : > { %1253 = vrot.lane.b32.xlu1 %v629_v58, %s12099_s27 }
 0x13e   : > { %1251 = vrot.lane.b32.xlu0 %v560_v61, %s12099_s27 }
 0x141   : > { %1466 = vrot.lane.b32.xlu1 %v560_v61, %s12100_s28 }
 0x142   : > { %1249 = vrot.lane.b32.xlu0 %v558_v60, %s12099_s27 }
 0x145   : > { %1464 = vrot.lane.b32.xlu1 %v558_v60, %s12100_s28 }
 0x146   : > { %1468 = vrot.lane.b32.xlu0 %v629_v58, %s12100_s28 }
 0x149   : > { %1683 = vrot.lane.b32.xlu1 %v629_v58, %s12101_s29 }
 0x14a   : > { %1681 = vrot.lane.b32.xlu0 %v560_v61, %s12101_s29 }
 0x14d   : > { %1896 = vrot.lane.b32.xlu1 %v560_v61, %s12102_s14 }
 0x14e   : > { %1679 = vrot.lane.b32.xlu0 %v558_v60, %s12101_s29 }
 0x151   : > { %1894 = vrot.lane.b32.xlu1 %v558_v60, %s12102_s14 }
 0x152   : > { %1898 = vrot.lane.b32.xlu0 %v629_v58, %s12102_s14 }
 0x155   : > { %2115 = vperm.xlu1 %11788, %v2105_v18  }
 0x156   : > { %2110 = vperm.xlu0 %11787, %v2104_v17  }
 0x159   : > { %2120 = vperm.xlu1 %11788, %v2106_v23  }
 0x15a   : > { %2125 = vperm.xlu0 %11787, %v2107_v21  }
 0x1a3   : > { %v646_v63 = vpop.permute.xlu1 %645 }
 0x1a4   : > { %v648_v62 = vpop.permute.xlu0 %647 }
 0x1a5   : > { %v652_v6 = vsel %vm16554_vm4, %v646_v63, %v648_v62  ;;  %v10712_v63 = vld [vmem:[%s16498_s1 + $0xd8] sm:$0xff] }
 0x1a7   : > { %v1037_v12 = vpop.permute.xlu1 %1036 }
 0x1a8   : > { %v650_v0 = vpop.permute.xlu0 %649 }
 0x1a9   : > { %v653_v2 = vsel %vm16554_vm4, %v648_v62, %v650_v0  ;;  %v10711_v62 = vld [vmem:[%s16498_s1 + $0xd0] sm:$0xff] }
 0x1aa   : > { %669 = vmatprep.subr.mxu1 %v653_v2 }
 0x1ab   : > { %670 = vmatpush1.msra.mxu1 %v652_v6  ;;  %v1035_v19 = vpop.permute.xlu1 %1034 }
 0x1ac   : > { %10645 = vmatmul.mubr.msk.f32.vlgmr.msra.gmra.mrb[2].mxu1 %vm16519_vm1, %v10641_v5  ;;  %11118 = vmatprep.subr.mxu1 %v650_v0  ;;  %v1039_v11 = vpop.permute.xlu0 %1038  ;;  %v1041_v22 = vsel %vm16540_vm5, %v1035_v19, %v1037_v12 }
 0x1ad   : > { %11119 = vmatpush3.msra.mxu1 %v650_v0  ;;  %739 = vmatprep.mubr.f32.mxu1 %v16509_v4  ;;  %v1042_v13 = vsel %vm16540_vm5, %v1037_v12, %v1039_v11 }
 0x1ae   : > { %855 = vmatprep.subr.mxu1 %v560_v61  ;;  %v10710_v61 = vld [vmem:[%s16498_s1 + $0xc8] sm:$0xff] }
 0x1af   : > { %v1254_v25 = vpop.permute.xlu1 %1253 }
 0x1b0   : > { %10646 = vmatmul.mubr.msk.f32.gmra.mrb[4].mxu1 %vm16519_vm1, %v10642_v7  ;;  %v1252_v26 = vpop.permute.xlu0 %1251 }
 0x1b1   : > { %745 = vmatprep.mubr.f32.mxu1 %v16509_v4  ;;  %v1257_v27 = vsel %vm1255_vm6, %v1252_v26, %v1254_v25 }
 0x1b3   : > { %v1467_v35 = vpop.permute.xlu1 %1466 }
 0x1b4   : > { %10647 = vmatmul.mubr.msk.f32.gmra.mrb[6].mxu1 %vm16519_vm1, %v10643_v8  ;;  %v1250_v31 = vpop.permute.xlu0 %1249 }
 0x1b5   : > { %751 = vmatprep.mubr.f32.mxu1 %v16509_v4  ;;  %v1256_v32 = vsel %vm1255_vm6, %v1250_v31, %v1252_v26 }
 0x1b7   : > { %v1465_v40 = vpop.permute.xlu1 %1464 }
 0x1b8   : > { %10648 = vmatmul.mubr.msk.f32.gmra.mrb[8].mxu1 %vm16519_vm1, %v10644_v9  ;;  %v1469_v34 = vpop.permute.xlu0 %1468  ;;  %v1471_v41 = vsel %vm1470_vm7, %v1465_v40, %v1467_v35 }
 0x1b9   : > { %11120 = vmatprep.mubr.msk.f32.mxu1 %vm16519_vm1, %v10641_v5  ;;  %v1472_v36 = vsel %vm1470_vm7, %v1467_v35, %v1469_v34 }
 0x1bb   : > { %v1684_v43 = vpop.permute.xlu1 %1683 }
 0x1bc   : > { %11121 = vmatmul.mubr.msk.f32.vlgmr.msra.gmra.mrb[10].mxu1 %vm16519_vm1, %v10642_v7  ;;  %v1682_v44 = vpop.permute.xlu0 %1681 }
 0x1bd   : > { %856 = vmatpush1.msra.mxu1 %v558_v60  ;;  %11123 = vmatprep.mubr.msk.f32.mxu1 %vm16519_vm1, %v10643_v8  ;;  %v1687_v45 = vsel %vm1685_vm8, %v1682_v44, %v1684_v43  ;;  %v10709_v60 = vld [vmem:[%s16498_s1 + $0xc0] sm:$0xff] }
 0x1be   : > { %11126 = vmatprep.subr.mxu1 %v629_v58 }
 0x1bf   : > { %v1897_v53 = vpop.permute.xlu1 %1896 }
 0x1c0   : > { %11124 = vmatmul.mubr.msk.f32.gmra.mrb[12].mxu1 %vm16519_vm1, %v10644_v9  ;;  %v1680_v49 = vpop.permute.xlu0 %1679 }
 0x1c1   : > { %919 = vmatprep.mubr.f32.mxu1 %v16509_v4  ;;  %v1686_v50 = vsel %vm1685_vm8, %v1680_v49, %v1682_v44 }
 0x1c4   : > { %10653 = vmatmul.mubr.msk.f32.vlgmr.msra.gmra.mrb[2].mxu1 %vm16519_vm1, %v633_v10  ;;  %v1899_v52 = vpop.permute.xlu0 %1898 }
 0x1c5   : > { %11127 = vmatpush3.msra.mxu1 %v629_v58  ;;  %925 = vmatprep.mubr.f32.mxu1 %v16509_v4  ;;  %v1902_v54 = vsel %vm1900_vm9, %v1897_v53, %v1899_v52  ;;  %v1895_v58 = vpop.permute.xlu1 %1894 }
 0x1c6   : > { %1058 = vmatprep.subr.mxu1 %v1042_v13  ;;  %v1901_v59 = vsel %vm1900_vm9, %v1895_v58, %v1897_v53  ;;  %v16517_v53 = vmov 2102212464  }
 0x1c8   : > { %10654 = vmatmul.mubr.msk.f32.gmra.mrb[4].mxu1 %vm16519_vm1, %v634_v14 }
 0x1c9   : > { %931 = vmatprep.mubr.f32.mxu1 %v16509_v4 }
 0x1cc   : > { %10655 = vmatmul.mubr.msk.f32.gmra.mrb[6].mxu1 %vm16519_vm1, %v635_v15 }
 0x1cd   : > { %937 = vmatprep.mubr.f32.mxu1 %v16509_v4 }
 0x1d0   : > { %10656 = vmatmul.mubr.msk.f32.gmra.mrb[8].mxu1 %vm16519_vm1, %v636_v16 }
 0x1d1   : > { %11128 = vmatprep.mubr.msk.f32.mxu1 %vm16519_vm1, %v633_v10 }
 0x1d4   : > { %11129 = vmatmul.mubr.msk.f32.vlgmr.msra.gmra.mrb[10].mxu1 %vm16519_vm1, %v634_v14  ;;  %v12509_v8 = vpop.permute.xlu1 %2115 }
 0x1d5   : > { %1059 = vmatpush1.msra.mxu1 %v1041_v22  ;;  %11131 = vmatprep.mubr.msk.f32.mxu1 %vm16519_vm1, %v635_v15  ;;  %v12501_v0 = vpop.permute.xlu0 %2110 }
 0x1d6   : > { %11134 = vmatprep.subr.mxu1 %v1039_v11 }
 0x1d8   : > { %11132 = vmatmul.mubr.msk.f32.gmra.mrb[12].mxu1 %vm16519_vm1, %v636_v16 }
 0x1d9   : > { %1122 = vmatprep.mubr.f32.mxu1 %v16509_v4 }
 0x1dc   : > { %10665 = vmatmul.mubr.msk.f32.vlgmr.msra.gmra.mrb[2].mxu1 %vm16519_vm1, %v10661_v24 }
 0x1dd   : > { %11135 = vmatpush3.msra.mxu1 %v1039_v11  ;;  %1128 = vmatprep.mubr.f32.mxu1 %v16509_v4 }
 0x1de   : > { %1273 = vmatprep.subr.mxu1 %v1257_v27 }
 0x1e0   : > { %10666 = vmatmul.mubr.msk.f32.gmra.mrb[4].mxu1 %vm16519_vm1, %v10662_v28 }
 0x1e1   : > { %1134 = vmatprep.mubr.f32.mxu1 %v16509_v4 }
 0x1e4   : > { %10667 = vmatmul.mubr.msk.f32.gmra.mrb[6].mxu1 %vm16519_vm1, %v10663_v29 }
 0x1e5   : > { %1140 = vmatprep.mubr.f32.mxu1 %v16509_v4 }
 0x1e8   : > { %10668 = vmatmul.mubr.msk.f32.gmra.mrb[8].mxu1 %vm16519_vm1, %v10664_v30 }
 0x1e9   : > { %11136 = vmatprep.mubr.msk.f32.mxu1 %vm16519_vm1, %v10661_v24 }
 0x1ec   : > { %11137 = vmatmul.mubr.msk.f32.vlgmr.msra.gmra.mrb[10].mxu1 %vm16519_vm1, %v10662_v28 }
 0x1ed   : > { %1274 = vmatpush1.msra.mxu1 %v1256_v32  ;;  %11139 = vmatprep.mubr.msk.f32.mxu1 %vm16519_vm1, %v10663_v29 }
 0x1ee   : > { %11142 = vmatprep.subr.mxu1 %v1254_v25 }
 0x1f0   : > { %11140 = vmatmul.mubr.msk.f32.gmra.mrb[12].mxu1 %vm16519_vm1, %v10664_v30 }
 0x1f1   : > { %1337 = vmatprep.mubr.f32.mxu1 %v16509_v4 }
 0x1f4   : > { %10677 = vmatmul.mubr.msk.f32.vlgmr.msra.gmra.mrb[2].mxu1 %vm16519_vm1, %v10673_v33 }
 0x1f5   : > { %11143 = vmatpush3.msra.mxu1 %v1254_v25  ;;  %1343 = vmatprep.mubr.f32.mxu1 %v16509_v4 }
 0x1f6   : > { %1488 = vmatprep.subr.mxu1 %v1472_v36 }
 0x1f8   : > { %10678 = vmatmul.mubr.msk.f32.gmra.mrb[4].mxu1 %vm16519_vm1, %v10674_v37 }
 0x1f9   : > { %1349 = vmatprep.mubr.f32.mxu1 %v16509_v4 }
 0x1fc   : > { %10679 = vmatmul.mubr.msk.f32.gmra.mrb[6].mxu1 %vm16519_vm1, %v10675_v38 }
 0x1fd   : > { %1355 = vmatprep.mubr.f32.mxu1 %v16509_v4 }
 0x200   : > { %10680 = vmatmul.mubr.msk.f32.gmra.mrb[8].mxu1 %vm16519_vm1, %v10676_v39 }
 0x201   : > { %11144 = vmatprep.mubr.msk.f32.mxu1 %vm16519_vm1, %v10673_v33 }
 0x204   : > { %11145 = vmatmul.mubr.msk.f32.vlgmr.msra.gmra.mrb[10].mxu1 %vm16519_vm1, %v10674_v37 }
 0x205   : > { %1489 = vmatpush1.msra.mxu1 %v1471_v41  ;;  %11147 = vmatprep.mubr.msk.f32.mxu1 %vm16519_vm1, %v10675_v38 }
 0x206   : > { %11150 = vmatprep.subr.mxu1 %v1469_v34 }
 0x208   : > { %11148 = vmatmul.mubr.msk.f32.gmra.mrb[12].mxu1 %vm16519_vm1, %v10676_v39 }
 0x209   : > { %1552 = vmatprep.mubr.f32.mxu1 %v16509_v4 }
 0x20c   : > { %10689 = vmatmul.mubr.msk.f32.vlgmr.msra.gmra.mrb[2].mxu1 %vm16519_vm1, %v10685_v42 }
 0x20d   : > { %11151 = vmatpush3.msra.mxu1 %v1469_v34  ;;  %1558 = vmatprep.mubr.f32.mxu1 %v16509_v4 }
 0x20e   : > { %1703 = vmatprep.subr.mxu1 %v1687_v45 }
 0x210   : > { %10690 = vmatmul.mubr.msk.f32.gmra.mrb[4].mxu1 %vm16519_vm1, %v10686_v46 }
 0x211   : > { %1564 = vmatprep.mubr.f32.mxu1 %v16509_v4 }
 0x214   : > { %10691 = vmatmul.mubr.msk.f32.gmra.mrb[6].mxu1 %vm16519_vm1, %v10687_v47 }
 0x215   : > { %1570 = vmatprep.mubr.f32.mxu1 %v16509_v4 }
 0x218   : > { %10692 = vmatmul.mubr.msk.f32.gmra.mrb[8].mxu1 %vm16519_vm1, %v10688_v48 }
 0x219   : > { %11152 = vmatprep.mubr.msk.f32.mxu1 %vm16519_vm1, %v10685_v42 }
 0x21c   : > { %11153 = vmatmul.mubr.msk.f32.vlgmr.msra.gmra.mrb[10].mxu1 %vm16519_vm1, %v10686_v46  ;;  %v16526_v46 = vmov 683565275  }
 0x21d   : > { %1704 = vmatpush1.msra.mxu1 %v1686_v50  ;;  %11155 = vmatprep.mubr.msk.f32.mxu1 %vm16519_vm1, %v10687_v47 }
 0x21e   : > { %11158 = vmatprep.subr.mxu1 %v1684_v43 }
 0x220   : > { %11156 = vmatmul.mubr.msk.f32.gmra.mrb[12].mxu1 %vm16519_vm1, %v10688_v48  ;;  %v16514_v48 = vmov 2475754826  }
 0x221   : > { %1767 = vmatprep.mubr.f32.mxu1 %v16509_v4 }
 0x224   : > { %10701 = vmatmul.mubr.msk.f32.vlgmr.msra.gmra.mrb[2].mxu1 %vm16519_vm1, %v10697_v51 }
 0x225   : > { %11159 = vmatpush3.msra.mxu1 %v1684_v43  ;;  %1773 = vmatprep.mubr.f32.mxu1 %v16509_v4 }
 0x226   : > { %1918 = vmatprep.subr.mxu1 %v1902_v54 }
 0x228   : > { %10702 = vmatmul.mubr.msk.f32.gmra.mrb[4].mxu1 %vm16519_vm1, %v10698_v55 }
 0x229   : > { %1779 = vmatprep.mubr.f32.mxu1 %v16509_v4 }
 0x22c   : > { %10703 = vmatmul.mubr.msk.f32.gmra.mrb[6].mxu1 %vm16519_vm1, %v10699_v56 }
 0x22d   : > { %1785 = vmatprep.mubr.f32.mxu1 %v16509_v4 }
 0x230   : > { %10704 = vmatmul.mubr.msk.f32.gmra.mrb[8].mxu1 %vm16519_vm1, %v10700_v57 }
 0x231   : > { %11160 = vmatprep.mubr.msk.f32.mxu1 %vm16519_vm1, %v10697_v51  ;;  %v16524_v51 = vmov 2131351028  }
 0x234   : > { %11161 = vmatmul.mubr.msk.f32.vlgmr.msra.gmra.mrb[10].mxu1 %vm16519_vm1, %v10698_v55  ;;  %v16522_v55 = vmov 920167782  }
 0x235   : > { %1919 = vmatpush1.msra.mxu1 %v1901_v59  ;;  %11163 = vmatprep.mubr.msk.f32.mxu1 %vm16519_vm1, %v10699_v56 }
 0x236   : > { %11166 = vmatprep.subr.mxu1 %v1899_v52 }
 0x238   : > { %11164 = vmatmul.mubr.msk.f32.gmra.mrb[12].mxu1 %vm16519_vm1, %v10700_v57 }
 0x239   : > { %1982 = vmatprep.mubr.f32.mxu1 %v16509_v4 }
 0x23c   : > { %10713 = vmatmul.mubr.msk.f32.vlgmr.msra.gmra.mrb[2].mxu1 %vm16519_vm1, %v10709_v60 }
 0x23d   : > { %11167 = vmatpush3.msra.mxu1 %v1899_v52  ;;  %1988 = vmatprep.mubr.f32.mxu1 %v16509_v4 }
 0x23e   : > { %11436 = vmatprep.subr.bf16.mxu1 %v16507_v1 }
 0x240   : > { %10714 = vmatmul.mubr.msk.f32.gmra.mrb[4].mxu1 %vm16519_vm1, %v10710_v61 }
 0x241   : > { %1994 = vmatprep.mubr.f32.mxu1 %v16509_v4 }
 0x244   : > { %10715 = vmatmul.mubr.msk.f32.gmra.mrb[6].mxu1 %vm16519_vm1, %v10711_v62 }
 0x245   : > { %2000 = vmatprep.mubr.f32.mxu1 %v16509_v4 }
 0x248   : > { %10716 = vmatmul.mubr.msk.f32.gmra.mrb[8].mxu1 %vm16519_vm1, %v10712_v63 }
 0x249   : > { %11168 = vmatprep.mubr.msk.f32.mxu1 %vm16519_vm1, %v10709_v60 }
 0x24c   : > { %11169 = vmatmul.mubr.msk.f32.vlgmr.msra.gmra.mrb[10].mxu1 %vm16519_vm1, %v10710_v61 }
 0x24d   : > { %11171 = vmatprep.mubr.msk.f32.mxu1 %vm16519_vm1, %v10711_v62  ;;  %v16520_v62 = vmov 1326507024  }
 0x250   : > { %11172 = vmatmul.mubr.msk.f32.gmra.mrb[12].mxu1 %vm16519_vm1, %v10712_v63 }
 0x251   : > { %11264 = vmatprep.mubr.msk.f32.mxu1 %vm16536_vm0, %v16509_v4 }
 0x30f   : > { %v1984_v2 = vpop.f32.mrb[2].mxu1 }
 0x310   : > { %v12504_v5 = vadd.f32 %v12501_v0, %v1984_v2  ;;  %v1986_v6 = vpop.f32.mrb[3].mxu1 }
 0x311   : > { %v12507_v7 = vadd.f32 %v12501_v0, %v1986_v6 }
 0x312   : > { %16664 = vst [vmem:[#allocation4_spill] sm:$0xff] %v12504_v5  ;;  %v2140_v9 = vand.u32 2147483647, %v12504_v5  ;;  %v2143_v10 = vand.u32 2139095040, %v12504_v5 }
 0x313   : > { %v2244_v11 = vand.u32 2147483647, %v12507_v7  ;;  %v2247_v12 = vand.u32 2139095040, %v12507_v7  ;;  %v1990_v13 = vpop.f32.mrb[4].mxu1 }
 0x314   : > { %v2144_v14 = vshrl.u32 %v2143_v10, 23  ;;  %v2147_v15 = vand.u32 8388607, %v2140_v9  ;;  %v12518_v16 = vadd.f32 %v12509_v8, %v1990_v13  ;;  %v1992_v17 = vpop.f32.mrb[5].mxu1 }
 0x315   : > { %v2248_v18 = vshrl.u32 %v2247_v12, 23  ;;  %v2251_v19 = vand.u32 8388607, %v2244_v11  ;;  %v12533_v34 = vadd.f32 %v12509_v8, %v1992_v17 }
 0x316   : > { %v10721_v20 = vadd.s32 4294967169, %v2144_v14  ;;  %v2452_v21 = vand.u32 2147483647, %v12518_v16  ;;  %v2455_v23 = vand.u32 2139095040, %v12518_v16  ;;  %v2148_v25 = vor.u32 8388608, %v2147_v15 }
 0x317   : > { %v10725_v22 = vadd.s32 4294967169, %v2248_v18  ;;  %v12524_v24 = vpop.f32.mrb[6].mxu1  ;;  %v2252_v27 = vor.u32 8388608, %v2251_v19 }
 0x318   : > { %v2150_v26 = vadd.s32 1, %v10721_v20  ;;  %v2456_v29 = vshrl.u32 %v2455_v23, 23  ;;  %v12528_v30 = vand.u32 8388607, %v2452_v21  ;;  %v12530_v31 = vpop.f32.mrb[7].mxu1  ;;  %v12537_v38 = vshll.u32 %v2148_v25, 8 }
 0x319   : > { %v2254_v28 = vadd.s32 1, %v10725_v22  ;;  %v12545_v43 = vshll.u32 %v2252_v27, 8 }
 0x31a   : > { %vm2151_vm10 = vcmp.gt.s32.totalorder %v2150_v26, 0  ;;  %v10733_v33 = vadd.s32 4294967169, %v2456_v29  ;;  %v2460_v44 = vor.u32 8388608, %v12528_v30 }
 0x31b   : > { %v2152_v32 = vsel %vm2151_vm10, %v2150_v26, 0  ;;  %vm2255_vm11 = vcmp.gt.s32.totalorder %v2254_v28, 0  ;;  %v12535_v35 = vpop.f32.mrb[8].mxu1 }
 0x31c   : > { %v2153_v36 = vshrl.u32 %v2152_v32, 5  ;;  %v2154_v37 = vand.u32 31, %v2152_v32  ;;  %v2256_v39 = vsel %vm2255_vm11, %v2254_v28, 0  ;;  %v12539_v40 = vpop.f32.mrb[9].mxu1  ;;  %v12550_v50 = vadd.s32 1, %v10733_v33 }
 0x31d   : > { %v12541_v41 = vshrl.u32 %v2256_v39, 5  ;;  %v12543_v42 = vand.u32 31, %v2256_v39 }
 0x31e   : > { %v2155_v45 = vsub.s32 32, %v2154_v37  ;;  %v2157_v47 = vshll.u32 %v16526_v46, %v2154_v37  ;;  %v2160_v49 = vshll.u32 %v16514_v48, %v2154_v37  ;;  %v2163_v52 = vshll.u32 %v16524_v51, %v2154_v37 }
 0x31f   : > { %v2166_v54 = vshll.u32 %v16517_v53, %v2154_v37  ;;  %v2169_v56 = vshll.u32 %v16522_v55, %v2154_v37  ;;  %vm2172_vm12 = vcmp.lt.s32.totalorder %v2153_v36, 1  ;;  %vm2173_vm13 = vcmp.lt.s32.totalorder %v2153_v36, 2  ;;  %v12561_v2 = vpop.f32.mrb[10].mxu1 }
 0x320   : > { %v2158_v57 = vshrl.u32 %v16514_v48, %v2155_v45  ;;  %v2161_v58 = vshrl.u32 %v16524_v51, %v2155_v45  ;;  %v2164_v59 = vshrl.u32 %v16517_v53, %v2155_v45  ;;  %v2156_v60 = vshrl.u32 %v16526_v46, %v2155_v45 }
 0x321   : > { %v2167_v61 = vshrl.u32 %v16522_v55, %v2155_v45  ;;  %v2170_v63 = vshrl.u32 %v16520_v62, %v2155_v45  ;;  %vm2174_vm14 = vcmp.lt.s32.totalorder %v2153_v36, 3  ;;  %v2259_v13 = vsub.s32 32, %v12543_v42 }
 0x322   : > { %v2159_v6 = vor.u32 %v2158_v57, %v2157_v47  ;;  %v2162_v10 = vor.u32 %v2161_v58, %v2160_v49  ;;  %v2165_v12 = vor.u32 %v2164_v59, %v2163_v52  ;;  %vm2175_vm15 = vcmp.lt.s32.totalorder %v2153_v36, 4 }
 0x323   : > { %v2168_v14 = vor.u32 %v2167_v61, %v2166_v54  ;;  %v2171_v15 = vor.u32 %v2170_v63, %v2169_v56  ;;  %v2261_v17 = vshll.u32 %v16526_v46, %v12543_v42  ;;  %v2264_v27 = vshll.u32 %v16514_v48, %v12543_v42 }
 0x324   : > { %v2176_v18 = vsel %vm2172_vm12, %v2156_v60, %v2159_v6  ;;  %v2177_v19 = vsel %vm2175_vm15, %v2165_v12, 2102212464  ;;  %v2180_v20 = vsel %vm2172_vm12, %v2159_v6, %v2162_v10  ;;  %v2184_v22 = vsel %vm2172_vm12, %v2162_v10, %v2165_v12 }
 0x325   : > { %v2178_v23 = vsel %vm2174_vm14, %v2162_v10, %v2177_v19  ;;  %v2181_v25 = vsel %vm2175_vm15, %v2168_v14, 920167782  ;;  %v2185_v26 = vsel %vm2175_vm15, %v2171_v15, 1326507024  ;;  %v2260_v32 = vshrl.u32 %v16526_v46, %v2259_v13 }
 0x326   : > { %v2182_v28 = vsel %vm2174_vm14, %v2165_v12, %v2181_v25  ;;  %v2186_v29 = vsel %vm2174_vm14, %v2168_v14, %v2185_v26  ;;  %v2262_v33 = vshrl.u32 %v16514_v48, %v2259_v13  ;;  %v2179_v37 = vsel %vm2173_vm13, %v2176_v18, %v2178_v23 }
 0x327   : > { %v2183_v39 = vsel %vm2173_vm13, %v2180_v20, %v2182_v28  ;;  %v2187_v45 = vsel %vm2173_vm13, %v2184_v22, %v2186_v29  ;;  %v2265_v47 = vshrl.u32 %v16524_v51, %v2259_v13  ;;  %v2267_v59 = vshll.u32 %v16524_v51, %v12543_v42 }
 0x328   : > { %v12581_v49 = vmul.u32.u64.low %v12537_v38, %v2187_v45  ;;  %v12582_v52 = vmul.u32.u64.high %v12537_v38, %v2187_v45, %v12581_v49  ;;  %v12585_v54 = vmul.u32.u64.low %v12537_v38, %v2183_v39  ;;  %v12586_v56 = vmul.u32.u64.high %v12537_v38, %v2183_v39, %v12585_v54 }
 0x329   : > { %v2263_v57 = vor.u32 %v2262_v33, %v2261_v17  ;;  %v2266_v58 = vor.u32 %v2265_v47, %v2264_v27  ;;  %v2268_v60 = vshrl.u32 %v16517_v53, %v2259_v13  ;;  %v2195_v36 = vmul.u32 %v12537_v38, %v2179_v37 }
 0x32a   : > { %v2270_v61 = vshll.u32 %v16517_v53, %v12543_v42  ;;  %v2271_v63 = vshrl.u32 %v16522_v55, %v2259_v13  ;;  %v2274_v6 = vshrl.u32 %v16520_v62, %v2259_v13  ;;  %v2273_v12 = vshll.u32 %v16522_v55, %v12543_v42 }
 0x32b   : > { %v2269_v10 = vor.u32 %v2268_v60, %v2267_v59  ;;  %vm2276_vm2 = vcmp.lt.s32.totalorder %v12541_v41, 1  ;;  %vm2277_vm3 = vcmp.lt.s32.totalorder %v12541_v41, 2  ;;  %vm2197_vm6 = vc.u32 %v12582_v52, %v12585_v54 }
 0x32c   : > { %v2198_v38 = vadd.s32 1, %v12586_v56  ;;  %v2272_v14 = vor.u32 %v2271_v63, %v2270_v61  ;;  %vm2278_vm7 = vcmp.lt.s32.totalorder %v12541_v41, 3  ;;  %v2275_v15 = vor.u32 %v2274_v6, %v2273_v12 }
 0x32d   : > { %vm2279_vm8 = vcmp.lt.s32.totalorder %v12541_v41, 4  ;;  %v2280_v13 = vsel %vm2276_vm2, %v2260_v32, %v2263_v57  ;;  %v2284_v17 = vsel %vm2276_vm2, %v2263_v57, %v2266_v58  ;;  %v2288_v20 = vsel %vm2276_vm2, %v2266_v58, %v2269_v10  ;;  %v12625_v57 = vpop.f32.mrb[11].mxu1 }
 0x32e   : > { %v2199_v18 = vsel %vm2197_vm6, %v2198_v38, %v12586_v56  ;;  %v2281_v42 = vsel %vm2279_vm8, %v2269_v10, 2102212464  ;;  %v2285_v19 = vsel %vm2279_vm8, %v2272_v14, 920167782  ;;  %v2289_v26 = vsel %vm2279_vm8, %v2275_v15, 1326507024 }
 0x32f   : > { %v2200_v22 = vadd.s32 %v2199_v18, %v2195_v36  ;;  %v2282_v23 = vsel %vm2278_vm7, %v2266_v58, %v2281_v42  ;;  %v2286_v25 = vsel %vm2278_vm7, %v2269_v10, %v2285_v19  ;;  %v2290_v28 = vsel %vm2278_vm7, %v2272_v14, %v2289_v26 }
 0x330   : > { %v2287_v27 = vsel %vm2277_vm3, %v2284_v17, %v2286_v25  ;;  %vm2463_vm9 = vcmp.gt.s32.totalorder %v12550_v50, 0  ;;  %v2559_v29 = vand.u32 2139095040, %v12533_v34  ;;  %v2291_v32 = vsel %vm2277_vm3, %v2288_v20, %v2290_v28 }
 0x331   : > { %v2201_v33 = vadd.s32 536870912, %v2200_v22  ;;  %v12614_v37 = vmul.u32.u64.low %v12545_v43, %v2287_v27  ;;  %v12615_v39 = vmul.u32.u64.high %v12545_v43, %v2287_v27, %v12614_v37  ;;  %v2283_v45 = vsel %vm2277_vm3, %v2280_v13, %v2282_v23 }
 0x332   : > { %v12621_v47 = vmul.u32.u64.low %v12545_v43, %v2291_v32  ;;  %v12622_v49 = vmul.u32.u64.high %v12545_v43, %v2291_v32, %v12621_v47  ;;  %v2464_v56 = vsel %vm2463_vm9, %v12550_v50, 0  ;;  %v12631_v60 = vshll.u32 %v2460_v44, 8 }
 0x333   : > { %v12627_v58 = vshrl.u32 %v2201_v33, 30  ;;  %v2466_v59 = vand.u32 31, %v2464_v56  ;;  %v16516_v36 = vand.u32 2147483647, %v12533_v34  ;;  %v2560_v61 = vshrl.u32 %v2559_v29, 23 }
 0x334   : > { %v2299_v63 = vmul.u32 %v12545_v43, %v2283_v45  ;;  %v2302_v6 = vadd.s32 1, %v12615_v39  ;;  %vm2301_vm10 = vc.u32 %v12622_v49, %v12614_v37  ;;  %v2465_v50 = vshrl.u32 %v2464_v56, 5 }
 0x335   : > { %v2203_v41 = vshll.u32 %v12627_v58, 30  ;;  %v2467_v10 = vsub.s32 32, %v2466_v59  ;;  %v2469_v12 = vshll.u32 %v16526_v46, %v2466_v59  ;;  %v2472_v30 = vshll.u32 %v16514_v48, %v2466_v59 }
 0x336   : > { %v2303_v38 = vsel %vm2301_vm10, %v2302_v6, %v12615_v39  ;;  %v2475_v15 = vshll.u32 %v16524_v51, %v2466_v59  ;;  %v2478_v18 = vshll.u32 %v16517_v53, %v2466_v59  ;;  %v10737_v32 = vadd.s32 4294967169, %v2560_v61 }
 0x337   : > { %v12641_v44 = vsub.s32 %v2200_v22, %v2203_v41  ;;  %v2470_v14 = vshrl.u32 %v16514_v48, %v2467_v10  ;;  %v2304_v43 = vadd.s32 %v2303_v38, %v2299_v63  ;;  %v2473_v13 = vshrl.u32 %v16524_v51, %v2467_v10 }
 0x338   : > { %v2476_v17 = vshrl.u32 %v16517_v53, %v2467_v10  ;;  %v2479_v20 = vshrl.u32 %v16522_v55, %v2467_v10  ;;  %v2481_v22 = vshll.u32 %v16522_v55, %v2466_v59  ;;  %v2482_v27 = vshrl.u32 %v16520_v62, %v2467_v10 }
 0x339   : > { %v2206_v42 = vsub.s32 0, %v12641_v44  ;;  %v2471_v19 = vor.u32 %v2470_v14, %v2469_v12  ;;  %v2305_v23 = vadd.s32 536870912, %v2304_v43  ;;  %v2474_v25 = vor.u32 %v2473_v13, %v2472_v30 }
 0x33a   : > { %v2477_v26 = vor.u32 %v2476_v17, %v2475_v15  ;;  %v2468_v29 = vshrl.u32 %v16526_v46, %v2467_v10  ;;  %v2480_v33 = vor.u32 %v2479_v20, %v2478_v18  ;;  %v2483_v45 = vor.u32 %v2482_v27, %v2481_v22 }
 0x33b   : > { %v10722_v28 = vmin.u32 %v2206_v42, %v12641_v44  ;;  %v12655_v39 = vshrl.u32 %v2305_v23, 30  ;;  %vm2484_vm11 = vcmp.lt.s32.totalorder %v2465_v50, 1  ;;  %vm2487_vm12 = vcmp.lt.s32.totalorder %v2465_v50, 4 }
 0x33c   : > { %vm2485_vm13 = vcmp.lt.s32.totalorder %v2465_v50, 2  ;;  %v2489_v56 = vsel %vm2487_vm12, %v2477_v26, 2102212464  ;;  %v2492_v59 = vsel %vm2484_vm11, %v2471_v19, %v2474_v25  ;;  %vm2486_vm14 = vcmp.lt.s32.totalorder %v2465_v50, 3 }
 0x33d   : > { %v2208_v47 = vclz %v10722_v28  ;;  %v2307_v41 = vshll.u32 %v12655_v39, 30  ;;  %v2493_v63 = vsel %vm2487_vm12, %v2480_v33, 920167782  ;;  %v2496_v6 = vsel %vm2484_vm11, %v2474_v25, %v2477_v26 }
 0x33e   : > { %v2488_v30 = vsel %vm2484_vm11, %v2468_v29, %v2471_v19  ;;  %v2494_v38 = vsel %vm2486_vm14, %v2477_v26, %v2493_v63  ;;  %v2497_v10 = vsel %vm2487_vm12, %v2483_v45, 1326507024  ;;  %v2490_v61 = vsel %vm2486_vm14, %v2474_v25, %v2489_v56 }
 0x33f   : > { %v10723_v12 = vadd.s32 4294967294, %v2208_v47  ;;  %v12658_v14 = vsub.s32 %v2304_v43, %v2307_v41  ;;  %v2495_v15 = vsel %vm2485_vm13, %v2492_v59, %v2494_v38  ;;  %v2498_v13 = vsel %vm2486_vm14, %v2480_v33, %v2497_v10 }
 0x340   : > { %v2499_v17 = vsel %vm2485_vm13, %v2496_v6, %v2498_v13  ;;  %v12663_v18 = vmul.u32.u64.low %v12631_v60, %v2495_v15  ;;  %v12664_v42 = vmul.u32.u64.high %v12631_v60, %v2495_v15, %v12663_v18  ;;  %v2491_v26 = vsel %vm2485_vm13, %v2488_v30, %v2490_v61 }
 0x341   : > { %vm10724_vm15 = vcmp.lt.s32.totalorder %v10723_v12, 0  ;;  %v2310_v22 = vsub.s32 0, %v12658_v14  ;;  %v12669_v19 = vmul.u32.u64.low %v12631_v60, %v2499_v17  ;;  %v12670_v23 = vmul.u32.u64.high %v12631_v60, %v2499_v17, %v12669_v19 }
 0x342   : > { %v2211_v20 = vsel %vm10724_vm15, 0, %v10723_v12  ;;  %v2566_v27 = vadd.s32 1, %v10737_v32  ;;  %v2563_v29 = vand.u32 8388607, %v16516_v36  ;;  %v2196_v33 = vadd.s32 %v12585_v54, %v12582_v52  ;;  %v12682_v32 = vpop.permute.xlu1 %2120 }
 0x343   : > { %v2212_v43 = vsub.s32 32, %v2211_v20  ;;  %v2216_v25 = vsub.s32 4294967266, %v2211_v20  ;;  %v10726_v28 = vmin.u32 %v2310_v22, %v12658_v14  ;;  %v2510_v47 = vadd.s32 1, %v12664_v42  ;;  %v12690_v22 = vpop.f32.mrb[12].mxu1 }
 0x344   : > { %vm2567_vm2 = vcmp.gt.s32.totalorder %v2566_v27, 0  ;;  %v2507_v59 = vmul.u32 %v12631_v60, %v2491_v26  ;;  %vm2509_vm3 = vc.u32 %v12670_v23, %v12663_v18  ;;  %v2213_v54 = vshll.u32 %v12641_v44, %v2211_v20 }
 0x345   : > { %v2217_v45 = vadd.s32 127, %v2216_v25  ;;  %v2312_v56 = vclz %v10726_v28  ;;  %v2568_v50 = vsel %vm2567_vm2, %v2566_v27, 0  ;;  %v2214_v41 = vshrl.u32 %v2196_v33, %v2212_v43 }
 0x346   : > { %v2511_v6 = vsel %vm2509_vm3, %v2510_v47, %v12664_v42  ;;  %v2570_v52 = vand.u32 31, %v2568_v50  ;;  %v2564_v38 = vor.u32 8388608, %v2563_v29  ;;  %v12688_v10 = vadd.f32 %v12682_v32, %v12524_v24 }
 0x347   : > { %v2218_v63 = vshll.u32 %v2217_v45, 23  ;;  %v10727_v12 = vadd.s32 4294967294, %v2312_v56  ;;  %v2512_v30 = vadd.s32 %v2511_v6, %v2507_v59  ;;  %v2215_v15 = vor.u32 %v2214_v41, %v2213_v54 }
 0x348   : > { %16665 = vst [vmem:[#allocation5_spill] sm:$0xff] %v12688_v10  ;;  %v2571_v61 = vsub.s32 32, %v2570_v52  ;;  %v2300_v42 = vadd.s32 %v12614_v37, %v12622_v49  ;;  %v12698_v24 = vshll.u32 %v2564_v38, 8  ;;  %v16512_v25 = vand.u32 2147483647, %v12688_v10 }
 0x349   : > { %vm10728_vm6 = vcmp.lt.s32.totalorder %v10727_v12, 0  ;;  %v2513_v60 = vadd.s32 536870912, %v2512_v30  ;;  %v2219_v13 = vor.u32 4788187, %v2218_v63  ;;  %v2569_v28 = vshrl.u32 %v2568_v50, 5 }
 0x34a   : > { %v2315_v17 = vsel %vm10728_vm6, 0, %v10727_v12  ;;  %v2574_v44 = vshrl.u32 %v16514_v48, %v2571_v61  ;;  %v2577_v20 = vshrl.u32 %v16524_v51, %v2571_v61  ;;  %v2573_v29 = vshll.u32 %v16526_v46, %v2570_v52 }
 0x34b   : > { %v2320_v19 = vsub.s32 4294967266, %v2315_v17  ;;  %v12694_v43 = vshrl.u32 %v2513_v60, 30  ;;  %v2220_v33 = vand.u32 2147483647, %v2219_v13  ;;  %v2222_v45 = vcvt.s32.f32 %v2215_v15 }
 0x34c   : > { %v2576_v37 = vshll.u32 %v16514_v48, %v2570_v52  ;;  %v2580_v49 = vshrl.u32 %v16517_v53, %v2571_v61  ;;  %v2316_v47 = vsub.s32 32, %v2315_v17  ;;  %v2575_v59 = vor.u32 %v2574_v44, %v2573_v29 }
 0x34d   : > { %v2321_v26 = vadd.s32 127, %v2320_v19  ;;  %v2515_v27 = vshll.u32 %v12694_v43, 30  ;;  %v2579_v41 = vshll.u32 %v16524_v51, %v2570_v52  ;;  %v2582_v12 = vshll.u32 %v16517_v53, %v2570_v52 }
 0x34e   : > { %v2578_v6 = vor.u32 %v2577_v20, %v2576_v37  ;;  %v2583_v50 = vshrl.u32 %v16522_v55, %v2571_v61  ;;  %vm2588_vm7 = vcmp.lt.s32.totalorder %v2569_v28, 1  ;;  %vm2589_vm8 = vcmp.lt.s32.totalorder %v2569_v28, 2 }
 0x34f   : > { %v12705_v56 = vsub.s32 %v2512_v30, %v2515_v27  ;;  %v2322_v63 = vshll.u32 %v2321_v26, 23  ;;  %v2581_v38 = vor.u32 %v2580_v49, %v2579_v41  ;;  %v2223_v60 = vmul.f32 %v2222_v45, %v2220_v33 }
 0x350   : > { %v2584_v15 = vor.u32 %v2583_v50, %v2582_v12  ;;  %v2585_v13 = vshll.u32 %v16522_v55, %v2570_v52  ;;  %v2586_v30 = vshrl.u32 %v16520_v62, %v2571_v61  ;;  %vm16557_vm9 = vcmp.lt.s32.totalorder %v12504_v5, 0 }
 0x351   : > { %v2518_v54 = vsub.s32 0, %v12705_v56  ;;  %v2317_v19 = vshll.u32 %v12658_v14, %v2315_v17  ;;  %v2318_v44 = vshrl.u32 %v2300_v42, %v2316_v47  ;;  %v2572_v26 = vshrl.u32 %v16526_v46, %v2571_v61 }
 0x352   : > { %v2323_v27 = vor.u32 4788187, %v2322_v63  ;;  %v2587_v29 = vor.u32 %v2586_v30, %v2585_v13  ;;  %vm2591_vm10 = vcmp.lt.s32.totalorder %v2569_v28, 4  ;;  %v2596_v37 = vsel %vm2588_vm7, %v2575_v59, %v2578_v6 }
 0x353   : > { %v10734_v20 = vmin.u32 %v2518_v54, %v12705_v56  ;;  %vm2590_vm11 = vcmp.lt.s32.totalorder %v2569_v28, 3  ;;  %v2593_v45 = vsel %vm2591_vm10, %v2581_v38, 2102212464  ;;  %v2597_v52 = vsel %vm2591_vm10, %v2584_v15, 920167782 }
 0x354   : > { %v2224_v49 = vxor.u32 2147483648, %v2223_v60  ;;  %v2598_v41 = vsel %vm2590_vm11, %v2581_v38, %v2597_v52  ;;  %v2600_v12 = vsel %vm2588_vm7, %v2578_v6, %v2581_v38  ;;  %v2601_v50 = vsel %vm2591_vm10, %v2587_v29, 1326507024 }
 0x355   : > { %v2520_v33 = vclz %v10734_v20  ;;  %v2319_v14 = vor.u32 %v2318_v44, %v2317_v19  ;;  %v2592_v42 = vsel %vm2588_vm7, %v2572_v26, %v2575_v59  ;;  %v2599_v61 = vsel %vm2589_vm8, %v2596_v37, %v2598_v41 }
 0x356   : > { %v2594_v47 = vsel %vm2590_vm11, %v2578_v6, %v2593_v45  ;;  %v2602_v63 = vsel %vm2590_vm11, %v2584_v15, %v2601_v50  ;;  %v12722_v54 = vmul.u32.u64.low %v12698_v24, %v2599_v61  ;;  %v12723_v13 = vmul.u32.u64.high %v12698_v24, %v2599_v61, %v12722_v54 }
 0x357   : > { %v10735_v17 = vadd.s32 4294967294, %v2520_v33  ;;  %v2324_v30 = vand.u32 2147483647, %v2323_v27  ;;  %v2603_v20 = vsel %vm2589_vm8, %v2600_v12, %v2602_v63  ;;  %v2767_v38 = vand.u32 2139095040, %v12688_v10  ;;  %v12735_v33 = vpop.f32.mrb[13].mxu1 }
 0x358   : > { %v2508_v19 = vadd.s32 %v12663_v18, %v12670_v23  ;;  %v12731_v59 = vmul.u32.u64.low %v12698_v24, %v2603_v20  ;;  %v12732_v26 = vmul.u32.u64.high %v12698_v24, %v2603_v20, %v12731_v59  ;;  %v2326_v6 = vcvt.s32.f32 %v2319_v14  ;;  %v12760_v20 = vpop.permute.xlu0 %2125 }
 0x359   : > { %vm10736_vm12 = vcmp.lt.s32.totalorder %v10735_v17, 0  ;;  %v2595_v37 = vsel %vm2589_vm8, %v2592_v42, %v2594_v47  ;;  %v2225_v27 = vsel %vm16557_vm9, %v2224_v49, %v2223_v60  ;;  %v2614_v45 = vadd.s32 1, %v12723_v13 }
 0x35a   : > { %v2523_v44 = vsel %vm10736_vm12, 0, %v10735_v17  ;;  %v2768_v52 = vshrl.u32 %v2767_v38, 23  ;;  %v2327_v41 = vmul.f32 %v2326_v6, %v2324_v30  ;;  %v2771_v12 = vand.u32 8388607, %v16512_v25 }
 0x35b   : > { %v2524_v15 = vsub.s32 32, %v2523_v44  ;;  %v2528_v29 = vsub.s32 4294967266, %v2523_v44  ;;  %v2611_v50 = vmul.u32 %v12698_v24, %v2595_v37  ;;  %vm2613_vm13 = vc.u32 %v12732_v26, %v12722_v54 }
 0x35c   : > { %v10745_v28 = vadd.s32 4294967169, %v2768_v52  ;;  %v12747_v14 = vadd.f32 %v12682_v32, %v12530_v31  ;;  %vm12751_vm14 = vcmp.le.f32.partialorder %v2140_v9, 0.7853982  ;;  %v16667_v60 = vmov 0 }
 0x35d   : > { %v2526_v18 = vshrl.u32 %v2508_v19, %v2524_v15  ;;  %v2529_v23 = vadd.s32 127, %v2528_v29  ;;  %v16668_v60 = vsel %vm12751_vm14, 4294967295, %v16667_v60  ;;  %v2525_v49 = vshll.u32 %v12705_v56, %v2523_v44 }
 0x35e   : > { %16666 = vst [vmem:[#allocation6_spill] sm:$0xff] %v12747_v14  ;;  %16669 = vst [vmem:[#allocation7_spill] sm:$0xff] %v16668_v60  ;;  %v2615_v42 = vsel %vm2613_vm13, %v2614_v45, %v12723_v13  ;;  %v2228_v24 = vsel %vm12751_vm14, %v12504_v5, %v2225_v27  ;;  %v2774_v47 = vadd.s32 1, %v10745_v28  ;;  %v2328_v63 = vxor.u32 2147483648, %v2327_v41 }
 0x35f   : > { %v2530_v17 = vshll.u32 %v2529_v23, 23  ;;  %v2616_v61 = vadd.s32 %v2615_v42, %v2611_v50  ;;  %v2527_v31 = vor.u32 %v2526_v18, %v2525_v49  ;;  %v2772_v30 = vor.u32 8388608, %v2771_v12 }
 0x360   : > { %vm2775_vm15 = vcmp.gt.s32.totalorder %v2774_v47, 0  ;;  %v2871_v19 = vand.u32 2139095040, %v12747_v14  ;;  %11894 = vcosq.f32 %v2228_v24  ;;  %vm2246_vm2 = vcmp.lt.s32.totalorder %v12507_v7, 0 }
 0x361   : > { %v2531_v9 = vor.u32 4788187, %v2530_v17  ;;  %v2617_v38 = vadd.s32 536870912, %v2616_v61  ;;  %v2776_v56 = vsel %vm2775_vm15, %v2774_v47, 0  ;;  %11896 = vsinq.f32 %v2228_v24 }
 0x362   : > { %v2778_v44 = vand.u32 31, %v2776_v56  ;;  %v12768_v59 = vadd.f32 %v12760_v20, %v12535_v35  ;;  %v12772_v6 = vsel %vm2246_vm2, %v2328_v63, %v2327_v41  ;;  %v2534_v15 = vcvt.s32.f32 %v2527_v31 }
 0x363   : > { %v12764_v13 = vshrl.u32 %v2617_v38, 30  ;;  %v12774_v29 = vshll.u32 %v2772_v30, 8  ;;  %v16511_v37 = vand.u32 2147483647, %v12747_v14  ;;  %v2532_v27 = vand.u32 2147483647, %v2531_v9 }
 0x364   : > { %16670 = vst [vmem:[#allocation8_spill] sm:$0xff] %v12768_v59  ;;  %v2779_v52 = vsub.s32 32, %v2778_v44  ;;  %v2872_v18 = vshrl.u32 %v2871_v19, 23  ;;  %v2777_v23 = vshrl.u32 %v2776_v56, 5  ;;  %v2781_v12 = vshll.u32 %v16526_v46, %v2778_v44 }
 0x365   : > { %v2619_v45 = vshll.u32 %v12764_v13, 30  ;;  %v2784_v35 = vshll.u32 %v16514_v48, %v2778_v44  ;;  %v2787_v50 = vshll.u32 %v16524_v51, %v2778_v44  ;;  %v2790_v17 = vshll.u32 %v16517_v53, %v2778_v44 }
 0x366   : > { %v2782_v41 = vshrl.u32 %v16514_v48, %v2779_v52  ;;  %v2785_v49 = vshrl.u32 %v16524_v51, %v2779_v52  ;;  %v2788_v42 = vshrl.u32 %v16517_v53, %v2779_v52  ;;  %v2791_v24 = vshrl.u32 %v16522_v55, %v2779_v52 }
 0x367   : > { %v12781_v28 = vsub.s32 %v2616_v61, %v2619_v45  ;;  %v2793_v47 = vshll.u32 %v16522_v55, %v2778_v44  ;;  %v2794_v63 = vshrl.u32 %v16520_v62, %v2779_v52  ;;  %v12793_v61 = vand.u32 8388607, %v16511_v37 }
 0x368   : > { %v2783_v30 = vor.u32 %v2782_v41, %v2781_v12  ;;  %v2786_v9 = vor.u32 %v2785_v49, %v2784_v35  ;;  %v2789_v38 = vor.u32 %v2788_v42, %v2787_v50  ;;  %v2792_v19 = vor.u32 %v2791_v24, %v2790_v17 }
 0x369   : > { %v2622_v31 = vsub.s32 0, %v12781_v28  ;;  %v2795_v56 = vor.u32 %v2794_v63, %v2793_v47  ;;  %v10749_v45 = vadd.s32 4294967169, %v2872_v18  ;;  %vm12797_vm3 = vcmp.le.f32.partialorder %v2244_v11, 0.7853982 }
 0x36a   : > { %v2535_v44 = vmul.f32 %v2534_v15, %v2532_v27  ;;  %v2780_v12 = vshrl.u32 %v16526_v46, %v2779_v52  ;;  %vm2796_vm6 = vcmp.lt.s32.totalorder %v2777_v23, 1  ;;  %v12803_v35 = vpop.eup %11894  ;;  %vm2797_vm7 = vcmp.lt.s32.totalorder %v2777_v23, 2 }
 0x36b   : > { %v10738_v4 = vmin.u32 %v2622_v31, %v12781_v28  ;;  %16673 = vst [vmem:[#allocation9_spill] sm:$0xff] %v12803_v35  ;;  %vm2798_vm8 = vcmp.lt.s32.totalorder %v2777_v23, 3  ;;  %vm2799_vm10 = vcmp.lt.s32.totalorder %v2777_v23, 4  ;;  %v2804_v50 = vsel %vm2796_vm6, %v2783_v30, %v2786_v9  ;;  %v12805_v41 = vpop.eup %11896 }
 0x36c   : > { %16674 = vst [vmem:[#allocation10_spill] sm:$0xff] %v12805_v41  ;;  %vm2454_vm11 = vcmp.lt.s32.totalorder %v12518_v16, 0  ;;  %v2801_v18 = vsel %vm2799_vm10, %v2789_v38, 2102212464  ;;  %v2805_v49 = vsel %vm2799_vm10, %v2792_v19, 920167782  ;;  %v2808_v17 = vsel %vm2796_vm6, %v2786_v9, %v2789_v38 }
 0x36d   : > { %v2624_v11 = vclz %v10738_v4  ;;  %v2800_v15 = vsel %vm2796_vm6, %v2780_v12, %v2783_v30  ;;  %v2806_v27 = vsel %vm2798_vm8, %v2789_v38, %v2805_v49  ;;  %v2809_v42 = vsel %vm2799_vm10, %v2795_v56, 1326507024 }
 0x36e   : > { %v2878_v52 = vadd.s32 1, %v10749_v45  ;;  %v2802_v47 = vsel %vm2798_vm8, %v2786_v9, %v2801_v18  ;;  %v2807_v63 = vsel %vm2797_vm7, %v2804_v50, %v2806_v27  ;;  %v2810_v31 = vsel %vm2798_vm8, %v2792_v19, %v2809_v42 }
 0x36f   : > { %v10739_v24 = vadd.s32 4294967294, %v2624_v11  ;;  %v2811_v37 = vsel %vm2797_vm7, %v2808_v17, %v2810_v31  ;;  %v12814_v25 = vmul.u32.u64.low %v12774_v29, %v2807_v63  ;;  %v12815_v4 = vmul.u32.u64.high %v12774_v29, %v2807_v63, %v12814_v25 }
 0x370   : > { %v16513_v30 = vand.u32 2147483647, %v12768_v59  ;;  %v12820_v38 = vmul.u32.u64.low %v12774_v29, %v2811_v37  ;;  %v12821_v56 = vmul.u32.u64.high %v12774_v29, %v2811_v37, %v12820_v38  ;;  %vm2879_vm13 = vcmp.gt.s32.totalorder %v2878_v52, 0 }
 0x371   : > { %vm10740_vm12 = vcmp.lt.s32.totalorder %v10739_v24, 0  ;;  %v2536_v9 = vxor.u32 2147483648, %v2535_v44  ;;  %v2803_v12 = vsel %vm2797_vm7, %v2800_v15, %v2802_v47  ;;  %v2880_v19 = vsel %vm2879_vm13, %v2878_v52, 0 }
 0x372   : > { %v2627_v45 = vsel %vm10740_vm12, 0, %v10739_v24  ;;  %v2612_v50 = vadd.s32 %v12722_v54, %v12732_v26  ;;  %v3079_v49 = vand.u32 2139095040, %v12768_v59  ;;  %v12831_v17 = vsel %vm12797_vm3, %v12507_v7, %v12772_v6 }
 0x373   : > { %v2628_v11 = vsub.s32 32, %v2627_v45  ;;  %v2632_v18 = vsub.s32 4294967266, %v2627_v45  ;;  %v2822_v37 = vadd.s32 1, %v12815_v4  ;;  %v2876_v27 = vor.u32 8388608, %v12793_v61 }
 0x374   : > { %v2882_v23 = vand.u32 31, %v2880_v19  ;;  %vm12837_vm15 = vcmp.le.f32.partialorder %v2452_v21, 0.7853982  ;;  %v16675_v15 = vmov 0  ;;  %v2819_v42 = vmul.u32 %v12774_v29, %v2803_v12 }
 0x375   : > { %v16676_v15 = vsel %vm12837_vm15, 4294967295, %v16675_v15  ;;  %v2630_v54 = vshrl.u32 %v2612_v50, %v2628_v11  ;;  %v2633_v26 = vadd.s32 127, %v2632_v18  ;;  %vm2821_vm6 = vc.u32 %v12821_v56, %v12814_v25 }
 0x376   : > { %16677 = vst [vmem:[#allocation11_spill] sm:$0xff] %v16676_v15  ;;  %v2537_v6 = vsel %vm2454_vm11, %v2536_v9, %v2535_v44  ;;  %v2823_v52 = vsel %vm2821_vm6, %v2822_v37, %v12815_v4  ;;  %v2883_v61 = vsub.s32 32, %v2882_v23  ;;  %v12849_v24 = vand.u32 8388607, %v16513_v30 }
 0x377   : > { %v2629_v21 = vshll.u32 %v12781_v28, %v2627_v45  ;;  %v2634_v47 = vshll.u32 %v2633_v26, 23  ;;  %v2824_v63 = vadd.s32 %v2823_v52, %v2819_v42  ;;  %v3080_v31 = vshrl.u32 %v3079_v49, 23 }
 0x378   : > { %v2881_v38 = vshrl.u32 %v2880_v19, 5  ;;  %v2886_v29 = vshrl.u32 %v16514_v48, %v2883_v61  ;;  %v2889_v12 = vshrl.u32 %v16524_v51, %v2883_v61  ;;  %v2892_v50 = vshrl.u32 %v16517_v53, %v2883_v61 }
 0x379   : > { %v2631_v44 = vor.u32 %v2630_v54, %v2629_v21  ;;  %v2635_v9 = vor.u32 4788187, %v2634_v47  ;;  %v2825_v4 = vadd.s32 536870912, %v2824_v63  ;;  %v2885_v11 = vshll.u32 %v16526_v46, %v2882_v23 }
 0x37a   : > { %v2888_v18 = vshll.u32 %v16514_v48, %v2882_v23  ;;  %v2891_v37 = vshll.u32 %v16524_v51, %v2882_v23  ;;  %v2894_v28 = vshll.u32 %v16517_v53, %v2882_v23  ;;  %v2895_v45 = vshrl.u32 %v16522_v55, %v2883_v61 }
 0x37b   : > { %v2636_v19 = vand.u32 2147483647, %v2635_v9  ;;  %v2826_v49 = vshrl.u32 %v2825_v4, 30  ;;  %v2897_v26 = vshll.u32 %v16522_v55, %v2882_v23  ;;  %v2898_v42 = vshrl.u32 %v16520_v62, %v2883_v61 }
 0x37c   : > { %v2887_v52 = vor.u32 %v2886_v29, %v2885_v11  ;;  %v2890_v54 = vor.u32 %v2889_v12, %v2888_v18  ;;  %v2893_v21 = vor.u32 %v2892_v50, %v2891_v37  ;;  %v2896_v47 = vor.u32 %v2895_v45, %v2894_v28 }
 0x37d   : > { %11898 = vcosq.f32 %v12831_v17  ;;  %v2638_v30 = vcvt.s32.f32 %v2631_v44  ;;  %v2827_v48 = vshll.u32 %v2826_v49, 30  ;;  %v2899_v36 = vor.u32 %v2898_v42, %v2897_v26 }
 0x37e   : > { %v12866_v53 = vsel %vm12837_vm15, %v12518_v16, %v2537_v6  ;;  %vm2766_vm7 = vcmp.lt.s32.totalorder %v12688_v10, 0  ;;  %v2916_v9 = vshll.u32 %v2876_v27, 8  ;;  %v10757_v23 = vadd.s32 4294967169, %v3080_v31 }
 0x37f   : > { %v3084_v4 = vor.u32 8388608, %v12849_v24  ;;  %vm2558_vm8 = vcmp.lt.s32.totalorder %v12533_v34, 0  ;;  %v2639_v29 = vmul.f32 %v2638_v30, %v2636_v19  ;;  %v12871_v12 = vsub.s32 %v2824_v63, %v2827_v48 }
 0x380   : > { %vm2900_vm10 = vcmp.lt.s32.totalorder %v2881_v38, 1  ;;  %vm2903_vm12 = vcmp.lt.s32.totalorder %v2881_v38, 4  ;;  %v2884_v37 = vshrl.u32 %v16526_v46, %v2883_v61  ;;  %vm2902_vm13 = vcmp.lt.s32.totalorder %v2881_v38, 3 }
 0x381   : > { %v2905_v50 = vsel %vm2903_vm12, %v2893_v21, 2102212464  ;;  %v2908_v44 = vsel %vm2900_vm10, %v2887_v52, %v2890_v54  ;;  %v2909_v11 = vsel %vm2903_vm12, %v2896_v47, 920167782  ;;  %v2913_v18 = vsel %vm2903_vm12, %v2899_v36, 1326507024 }
 0x382   : > { %v2830_v6 = vsub.s32 0, %v12871_v12  ;;  %v2912_v27 = vsel %vm2900_vm10, %v2890_v54, %v2893_v21  ;;  %v16678_v24 = vand.u32 2147483647, %v12533_v34  ;;  %v2850_v48 = vsub.s32 4, %v2826_v49 }
 0x383   : > { %vm2901_vm1 = vcmp.lt.s32.totalorder %v2881_v38, 2  ;;  %v2910_v63 = vsel %vm2902_vm13, %v2893_v21, %v2909_v11  ;;  %v2914_v31 = vsel %vm2902_vm13, %v2896_v47, %v2913_v18  ;;  %v2904_v36 = vsel %vm2900_vm10, %v2884_v37, %v2887_v52 }
 0x384   : > { %vm12879_vm6 = vcmp.le.f32.partialorder %v16678_v24, 0.7853982  ;;  %v10746_v28 = vmin.u32 %v2830_v6, %v12871_v12  ;;  %v2906_v45 = vsel %vm2902_vm13, %v2890_v54, %v2905_v50  ;;  %v2911_v61 = vsel %vm2901_vm1, %v2908_v44, %v2910_v63 }
 0x385   : > { %v2640_v19 = vxor.u32 2147483648, %v2639_v29  ;;  %v2915_v26 = vsel %vm2901_vm1, %v2912_v27, %v2914_v31  ;;  %v12887_v42 = vmul.u32.u64.low %v2916_v9, %v2911_v61  ;;  %v12888_v62 = vmul.u32.u64.high %v2916_v9, %v2911_v61, %v12887_v42 }
 0x386   : > { %v2832_v24 = vclz %v10746_v28  ;;  %v12891_v55 = vmul.u32.u64.low %v2916_v9, %v2915_v26  ;;  %v12892_v51 = vmul.u32.u64.high %v2916_v9, %v2915_v26, %v12891_v55  ;;  %v3086_v21 = vadd.s32 1, %v10757_v23 }
 0x387   : > { %11900 = vsinq.f32 %v12831_v17  ;;  %v16681_v52 = vand.u32 2147483647, %v12688_v10  ;;  %v2907_v50 = vsel %vm2901_vm1, %v2904_v36, %v2906_v45  ;;  %v12903_v44 = vpop.eup %11898  ;;  %v12908_v55 = vsel %vm2766_vm7, %v2850_v48, %v2826_v49 }
 0x388   : > { %11902 = vcosq.f32 %v12866_v53  ;;  %v10747_v11 = vadd.s32 4294967294, %v2832_v24  ;;  %vm3087_vm12 = vcmp.gt.s32.totalorder %v3086_v21, 0  ;;  %v2641_v17 = vsel %vm2558_vm8, %v2640_v19, %v2639_v29 }
 0x389   : > { %vm12898_vm10 = vcmp.le.f32.partialorder %v16681_v52, 0.7853982  ;;  %v2926_v23 = vadd.s32 1, %v12888_v62  ;;  %v3088_v18 = vsel %vm3087_vm12, %v3086_v21, 0  ;;  %v12913_v6 = vshll.u32 %v3084_v4, 8 }
 0x38a   : > { %v2820_v38 = vadd.s32 %v12814_v25, %v12821_v56  ;;  %vm10748_vm1 = vcmp.lt.s32.totalorder %v10747_v11, 0  ;;  %v2923_v37 = vmul.u32 %v2916_v9, %v2907_v50  ;;  %vm2925_vm13 = vc.u32 %v12892_v51, %v12887_v42 }
 0x38b   : > { %v2835_v27 = vsel %vm10748_vm1, 0, %v10747_v11  ;;  %v2853_v49 = vsel %vm12898_vm10, 0, %v12908_v55  ;;  %v2927_v29 = vsel %vm2925_vm13, %v2926_v23, %v12888_v62  ;;  %v3090_v48 = vand.u32 31, %v3088_v18 }
 0x38c   : > { %v12926_v4 = vsel %vm12879_vm6, %v12533_v34, %v2641_v17  ;;  %v2836_v63 = vsub.s32 32, %v2835_v27  ;;  %v2840_v25 = vsub.s32 4294967266, %v2835_v27  ;;  %v2928_v56 = vadd.s32 %v2927_v29, %v2923_v37 }
 0x38d   : > { %v2837_v9 = vshll.u32 %v12871_v12, %v2835_v27  ;;  %v3089_v31 = vshrl.u32 %v3088_v18, 5  ;;  %v3091_v28 = vsub.s32 32, %v3090_v48  ;;  %v3093_v36 = vshll.u32 %v16526_v46, %v3090_v48 }
 0x38e   : > { %v2838_v45 = vshrl.u32 %v2820_v38, %v2836_v63  ;;  %v2841_v61 = vadd.s32 127, %v2840_v25  ;;  %v2929_v19 = vadd.s32 536870912, %v2928_v56  ;;  %v16684_v26 = vmov 2475754826  }
 0x38f   : > { %v3096_v62 = vshll.u32 %v16684_v26, %v3090_v48  ;;  %v3094_v24 = vshrl.u32 %v16684_v26, %v3091_v28  ;;  %v16685_v21 = vmov 2131351028   ;;  %v16686_v11 = vmov 2102212464  }
 0x390   : > { %v3097_v52 = vshrl.u32 %v16685_v21, %v3091_v28  ;;  %v3099_v50 = vshll.u32 %v16685_v21, %v3090_v48  ;;  %v3100_v55 = vshrl.u32 %v16686_v11, %v3091_v28  ;;  %v2842_v17 = vshll.u32 %v2841_v61, 23 }
 0x391   : > { %v12935_v23 = vshrl.u32 %v2929_v19, 30  ;;  %v3102_v12 = vshll.u32 %v16686_v11, %v3090_v48  ;;  %v16687_v18 = vmov 920167782   ;;  %v12939_v38 = vpop.eup %11900  ;;  %v3095_v27 = vor.u32 %v3094_v24, %v3093_v36 }
 0x392   : > { %v3103_v37 = vshrl.u32 %v16687_v18, %v3091_v28  ;;  %v3098_v29 = vor.u32 %v3097_v52, %v3096_v62  ;;  %v3101_v63 = vor.u32 %v3100_v55, %v3099_v50  ;;  %v12943_v25 = vadd.f32 %v12760_v20, %v12539_v40  ;;  %v12945_v47 = vpop.eup %11902 }
 0x393   : > { %v2839_v46 = vor.u32 %v2838_v45, %v2837_v9  ;;  %v2843_v3 = vor.u32 4788187, %v2842_v17  ;;  %v2931_v61 = vshll.u32 %v12935_v23, 30  ;;  %v16689_v35 = vmov 683565275  }
 0x394   : > { %16688 = vst [vmem:[#allocation12_spill] sm:$0xff] %v12943_v25  ;;  %v3104_v19 = vor.u32 %v3103_v37, %v3102_v12  ;;  %v3092_v15 = vshrl.u32 %v16689_v35, %v3091_v28  ;;  %v3105_v41 = vshll.u32 %v16687_v18, %v3090_v48  ;;  %v16690_v60 = vmov 1326507024  }
 0x395   : > { %v3106_v5 = vshrl.u32 %v16690_v60, %v3091_v28  ;;  %vm3108_vm12 = vcmp.lt.s32.totalorder %v3089_v31, 1  ;;  %v2844_v36 = vand.u32 2147483647, %v2843_v3  ;;  %v12951_v62 = vsub.s32 %v2928_v56, %v2931_v61 }
 0x396   : > { %vm3110_vm1 = vcmp.lt.s32.totalorder %v3089_v31, 3  ;;  %vm3111_vm13 = vcmp.lt.s32.totalorder %v3089_v31, 4  ;;  %v3116_v52 = vsel %vm3108_vm12, %v3095_v27, %v3098_v29  ;;  %v2846_v45 = vcvt.s32.f32 %v2839_v46 }
 0x397   : > { %v3107_v40 = vor.u32 %v3106_v5, %v3105_v41  ;;  %v3113_v24 = vsel %vm3111_vm13, %v3101_v63, 2102212464  ;;  %v3117_v9 = vsel %vm3111_vm13, %v3104_v19, 920167782  ;;  %v2934_v50 = vsub.s32 0, %v12951_v62 }
 0x398   : > { %vm3109_vm0 = vcmp.lt.s32.totalorder %v3089_v31, 2  ;;  %v3118_v55 = vsel %vm3110_vm1, %v3101_v63, %v3117_v9  ;;  %v3112_v17 = vsel %vm3108_vm12, %v3092_v15, %v3095_v27  ;;  %v3120_v28 = vsel %vm3108_vm12, %v3098_v29, %v3101_v63 }
 0x399   : > { %v3119_v48 = vsel %vm3109_vm0, %v3116_v52, %v3118_v55  ;;  %v3121_v12 = vsel %vm3111_vm13, %v3107_v40, 1326507024  ;;  %v2847_v3 = vmul.f32 %v2846_v45, %v2844_v36  ;;  %v10750_v56 = vmin.u32 %v2934_v50, %v12951_v62 }
 0x39a   : > { %v3114_v37 = vsel %vm3110_vm1, %v3098_v29, %v3113_v24  ;;  %v3122_v5 = vsel %vm3110_vm1, %v3104_v19, %v3121_v12  ;;  %v12961_v46 = vmul.u32.u64.low %v12913_v6, %v3119_v48  ;;  %v12962_v61 = vmul.u32.u64.high %v12913_v6, %v3119_v48, %v12961_v46 }
 0x39b   : > { %v3123_v41 = vsel %vm3109_vm0, %v3120_v28, %v3122_v5  ;;  %v3183_v9 = vand.u32 2139095040, %v12943_v25  ;;  %v2857_v15 = vadd.s32 3, %v2853_v49  ;;  %v2936_v27 = vclz %v10750_v56 }
 0x39c   : > { %v12966_v63 = vmul.u32.u64.low %v12913_v6, %v3123_v41  ;;  %v12967_v40 = vmul.u32.u64.high %v12913_v6, %v3123_v41, %v12966_v63  ;;  %11904 = vsinq.f32 %v12866_v53  ;;  %v3115_v29 = vsel %vm3109_vm0, %v3112_v17, %v3114_v37 }
 0x39d   : > { %v3184_v36 = vshrl.u32 %v3183_v9, 23  ;;  %v16691_v19 = vsub.s32 4, %v12694_v43  ;;  %11906 = vcosq.f32 %v12926_v4  ;;  %v10751_v49 = vadd.s32 4294967294, %v2936_v27 }
 0x39e   : > { %v12981_v52 = vadd.f32 %v12561_v2, %v12509_v8  ;;  %v2848_v45 = vxor.u32 2147483648, %v2847_v3  ;;  %v3134_v53 = vadd.s32 1, %v12962_v61  ;;  %v16539_v31 = vand.u32 2147483647, %v12943_v25 }
 0x39f   : > { %v12976_v24 = vsel %vm2454_vm11, %v16691_v19, %v12694_v43  ;;  %v10761_v50 = vadd.s32 4294967169, %v3184_v36  ;;  %v12985_v55 = vand.u32 3, %v2857_v15  ;;  %vm10752_vm0 = vcmp.lt.s32.totalorder %v10751_v49, 0 }
 0x3a0   : > { %v3131_v17 = vmul.u32 %v12913_v6, %v3115_v29  ;;  %vm3133_vm11 = vc.u32 %v12967_v40, %v12961_v46  ;;  %11908 = vsinq.f32 %v12926_v4  ;;  %v2939_v43 = vsel %vm10752_vm0, 0, %v10751_v49 }
 0x3a1   : > { %16692 = vst [vmem:[#allocation13_spill] sm:$0xff] %v12985_v55  ;;  %v3135_v48 = vsel %vm3133_vm11, %v3134_v53, %v12962_v61  ;;  %v3190_v8 = vadd.s32 1, %v10761_v50  ;;  %v2924_v2 = vadd.s32 %v12887_v42, %v12892_v51  ;;  %v2940_v28 = vsub.s32 32, %v2939_v43 }
 0x3a2   : > { %v2944_v12 = vsub.s32 4294967266, %v2939_v43  ;;  %v3136_v56 = vadd.s32 %v3135_v48, %v3131_v17  ;;  %v2849_v37 = vsel %vm2766_vm7, %v2848_v45, %v2847_v3  ;;  %v3187_v6 = vand.u32 8388607, %v16539_v31 }
 0x3a3   : > { %vm3191_vm12 = vcmp.gt.s32.totalorder %v3190_v8, 0  ;;  %v2663_v5 = vand.u32 2139095040, %v12981_v52  ;;  %v2942_v4 = vshrl.u32 %v2924_v2, %v2940_v28  ;;  %v2941_v15 = vshll.u32 %v12951_v62, %v2939_v43 }
 0x3a4   : > { %v2945_v41 = vadd.s32 127, %v2944_v12  ;;  %v3137_v9 = vadd.s32 536870912, %v3136_v56  ;;  %v3192_v61 = vsel %vm3191_vm12, %v3190_v8, 0  ;;  %v13001_v51 = vadd.f32 %v12501_v0, %v12625_v57 }
 0x3a5   : > { %v3194_v27 = vand.u32 31, %v3192_v61  ;;  %v13005_v42 = vadd.f32 %v12690_v22, %v12760_v20  ;;  %v13010_v3 = vsel %vm12898_vm10, %v12688_v10, %v2849_v37  ;;  %v16538_v36 = vand.u32 2147483647, %v12981_v52 }
 0x3a6   : > { %v2946_v63 = vshll.u32 %v2945_v41, 23  ;;  %v13012_v29 = vshrl.u32 %v3137_v9, 30  ;;  %v13015_v62 = vpop.eup %11904  ;;  %v2943_v19 = vor.u32 %v2942_v4, %v2941_v15  ;;  %v13018_v0 = vadd.s32 %v12961_v46, %v12967_v40 }
 0x3a7   : > { %v3188_v57 = vor.u32 8388608, %v3187_v6  ;;  %v3195_v49 = vsub.s32 32, %v3194_v27  ;;  %v13020_v22 = vpop.eup %11906  ;;  %v3197_v45 = vshll.u32 %v16689_v35, %v3194_v27  ;;  %v2664_v53 = vshrl.u32 %v2663_v5, 23 }
 0x3a8   : > { %v2947_v20 = vor.u32 4788187, %v2946_v63  ;;  %v3139_v54 = vshll.u32 %v13012_v29, 30  ;;  %v3200_v17 = vshll.u32 %v16684_v26, %v3194_v27  ;;  %v3193_v8 = vshrl.u32 %v3192_v61, 5 }
 0x3a9   : > { %v3198_v50 = vshrl.u32 %v16684_v26, %v3195_v49  ;;  %v3201_v43 = vshrl.u32 %v16685_v21, %v3195_v49  ;;  %v3204_v48 = vshrl.u32 %v16686_v11, %v3195_v49  ;;  %v3203_v2 = vshll.u32 %v16685_v21, %v3194_v27 }
 0x3aa   : > { %v2948_v46 = vand.u32 2147483647, %v2947_v20  ;;  %v13028_v40 = vsub.s32 %v3136_v56, %v3139_v54  ;;  %v13031_v28 = vpop.eup %11908  ;;  %v2950_v12 = vcvt.s32.f32 %v2943_v19  ;;  %v13033_v5 = vshll.u32 %v3188_v57, 8 }
 0x3ab   : > { %v3199_v37 = vor.u32 %v3198_v50, %v3197_v45  ;;  %v3202_v6 = vor.u32 %v3201_v43, %v3200_v17  ;;  %vm16556_vm7 = vcmp.lt.s32.totalorder %v12747_v14, 0  ;;  %v3205_v41 = vor.u32 %v3204_v48, %v3203_v2 }
 0x3ac   : > { %v3142_v4 = vsub.s32 0, %v13028_v40  ;;  %v3206_v9 = vshll.u32 %v16686_v11, %v3194_v27  ;;  %v3207_v56 = vshrl.u32 %v16687_v18, %v3195_v49  ;;  %v2951_v15 = vmul.f32 %v2950_v12, %v2948_v46 }
 0x3ad   : > { %v3209_v61 = vshll.u32 %v16687_v18, %v3194_v27  ;;  %v3210_v63 = vshrl.u32 %v16690_v60, %v3195_v49  ;;  %v13043_v19 = vand.u32 8388607, %v16538_v36  ;;  %vm3212_vm10 = vcmp.lt.s32.totalorder %v3193_v8, 1 }
 0x3ae   : > { %v10758_v57 = vmin.u32 %v3142_v4, %v13028_v40  ;;  %v3208_v20 = vor.u32 %v3207_v56, %v3206_v9  ;;  %v10741_v54 = vadd.s32 4294967169, %v2664_v53  ;;  %vm3078_vm1 = vcmp.lt.s32.totalorder %v12768_v59, 0 }
 0x3af   : > { %v3196_v45 = vshrl.u32 %v16689_v35, %v3195_v49  ;;  %v3211_v50 = vor.u32 %v3210_v63, %v3209_v61  ;;  %vm3215_vm13 = vcmp.lt.s32.totalorder %v3193_v8, 4  ;;  %v3220_v17 = vsel %vm3212_vm10, %v3199_v37, %v3202_v6 }
 0x3b0   : > { %v16693_v27 = vand.u32 2147483647, %v12747_v14  ;;  %v16694_v43 = vmov 0  ;;  %v3144_v48 = vclz %v10758_v57  ;;  %vm3214_vm11 = vcmp.lt.s32.totalorder %v3193_v8, 3 }
 0x3b1   : > { %v3217_v46 = vsel %vm3215_vm13, %v3205_v41, 2102212464  ;;  %v3221_v2 = vsel %vm3215_vm13, %v3208_v20, 920167782  ;;  %v2952_v12 = vxor.u32 2147483648, %v2951_v15  ;;  %vm3213_vm12 = vcmp.lt.s32.totalorder %v3193_v8, 2 }
 0x3b2   : > { %vm13051_vm0 = vcmp.le.f32.partialorder %v16693_v27, 0.7853982  ;;  %v3222_v53 = vsel %vm3214_vm11, %v3205_v41, %v3221_v2  ;;  %v3224_v4 = vsel %vm3212_vm10, %v3202_v6, %v3205_v41  ;;  %v10759_v49 = vadd.s32 4294967294, %v3144_v48 }
 0x3b3   : > { %v16695_v43 = vsel %vm13051_vm0, 4294967295, %v16694_v43  ;;  %v3216_v9 = vsel %vm3212_vm10, %v3196_v45, %v3199_v37  ;;  %v3223_v56 = vsel %vm3213_vm12, %v3220_v17, %v3222_v53  ;;  %v3225_v61 = vsel %vm3215_vm13, %v3211_v50, 1326507024 }
 0x3b4   : > { %16696 = vst [vmem:[#allocation14_spill] sm:$0xff] %v16695_v43  ;;  %v3218_v63 = vsel %vm3214_vm11, %v3202_v6, %v3217_v46  ;;  %v3226_v27 = vsel %vm3214_vm11, %v3208_v20, %v3225_v61  ;;  %v13059_v36 = vmul.u32.u64.low %v13033_v5, %v3223_v56  ;;  %v13060_v31 = vmul.u32.u64.high %v13033_v5, %v3223_v56, %v13059_v36 }
 0x3b5   : > { %vm10760_vm5 = vcmp.lt.s32.totalorder %v10759_v49, 0  ;;  %v3162_v57 = vsub.s32 4, %v13012_v29  ;;  %v3227_v2 = vsel %vm3213_vm12, %v3224_v4, %v3226_v27  ;;  %v2670_v10 = vadd.s32 1, %v10741_v54 }
 0x3b6   : > { %v2953_v41 = vsel %vm16556_vm7, %v2952_v12, %v2951_v15  ;;  %v3147_v37 = vsel %vm10760_vm5, 0, %v10759_v49  ;;  %v13068_v45 = vmul.u32.u64.low %v13033_v5, %v3227_v2  ;;  %v13069_v50 = vmul.u32.u64.high %v13033_v5, %v3227_v2, %v13068_v45 }
 0x3b7   : > { %v3148_v6 = vsub.s32 32, %v3147_v37  ;;  %v3152_v20 = vsub.s32 4294967266, %v3147_v37  ;;  %v3219_v17 = vsel %vm3213_vm12, %v3216_v9, %v3218_v63  ;;  %vm2671_vm10 = vcmp.gt.s32.totalorder %v2670_v10, 0 }
 0x3b8   : > { %v3238_v48 = vadd.s32 1, %v13060_v31  ;;  %v2668_v46 = vor.u32 8388608, %v13043_v19  ;;  %v2672_v53 = vsel %vm2671_vm10, %v2670_v10, 0  ;;  %v13079_v12 = vsel %vm3078_vm1, %v3162_v57, %v13012_v29 }
 0x3b9   : > { %v3150_v4 = vshrl.u32 %v13018_v0, %v3148_v6  ;;  %v3153_v15 = vadd.s32 127, %v3152_v20  ;;  %16697 = vst [vmem:[#allocation15_spill] sm:$0xff] %v13079_v12  ;;  %v2674_v49 = vand.u32 31, %v2672_v53  ;;  %v13084_v8 = vsel %vm13051_vm0, %v12747_v14, %v2953_v41 }
 0x3ba   : > { %v3149_v9 = vshll.u32 %v13028_v40, %v3147_v37  ;;  %v3235_v10 = vmul.u32 %v13033_v5, %v3219_v17  ;;  %vm3237_vm5 = vc.u32 %v13069_v50, %v13059_v36  ;;  %v2351_v29 = vand.u32 2139095040, %v13001_v51 }
 0x3bb   : > { %v3154_v0 = vshll.u32 %v3153_v15, 23  ;;  %v3239_v19 = vsel %vm3237_vm5, %v3238_v48, %v13060_v31  ;;  %v2675_v56 = vsub.s32 32, %v2674_v49  ;;  %v2673_v27 = vshrl.u32 %v2672_v53, 5 }
 0x3bc   : > { %v3151_v61 = vor.u32 %v3150_v4, %v3149_v9  ;;  %v3240_v63 = vadd.s32 %v3239_v19, %v3235_v10  ;;  %v2677_v57 = vshll.u32 %v16689_v35, %v2674_v49  ;;  %v2680_v40 = vshll.u32 %v16684_v26, %v2674_v49 }
 0x3bd   : > { %v3155_v2 = vor.u32 4788187, %v3154_v0  ;;  %v2678_v41 = vshrl.u32 %v16684_v26, %v2675_v56  ;;  %v2683_v5 = vshll.u32 %v16685_v21, %v2674_v49  ;;  %v2681_v45 = vshrl.u32 %v16685_v21, %v2675_v56 }
 0x3be   : > { %v3241_v37 = vadd.s32 536870912, %v3240_v63  ;;  %v2684_v31 = vshrl.u32 %v16686_v11, %v2675_v56  ;;  %v2686_v6 = vshll.u32 %v16686_v11, %v2674_v49  ;;  %v2687_v48 = vshrl.u32 %v16687_v18, %v2675_v56 }
 0x3bf   : > { %v3156_v20 = vand.u32 2147483647, %v3155_v2  ;;  %v2679_v17 = vor.u32 %v2678_v41, %v2677_v57  ;;  %v2689_v53 = vshll.u32 %v16687_v18, %v2674_v49  ;;  %v2682_v15 = vor.u32 %v2681_v45, %v2680_v40 }
 0x3c0   : > { %v13101_v4 = vshrl.u32 %v3241_v37, 30  ;;  %v2685_v9 = vor.u32 %v2684_v31, %v2683_v5  ;;  %v2690_v10 = vshrl.u32 %v16690_v60, %v2675_v56  ;;  %v16699_v0 = vand.u32 2147483647, %v12768_v59 }
 0x3c1   : > { %v16700_v19 = vmov 0  ;;  %v3158_v54 = vcvt.s32.f32 %v3151_v61  ;;  %v2688_v55 = vor.u32 %v2687_v48, %v2686_v6  ;;  %v2708_v2 = vshll.u32 %v2668_v46, 8 }
 0x3c2   : > { %16698 = vst [vmem:[#allocation16_spill] sm:$0xff] %v13101_v4  ;;  %vm13106_vm13 = vcmp.le.f32.partialorder %v16699_v0, 0.7853982  ;;  %v2352_v57 = vshrl.u32 %v2351_v29, 23  ;;  %v3243_v41 = vshll.u32 %v13101_v4, 30  ;;  %v2691_v43 = vor.u32 %v2690_v10, %v2689_v53 }
 0x3c3   : > { %v16701_v19 = vsel %vm13106_vm13, 4294967295, %v16700_v19  ;;  %vm2692_vm11 = vcmp.lt.s32.totalorder %v2673_v27, 1  ;;  %vm2695_vm12 = vcmp.lt.s32.totalorder %v2673_v27, 4  ;;  %v3159_v49 = vmul.f32 %v3158_v54, %v3156_v20 }
 0x3c4   : > { %16702 = vst [vmem:[#allocation17_spill] sm:$0xff] %v16701_v19  ;;  %v2676_v40 = vshrl.u32 %v16689_v35, %v2675_v56  ;;  %v2697_v5 = vsel %vm2695_vm12, %v2685_v9, 2102212464  ;;  %v2700_v37 = vsel %vm2692_vm11, %v2679_v17, %v2682_v15  ;;  %v13112_v45 = vsub.s32 %v3240_v63, %v3243_v41 }
 0x3c5   : > { %vm2694_vm10 = vcmp.lt.s32.totalorder %v2673_v27, 3  ;;  %v2701_v31 = vsel %vm2695_vm12, %v2688_v55, 920167782  ;;  %v2704_v0 = vsel %vm2692_vm11, %v2682_v15, %v2685_v9  ;;  %vm2693_vm5 = vcmp.lt.s32.totalorder %v2673_v27, 2 }
 0x3c6   : > { %v2696_v61 = vsel %vm2692_vm11, %v2676_v40, %v2679_v17  ;;  %v2702_v6 = vsel %vm2694_vm10, %v2685_v9, %v2701_v31  ;;  %v2705_v46 = vsel %vm2695_vm12, %v2691_v43, 1326507024  ;;  %v3246_v29 = vsub.s32 0, %v13112_v45 }
 0x3c7   : > { %v2698_v48 = vsel %vm2694_vm10, %v2682_v15, %v2697_v5  ;;  %v2703_v53 = vsel %vm2693_vm5, %v2700_v37, %v2702_v6  ;;  %v2706_v10 = vsel %vm2694_vm10, %v2688_v55, %v2705_v46  ;;  %v3160_v4 = vxor.u32 2147483648, %v3159_v49 }
 0x3c8   : > { %v2707_v54 = vsel %vm2693_vm5, %v2704_v0, %v2706_v10  ;;  %v13115_v20 = vmul.u32.u64.low %v2708_v2, %v2703_v53  ;;  %v13116_v56 = vmul.u32.u64.high %v2708_v2, %v2703_v53, %v13115_v20  ;;  %v10762_v63 = vmin.u32 %v3246_v29, %v13112_v45 }
 0x3c9   : > { %v13120_v41 = vmul.u32.u64.low %v2708_v2, %v2707_v54  ;;  %v13121_v14 = vmul.u32.u64.high %v2708_v2, %v2707_v54, %v13120_v41  ;;  %v16703_v27 = vand.u32 2147483647, %v13001_v51  ;;  %11910 = vcosq.f32 %v13010_v3 }
 0x3ca   : > { %v2699_v43 = vsel %vm2693_vm5, %v2696_v61, %v2698_v48  ;;  %v10729_v15 = vadd.s32 4294967169, %v2352_v57  ;;  %v13128_v55 = vadd.f32 %v12682_v32, %v12735_v33  ;;  %11912 = vsinq.f32 %v13010_v3 }
 0x3cb   : > { %v2355_v17 = vand.u32 8388607, %v16703_v27  ;;  %v3248_v40 = vclz %v10762_v63  ;;  %11914 = vcosq.f32 %v13084_v8  ;;  %v3161_v37 = vsel %vm3078_vm1, %v3160_v4, %v3159_v49 }
 0x3cc   : > { %v2718_v57 = vadd.s32 1, %v13116_v56  ;;  %v2358_v31 = vadd.s32 1, %v10729_v15  ;;  %v2715_v32 = vmul.u32 %v2708_v2, %v2699_v43  ;;  %vm2717_vm11 = vc.u32 %v13121_v14, %v13115_v20 }
 0x3cd   : > { %v10763_v0 = vadd.s32 4294967294, %v3248_v40  ;;  %v2356_v33 = vor.u32 8388608, %v2355_v17  ;;  %11916 = vsinq.f32 %v13084_v8  ;;  %v3287_v61 = vand.u32 2139095040, %v13005_v42 }
 0x3ce   : > { %v2719_v3 = vsel %vm2717_vm11, %v2718_v57, %v13116_v56  ;;  %vm2359_vm12 = vcmp.gt.s32.totalorder %v2358_v31, 0  ;;  %v3236_v6 = vadd.s32 %v13059_v36, %v13069_v50  ;;  %v13149_v2 = vsel %vm13106_vm13, %v12768_v59, %v3161_v37 }
 0x3cf   : > { %vm10764_vm1 = vcmp.lt.s32.totalorder %v10763_v0, 0  ;;  %v2720_v4 = vadd.s32 %v2719_v3, %v2715_v32  ;;  %v2360_v49 = vsel %vm2359_vm12, %v2358_v31, 0  ;;  %v13152_v54 = vshll.u32 %v2356_v33, 8 }
 0x3d0   : > { %v3251_v46 = vsel %vm10764_vm1, 0, %v10763_v0  ;;  %v2362_v29 = vand.u32 31, %v2360_v49  ;;  %v13155_v36 = vshrl.u32 %v2360_v49, 5  ;;  %v3288_v63 = vshrl.u32 %v3287_v61, 23 }
 0x3d1   : > { %v3252_v48 = vsub.s32 32, %v3251_v46  ;;  %v3256_v53 = vsub.s32 4294967266, %v3251_v46  ;;  %v2721_v10 = vadd.s32 536870912, %v2720_v4  ;;  %v3253_v56 = vshll.u32 %v13112_v45, %v3251_v46 }
 0x3d2   : > { %v2363_v50 = vsub.s32 32, %v2362_v29  ;;  %v2365_v43 = vshll.u32 %v16689_v35, %v2362_v29  ;;  %v2368_v37 = vshll.u32 %v16684_v26, %v2362_v29  ;;  %v2371_v3 = vshll.u32 %v16685_v21, %v2362_v29 }
 0x3d3   : > { %v3254_v41 = vshrl.u32 %v3236_v6, %v3252_v48  ;;  %v3257_v27 = vadd.s32 127, %v3256_v53  ;;  %v13157_v17 = vshrl.u32 %v2721_v10, 30  ;;  %v13160_v15 = vpop.eup %11910  ;;  %v2374_v46 = vshll.u32 %v16686_v11, %v2362_v29 }
 0x3d4   : > { %16704 = vst [vmem:[#allocation18_spill] sm:$0xff] %v13160_v15  ;;  %v2366_v40 = vshrl.u32 %v16684_v26, %v2363_v50  ;;  %v2369_v57 = vshrl.u32 %v16685_v21, %v2363_v50  ;;  %v2372_v45 = vshrl.u32 %v16686_v11, %v2363_v50  ;;  %v13166_v31 = vpop.eup %11912  ;;  %v2375_v48 = vshrl.u32 %v16687_v18, %v2363_v50 }
 0x3d5   : > { %16705 = vst [vmem:[#allocation19_spill] sm:$0xff] %v13166_v31  ;;  %v3255_v0 = vor.u32 %v3254_v41, %v3253_v56  ;;  %v3258_v32 = vshll.u32 %v3257_v27, 23  ;;  %v2723_v33 = vshll.u32 %v13157_v17, 30  ;;  %v13170_v61 = vpop.eup %11914  ;;  %v10765_v5 = vadd.s32 4294967169, %v3288_v63 }
 0x3d6   : > { %16706 = vst [vmem:[#allocation20_spill] sm:$0xff] %v13170_v61  ;;  %v2367_v6 = vor.u32 %v2366_v40, %v2365_v43  ;;  %v2370_v49 = vor.u32 %v2369_v57, %v2368_v37  ;;  %v2373_v9 = vor.u32 %v2372_v45, %v2371_v3  ;;  %v2364_v56 = vshrl.u32 %v16689_v35, %v2363_v50 }
 0x3d7   : > { %v3259_v53 = vor.u32 4788187, %v3258_v32  ;;  %v13174_v10 = vsub.s32 %v2720_v4, %v2723_v33  ;;  %v13176_v8 = vpop.eup %11916  ;;  %v2376_v41 = vor.u32 %v2375_v48, %v2374_v46  ;;  %v2377_v27 = vshll.u32 %v16687_v18, %v2362_v29 }
 0x3d8   : > { %v2378_v12 = vshrl.u32 %v16690_v60, %v2363_v50  ;;  %v3262_v40 = vcvt.s32.f32 %v3255_v0  ;;  %vm2380_vm10 = vcmp.lt.s32.totalorder %v13155_v36, 1  ;;  %vm2381_vm5 = vcmp.lt.s32.totalorder %v13155_v36, 2 }
 0x3d9   : > { %v3260_v43 = vand.u32 2147483647, %v3259_v53  ;;  %v2726_v37 = vsub.s32 0, %v13174_v10  ;;  %vm2383_vm11 = vcmp.lt.s32.totalorder %v13155_v36, 4  ;;  %v2388_v4 = vsel %vm2380_vm10, %v2367_v6, %v2370_v49 }
 0x3da   : > { %v2379_v57 = vor.u32 %v2378_v12, %v2377_v27  ;;  %vm16555_vm12 = vcmp.lt.s32.totalorder %v12943_v25, 0  ;;  %vm2382_vm1 = vcmp.lt.s32.totalorder %v13155_v36, 3  ;;  %v2385_v50 = vsel %vm2383_vm11, %v2373_v9, 2102212464 }
 0x3db   : > { %v10742_v29 = vmin.u32 %v2726_v37, %v13174_v10  ;;  %v2389_v63 = vsel %vm2383_vm11, %v2376_v41, 920167782  ;;  %v3263_v45 = vmul.f32 %v3262_v40, %v3260_v43  ;;  %v2392_v12 = vsel %vm2380_vm10, %v2370_v49, %v2373_v9 }
 0x3dc   : > { %v2390_v0 = vsel %vm2382_vm1, %v2373_v9, %v2389_v63  ;;  %v2393_v32 = vsel %vm2383_vm11, %v2379_v57, 1326507024  ;;  %11918 = vcosq.f32 %v13149_v2  ;;  %v2384_v3 = vsel %vm2380_vm10, %v2364_v56, %v2367_v6 }
 0x3dd   : > { %v2728_v33 = vclz %v10742_v29  ;;  %v2391_v46 = vsel %vm2381_vm5, %v2388_v4, %v2390_v0  ;;  %v2386_v48 = vsel %vm2382_vm1, %v2370_v49, %v2385_v50  ;;  %v2394_v53 = vsel %vm2382_vm1, %v2376_v41, %v2393_v32 }
 0x3de   : > { %v13198_v27 = vmul.u32.u64.low %v13152_v54, %v2391_v46  ;;  %v13199_v37 = vmul.u32.u64.high %v13152_v54, %v2391_v46, %v13198_v27  ;;  %v2395_v9 = vsel %vm2381_vm5, %v2392_v12, %v2394_v53  ;;  %v16707_v40 = vand.u32 2147483647, %v13005_v42 }
 0x3df   : > { %v10743_v43 = vadd.s32 4294967294, %v2728_v33  ;;  %v3294_v29 = vadd.s32 1, %v10765_v5  ;;  %11920 = vsinq.f32 %v13149_v2  ;;  %v3264_v6 = vxor.u32 2147483648, %v3263_v45 }
 0x3e0   : > { %v3291_v57 = vand.u32 8388607, %v16707_v40  ;;  %v13208_v56 = vmul.u32.u64.low %v13152_v54, %v2395_v9  ;;  %v13209_v49 = vmul.u32.u64.high %v13152_v54, %v2395_v9, %v13208_v56  ;;  %v2387_v41 = vsel %vm2381_vm5, %v2384_v3, %v2386_v48 }
 0x3e1   : > { %vm10744_vm10 = vcmp.lt.s32.totalorder %v10743_v43, 0  ;;  %vm3295_vm11 = vcmp.gt.s32.totalorder %v3294_v29, 0  ;;  %v2716_v50 = vadd.s32 %v13115_v20, %v13121_v14  ;;  %v2406_v5 = vadd.s32 1, %v13199_v37 }
 0x3e2   : > { %v2731_v63 = vsel %vm10744_vm10, 0, %v10743_v43  ;;  %v3296_v0 = vsel %vm3295_vm11, %v3294_v29, 0  ;;  %v16708_v2 = vand.u32 2147483647, %v12943_v25  ;;  %v16709_v12 = vmov 0 }
 0x3e3   : > { %v2732_v32 = vsub.s32 32, %v2731_v63  ;;  %v2736_v33 = vsub.s32 4294967266, %v2731_v63  ;;  %v3292_v3 = vor.u32 8388608, %v3291_v57  ;;  %v3265_v46 = vsel %vm16555_vm12, %v3264_v6, %v3263_v45 }
 0x3e4   : > { %vm13219_vm1 = vcmp.le.f32.partialorder %v16708_v2, 0.7853982  ;;  %v2403_v14 = vmul.u32 %v13152_v54, %v2387_v41  ;;  %vm2405_vm5 = vc.u32 %v13209_v49, %v13198_v27  ;;  %v3298_v20 = vand.u32 31, %v3296_v0 }
 0x3e5   : > { %v16710_v12 = vsel %vm13219_vm1, 4294967295, %v16709_v12  ;;  %v2733_v48 = vshll.u32 %v13174_v10, %v2731_v63  ;;  %v2734_v53 = vshrl.u32 %v2716_v50, %v2732_v32  ;;  %v2737_v43 = vadd.s32 127, %v2736_v33 }
 0x3e6   : > { %16711 = vst [vmem:[#allocation21_spill] sm:$0xff] %v16710_v12  ;;  %v2407_v9 = vsel %vm2405_vm5, %v2406_v5, %v13199_v37  ;;  %v3297_v29 = vshrl.u32 %v3296_v0, 5  ;;  %v3299_v56 = vsub.s32 32, %v3298_v20  ;;  %v3301_v57 = vshll.u32 %v16689_v35, %v3298_v20  ;;  %v13232_v2 = vpop.eup %11918 }
 0x3e7   : > { %v2408_v40 = vadd.s32 %v2407_v9, %v2403_v14  ;;  %16712 = vst [vmem:[#allocation22_spill] sm:$0xff] %v13232_v2  ;;  %v2735_v45 = vor.u32 %v2734_v53, %v2733_v48  ;;  %v2738_v6 = vshll.u32 %v2737_v43, 23  ;;  %v3304_v54 = vshll.u32 %v16684_v26, %v3298_v20 }
 0x3e8   : > { %v3307_v41 = vshll.u32 %v16685_v21, %v3298_v20  ;;  %v3302_v10 = vshrl.u32 %v16684_v26, %v3299_v56  ;;  %v3305_v50 = vshrl.u32 %v16685_v21, %v3299_v56  ;;  %v3310_v37 = vshll.u32 %v16686_v11, %v3298_v20 }
 0x3e9   : > { %v2409_v36 = vadd.s32 536870912, %v2408_v40  ;;  %vm2662_vm10 = vcmp.lt.s32.totalorder %v12981_v52, 0  ;;  %v2739_v63 = vor.u32 4788187, %v2738_v6  ;;  %v2742_v5 = vcvt.s32.f32 %v2735_v45  ;;  %v13242_v33 = vpop.eup %11920 }
 0x3ea   : > { %v3308_v0 = vshrl.u32 %v16686_v11, %v3299_v56  ;;  %v3311_v32 = vshrl.u32 %v16687_v18, %v3299_v56  ;;  %16713 = vst [vmem:[#allocation23_spill] sm:$0xff] %v13242_v33  ;;  %v3303_v48 = vor.u32 %v3302_v10, %v3301_v57  ;;  %v3306_v53 = vor.u32 %v3305_v50, %v3304_v54 }
 0x3eb   : > { %v2410_v14 = vshrl.u32 %v2409_v36, 30  ;;  %v3313_v43 = vshll.u32 %v16687_v18, %v3298_v20  ;;  %v2740_v9 = vand.u32 2147483647, %v2739_v63  ;;  %v3314_v19 = vshrl.u32 %v16690_v60, %v3299_v56 }
 0x3ec   : > { %v3309_v4 = vor.u32 %v3308_v0, %v3307_v41  ;;  %v3312_v2 = vor.u32 %v3311_v32, %v3310_v37  ;;  %v3268_v45 = vsel %vm13219_vm1, %v12943_v25, %v3265_v46  ;;  %v16714_v6 = vand.u32 2147483647, %v12981_v52 }
 0x3ed   : > { %v2411_v36 = vshll.u32 %v2410_v14, 30  ;;  %v3332_v57 = vshll.u32 %v3292_v3, 8  ;;  %v2975_v54 = vand.u32 2139095040, %v13128_v55  ;;  %v2743_v20 = vmul.f32 %v2742_v5, %v2740_v9 }
 0x3ee   : > { %vm13251_vm11 = vcmp.le.f32.partialorder %v16714_v6, 0.7853982  ;;  %v3315_v10 = vor.u32 %v3314_v19, %v3313_v43  ;;  %vm3316_vm5 = vcmp.lt.s32.totalorder %v3297_v29, 1  ;;  %vm3319_vm4 = vcmp.lt.s32.totalorder %v3297_v29, 4 }
 0x3ef   : > { %vm2350_vm12 = vcmp.lt.s32.totalorder %v13001_v51, 0  ;;  %v13257_v41 = vsub.s32 %v2408_v40, %v2411_v36  ;;  %v3300_v46 = vshrl.u32 %v16689_v35, %v3299_v56  ;;  %v3321_v50 = vsel %vm3319_vm4, %v3309_v4, 2102212464 }
 0x3f0   : > { %v3324_v37 = vsel %vm3316_vm5, %v3303_v48, %v3306_v53  ;;  %v2744_v63 = vxor.u32 2147483648, %v2743_v20  ;;  %vm3318_vm7 = vcmp.lt.s32.totalorder %v3297_v29, 3  ;;  %v3325_v0 = vsel %vm3319_vm4, %v3312_v2, 920167782 }
 0x3f1   : > { %v3328_v32 = vsel %vm3316_vm5, %v3306_v53, %v3309_v4  ;;  %v2414_v3 = vsub.s32 0, %v13257_v41  ;;  %vm3317_vm9 = vcmp.lt.s32.totalorder %v3297_v29, 2  ;;  %v3326_v6 = vsel %vm3318_vm7, %v3309_v4, %v3325_v0 }
 0x3f2   : > { %v3329_v5 = vsel %vm3319_vm4, %v3315_v10, 1326507024  ;;  %v3320_v19 = vsel %vm3316_vm5, %v3300_v46, %v3303_v48  ;;  %v3322_v43 = vsel %vm3318_vm7, %v3306_v53, %v3321_v50  ;;  %v3327_v9 = vsel %vm3317_vm9, %v3324_v37, %v3326_v6 }
 0x3f3   : > { %v3330_v33 = vsel %vm3318_vm7, %v3312_v2, %v3329_v5  ;;  %v2745_v40 = vsel %vm2662_vm10, %v2744_v63, %v2743_v20  ;;  %v10730_v56 = vmin.u32 %v2414_v3, %v13257_v41  ;;  %v2976_v15 = vshrl.u32 %v2975_v54, 23 }
 0x3f4   : > { %v3331_v36 = vsel %vm3317_vm9, %v3328_v32, %v3330_v33  ;;  %11922 = vcosq.f32 %v3268_v45  ;;  %v2434_v31 = vsub.s32 4, %v2410_v14  ;;  %v3323_v29 = vsel %vm3317_vm9, %v3320_v19, %v3322_v43 }
 0x3f5   : > { %v13264_v12 = vmul.u32.u64.low %v3332_v57, %v3331_v36  ;;  %v13265_v25 = vmul.u32.u64.high %v3332_v57, %v3331_v36, %v13264_v12  ;;  %v2416_v61 = vclz %v10730_v56  ;;  %v2748_v2 = vsel %vm13251_vm11, %v12981_v52, %v2745_v40 }
 0x3f6   : > { %v13267_v4 = vmul.u32.u64.low %v3332_v57, %v3327_v9  ;;  %v13268_v10 = vmul.u32.u64.high %v3332_v57, %v3327_v9, %v13267_v4  ;;  %v10753_v48 = vadd.s32 4294967169, %v2976_v15  ;;  %v16717_v53 = vand.u32 2147483647, %v13128_v55 }
 0x3f7   : > { %v16718_v33 = vsub.s32 4, %v12655_v39  ;;  %11924 = vsinq.f32 %v3268_v45  ;;  %v16719_v12 = vsub.s32 4, %v13157_v17  ;;  %v2404_v15 = vadd.s32 %v13198_v27, %v13209_v49 }
 0x3f8   : > { %v2979_v20 = vand.u32 8388607, %v16717_v53  ;;  %v10731_v50 = vadd.s32 4294967294, %v2416_v61  ;;  %v13291_v37 = vsel %vm2350_vm12, %v2434_v31, %v2410_v14  ;;  %v3339_v63 = vmul.u32 %v3332_v57, %v3323_v29 }
 0x3f9   : > { %v2331_v54 = vsel %vm2246_vm2, %v16718_v33, %v12655_v39  ;;  %v13285_v46 = vsel %vm2662_vm10, %v16719_v12, %v13157_v17  ;;  %vm3341_vm4 = vc.u32 %v13265_v25, %v13267_v4  ;;  %v2982_v39 = vadd.s32 1, %v10753_v48 }
 0x3fa   : > { %11926 = vcosq.f32 %v2748_v2  ;;  %vm10732_vm9 = vcmp.lt.s32.totalorder %v10731_v50, 0  ;;  %v3342_v45 = vadd.s32 1, %v13268_v10  ;;  %v2333_v17 = vsel %vm12797_vm3, 0, %v2331_v54 }
 0x3fb   : > { %11928 = vsinq.f32 %v2748_v2  ;;  %v2419_v0 = vsel %vm10732_vm9, 0, %v10731_v50  ;;  %v2980_v32 = vor.u32 8388608, %v2979_v20  ;;  %vm2983_vm2 = vcmp.gt.s32.totalorder %v2982_v39, 0 }
 0x3fc   : > { %v2420_v61 = vsub.s32 32, %v2419_v0  ;;  %v2424_v27 = vsub.s32 4294967266, %v2419_v0  ;;  %v3343_v31 = vsel %vm3341_vm4, %v3342_v45, %v13268_v10  ;;  %v2341_v49 = vxor.u32 2147483648, %v12939_v38 }
 0x3fd   : > { %v3344_v14 = vadd.s32 %v3343_v31, %v3339_v63  ;;  %v2984_v57 = vsel %vm2983_vm2, %v2982_v39, 0  ;;  %v2337_v3 = vadd.s32 3, %v2333_v17  ;;  %v2642_v6 = vsub.s32 4, %v12764_v13 }
 0x3fe   : > { %v2421_v5 = vshll.u32 %v13257_v41, %v2419_v0  ;;  %v2422_v19 = vshrl.u32 %v2404_v15, %v2420_v61  ;;  %v2425_v1 = vadd.s32 127, %v2424_v27  ;;  %v2986_v43 = vand.u32 31, %v2984_v57  ;;  %v13301_v9 = vpop.eup %11922 }
 0x3ff   : > { %v13304_v40 = vadd.s32 %v13267_v4, %v13265_v25  ;;  %v3345_v56 = vadd.s32 536870912, %v3344_v14  ;;  %v13306_v36 = vshll.u32 %v2980_v32, 8  ;;  %v2344_v29 = vxor.u32 2147483648, %v12903_v44 }
 0x400   : > { %v2423_v10 = vor.u32 %v2422_v19, %v2421_v5  ;;  %v2426_v2 = vshll.u32 %v2425_v1, 23  ;;  %v2987_v48 = vsub.s32 32, %v2986_v43  ;;  %v2985_v41 = vshrl.u32 %v2984_v57, 5 }
 0x401   : > { %v13310_v20 = vshrl.u32 %v3345_v56, 30  ;;  %v13312_v33 = vand.u32 3, %v2337_v3  ;;  %v13317_v25 = vsel %vm2558_vm8, %v2642_v6, %v12764_v13  ;;  %v13319_v4 = vpop.eup %11924  ;;  %v2989_v12 = vshll.u32 %v16689_v35, %v2986_v43 }
 0x402   : > { %v2427_v54 = vor.u32 4788187, %v2426_v2  ;;  %v2990_v15 = vshrl.u32 %v16684_v26, %v2987_v48  ;;  %v2992_v50 = vshll.u32 %v16684_v26, %v2986_v43  ;;  %v2993_v39 = vshrl.u32 %v16685_v21, %v2987_v48 }
 0x403   : > { %v3347_v63 = vshll.u32 %v13310_v20, 30  ;;  %v2995_v45 = vshll.u32 %v16685_v21, %v2986_v43  ;;  %v2996_v17 = vshrl.u32 %v16686_v11, %v2987_v48  ;;  %v2430_v32 = vcvt.s32.f32 %v2423_v10 }
 0x404   : > { %v13328_v0 = vpop.eup %11926  ;;  %v2428_v13 = vand.u32 2147483647, %v2427_v54  ;;  %v2998_v61 = vshll.u32 %v16686_v11, %v2986_v43  ;;  %v2999_v27 = vshrl.u32 %v16687_v18, %v2987_v48  ;;  %v2991_v3 = vor.u32 %v2990_v15, %v2989_v12 }
 0x405   : > { %v13332_v31 = vpop.eup %11928  ;;  %v13334_v57 = vsub.s32 %v3344_v14, %v3347_v63  ;;  %v2994_v6 = vor.u32 %v2993_v39, %v2992_v50  ;;  %v2997_v5 = vor.u32 %v2996_v17, %v2995_v45  ;;  %vm2340_vm3 = vcmp.eq.s32.totalorder %v13312_v33, 0 }
 0x406   : > { %v16720_v19 = vand.u32 2147483647, %v13001_v51  ;;  %v2431_v56 = vmul.f32 %v2430_v32, %v2428_v13  ;;  %v3000_v10 = vor.u32 %v2999_v27, %v2998_v61  ;;  %v3001_v2 = vshll.u32 %v16687_v18, %v2986_v43 }
 0x407   : > { %v3002_v54 = vshrl.u32 %v16690_v60, %v2987_v48  ;;  %v3350_v14 = vsub.s32 0, %v13334_v57  ;;  %v2988_v12 = vshrl.u32 %v16689_v35, %v2987_v48  ;;  %vm3004_vm10 = vcmp.lt.s32.totalorder %v2985_v41, 1 }
 0x408   : > { %vm13339_vm8 = vcmp.le.f32.partialorder %v16720_v19, 0.7853982  ;;  %vm3007_vm5 = vcmp.lt.s32.totalorder %v2985_v41, 4  ;;  %v2432_v15 = vxor.u32 2147483648, %v2431_v56  ;;  %vm3005_vm9 = vcmp.lt.s32.totalorder %v2985_v41, 2 }
 0x409   : > { %v3003_v50 = vor.u32 %v3002_v54, %v3001_v2  ;;  %v3009_v63 = vsel %vm3007_vm5, %v2997_v5, 2102212464  ;;  %v10766_v39 = vmin.u32 %v3350_v14, %v13334_v57  ;;  %vm3006_vm2 = vcmp.lt.s32.totalorder %v2985_v41, 3 }
 0x40a   : > { %v3012_v43 = vsel %vm3004_vm10, %v2991_v3, %v2994_v6  ;;  %v3013_v45 = vsel %vm3007_vm5, %v3000_v10, 920167782  ;;  %v3008_v17 = vsel %vm3004_vm10, %v2988_v12, %v2991_v3  ;;  %v3010_v13 = vsel %vm3006_vm2, %v2994_v6, %v3009_v63 }
 0x40b   : > { %v3014_v32 = vsel %vm3006_vm2, %v2997_v5, %v3013_v45  ;;  %v3016_v61 = vsel %vm3004_vm10, %v2994_v6, %v2997_v5  ;;  %v3352_v48 = vclz %v10766_v39  ;;  %v3017_v19 = vsel %vm3007_vm5, %v3003_v50, 1326507024 }
 0x40c   : > { %v3015_v27 = vsel %vm3005_vm9, %v3012_v43, %v3014_v32  ;;  %vm2343_vm4 = vcmp.eq.s32.totalorder %v13312_v33, 2  ;;  %v2433_v2 = vsel %vm2350_vm12, %v2432_v15, %v2431_v56  ;;  %v3018_v54 = vsel %vm3006_vm2, %v3000_v10, %v3017_v19 }
 0x40d   : > { %v13358_v14 = vmul.u32.u64.low %v13306_v36, %v3015_v27  ;;  %v13359_v53 = vmul.u32.u64.high %v13306_v36, %v3015_v27, %v13358_v14  ;;  %vm3286_vm7 = vcmp.lt.s32.totalorder %v13005_v42, 0  ;;  %v10767_v3 = vadd.s32 4294967294, %v3352_v48 }
 0x40e   : > { %v3370_v6 = vsub.s32 4, %v13310_v20  ;;  %v3011_v5 = vsel %vm3005_vm9, %v3008_v17, %v3010_v13  ;;  %v3019_v12 = vsel %vm3005_vm9, %v3016_v61, %v3018_v54  ;;  %v2342_v56 = vsel %vm2340_vm3, %v12903_v44, %v2341_v49 }
 0x40f   : > { %v13367_v50 = vmul.u32.u64.low %v13306_v36, %v3019_v12  ;;  %v13368_v63 = vmul.u32.u64.high %v13306_v36, %v3019_v12, %v13367_v50  ;;  %v2345_v10 = vsel %vm2343_vm4, %v2344_v29, %v12939_v38  ;;  %vm2648_vm12 = vweird.f32 %v12533_v34  ;;  %v16726_v12 = vld [vmem:[#allocation4_spill] sm:$0xff] }
 0x410   : > { %v13382_v41 = vsel %vm13339_vm8, %v13001_v51, %v2433_v2  ;;  %vm10768_vm10 = vcmp.lt.s32.totalorder %v10767_v3, 0  ;;  %vm16723_vm5 = vcmp.lt.s32.totalorder %v13312_v33, 2  ;;  %v2645_v39 = vsel %vm12879_vm6, 0, %v13317_v25 }
 0x411   : > { %v2346_v15 = vsel %vm16723_vm5, %v2342_v56, %v2345_v10  ;;  %v3355_v49 = vsel %vm10768_vm10, 0, %v10767_v3  ;;  %v3030_v43 = vadd.s32 1, %v13359_v53  ;;  %vm16724_vm3 = vweird.f32 %v12507_v7 }
 0x412   : > { %v2347_v44 = vsel %vm16724_vm3, nan, %v2346_v15  ;;  %v2649_v38 = vadd.s32 3, %v2645_v39  ;;  %v3356_v29 = vsub.s32 32, %v3355_v49  ;;  %v3360_v45 = vsub.s32 4294967266, %v3355_v49 }
 0x413   : > { %v3027_v17 = vmul.u32 %v13306_v36, %v3011_v5  ;;  %v2656_v13 = vxor.u32 2147483648, %v13020_v22  ;;  %v3357_v33 = vshll.u32 %v13334_v57, %v3355_v49  ;;  %vm3029_vm4 = vc.u32 %v13368_v63, %v13358_v14 }
 0x414   : > { %v2650_v30 = vand.u32 3, %v2649_v38  ;;  %v2226_v25 = vsub.s32 4, %v12627_v58  ;;  %v3358_v32 = vshrl.u32 %v13304_v40, %v3356_v29  ;;  %v3361_v61 = vadd.s32 127, %v3360_v45  ;;  %v16732_v38 = vld [vmem:[#allocation10_spill] sm:$0xff] }
 0x415   : > { %v3031_v48 = vsel %vm3029_vm4, %v3030_v43, %v13359_v53  ;;  %v3389_v27 = vmul.f32 %v2347_v44, %v2347_v44  ;;  %v16725_v57 = vxor.u32 2147483648, %v13031_v28  ;;  %v13407_v40 = vsel %vm3286_vm7, %v3370_v6, %v13310_v20 }
 0x416   : > { %v3032_v19 = vadd.s32 %v3031_v48, %v3027_v17  ;;  %vm2651_vm6 = vcmp.lt.s32.totalorder %v2650_v30, 2  ;;  %vm2652_vm9 = vcmp.eq.s32.totalorder %v2650_v30, 0  ;;  %vm2655_vm2 = vcmp.eq.s32.totalorder %v2650_v30, 2 }
 0x417   : > { %v3359_v36 = vor.u32 %v3358_v32, %v3357_v33  ;;  %v3362_v2 = vshll.u32 %v3361_v61, 23  ;;  %v2654_v54 = vsel %vm2652_vm9, %v13020_v22, %v16725_v57  ;;  %v2657_v3 = vsel %vm2655_vm2, %v2656_v13, %v13031_v28 }
 0x418   : > { %v3033_v5 = vadd.s32 536870912, %v3032_v19  ;;  %v2658_v53 = vsel %vm2651_vm6, %v2654_v54, %v2657_v3  ;;  %vm16727_vm10 = vcmp.lt.s32.totalorder %v16726_v12, 0  ;;  %11930 = vcosq.f32 %v13382_v41 }
 0x419   : > { %v2227_v50 = vsel %vm16727_vm10, %v2226_v25, %v12627_v58  ;;  %v3363_v56 = vor.u32 4788187, %v3362_v2  ;;  %v2659_v10 = vsel %vm2648_vm12, nan, %v2658_v53  ;;  %v16729_v15 = vand.u32 2147483647, %v13005_v42  ;;  %v16734_v25 = vld [vmem:[#allocation9_spill] sm:$0xff] }
 0x41a   : > { %v2229_v28 = vsel %vm12751_vm14, 0, %v2227_v50  ;;  %v3034_v6 = vshrl.u32 %v3033_v5, 30  ;;  %v3392_v39 = vmul.f32 %v2659_v10, %v2659_v10  ;;  %v13424_v49 = vadd.f32 %v3389_v27, %v12507_v7  ;;  %v16735_v5 = vld [vmem:[#allocation3_spill] sm:$0xff] }
 0x41b   : > { %vm13419_vm5 = vcmp.le.f32.partialorder %v16729_v15, 0.7853982  ;;  %v2233_v58 = vadd.s32 3, %v2229_v28  ;;  %v3364_v43 = vand.u32 2147483647, %v3363_v56  ;;  %v3366_v44 = vcvt.s32.f32 %v3359_v36 }
 0x41c   : > { %v2237_v29 = vxor.u32 2147483648, %v16732_v38  ;;  %v2541_v17 = vsel %vm12837_vm15, 0, %v12976_v24  ;;  %vm2974_vm14 = vcmp.lt.s32.totalorder %v13128_v55, 0  ;;  %v3035_v13 = vshll.u32 %v3034_v6, 30 }
 0x41d   : > { %v13432_v33 = vadd.f32 %v3392_v39, %v12533_v34  ;;  %v2234_v30 = vand.u32 3, %v2233_v58  ;;  %v2240_v32 = vxor.u32 2147483648, %v16734_v25  ;;  %v3367_v7 = vmul.f32 %v3366_v44, %v3364_v43 }
 0x41e   : > { %vm2232_vm12 = vweird.f32 %v16726_v12  ;;  %v2545_v61 = vadd.s32 3, %v2541_v17  ;;  %v2549_v48 = vxor.u32 2147483648, %v13015_v62  ;;  %v13437_v27 = vsub.s32 %v3032_v19, %v3035_v13 }
 0x41f   : > { %v11326_v24 = vpack.c.bf16 %v13432_v33, %v13424_v49  ;;  %vm2235_vm15 = vcmp.lt.s32.totalorder %v2234_v30, 2  ;;  %v2552_v36 = vxor.u32 2147483648, %v12945_v47  ;;  %v3368_v2 = vxor.u32 2147483648, %v3367_v7 }
 0x420   : > { %vm2236_vm3 = vcmp.eq.s32.totalorder %v2234_v30, 0  ;;  %vm2239_vm4 = vcmp.eq.s32.totalorder %v2234_v30, 2  ;;  %v2546_v34 = vand.u32 3, %v2545_v61  ;;  %v3038_v57 = vsub.s32 0, %v13437_v27 }
 0x421   : > { %11327 = vmatprep.subr.bf16.mxu0 %v11326_v24  ;;  %v2238_v54 = vsel %vm2236_vm3, %v16734_v25, %v2237_v29  ;;  %v2241_v3 = vsel %vm2239_vm4, %v2240_v32, %v16732_v38  ;;  %v3416_v19 = vadd.s32 4294967293, %v16735_v5  ;;  %v3369_v53 = vsel %vm3286_vm7, %v3368_v2, %v3367_v7  ;;  %v16739_v25 = vld [vmem:[#allocation16_spill] sm:$0xff] }
 0x422   : > { %v3058_v50 = vsub.s32 4, %v3034_v6  ;;  %v2242_v56 = vsel %vm2235_vm15, %v2238_v54, %v2241_v3  ;;  %vm2548_vm6 = vcmp.eq.s32.totalorder %v2546_v34, 0  ;;  %11932 = vsinq.f32 %v13382_v41  ;;  %v13453_v15 = vpop.eup %11930  ;;  %v16741_v24 = vld [vmem:[#allocation20_spill] sm:$0xff] }
 0x423   : > { %v10754_v10 = vmin.u32 %v3038_v57, %v13437_v27  ;;  %v2243_v22 = vsel %vm2232_vm12, nan, %v2242_v56  ;;  %v2550_v28 = vsel %vm2548_vm6, %v12945_v47, %v2549_v48  ;;  %v13458_v39 = vsel %vm13419_vm5, %v13005_v42, %v3369_v53  ;;  %v16742_v57 = vld [vmem:[#allocation12_spill] sm:$0xff]  ;;  %v16751_v53 = vld [vmem:[#allocation18_spill] sm:$0xff] }
 0x424   : > { %v3028_v58 = vadd.s32 %v13358_v14, %v13368_v63  ;;  %vm2551_vm7 = vcmp.eq.s32.totalorder %v2546_v34, 2  ;;  %v3388_v43 = vmul.f32 %v2243_v22, %v2243_v22  ;;  %vm2547_vm9 = vcmp.lt.s32.totalorder %v2546_v34, 2 }
 0x425   : > { %v3040_v41 = vclz %v10754_v10  ;;  %v2553_v44 = vsel %vm2551_vm7, %v2552_v36, %v13015_v62  ;;  %vm3419_vm2 = vcmp.ge.s32.totalorder %v3416_v19, 0  ;;  %v13465_v47 = vsel %vm2974_vm14, %v3058_v50, %v3034_v6  ;;  %v16737_v62 = vld [vmem:[#allocation6_spill] sm:$0xff] }
 0x426   : > { %vm2544_vm10 = vweird.f32 %v12518_v16  ;;  %v2554_v38 = vsel %vm2547_vm9, %v2550_v28, %v2553_v44  ;;  %v2954_v29 = vsub.s32 4, %v12935_v23  ;;  %11934 = vsinq.f32 %v13458_v39 }
 0x427   : > { %v10755_v45 = vadd.s32 4294967294, %v3040_v41  ;;  %v2555_v14 = vsel %vm2544_vm10, nan, %v2554_v38  ;;  %v3400_v63 = vadd.f32 %v3388_v43, %v16726_v12  ;;  %v16736_v13 = vmov 0.0  }
 0x428   : > { %v3391_v17 = vmul.f32 %v2555_v14, %v2555_v14  ;;  %v13472_v30 = vsel %vm3419_vm2, 1.0, %v16736_v13  ;;  %vm16738_vm12 = vcmp.lt.s32.totalorder %v16737_v62, 0  ;;  %v3266_v32 = vsub.s32 4, %v16739_v25  ;;  %v16745_v14 = vld [vmem:[#allocation13_spill] sm:$0xff] }
 0x429   : > { %v2955_v6 = vsel %vm16738_vm12, %v2954_v29, %v12935_v23  ;;  %vm10756_vm15 = vcmp.lt.s32.totalorder %v10755_v45, 0  ;;  %vm2960_vm3 = vweird.f32 %v16737_v62  ;;  %v2965_v48 = vxor.u32 2147483648, %v13176_v8 }
 0x42a   : > { %v2957_v61 = vsel %vm13051_vm0, 0, %v2955_v6  ;;  %v2968_v12 = vxor.u32 2147483648, %v16741_v24  ;;  %v3043_v36 = vsel %vm10756_vm15, 0, %v10755_v45  ;;  %v3403_v2 = vadd.f32 %v3391_v17, %v12518_v16 }
 0x42b   : > { %v2961_v34 = vadd.s32 3, %v2957_v61  ;;  %vm16743_vm4 = vcmp.lt.s32.totalorder %v16742_v57, 0  ;;  %v3044_v54 = vsub.s32 32, %v3043_v36  ;;  %v3048_v3 = vsub.s32 4294967266, %v3043_v36 }
 0x42c   : > { %v3267_v23 = vsel %vm16743_vm4, %v3266_v32, %v16739_v25  ;;  %v3434_v19 = vmul.f32 %v13472_v30, %v3400_v63  ;;  %v3437_v56 = vmul.f32 %v13472_v30, %v3403_v2  ;;  %vm3272_vm0 = vweird.f32 %v16742_v57  ;;  %v13493_v28 = vpop.eup %11932  ;;  %v16746_v25 = vld [vmem:[#allocation5_spill] sm:$0xff]  ;;  %v16747_v32 = vld [vmem:[#allocation19_spill] sm:$0xff] }
 0x42d   : > { %v3269_v50 = vsel %vm13219_vm1, 0, %v3267_v23  ;;  %v2962_v10 = vand.u32 3, %v2961_v34  ;;  %v3277_v16 = vxor.u32 2147483648, %v13319_v4  ;;  %v3045_v43 = vshll.u32 %v13437_v27, %v3043_v36 }
 0x42e   : > { %v3273_v22 = vadd.s32 3, %v3269_v50  ;;  %v3046_v41 = vshrl.u32 %v3028_v58, %v3044_v54  ;;  %v3049_v44 = vadd.s32 127, %v3048_v3  ;;  %v3280_v38 = vxor.u32 2147483648, %v13301_v9 }
 0x42f   : > { %v13497_v29 = vpack.i.bf16 %v3437_v56, %v3434_v19  ;;  %v11328_v45 = vpack.c.bf16 %v3437_v56, %v3434_v19  ;;  %vm2964_vm1 = vcmp.eq.s32.totalorder %v2962_v10, 0  ;;  %vm2859_vm6 = vcmp.lt.s32.totalorder %v16745_v14, 2 }
 0x430   : > { %v3047_v63 = vor.u32 %v3046_v41, %v3045_v43  ;;  %v3050_v17 = vshll.u32 %v3049_v44, 23  ;;  %v2966_v6 = vsel %vm2964_vm1, %v16741_v24, %v2965_v48  ;;  %vm2967_vm7 = vcmp.eq.s32.totalorder %v2962_v10, 2  ;;  %v13506_v61 = vpop.eup %11934  ;;  %v16752_v43 = vld [vmem:[#allocation8_spill] sm:$0xff]  ;;  %v16754_v44 = vld [vmem:[#allocation15_spill] sm:$0xff] }
 0x431   : > { %vm2856_vm9 = vweird.f32 %v16746_v25  ;;  %11790 = vrot.lane.b32.xlu1 %v13497_v29, %s12097_s25  ;;  %11329 = vmatpush1.bf16.msra.mxu0 %v11328_v45  ;;  %vm2963_vm2 = vcmp.lt.s32.totalorder %v2962_v10, 2  ;;  %v2969_v27 = vsel %vm2967_vm7, %v2968_v12, %v13176_v8  ;;  %v3274_v58 = vand.u32 3, %v3273_v22 }
 0x432   : > { %v2861_v7 = vxor.u32 2147483648, %v16747_v32  ;;  %v16748_v36 = vand.u32 2147483647, %v13128_v55  ;;  %v3051_v48 = vor.u32 4788187, %v3050_v17  ;;  %v3054_v24 = vcvt.s32.f32 %v3047_v63  ;;  %v16757_v17 = vld [vmem:[#allocation22_spill] sm:$0xff] }
 0x433   : > { %v2970_v34 = vsel %vm2963_vm2, %v2966_v6, %v2969_v27  ;;  %vm2860_vm12 = vcmp.eq.s32.totalorder %v16745_v14, 0  ;;  %vm3276_vm15 = vcmp.eq.s32.totalorder %v3274_v58, 0  ;;  %vm3279_vm4 = vcmp.eq.s32.totalorder %v3274_v58, 2 }
 0x434   : > { %vm13510_vm10 = vcmp.le.f32.partialorder %v16748_v36, 0.7853982  ;;  %v2971_v23 = vsel %vm2960_vm3, nan, %v2970_v34  ;;  %vm2863_vm1 = vcmp.eq.s32.totalorder %v16745_v14, 2  ;;  %v3052_v8 = vand.u32 2147483647, %v3051_v48 }
 0x435   : > { %vm3275_vm7 = vcmp.lt.s32.totalorder %v3274_v58, 2  ;;  %v3278_v12 = vsel %vm3276_vm15, %v13301_v9, %v3277_v16  ;;  %v3281_v54 = vsel %vm3279_vm4, %v3280_v38, %v13319_v4  ;;  %v3395_v19 = vmul.f32 %v2971_v23, %v2971_v23  ;;  %v16756_v16 = vld [vmem:[#allocation23_spill] sm:$0xff] }
 0x436   : > { %v3282_v3 = vsel %vm3275_vm7, %v3278_v12, %v3281_v54  ;;  %v2862_v50 = vsel %vm2860_vm12, %v16751_v53, %v2861_v7  ;;  %v2864_v56 = vxor.u32 2147483648, %v16751_v53  ;;  %v3055_v10 = vmul.f32 %v3054_v24, %v3052_v8 }
 0x437   : > { %v3283_v22 = vsel %vm3272_vm0, nan, %v3282_v3  ;;  %vm3168_vm3 = vweird.f32 %v16752_v43  ;;  %v16755_v45 = vsel %vm13106_vm13, 0, %v16754_v44  ;;  %v3173_v38 = vxor.u32 2147483648, %v16756_v16 }
 0x438   : > { %v3169_v63 = vadd.s32 3, %v16755_v45  ;;  %v3398_v9 = vmul.f32 %v3283_v22, %v3283_v22  ;;  %v2865_v4 = vsel %vm2863_vm1, %v2864_v56, %v16747_v32  ;;  %v3176_v6 = vxor.u32 2147483648, %v16757_v17 }
 0x439   : > { %v3056_v27 = vxor.u32 2147483648, %v3055_v10  ;;  %v2866_v58 = vsel %vm2859_vm6, %v2862_v50, %v2865_v4  ;;  %v2749_v36 = vsel %vm13251_vm11, 0, %v13285_v46  ;;  %v13538_v48 = vadd.f32 %v3395_v19, %v16737_v62 }
 0x43a   : > { %v3170_v7 = vand.u32 3, %v3169_v63  ;;  %v13541_v24 = vadd.f32 %v3398_v9, %v16742_v57  ;;  %v2867_v32 = vsel %vm2856_vm9, nan, %v2866_v58  ;;  %v2753_v34 = vadd.s32 3, %v2749_v36 }
 0x43b   : > { %v3057_v23 = vsel %vm2974_vm14, %v3056_v27, %v3055_v10  ;;  %v3394_v8 = vmul.f32 %v2867_v32, %v2867_v32  ;;  %v2757_v3 = vxor.u32 2147483648, %v13332_v31  ;;  %v2760_v19 = vxor.u32 2147483648, %v13328_v0 }
 0x43c   : > { %vm3171_vm13 = vcmp.lt.s32.totalorder %v3170_v7, 2  ;;  %vm3172_vm0 = vcmp.eq.s32.totalorder %v3170_v7, 0  ;;  %vm3175_vm6 = vcmp.eq.s32.totalorder %v3170_v7, 2  ;;  %v3060_v59 = vsel %vm13510_vm10, %v13128_v55, %v3057_v23 }
 0x43d   : > { %v11330_v46 = vpack.c.bf16 %v13541_v24, %v13538_v48  ;;  %v3174_v62 = vsel %vm3172_vm0, %v16757_v17, %v3173_v38  ;;  %v3177_v57 = vsel %vm3175_vm6, %v3176_v6, %v16756_v16  ;;  %11936 = vcosq.f32 %v3060_v59 }
 0x43e   : > { %v3178_v14 = vsel %vm3171_vm13, %v3174_v62, %v3177_v57  ;;  %v2754_v12 = vand.u32 3, %v2753_v34  ;;  %11938 = vsinq.f32 %v3060_v59  ;;  %v3406_v50 = vadd.f32 %v3394_v8, %v16746_v25 }
 0x43f   : > { %11331 = vmatprep.subr.bf16.mxu0 %v11330_v46  ;;  %v3179_v54 = vsel %vm3168_vm3, nan, %v3178_v14  ;;  %11940 = vcosq.f32 %v13458_v39  ;;  %v13562_v10 = vadd.s32 256, %v16735_v5  ;;  %v2437_v22 = vsel %vm13339_vm8, 0, %v13291_v37  ;;  %v10774_v14 = vld [vmem:[%s16500_s3 + $0x38] sm:$0xff] }
 0x440   : > { %v3397_v53 = vmul.f32 %v3179_v54, %v3179_v54  ;;  %vm2756_vm11 = vcmp.eq.s32.totalorder %v2754_v12, 0  ;;  %vm2759_vm14 = vcmp.eq.s32.totalorder %v2754_v12, 2  ;;  %vm2752_vm9 = vweird.f32 %v12981_v52 }
 0x441   : > { %v2758_v56 = vsel %vm2756_vm11, %v13328_v0, %v2757_v3  ;;  %16758 = vst [vmem:[#allocation4_spill] sm:$0xff] %v13562_v10  ;;  %vm2755_vm2 = vcmp.lt.s32.totalorder %v2754_v12, 2  ;;  %v2761_v39 = vsel %vm2759_vm14, %v2760_v19, %v13332_v31  ;;  %v13571_v25 = vmul.f32 %v13472_v30, %v3406_v50 }
 0x442   : > { %v3409_v41 = vadd.f32 %v3397_v53, %v16752_v43  ;;  %v2762_v44 = vsel %vm2755_vm2, %v2758_v56, %v2761_v39  ;;  %v3418_v0 = vadd.s32 4294967293, %v13562_v10  ;;  %v2441_v45 = vadd.s32 3, %v2437_v22 }
 0x443   : > { %v2763_v9 = vsel %vm2752_vm9, nan, %v2762_v44  ;;  %v2445_v37 = vxor.u32 2147483648, %v13493_v28  ;;  %v2448_v1 = vxor.u32 2147483648, %v13453_v15  ;;  %v3061_v31 = vsel %vm13510_vm10, 0, %v13465_v47  ;;  %v10773_v47 = vld [vmem:[%s16500_s3 + $0x30] sm:$0xff] }
 0x444   : > { %v13575_v63 = vmul.f32 %v13472_v30, %v3409_v41  ;;  %v3393_v43 = vmul.f32 %v2763_v9, %v2763_v9  ;;  %vm3424_vm8 = vcmp.lt.s32.totalorder %v3418_v0, 256  ;;  %v2442_v4 = vand.u32 3, %v2441_v45 }
 0x445   : > { %v13585_v38 = vsel %vm3424_vm8, 1.0, %v16736_v13  ;;  %vm3452_vm12 = vcmask 261120   ;;  %v3065_v30 = vadd.s32 3, %v3061_v31  ;;  %v3373_v7 = vsel %vm13419_vm5, 0, %v13407_v40 }
 0x446   : > { %v11332_v16 = vpack.c.bf16 %v13575_v63, %v13571_v25  ;;  %v3405_v17 = vadd.f32 %v3393_v43, %v12981_v52  ;;  %vm2443_vm15 = vcmp.lt.s32.totalorder %v2442_v4, 2  ;;  %vm2444_vm4 = vcmp.eq.s32.totalorder %v2442_v4, 0 }
 0x447   : > { %vm2447_vm1 = vcmp.eq.s32.totalorder %v2442_v4, 2  ;;  %v11937_v6 = vpop.eup %11936  ;;  %v2446_v27 = vsel %vm2444_vm4, %v13453_v15, %v2445_v37  ;;  %v3066_v58 = vand.u32 3, %v3065_v30  ;;  %vm2440_vm10 = vweird.f32 %v13001_v51 }
 0x448   : > { %11333 = vmatpush1.bf16.msra.mxu0 %v11332_v16  ;;  %v2449_v2 = vsel %vm2447_vm1, %v2448_v1, %v13493_v28  ;;  %v11939_v36 = vpop.eup %11938  ;;  %v3439_v52 = vmul.f32 %v13585_v38, %v3405_v17  ;;  %v3072_v34 = vxor.u32 2147483648, %v11937_v6  ;;  %vm3064_vm7 = vweird.f32 %v13128_v55 }
 0x449   : > { %v2450_v32 = vsel %vm2443_vm15, %v2446_v27, %v2449_v2  ;;  %v11941_v23 = vpop.eup %11940  ;;  %vm3068_vm3 = vcmp.eq.s32.totalorder %v3066_v58, 0  ;;  %v3069_v28 = vxor.u32 2147483648, %v11939_v36  ;;  %vm3071_vm13 = vcmp.eq.s32.totalorder %v3066_v58, 2 }
 0x44a   : > { %v2451_v15 = vsel %vm2440_vm10, nan, %v2450_v32  ;;  %v11794_v59 = vpack.i.bf16 %v3439_v52, %v13432_v33  ;;  %v3377_v40 = vadd.s32 3, %v3373_v7  ;;  %vm3067_vm5 = vcmp.lt.s32.totalorder %v3066_v58, 2 }
 0x44b   : > { %v3390_v46 = vmul.f32 %v2451_v15, %v2451_v15  ;;  %10775 = vmatmul.mubr.msk.f32.vlgmr.msra.gmra.mrb[2].mxu0 %vm3452_vm12, %v10773_v47  ;;  %v3070_v20 = vsel %vm3068_vm3, %v11937_v6, %v3069_v28  ;;  %v3073_v62 = vsel %vm3071_vm13, %v3072_v34, %v11939_v36  ;;  %v3381_v57 = vxor.u32 2147483648, %v13506_v61 }
 0x44c   : > { %3529 = vmatprep.mubr.f32.mxu0 %v16736_v13  ;;  %11795 = vrot.lane.b32.xlu0 %v11794_v59, %s12097_s25  ;;  %v3074_v8 = vsel %vm3067_vm5, %v3070_v20, %v3073_v62  ;;  %v3378_v12 = vand.u32 3, %v3377_v40  ;;  %v3384_v54 = vxor.u32 2147483648, %v11941_v23  ;;  %vm3376_vm14 = vweird.f32 %v13005_v42 }
 0x44d   : > { %v3402_v33 = vadd.f32 %v3390_v46, %v13001_v51  ;;  %v3075_v3 = vsel %vm3064_vm7, nan, %v3074_v8  ;;  %vm16759_vm9 = vcmask 1039360   ;;  %vm16767_vm3 = vcmask 1031168  }
 0x44e   : > { %v3396_v53 = vmul.f32 %v3075_v3, %v3075_v3  ;;  %vm3380_vm0 = vcmp.eq.s32.totalorder %v3378_v12, 0  ;;  %vm3379_vm6 = vcmp.lt.s32.totalorder %v3378_v12, 2  ;;  %vm3383_vm11 = vcmp.eq.s32.totalorder %v3378_v12, 2  ;;  %vm16760_vm2 = vmmov %vm16759_vm9  ;;  %v10772_v12 = vld [vmem:[%s16500_s3 + $0x18] sm:$0xff] }
 0x44f   : > { %v3436_v19 = vmul.f32 %v13585_v38, %v3402_v33  ;;  %10776 = vmatmul.mubr.msk.f32.gmra.mrb[4].mxu0 %vm3452_vm12, %v10774_v14  ;;  %v3382_v50 = vsel %vm3380_vm0, %v11941_v23, %v3381_v57  ;;  %v3385_v41 = vsel %vm3383_vm11, %v3384_v54, %v13506_v61  ;;  %v11814_v61 = vpack.i.bf16 %v13575_v63, %v13571_v25  ;;  %vm16761_vm8 = vmmov %vm16760_vm2  ;;  %v10771_v33 = vld [vmem:[%s16500_s3 + $0x10] sm:$0xff] }
 0x450   : > { %11182 = vmatprep.mubr.msk.f32.mxu0 %vm3452_vm12, %v10773_v47  ;;  %v3408_v22 = vadd.f32 %v3396_v53, %v13128_v55  ;;  %v3386_v39 = vsel %vm3379_vm6, %v3382_v50, %v3385_v41  ;;  %vm16762_vm15 = vmmov %vm16760_vm2 }
 0x451   : > { %v11799_v56 = vpack.i.bf16 %v3436_v19, %v13424_v49  ;;  %v11334_v51 = vpack.c.bf16 %v3439_v52, %v3436_v19  ;;  %v3387_v0 = vsel %vm3376_vm14, nan, %v3386_v39  ;;  %vm16763_vm4 = vmmov %vm16760_vm2 }
 0x452   : > { %v3442_v44 = vmul.f32 %v13585_v38, %v3408_v22  ;;  %v3399_v45 = vmul.f32 %v3387_v0, %v3387_v0  ;;  %vm16764_vm1 = vmmov %vm16760_vm2 }
 0x453   : > { %11800 = vrot.lane.b32.xlu1 %v11799_v56, %s12097_s25  ;;  %11335 = vmatprep.subr.bf16.mxu0 %v11334_v51  ;;  %vm16765_vm10 = vmmov %vm16764_vm1 }
 0x454   : > { %11337 = vmatpush3.bf16.msra.mxu0 %v11334_v51  ;;  %v11809_v9 = vpack.i.bf16 %v3442_v44, %v13538_v48  ;;  %v3411_v49 = vadd.f32 %v3399_v45, %v13005_v42  ;;  %v3826_v42 = vld [vmem:[%s16501_s4 + $0x8] sm:$0xff]  ;;  %v3825_v48 = vld [vmem:[%s16501_s4] sm:$0xff]  ;;  %vm16766_vm7 = vmmov %vm16764_vm1 }
 0x455   : > { %v10783_v51 = vld [vmem:[%s16500_s3 + $0x20] sm:$0xff]  ;;  %vm16768_vm13 = vmmov %vm16767_vm3 }
 0x456   : > { %11810 = vrot.lane.b32.xlu0 %v11809_v9, %s12097_s25  ;;  %v3445_v55 = vmul.f32 %v13585_v38, %v3411_v49  ;;  %vm16769_vm5 = vmmov %vm16767_vm3 }
 0x457   : > { %vm16770_vm0 = vmmov %vm16767_vm3 }
 0x458   : > { %v11804_v37 = vpack.i.bf16 %v3445_v55, %v13541_v24  ;;  %v11338_v1 = vpack.c.bf16 %v3445_v55, %v3442_v44  ;;  %vm16771_vm6 = vmmov %vm16770_vm0 }
 0x459   : > { %vm16772_vm11 = vmmov %vm16770_vm0 }
 0x45a   : > { %11815 = vrot.lane.b32.xlu0 %v11814_v61, %s12097_s25  ;;  %11805 = vrot.lane.b32.xlu1 %v11804_v37, %s12097_s25  ;;  %vm16773_vm14 = vmmov %vm16770_vm0 }
 0x45b   : > { %11339 = vmatprep.subr.bf16.mxu0 %v11338_v1 }
 0x45c   : > { %11341 = vmatpush3.bf16.msra.mxu0 %v11338_v1  ;;  %v10784_v1 = vld [vmem:[%s16500_s3 + $0x28] sm:$0xff] }
 0x45e   : > { %11825 = vrot.lane.b32.xlu0 %v11794_v59, %s12098_s26  ;;  %11820 = vrot.lane.b32.xlu1 %v11799_v56, %s12098_s26 }
 0x45f   : > { %11183 = vmatmul.mubr.msk.f32.vlgmr.msra.gmra.mrb[6].mxu0 %vm3452_vm12, %v10774_v14 }
 0x460   : > { %3737 = vmatprep.mubr.f32.mxu0 %v16736_v13 }
 0x462   : > { %11840 = vrot.lane.b32.xlu0 %v11809_v9, %s12098_s26  ;;  %11830 = vrot.lane.b32.xlu1 %v13497_v29, %s12098_s26 }
 0x466   : > { %11845 = vrot.lane.b32.xlu0 %v11814_v61, %s12098_s26  ;;  %11835 = vrot.lane.b32.xlu1 %v11804_v37, %s12098_s26 }
 0x46a   : > { %3834 = vperm.xlu0 %11787, %v3826_v42   ;;  %3829 = vperm.xlu1 %11788, %v3825_v48  }
 0x4a3   : > { %v11791_v25 = vpop.permute.xlu1 %11790 }
 0x4a4   : > { %v11793_v4 = vunpack.i.h.bf16 %v11791_v25  ;;  %v11792_v29 = vunpack.i.l.bf16 %v11791_v25 }
 0x4be   : > { %v11796_v24 = vpop.permute.xlu0 %11795 }
 0x4bf   : > { %v11798_v63 = vunpack.i.h.bf16 %v11796_v24  ;;  %v11797_v43 = vunpack.i.l.bf16 %v11796_v24 }
 0x4c1   : > { %v3649_v16 = vsel %vm16759_vm9, %v11793_v4, %v11797_v43  ;;  %v3650_v17 = vsel %vm16760_vm2, %v11797_v43, %v11798_v63  ;;  %vm16774_vm9 = vmmov %vm16770_vm0 }
 0x4c5   : > { %v11801_v31 = vpop.permute.xlu1 %11800 }
 0x4c6   : > { %v11803_v38 = vunpack.i.h.bf16 %v11801_v31  ;;  %v11802_v30 = vunpack.i.l.bf16 %v11801_v31 }
 0x4c8   : > { %v3647_v6 = vsel %vm16761_vm8, %v11792_v29, %v11802_v30  ;;  %v3648_v27 = vsel %vm16762_vm15, %v11802_v30, %v11803_v38  ;;  %v11811_v47 = vpop.permute.xlu0 %11810  ;;  %v11350_v14 = vpack.c.bf16 %v11798_v63, %v11803_v38 }
 0x4c9   : > { %v11344_v2 = vpack.c.bf16 %v3649_v16, %v3647_v6  ;;  %v11342_v58 = vpack.c.bf16 %v3650_v17, %v3648_v27  ;;  %v11813_v7 = vunpack.i.h.bf16 %v11811_v47  ;;  %v11812_v36 = vunpack.i.l.bf16 %v11811_v47  ;;  %v3843_v27 = vld [vmem:[%s16500_s3] sm:$0xff]  ;;  %v3844_v47 = vld [vmem:[%s16500_s3 + $0x8] sm:$0xff] }
 0x4cb   : > { %11343 = vmatprep.subr.bf16.mxu0 %v11342_v58  ;;  %v3652_v59 = vsel %vm16763_vm4, %v11812_v36, %v11813_v7 }
 0x4cc   : > { %11345 = vmatpush1.bf16.msra.mxu0 %v11344_v2  ;;  %v11816_v52 = vpop.permute.xlu0 %11815  ;;  %v11806_v32 = vpop.permute.xlu1 %11805 }
 0x4cd   : > { %v11818_v34 = vunpack.i.h.bf16 %v11816_v52  ;;  %v11817_v23 = vunpack.i.l.bf16 %v11816_v52  ;;  %v11808_v15 = vunpack.i.h.bf16 %v11806_v32  ;;  %v11807_v28 = vunpack.i.l.bf16 %v11806_v32 }
 0x4cf   : > { %v3651_v46 = vsel %vm16764_vm1, %v11817_v23, %v11812_v36  ;;  %v3653_v40 = vsel %vm16765_vm10, %v11818_v34, %v11807_v28  ;;  %v3654_v20 = vsel %vm16766_vm7, %v11807_v28, %v11808_v15  ;;  %v11354_v8 = vpack.c.bf16 %v11808_v15, %v11813_v7 }
 0x4d0   : > { %v11348_v62 = vpack.c.bf16 %v3653_v40, %v3651_v46  ;;  %v11346_v57 = vpack.c.bf16 %v3654_v20, %v3652_v59  ;;  %v11821_v54 = vpop.permute.xlu1 %11820  ;;  %v11826_v3 = vpop.permute.xlu0 %11825 }
 0x4d1   : > { %v11828_v50 = vunpack.i.h.bf16 %v11826_v3  ;;  %v11827_v56 = vunpack.i.l.bf16 %v11826_v3  ;;  %v11823_v22 = vunpack.i.h.bf16 %v11821_v54  ;;  %v11822_v41 = vunpack.i.l.bf16 %v11821_v54 }
 0x4d2   : > { %11347 = vmatprep.subr.bf16.mxu0 %v11346_v57 }
 0x4d3   : > { %11349 = vmatpush1.bf16.msra.mxu0 %v11348_v62  ;;  %v4033_v45 = vsel %vm16767_vm3, %v11827_v56, %v11828_v50  ;;  %v4031_v42 = vsel %vm16768_vm13, %v11822_v41, %v11823_v22  ;;  %v11382_v6 = vpack.c.bf16 %v11828_v50, %v11823_v22 }
 0x4d4   : > { %11351 = vmatprep.subr.bf16.mxu0 %v11350_v14  ;;  %v11831_v19 = vpop.permute.xlu1 %11830  ;;  %v11841_v53 = vpop.permute.xlu0 %11840  ;;  %v11374_v48 = vpack.c.bf16 %v4033_v45, %v4031_v42 }
 0x4d5   : > { %v11833_v44 = vunpack.i.h.bf16 %v11831_v19  ;;  %v11832_v0 = vunpack.i.l.bf16 %v11831_v19  ;;  %v11843_v55 = vunpack.i.h.bf16 %v11841_v53  ;;  %v11842_v61 = vunpack.i.l.bf16 %v11841_v53 }
 0x4d6   : > { %10779 = vmatmul.mubr.msk.f32.vlgmr.msra.gmra.mrb[2].mxu0 %vm3452_vm12, %v10771_v33 }
 0x4d7   : > { %11353 = vmatpush3.bf16.msra.mxu0 %v11350_v14  ;;  %3743 = vmatprep.mubr.f32.mxu0 %v16736_v13  ;;  %v4030_v24 = vsel %vm16769_vm5, %v11832_v0, %v11822_v41  ;;  %v4032_v25 = vsel %vm16770_vm0, %v11833_v44, %v11827_v56  ;;  %v4035_v4 = vsel %vm16771_vm6, %v11842_v61, %v11843_v55 }
 0x4d8   : > { %11355 = vmatprep.subr.bf16.mxu0 %v11354_v8  ;;  %v11836_v39 = vpop.permute.xlu1 %11835  ;;  %v11846_v37 = vpop.permute.xlu0 %11845  ;;  %v11376_v31 = vpack.c.bf16 %v4032_v25, %v4030_v24 }
 0x4d9   : > { %v11838_v9 = vunpack.i.h.bf16 %v11836_v39  ;;  %v11837_v49 = vunpack.i.l.bf16 %v11836_v39  ;;  %v11848_v63 = vunpack.i.h.bf16 %v11846_v37  ;;  %v11847_v43 = vunpack.i.l.bf16 %v11846_v37 }
 0x4da   : > { %10780 = vmatmul.mubr.msk.f32.gmra.mrb[4].mxu0 %vm3452_vm12, %v10772_v12 }
 0x4db   : > { %11357 = vmatpush3.bf16.msra.mxu0 %v11354_v8  ;;  %11193 = vmatprep.mubr.msk.f32.mxu0 %vm3452_vm12, %v10771_v33  ;;  %v4037_v29 = vsel %vm16772_vm11, %v11837_v49, %v11838_v9  ;;  %v4036_v16 = vsel %vm16773_vm14, %v11848_v63, %v11837_v49  ;;  %v4034_v38 = vsel %vm16774_vm9, %v11847_v43, %v11842_v61 }
 0x4dc   : > { %11359 = vmatprep.subr.bf16.mxu0 %v11342_v58  ;;  %v11378_v30 = vpack.c.bf16 %v4037_v29, %v4035_v4  ;;  %v11380_v17 = vpack.c.bf16 %v4036_v16, %v4034_v38 }
 0x4de   : > { %11194 = vmatmul.mubr.msk.f32.vlgmr.msra.gmra.mrb[6].mxu0 %vm3452_vm12, %v10772_v12 }
 0x4df   : > { %11361 = vmatpush1.bf16.msra.mxu0 %v11344_v2  ;;  %3918 = vmatprep.mubr.f32.mxu0 %v16736_v13  ;;  %v11386_v2 = vpack.c.bf16 %v11838_v9, %v11843_v55 }
 0x4e0   : > { %11363 = vmatprep.subr.bf16.mxu0 %v11346_v57 }
 0x4e3   : > { %11365 = vmatpush1.bf16.msra.mxu0 %v11348_v62 }
 0x4e4   : > { %11367 = vmatprep.subr.bf16.mxu0 %v11350_v14 }
 0x4e6   : > { %10785 = vmatmul.mubr.msk.f32.vlgmr.msra.gmra.mrb[8].mxu0 %vm3452_vm12, %v10783_v51 }
 0x4e7   : > { %11369 = vmatpush3.bf16.msra.mxu0 %v11350_v14  ;;  %3924 = vmatprep.mubr.f32.mxu0 %v16736_v13 }
 0x4e8   : > { %11371 = vmatprep.subr.bf16.mxu0 %v11354_v8 }
 0x4e9   : > { %v13695_v58 = vpop.permute.xlu1 %3829  ;;  %v13705_v15 = vpop.permute.xlu0 %3834 }
 0x4ea   : > { %10786 = vmatmul.mubr.msk.f32.gmra.mrb[10].mxu0 %vm3452_vm12, %v10784_v1 }
 0x4eb   : > { %11373 = vmatpush3.bf16.msra.mxu0 %v11354_v8  ;;  %11204 = vmatprep.mubr.msk.f32.mxu0 %vm3452_vm12, %v10783_v51 }
 0x4ec   : > { %11375 = vmatprep.subr.bf16.mxu0 %v11374_v48 }
 0x4ee   : > { %11205 = vmatmul.mubr.msk.f32.vlgmr.msra.gmra.mrb[12].mxu0 %vm3452_vm12, %v10784_v1 }
 0x4ef   : > { %11377 = vmatpush1.bf16.msra.mxu0 %v11376_v31  ;;  %4120 = vmatprep.mubr.f32.mxu0 %v16736_v13 }
 0x4f0   : > { %11379 = vmatprep.subr.bf16.mxu0 %v11378_v30 }
 0x4f3   : > { %11381 = vmatpush1.bf16.msra.mxu0 %v11380_v17 }
 0x4f4   : > { %11383 = vmatprep.subr.bf16.mxu0 %v11382_v6 }
 0x4f6   : > { %10789 = vmatmul.mubr.msk.f32.vlgmr.msra.gmra.mrb[8].mxu0 %vm3452_vm12, %v3843_v27 }
 0x4f7   : > { %11385 = vmatpush3.bf16.msra.mxu0 %v11382_v6  ;;  %4126 = vmatprep.mubr.f32.mxu0 %v16736_v13 }
 0x4f8   : > { %11387 = vmatprep.subr.bf16.mxu0 %v11386_v2 }
 0x4fa   : > { %10790 = vmatmul.mubr.msk.f32.gmra.mrb[10].mxu0 %vm3452_vm12, %v3844_v47 }
 0x4fb   : > { %11389 = vmatpush3.bf16.msra.mxu0 %v11386_v2  ;;  %11215 = vmatprep.mubr.msk.f32.mxu0 %vm3452_vm12, %v3843_v27 }
 0x4fe   : > { %11216 = vmatmul.mubr.msk.f32.vlgmr.msra.gmra.mrb[12].mxu0 %vm3452_vm12, %v3844_v47 }
 0x4ff   : > { %5614 = vmatprep.mubr.f32.mxu0 %v16736_v13 }
 0x5a9   : > { %v3739_v7 = vpop.f32.mrb[2].mxu0 }
 0x5aa   : > { %v13698_v36 = vadd.f32 %v13695_v58, %v3739_v7  ;;  %v3741_v52 = vpop.f32.mrb[3].mxu0 }
 0x5ab   : > { %v13701_v32 = vadd.f32 %v13695_v58, %v3741_v52 }
 0x5ac   : > { %16775 = vst [vmem:[#allocation7_spill] sm:$0xff] %v13698_v36  ;;  %v4214_v34 = vand.u32 2147483647, %v13698_v36  ;;  %v4217_v23 = vand.u32 2139095040, %v13698_v36 }
 0x5ad   : > { %16776 = vst [vmem:[#allocation10_spill] sm:$0xff] %v13701_v32  ;;  %v4318_v28 = vand.u32 2147483647, %v13701_v32  ;;  %v4321_v59 = vand.u32 2139095040, %v13701_v32  ;;  %v3745_v46 = vpop.f32.mrb[4].mxu0 }
 0x5ae   : > { %v4218_v40 = vshrl.u32 %v4217_v23, 23  ;;  %v4221_v20 = vand.u32 8388607, %v4214_v34  ;;  %v13712_v62 = vadd.f32 %v13705_v15, %v3745_v46  ;;  %v3747_v57 = vpop.f32.mrb[5].mxu0 }
 0x5af   : > { %v4322_v14 = vshrl.u32 %v4321_v59, 23  ;;  %v4325_v33 = vand.u32 8388607, %v4318_v28  ;;  %v13727_v45 = vadd.f32 %v13705_v15, %v3747_v57 }
 0x5b0   : > { %16777 = vst [vmem:[#allocation11_spill] sm:$0xff] %v13712_v62  ;;  %v10793_v8 = vadd.s32 4294967169, %v4218_v40  ;;  %v4526_v12 = vand.u32 2147483647, %v13712_v62  ;;  %v4529_v3 = vand.u32 2139095040, %v13712_v62  ;;  %v4222_v53 = vor.u32 8388608, %v4221_v20 }
 0x5b1   : > { %v10797_v54 = vadd.s32 4294967169, %v4322_v14  ;;  %v13718_v19 = vpop.f32.mrb[6].mxu0  ;;  %v4326_v56 = vor.u32 8388608, %v4325_v33 }
 0x5b2   : > { %v4224_v50 = vadd.s32 1, %v10793_v8  ;;  %v4530_v22 = vshrl.u32 %v4529_v3, 23  ;;  %v13722_v41 = vand.u32 8388607, %v4526_v12  ;;  %v13724_v39 = vpop.f32.mrb[7].mxu0  ;;  %v13729_v55 = vshll.u32 %v4222_v53, 8 }
 0x5b3   : > { %v4328_v51 = vadd.s32 1, %v10797_v54  ;;  %v13733_v42 = vshll.u32 %v4326_v56, 8 }
 0x5b4   : > { %vm4225_vm12 = vcmp.gt.s32.totalorder %v4224_v50, 0  ;;  %v10805_v0 = vadd.s32 4294967169, %v4530_v22  ;;  %v4534_v48 = vor.u32 8388608, %v13722_v41 }
 0x5b5   : > { %v4226_v44 = vsel %vm4225_vm12, %v4224_v50, 0  ;;  %vm4329_vm2 = vcmp.gt.s32.totalorder %v4328_v51, 0 }
 0x5b6   : > { %v4227_v9 = vshrl.u32 %v4226_v44, 5  ;;  %v4228_v49 = vand.u32 31, %v4226_v44  ;;  %v4330_v61 = vsel %vm4329_vm2, %v4328_v51, 0  ;;  %v13738_v43 = vadd.s32 1, %v10805_v0 }
 0x5b7   : > { %v13731_v37 = vshrl.u32 %v4330_v61, 5  ;;  %v4332_v1 = vand.u32 31, %v4330_v61 }
 0x5b8   : > { %v4229_v24 = vsub.s32 32, %v4228_v49  ;;  %v4231_v25 = vshll.u32 %v16689_v35, %v4228_v49  ;;  %v4234_v63 = vshll.u32 %v16684_v26, %v4228_v49  ;;  %v4237_v4 = vshll.u32 %v16685_v21, %v4228_v49 }
 0x5b9   : > { %v4240_v29 = vshll.u32 %v16686_v11, %v4228_v49  ;;  %v4243_v31 = vshll.u32 %v16687_v18, %v4228_v49  ;;  %vm4246_vm8 = vcmp.lt.s32.totalorder %v4227_v9, 1  ;;  %vm4247_vm15 = vcmp.lt.s32.totalorder %v4227_v9, 2 }
 0x5ba   : > { %v4232_v16 = vshrl.u32 %v16684_v26, %v4229_v24  ;;  %v4235_v38 = vshrl.u32 %v16685_v21, %v4229_v24  ;;  %v4238_v30 = vshrl.u32 %v16686_v11, %v4229_v24  ;;  %v4230_v17 = vshrl.u32 %v16689_v35, %v4229_v24 }
 0x5bb   : > { %v4241_v6 = vshrl.u32 %v16687_v18, %v4229_v24  ;;  %v4244_v27 = vshrl.u32 %v16690_v60, %v4229_v24  ;;  %vm4248_vm4 = vcmp.lt.s32.totalorder %v4227_v9, 3  ;;  %v4333_v52 = vsub.s32 32, %v4332_v1 }
 0x5bc   : > { %v4233_v2 = vor.u32 %v4232_v16, %v4231_v25  ;;  %v4236_v47 = vor.u32 %v4235_v38, %v4234_v63  ;;  %v4239_v7 = vor.u32 %v4238_v30, %v4237_v4  ;;  %vm4249_vm1 = vcmp.lt.s32.totalorder %v4227_v9, 4 }
 0x5bd   : > { %v4242_v23 = vor.u32 %v4241_v6, %v4240_v29  ;;  %v4245_v59 = vor.u32 %v4244_v27, %v4243_v31  ;;  %v4335_v46 = vshll.u32 %v16689_v35, %v4332_v1  ;;  %v4338_v3 = vshll.u32 %v16684_v26, %v4332_v1 }
 0x5be   : > { %v4250_v40 = vsel %vm4246_vm8, %v4230_v17, %v4233_v2  ;;  %v4251_v20 = vsel %vm4249_vm1, %v4239_v7, 2102212464  ;;  %v4254_v57 = vsel %vm4246_vm8, %v4233_v2, %v4236_v47  ;;  %v4258_v14 = vsel %vm4246_vm8, %v4236_v47, %v4239_v7 }
 0x5bf   : > { %v4252_v33 = vsel %vm4248_vm4, %v4236_v47, %v4251_v20  ;;  %v4255_v8 = vsel %vm4249_vm1, %v4242_v23, 920167782  ;;  %v4259_v54 = vsel %vm4249_vm1, %v4245_v59, 1326507024  ;;  %v4334_v56 = vshrl.u32 %v16689_v35, %v4333_v52 }
 0x5c0   : > { %v4256_v53 = vsel %vm4248_vm4, %v4239_v7, %v4255_v8  ;;  %v4260_v50 = vsel %vm4248_vm4, %v4242_v23, %v4259_v54  ;;  %v4336_v51 = vshrl.u32 %v16684_v26, %v4333_v52  ;;  %v4253_v22 = vsel %vm4247_vm15, %v4250_v40, %v4252_v33 }
 0x5c1   : > { %v4257_v44 = vsel %vm4247_vm15, %v4254_v57, %v4256_v53  ;;  %v4261_v0 = vsel %vm4247_vm15, %v4258_v14, %v4260_v50  ;;  %v4339_v49 = vshrl.u32 %v16685_v21, %v4333_v52  ;;  %v4341_v31 = vshll.u32 %v16685_v21, %v4332_v1 }
 0x5c2   : > { %v13764_v61 = vmul.u32.u64.low %v13729_v55, %v4261_v0  ;;  %v13765_v24 = vmul.u32.u64.high %v13729_v55, %v4261_v0, %v13764_v61  ;;  %v13768_v25 = vmul.u32.u64.low %v13729_v55, %v4257_v44  ;;  %v13769_v63 = vmul.u32.u64.high %v13729_v55, %v4257_v44, %v13768_v25 }
 0x5c3   : > { %v4337_v4 = vor.u32 %v4336_v51, %v4335_v46  ;;  %v4340_v29 = vor.u32 %v4339_v49, %v4338_v3  ;;  %v4342_v16 = vshrl.u32 %v16686_v11, %v4333_v52  ;;  %v4269_v9 = vmul.u32 %v13729_v55, %v4253_v22 }
 0x5c4   : > { %v4344_v38 = vshll.u32 %v16686_v11, %v4332_v1  ;;  %v4345_v30 = vshrl.u32 %v16687_v18, %v4333_v52  ;;  %v4348_v17 = vshrl.u32 %v16690_v60, %v4333_v52  ;;  %v4347_v27 = vshll.u32 %v16687_v18, %v4332_v1 }
 0x5c5   : > { %v4343_v6 = vor.u32 %v4342_v16, %v4341_v31  ;;  %vm4350_vm10 = vcmp.lt.s32.totalorder %v13731_v37, 1  ;;  %vm4351_vm7 = vcmp.lt.s32.totalorder %v13731_v37, 2  ;;  %vm4271_vm3 = vc.u32 %v13765_v24, %v13768_v25 }
 0x5c6   : > { %v4272_v2 = vadd.s32 1, %v13769_v63  ;;  %v4346_v47 = vor.u32 %v4345_v30, %v4344_v38  ;;  %vm4352_vm13 = vcmp.lt.s32.totalorder %v13731_v37, 3  ;;  %v4349_v55 = vor.u32 %v4348_v17, %v4347_v27 }
 0x5c7   : > { %vm4353_vm5 = vcmp.lt.s32.totalorder %v13731_v37, 4  ;;  %v4354_v7 = vsel %vm4350_vm10, %v4334_v56, %v4337_v4  ;;  %v4358_v52 = vsel %vm4350_vm10, %v4337_v4, %v4340_v29  ;;  %v4362_v46 = vsel %vm4350_vm10, %v4340_v29, %v4343_v6 }
 0x5c8   : > { %v4273_v23 = vsel %vm4271_vm3, %v4272_v2, %v13769_v63  ;;  %v4355_v1 = vsel %vm4353_vm5, %v4343_v6, 2102212464  ;;  %v4359_v59 = vsel %vm4353_vm5, %v4346_v47, 920167782  ;;  %v4363_v14 = vsel %vm4353_vm5, %v4349_v55, 1326507024 }
 0x5c9   : > { %v4274_v40 = vadd.s32 %v4273_v23, %v4269_v9  ;;  %v4356_v20 = vsel %vm4352_vm13, %v4340_v29, %v4355_v1  ;;  %v4360_v57 = vsel %vm4352_vm13, %v4343_v6, %v4359_v59  ;;  %v13787_v33 = vpop.f32.mrb[8].mxu0  ;;  %v4364_v54 = vsel %vm4352_vm13, %v4346_v47, %v4363_v14 }
 0x5ca   : > { %v4361_v8 = vsel %vm4351_vm7, %v4358_v52, %v4360_v57  ;;  %vm4537_vm0 = vcmp.gt.s32.totalorder %v13738_v43, 0  ;;  %v4633_v3 = vand.u32 2139095040, %v13727_v45  ;;  %v13793_v53 = vpop.f32.mrb[9].mxu0  ;;  %v4365_v56 = vsel %vm4351_vm7, %v4362_v46, %v4364_v54 }
 0x5cb   : > { %v4275_v50 = vadd.s32 536870912, %v4274_v40  ;;  %v13798_v51 = vmul.u32.u64.low %v13733_v42, %v4361_v8  ;;  %v13799_v22 = vmul.u32.u64.high %v13733_v42, %v4361_v8, %v13798_v51  ;;  %v4357_v44 = vsel %vm4351_vm7, %v4354_v7, %v4356_v20 }
 0x5cc   : > { %v13805_v0 = vmul.u32.u64.low %v13733_v42, %v4365_v56  ;;  %v13806_v49 = vmul.u32.u64.high %v13733_v42, %v4365_v56, %v13805_v0  ;;  %v4538_v61 = vsel %vm4537_vm0, %v13738_v43, 0  ;;  %v13815_v31 = vshll.u32 %v4534_v48, 8 }
 0x5cd   : > { %v13809_v63 = vshrl.u32 %v4275_v50, 30  ;;  %v4540_v4 = vand.u32 31, %v4538_v61  ;;  %v13811_v29 = vpop.f32.mrb[10].mxu0  ;;  %v16567_v16 = vand.u32 2147483647, %v13727_v45  ;;  %v4634_v9 = vshrl.u32 %v4633_v3, 23 }
 0x5ce   : > { %v13818_v37 = vpop.f32.mrb[11].mxu0  ;;  %v4373_v30 = vmul.u32 %v13733_v42, %v4357_v44  ;;  %v4376_v43 = vadd.s32 1, %v13799_v22  ;;  %vm4375_vm6 = vc.u32 %v13806_v49, %v13798_v51  ;;  %v4539_v6 = vshrl.u32 %v4538_v61, 5 }
 0x5cf   : > { %16778 = vst [vmem:[#allocation9_spill] sm:$0xff] %v13809_v63  ;;  %v4277_v38 = vshll.u32 %v13809_v63, 30  ;;  %v4541_v17 = vsub.s32 32, %v4540_v4  ;;  %v4543_v41 = vshll.u32 %v16689_v35, %v4540_v4  ;;  %v4546_v48 = vshll.u32 %v16684_v26, %v4540_v4 }
 0x5d0   : > { %v4377_v2 = vsel %vm4375_vm6, %v4376_v43, %v13799_v22  ;;  %v4549_v55 = vshll.u32 %v16685_v21, %v4540_v4  ;;  %v4552_v23 = vshll.u32 %v16686_v11, %v4540_v4  ;;  %v10809_v56 = vadd.s32 4294967169, %v4634_v9 }
 0x5d1   : > { %v13827_v27 = vsub.s32 %v4274_v40, %v4277_v38  ;;  %v4544_v47 = vshrl.u32 %v16684_v26, %v4541_v17  ;;  %v4378_v42 = vadd.s32 %v4377_v2, %v4373_v30  ;;  %v4547_v7 = vshrl.u32 %v16685_v21, %v4541_v17 }
 0x5d2   : > { %v4550_v52 = vshrl.u32 %v16686_v11, %v4541_v17  ;;  %v4553_v46 = vshrl.u32 %v16687_v18, %v4541_v17  ;;  %v4555_v40 = vshll.u32 %v16687_v18, %v4540_v4  ;;  %v4556_v8 = vshrl.u32 %v16690_v60, %v4541_v17 }
 0x5d3   : > { %v4280_v1 = vsub.s32 0, %v13827_v27  ;;  %v4545_v59 = vor.u32 %v4544_v47, %v4543_v41  ;;  %v4379_v20 = vadd.s32 536870912, %v4378_v42  ;;  %v4548_v57 = vor.u32 %v4547_v7, %v4546_v48 }
 0x5d4   : > { %v4551_v14 = vor.u32 %v4550_v52, %v4549_v55  ;;  %v4542_v3 = vshrl.u32 %v16689_v35, %v4541_v17  ;;  %v4554_v50 = vor.u32 %v4553_v46, %v4552_v23  ;;  %v4557_v44 = vor.u32 %v4556_v8, %v4555_v40 }
 0x5d5   : > { %v10794_v54 = vmin.u32 %v4280_v1, %v13827_v27  ;;  %v13841_v22 = vshrl.u32 %v4379_v20, 30  ;;  %vm4558_vm11 = vcmp.lt.s32.totalorder %v4539_v6, 1  ;;  %vm4561_vm14 = vcmp.lt.s32.totalorder %v4539_v6, 4 }
 0x5d6   : > { %vm4559_vm9 = vcmp.lt.s32.totalorder %v4539_v6, 2  ;;  %v4563_v61 = vsel %vm4561_vm14, %v4551_v14, 2102212464  ;;  %v4566_v4 = vsel %vm4558_vm11, %v4545_v59, %v4548_v57  ;;  %vm4560_vm12 = vcmp.lt.s32.totalorder %v4539_v6, 3 }
 0x5d7   : > { %16779 = vst [vmem:[#allocation6_spill] sm:$0xff] %v13841_v22  ;;  %v4282_v0 = vclz %v10794_v54  ;;  %v4381_v38 = vshll.u32 %v13841_v22, 30  ;;  %v4567_v30 = vsel %vm4561_vm14, %v4554_v50, 920167782  ;;  %v4570_v43 = vsel %vm4558_vm11, %v4548_v57, %v4551_v14 }
 0x5d8   : > { %v4562_v48 = vsel %vm4558_vm11, %v4542_v3, %v4545_v59  ;;  %v4568_v2 = vsel %vm4560_vm12, %v4551_v14, %v4567_v30  ;;  %v4571_v17 = vsel %vm4561_vm14, %v4557_v44, 1326507024  ;;  %v4564_v9 = vsel %vm4560_vm12, %v4548_v57, %v4563_v61 }
 0x5d9   : > { %v10795_v41 = vadd.s32 4294967294, %v4282_v0  ;;  %v13844_v47 = vsub.s32 %v4378_v42, %v4381_v38  ;;  %v4569_v55 = vsel %vm4559_vm9, %v4566_v4, %v4568_v2  ;;  %v4572_v7 = vsel %vm4560_vm12, %v4554_v50, %v4571_v17  ;;  %v13869_v2 = vpop.f32.mrb[12].mxu0 }
 0x5da   : > { %v4573_v52 = vsel %vm4559_vm9, %v4570_v43, %v4572_v7  ;;  %v13849_v23 = vmul.u32.u64.low %v13815_v31, %v4569_v55  ;;  %v13850_v1 = vmul.u32.u64.high %v13815_v31, %v4569_v55, %v13849_v23  ;;  %v4565_v14 = vsel %vm4559_vm9, %v4562_v48, %v4564_v9 }
 0x5db   : > { %vm10796_vm2 = vcmp.lt.s32.totalorder %v10795_v41, 0  ;;  %v4384_v40 = vsub.s32 0, %v13844_v47  ;;  %v13855_v59 = vmul.u32.u64.low %v13815_v31, %v4573_v52  ;;  %v13856_v20 = vmul.u32.u64.high %v13815_v31, %v4573_v52, %v13855_v59 }
 0x5dc   : > { %v4285_v46 = vsel %vm10796_vm2, 0, %v10795_v41  ;;  %v4640_v8 = vadd.s32 1, %v10809_v56  ;;  %v4637_v3 = vand.u32 8388607, %v16567_v16  ;;  %v4270_v50 = vadd.s32 %v13768_v25, %v13765_v24 }
 0x5dd   : > { %v4286_v42 = vsub.s32 32, %v4285_v46  ;;  %v4290_v57 = vsub.s32 4294967266, %v4285_v46  ;;  %v10798_v54 = vmin.u32 %v4384_v40, %v13844_v47  ;;  %v4584_v0 = vadd.s32 1, %v13850_v1 }
 0x5de   : > { %vm4641_vm8 = vcmp.gt.s32.totalorder %v4640_v8, 0  ;;  %v4581_v4 = vmul.u32 %v13815_v31, %v4565_v14  ;;  %vm4583_vm15 = vc.u32 %v13856_v20, %v13849_v23  ;;  %v4287_v24 = vshll.u32 %v13827_v27, %v4285_v46 }
 0x5df   : > { %v4291_v44 = vadd.s32 127, %v4290_v57  ;;  %v4386_v61 = vclz %v10798_v54  ;;  %v4642_v6 = vsel %vm4641_vm8, %v4640_v8, 0  ;;  %v4288_v56 = vshrl.u32 %v4270_v50, %v4286_v42 }
 0x5e0   : > { %v4585_v30 = vsel %vm4583_vm15, %v4584_v0, %v13850_v1  ;;  %v4644_v48 = vand.u32 31, %v4642_v6  ;;  %v4638_v17 = vor.u32 8388608, %v4637_v3  ;;  %v13874_v55 = vadd.f32 %v13718_v19, %v13705_v15 }
 0x5e1   : > { %v4292_v38 = vshll.u32 %v4291_v44, 23  ;;  %v10799_v43 = vadd.s32 4294967294, %v4386_v61  ;;  %v4586_v41 = vadd.s32 %v4585_v30, %v4581_v4  ;;  %v4289_v7 = vor.u32 %v4288_v56, %v4287_v24 }
 0x5e2   : > { %v4645_v31 = vsub.s32 32, %v4644_v48  ;;  %v4374_v52 = vadd.s32 %v13798_v51, %v13806_v49  ;;  %v13878_v40 = vshrl.u32 %v4642_v6, 5  ;;  %v4647_v27 = vshll.u32 %v16689_v35, %v4644_v48 }
 0x5e3   : > { %v4293_v25 = vor.u32 4788187, %v4292_v38  ;;  %vm10800_vm4 = vcmp.lt.s32.totalorder %v10799_v43, 0  ;;  %v4587_v9 = vadd.s32 536870912, %v4586_v41  ;;  %v4650_v8 = vshll.u32 %v16684_v26, %v4644_v48 }
 0x5e4   : > { %v4389_v1 = vsel %vm10800_vm4, 0, %v10799_v43  ;;  %v4648_v14 = vshrl.u32 %v16684_v26, %v4645_v31  ;;  %v4651_v19 = vshrl.u32 %v16685_v21, %v4645_v31  ;;  %v4654_v49 = vshrl.u32 %v16686_v11, %v4645_v31 }
 0x5e5   : > { %v4390_v59 = vsub.s32 32, %v4389_v1  ;;  %v4394_v42 = vsub.s32 4294967266, %v4389_v1  ;;  %v13880_v57 = vshrl.u32 %v4587_v9, 30  ;;  %v4294_v46 = vand.u32 2147483647, %v4293_v25 }
 0x5e6   : > { %v4296_v50 = vcvt.s32.f32 %v4289_v7  ;;  %v4391_v44 = vshll.u32 %v13844_v47, %v4389_v1  ;;  %v4649_v0 = vor.u32 %v4648_v14, %v4647_v27  ;;  %v4653_v61 = vshll.u32 %v16685_v21, %v4644_v48 }
 0x5e7   : > { %16780 = vst [vmem:[#allocation16_spill] sm:$0xff] %v13880_v57  ;;  %v4392_v54 = vshrl.u32 %v4374_v52, %v4390_v59  ;;  %v4395_v3 = vadd.s32 127, %v4394_v42  ;;  %v4589_v51 = vshll.u32 %v13880_v57, 30  ;;  %v4652_v56 = vor.u32 %v4651_v19, %v4650_v8 }
 0x5e8   : > { %v4656_v38 = vshll.u32 %v16686_v11, %v4644_v48  ;;  %vm16597_vm1 = vcmp.lt.s32.totalorder %v13698_v36, 0  ;;  %v4655_v30 = vor.u32 %v4654_v49, %v4653_v61  ;;  %v4657_v43 = vshrl.u32 %v16687_v18, %v4645_v31 }
 0x5e9   : > { %v4396_v4 = vshll.u32 %v4395_v3, 23  ;;  %v13890_v6 = vsub.s32 %v4586_v41, %v4589_v51  ;;  %v4659_v24 = vshll.u32 %v16687_v18, %v4644_v48  ;;  %v4660_v25 = vshrl.u32 %v16690_v60, %v4645_v31 }
 0x5ea   : > { %v4297_v9 = vmul.f32 %v4296_v50, %v4294_v46  ;;  %v4393_v47 = vor.u32 %v4392_v54, %v4391_v44  ;;  %v4678_v52 = vshll.u32 %v4638_v17, 8  ;;  %v4658_v41 = vor.u32 %v4657_v43, %v4656_v38 }
 0x5eb   : > { %v4592_v7 = vsub.s32 0, %v13890_v6  ;;  %v4397_v1 = vor.u32 4788187, %v4396_v4  ;;  %v4661_v59 = vor.u32 %v4660_v25, %v4659_v24  ;;  %vm4662_vm10 = vcmp.lt.s32.totalorder %v13878_v40, 1 }
 0x5ec   : > { %vm13901_vm7 = vcmp.le.f32.partialorder %v4214_v34, 0.7853982  ;;  %v16781_v42 = vmov 0  ;;  %v4646_v27 = vshrl.u32 %v16689_v35, %v4645_v31  ;;  %vm4663_vm3 = vcmp.lt.s32.totalorder %v13878_v40, 2 }
 0x5ed   : > { %v16782_v42 = vsel %vm13901_vm7, 4294967295, %v16781_v42  ;;  %v10806_v48 = vmin.u32 %v4592_v7, %v13890_v6  ;;  %vm4665_vm13 = vcmp.lt.s32.totalorder %v13878_v40, 4  ;;  %vm4664_vm5 = vcmp.lt.s32.totalorder %v13878_v40, 3  ;;  %v13941_v40 = vpop.f32.mrb[13].mxu0 }
 0x5ee   : > { %16783 = vst [vmem:[#allocation14_spill] sm:$0xff] %v16782_v42  ;;  %v4667_v17 = vsel %vm4665_vm13, %v4655_v30, 2102212464  ;;  %v4670_v46 = vsel %vm4662_vm10, %v4649_v0, %v4652_v56  ;;  %v4671_v14 = vsel %vm4665_vm13, %v4658_v41, 920167782  ;;  %v4298_v8 = vxor.u32 2147483648, %v4297_v9 }
 0x5ef   : > { %v4400_v34 = vcvt.s32.f32 %v4393_v47  ;;  %v4594_v19 = vclz %v10806_v48  ;;  %v4672_v54 = vsel %vm4664_vm5, %v4655_v30, %v4671_v14  ;;  %v4398_v3 = vand.u32 2147483647, %v4397_v1 }
 0x5f0   : > { %v4673_v51 = vsel %vm4663_vm3, %v4670_v46, %v4672_v54  ;;  %v4674_v31 = vsel %vm4662_vm10, %v4652_v56, %v4655_v30  ;;  %v4675_v49 = vsel %vm4665_vm13, %v4661_v59, 1326507024  ;;  %v4666_v44 = vsel %vm4662_vm10, %v4646_v27, %v4649_v0 }
 0x5f1   : > { %v10807_v50 = vadd.s32 4294967294, %v4594_v19  ;;  %v4668_v61 = vsel %vm4664_vm5, %v4652_v56, %v4667_v17  ;;  %v4676_v4 = vsel %vm4664_vm5, %v4658_v41, %v4675_v49  ;;  %v4737_v25 = vand.u32 2139095040, %v13874_v55 }
 0x5f2   : > { %v4677_v38 = vsel %vm4663_vm3, %v4674_v31, %v4676_v4  ;;  %v13920_v43 = vmul.u32.u64.low %v4678_v52, %v4673_v51  ;;  %v13921_v24 = vmul.u32.u64.high %v4678_v52, %v4673_v51, %v13920_v43  ;;  %v4299_v47 = vsel %vm16597_vm1, %v4298_v8, %v4297_v9 }
 0x5f3   : > { %vm10808_vm0 = vcmp.lt.s32.totalorder %v10807_v50, 0  ;;  %v13927_v30 = vmul.u32.u64.low %v4678_v52, %v4677_v38  ;;  %v13928_v7 = vmul.u32.u64.high %v4678_v52, %v4677_v38, %v13927_v30  ;;  %v4401_v1 = vmul.f32 %v4400_v34, %v4398_v3 }
 0x5f4   : > { %v4597_v0 = vsel %vm10808_vm0, 0, %v10807_v50  ;;  %v4669_v56 = vsel %vm4663_vm3, %v4666_v44, %v4668_v61  ;;  %v4738_v41 = vshrl.u32 %v4737_v25, 23  ;;  %v4582_v59 = vadd.s32 %v13849_v23, %v13856_v20 }
 0x5f5   : > { %v4598_v48 = vsub.s32 32, %v4597_v0  ;;  %v4602_v27 = vsub.s32 4294967266, %v4597_v0  ;;  %v16566_v17 = vand.u32 2147483647, %v13874_v55  ;;  %v4302_v9 = vsel %vm13901_vm7, %v13698_v36, %v4299_v47 }
 0x5f6   : > { %v4688_v46 = vadd.s32 1, %v13921_v24  ;;  %v10813_v14 = vadd.s32 4294967169, %v4738_v41  ;;  %v4685_v19 = vmul.u32 %v4678_v52, %v4669_v56  ;;  %vm4687_vm6 = vc.u32 %v13928_v7, %v13920_v43 }
 0x5f7   : > { %v4600_v8 = vshrl.u32 %v4582_v59, %v4598_v48  ;;  %v4603_v34 = vadd.s32 127, %v4602_v27  ;;  %v4402_v23 = vxor.u32 2147483648, %v4401_v1  ;;  %v4599_v20 = vshll.u32 %v13890_v6, %v4597_v0 }
 0x5f8   : > { %v4689_v54 = vsel %vm4687_vm6, %v4688_v46, %v13921_v24  ;;  %v4744_v3 = vadd.s32 1, %v10813_v14  ;;  %v4741_v49 = vand.u32 8388607, %v16566_v17  ;;  %v13949_v50 = vadd.f32 %v13695_v58, %v13724_v39 }
 0x5f9   : > { %v4604_v51 = vshll.u32 %v4603_v34, 23  ;;  %v4690_v31 = vadd.s32 %v4689_v54, %v4685_v19  ;;  %vm16599_vm11 = vcmp.lt.s32.totalorder %v13701_v32, 0  ;;  %v4601_v52 = vor.u32 %v4600_v8, %v4599_v20 }
 0x5fa   : > { %vm4745_vm14 = vcmp.gt.s32.totalorder %v4744_v3, 0  ;;  %11942 = vcosq.f32 %v4302_v9  ;;  %v4403_v4 = vsel %vm16599_vm11, %v4402_v23, %v4401_v1  ;;  %v13956_v24 = vadd.f32 %v13787_v33, %v13695_v58 }
 0x5fb   : > { %v4605_v44 = vor.u32 4788187, %v4604_v51  ;;  %v4691_v61 = vadd.s32 536870912, %v4690_v31  ;;  %v4746_v6 = vsel %vm4745_vm14, %v4744_v3, 0  ;;  %11944 = vsinq.f32 %v4302_v9 }
 0x5fc   : > { %v4748_v38 = vand.u32 31, %v4746_v6  ;;  %16784 = vst [vmem:[#allocation20_spill] sm:$0xff] %v13956_v24  ;;  %v4742_v47 = vor.u32 8388608, %v4741_v49  ;;  %v16565_v30 = vand.u32 2147483647, %v13949_v50  ;;  %v4608_v0 = vcvt.s32.f32 %v4601_v52 }
 0x5fd   : > { %v4606_v25 = vand.u32 2147483647, %v4605_v44  ;;  %v13958_v39 = vshrl.u32 %v4691_v61, 30  ;;  %v4747_v56 = vshrl.u32 %v4746_v6, 5  ;;  %v4425_v59 = vand.u32 2139095040, %v13949_v50 }
 0x5fe   : > { %v4749_v41 = vsub.s32 32, %v4748_v38  ;;  %v4751_v1 = vshll.u32 %v16689_v35, %v4748_v38  ;;  %v4754_v27 = vshll.u32 %v16684_v26, %v4748_v38  ;;  %v4757_v33 = vshll.u32 %v16685_v21, %v4748_v38 }
 0x5ff   : > { %v4693_v48 = vshll.u32 %v13958_v39, 30  ;;  %v4609_v9 = vmul.f32 %v4608_v0, %v4606_v25  ;;  %vm13971_vm9 = vcmp.le.f32.partialorder %v4318_v28, 0.7853982  ;;  %v16785_v34 = vmov 0 }
 0x600   : > { %v4752_v46 = vshrl.u32 %v16684_v26, %v4749_v41  ;;  %v4755_v14 = vshrl.u32 %v16685_v21, %v4749_v41  ;;  %v4758_v8 = vshrl.u32 %v16686_v11, %v4749_v41  ;;  %v16786_v34 = vsel %vm13971_vm9, 4294967295, %v16785_v34 }
 0x601   : > { %16787 = vst [vmem:[#allocation12_spill] sm:$0xff] %v16786_v34  ;;  %v13975_v19 = vsub.s32 %v4690_v31, %v4693_v48  ;;  %v4760_v23 = vshll.u32 %v16686_v11, %v4748_v38  ;;  %v4761_v20 = vshrl.u32 %v16687_v18, %v4749_v41  ;;  %v4764_v54 = vshrl.u32 %v16690_v60, %v4749_v41 }
 0x602   : > { %v4753_v3 = vor.u32 %v4752_v46, %v4751_v1  ;;  %v4756_v51 = vor.u32 %v4755_v14, %v4754_v27  ;;  %v4759_v49 = vor.u32 %v4758_v8, %v4757_v33  ;;  %v4763_v52 = vshll.u32 %v16687_v18, %v4748_v38 }
 0x603   : > { %vm16585_vm12 = vcmp.lt.s32.totalorder %v13712_v62, 0  ;;  %v4696_v28 = vsub.s32 0, %v13975_v19  ;;  %v4762_v44 = vor.u32 %v4761_v20, %v4760_v23  ;;  %v4782_v61 = vshll.u32 %v4742_v47, 8 }
 0x604   : > { %v4429_v31 = vand.u32 8388607, %v16565_v30  ;;  %v4750_v6 = vshrl.u32 %v16689_v35, %v4749_v41  ;;  %v4765_v25 = vor.u32 %v4764_v54, %v4763_v52  ;;  %vm4769_vm2 = vcmp.lt.s32.totalorder %v4747_v56, 4  ;;  %v13986_v48 = vpop.eup %11942 }
 0x605   : > { %v4426_v0 = vshrl.u32 %v4425_v59, 23  ;;  %16788 = vst [vmem:[#allocation21_spill] sm:$0xff] %v13986_v48  ;;  %v4610_v1 = vxor.u32 2147483648, %v4609_v9  ;;  %v10810_v27 = vmin.u32 %v4696_v28, %v13975_v19  ;;  %vm4766_vm8 = vcmp.lt.s32.totalorder %v4747_v56, 1  ;;  %v13990_v33 = vpop.eup %11944 }
 0x606   : > { %v4771_v38 = vsel %vm4769_vm2, %v4759_v49, 2102212464  ;;  %16789 = vst [vmem:[#allocation13_spill] sm:$0xff] %v13990_v33  ;;  %vm4767_vm15 = vcmp.lt.s32.totalorder %v4747_v56, 2  ;;  %vm4768_vm4 = vcmp.lt.s32.totalorder %v4747_v56, 3  ;;  %v4774_v47 = vsel %vm4766_vm8, %v4753_v3, %v4756_v51 }
 0x607   : > { %v4775_v46 = vsel %vm4769_vm2, %v4762_v44, 920167782  ;;  %vm13995_vm10 = vcmp.le.f32.partialorder %v4526_v12, 0.7853982  ;;  %v16790_v41 = vmov 0  ;;  %v4698_v59 = vclz %v10810_v27 }
 0x608   : > { %v16791_v41 = vsel %vm13995_vm10, 4294967295, %v16790_v41  ;;  %v4770_v14 = vsel %vm4766_vm8, %v4750_v6, %v4753_v3  ;;  %v4776_v8 = vsel %vm4768_vm4, %v4759_v49, %v4775_v46  ;;  %v4778_v23 = vsel %vm4766_vm8, %v4756_v51, %v4759_v49 }
 0x609   : > { %16792 = vst [vmem:[#allocation5_spill] sm:$0xff] %v16791_v41  ;;  %v4772_v20 = vsel %vm4768_vm4, %v4756_v51, %v4771_v38  ;;  %v4777_v54 = vsel %vm4767_vm15, %v4774_v47, %v4776_v8  ;;  %v4779_v52 = vsel %vm4769_vm2, %v4765_v25, 1326507024  ;;  %v10801_v28 = vadd.s32 4294967169, %v4426_v0 }
 0x60a   : > { %v10811_v30 = vadd.s32 4294967294, %v4698_v59  ;;  %v4780_v17 = vsel %vm4768_vm4, %v4762_v44, %v4779_v52  ;;  %v14001_v16 = vmul.u32.u64.low %v4782_v61, %v4777_v54  ;;  %v14002_v57 = vmul.u32.u64.high %v4782_v61, %v4777_v54, %v14001_v16 }
 0x60b   : > { %v14008_v12 = vsel %vm13971_vm9, %v13701_v32, %v4403_v4  ;;  %v4686_v3 = vadd.s32 %v13920_v43, %v13928_v7  ;;  %v4781_v51 = vsel %vm4767_vm15, %v4778_v23, %v4780_v17  ;;  %v4432_v49 = vadd.s32 1, %v10801_v28 }
 0x60c   : > { %vm10812_vm3 = vcmp.lt.s32.totalorder %v10811_v30, 0  ;;  %v4773_v6 = vsel %vm4767_vm15, %v4770_v14, %v4772_v20  ;;  %v14014_v25 = vmul.u32.u64.low %v4782_v61, %v4781_v51  ;;  %v14015_v44 = vmul.u32.u64.high %v4782_v61, %v4781_v51, %v14014_v25 }
 0x60d   : > { %v4611_v0 = vsel %vm16585_vm12, %v4610_v1, %v4609_v9  ;;  %v4701_v27 = vsel %vm10812_vm3, 0, %v10811_v30  ;;  %v4430_v38 = vor.u32 8388608, %v4429_v31  ;;  %vm4433_vm13 = vcmp.gt.s32.totalorder %v4432_v49, 0 }
 0x60e   : > { %v4702_v4 = vsub.s32 32, %v4701_v27  ;;  %v4706_v47 = vsub.s32 4294967266, %v4701_v27  ;;  %v4792_v46 = vadd.s32 1, %v14002_v57  ;;  %v4883_v43 = vand.u32 2139095040, %v13956_v24 }
 0x60f   : > { %11946 = vcosq.f32 %v14008_v12  ;;  %v4789_v7 = vmul.u32 %v4782_v61, %v4773_v6  ;;  %v4434_v17 = vsel %vm4433_vm13, %v4432_v49, 0  ;;  %v16573_v56 = vand.u32 2147483647, %v13956_v24 }
 0x610   : > { %v4703_v59 = vshll.u32 %v13975_v19, %v4701_v27  ;;  %v4704_v14 = vshrl.u32 %v4686_v3, %v4702_v4  ;;  %v4707_v8 = vadd.s32 127, %v4706_v47  ;;  %vm4791_vm5 = vc.u32 %v14015_v44, %v14001_v16 }
 0x611   : > { %v14029_v30 = vsel %vm13995_vm10, %v13712_v62, %v4611_v0  ;;  %v4793_v9 = vsel %vm4791_vm5, %v4792_v46, %v14002_v57  ;;  %v4436_v31 = vand.u32 31, %v4434_v17  ;;  %v14032_v1 = vshll.u32 %v4430_v38, 8 }
 0x612   : > { %v4705_v61 = vor.u32 %v4704_v14, %v4703_v59  ;;  %v4708_v23 = vshll.u32 %v4707_v8, 23  ;;  %v4794_v20 = vadd.s32 %v4793_v9, %v4789_v7  ;;  %v4884_v54 = vshrl.u32 %v4883_v43, 23 }
 0x613   : > { %v4435_v19 = vshrl.u32 %v4434_v17, 5  ;;  %v4437_v52 = vsub.s32 32, %v4436_v31  ;;  %v4439_v28 = vshll.u32 %v16689_v35, %v4436_v31  ;;  %v4442_v3 = vshll.u32 %v16684_v26, %v4436_v31 }
 0x614   : > { %v4709_v51 = vor.u32 4788187, %v4708_v23  ;;  %v4712_v49 = vcvt.s32.f32 %v4705_v61  ;;  %v4795_v6 = vadd.s32 536870912, %v4794_v20  ;;  %v4445_v25 = vshll.u32 %v16685_v21, %v4436_v31 }
 0x615   : > { %v4440_v57 = vshrl.u32 %v16684_v26, %v4437_v52  ;;  %v4443_v0 = vshrl.u32 %v16685_v21, %v4437_v52  ;;  %v4446_v27 = vshrl.u32 %v16686_v11, %v4437_v52  ;;  %v4448_v38 = vshll.u32 %v16686_v11, %v4436_v31 }
 0x616   : > { %vm4632_vm0 = vcmp.lt.s32.totalorder %v13727_v45, 0  ;;  %v4710_v4 = vand.u32 2147483647, %v4709_v51  ;;  %v14042_v47 = vshrl.u32 %v4795_v6, 30  ;;  %v4449_v46 = vshrl.u32 %v16687_v18, %v4437_v52 }
 0x617   : > { %v4451_v43 = vshll.u32 %v16687_v18, %v4436_v31  ;;  %v4441_v7 = vor.u32 %v4440_v57, %v4439_v28  ;;  %v4444_v17 = vor.u32 %v4443_v0, %v4442_v3  ;;  %v4447_v59 = vor.u32 %v4446_v27, %v4445_v25 }
 0x618   : > { %v4452_v14 = vshrl.u32 %v16690_v60, %v4437_v52  ;;  %v4713_v8 = vmul.f32 %v4712_v49, %v4710_v4  ;;  %v4797_v9 = vshll.u32 %v14042_v47, 30  ;;  %v4450_v61 = vor.u32 %v4449_v46, %v4448_v38 }
 0x619   : > { %v4887_v23 = vand.u32 8388607, %v16573_v56  ;;  %v14050_v41 = vpop.eup %11946  ;;  %v4438_v51 = vshrl.u32 %v16689_v35, %v4437_v52  ;;  %v10820_v62 = vadd.s32 4294967169, %v4884_v54  ;;  %v14055_v31 = vadd.f32 %v13793_v53, %v13695_v58 }
 0x61a   : > { %16793 = vst [vmem:[#allocation19_spill] sm:$0xff] %v14050_v41  ;;  %v4453_v6 = vor.u32 %v4452_v14, %v4451_v43  ;;  %v14057_v28 = vsub.s32 %v4794_v20, %v4797_v9  ;;  %vm4454_vm6 = vcmp.lt.s32.totalorder %v4435_v19, 1  ;;  %vm4456_vm14 = vcmp.lt.s32.totalorder %v4435_v19, 3 }
 0x61b   : > { %vm4457_vm2 = vcmp.lt.s32.totalorder %v4435_v19, 4  ;;  %v4714_v3 = vxor.u32 2147483648, %v4713_v8  ;;  %v4462_v25 = vsel %vm4454_vm6, %v4441_v7, %v4444_v17  ;;  %vm4455_vm8 = vcmp.lt.s32.totalorder %v4435_v19, 2 }
 0x61c   : > { %v4459_v49 = vsel %vm4457_vm2, %v4447_v59, 2102212464  ;;  %v4463_v57 = vsel %vm4457_vm2, %v4450_v61, 920167782  ;;  %v4800_v0 = vsub.s32 0, %v14057_v28  ;;  %v4466_v27 = vsel %vm4454_vm6, %v4444_v17, %v4447_v59 }
 0x61d   : > { %v4464_v52 = vsel %vm4456_vm14, %v4447_v59, %v4463_v57  ;;  %v4458_v54 = vsel %vm4454_vm6, %v4438_v51, %v4441_v7  ;;  %v4467_v53 = vsel %vm4457_vm2, %v4453_v6, 1326507024  ;;  %v4888_v4 = vor.u32 8388608, %v4887_v23 }
 0x61e   : > { %v4465_v38 = vsel %vm4455_vm8, %v4462_v25, %v4464_v52  ;;  %v10814_v20 = vmin.u32 %v4800_v0, %v14057_v28  ;;  %v4460_v46 = vsel %vm4456_vm14, %v4444_v17, %v4459_v49  ;;  %v4468_v43 = vsel %vm4456_vm14, %v4450_v61, %v4467_v53 }
 0x61f   : > { %v4890_v14 = vadd.s32 1, %v10820_v62  ;;  %v4715_v9 = vsel %vm4632_vm0, %v4714_v3, %v4713_v8  ;;  %v4469_v56 = vsel %vm4455_vm8, %v4466_v27, %v4468_v43  ;;  %11948 = vsinq.f32 %v14008_v12 }
 0x620   : > { %v14069_v57 = vmul.u32.u64.low %v14032_v1, %v4465_v38  ;;  %v14070_v59 = vmul.u32.u64.high %v14032_v1, %v4465_v38, %v14069_v57  ;;  %v4802_v7 = vclz %v10814_v20  ;;  %v16794_v62 = vand.u32 2147483647, %v13727_v45 }
 0x621   : > { %v14074_v23 = vmul.u32.u64.low %v14032_v1, %v4469_v56  ;;  %v14075_v51 = vmul.u32.u64.high %v14032_v1, %v4469_v56, %v14074_v23  ;;  %vm4891_vm15 = vcmp.gt.s32.totalorder %v4890_v14, 0  ;;  %v4461_v8 = vsel %vm4455_vm8, %v4458_v54, %v4460_v46 }
 0x622   : > { %vm14080_vm4 = vcmp.le.f32.partialorder %v16794_v62, 0.7853982  ;;  %v4892_v61 = vsel %vm4891_vm15, %v4890_v14, 0  ;;  %11950 = vcosq.f32 %v14029_v30  ;;  %v10815_v6 = vadd.s32 4294967294, %v4802_v7 }
 0x623   : > { %v4894_v3 = vand.u32 31, %v4892_v61  ;;  %v14090_v56 = vsel %vm14080_vm4, %v13727_v45, %v4715_v9  ;;  %v4790_v12 = vadd.s32 %v14001_v16, %v14015_v44  ;;  %v4480_v25 = vadd.s32 1, %v14070_v59 }
 0x624   : > { %v14095_v0 = vshll.u32 %v4888_v4, 8  ;;  %vm10816_vm3 = vcmp.lt.s32.totalorder %v10815_v6, 0  ;;  %v4477_v19 = vmul.u32 %v14032_v1, %v4461_v8  ;;  %vm4479_vm13 = vc.u32 %v14075_v51, %v14069_v57 }
 0x625   : > { %v4895_v52 = vsub.s32 32, %v4894_v3  ;;  %v4805_v27 = vsel %vm10816_vm3, 0, %v10815_v6  ;;  %v4481_v54 = vsel %vm4479_vm13, %v4480_v25, %v14070_v59  ;;  %v14101_v38 = vshrl.u32 %v4892_v61, 5 }
 0x626   : > { %v4987_v53 = vand.u32 2139095040, %v14055_v31  ;;  %v4806_v20 = vsub.s32 32, %v4805_v27  ;;  %v4810_v16 = vsub.s32 4294967266, %v4805_v27  ;;  %v4482_v44 = vadd.s32 %v4481_v54, %v4477_v19 }
 0x627   : > { %v4897_v4 = vshll.u32 %v16689_v35, %v4894_v3  ;;  %v4807_v46 = vshll.u32 %v14057_v28, %v4805_v27  ;;  %v4898_v1 = vshrl.u32 %v16684_v26, %v4895_v52  ;;  %v4900_v43 = vshll.u32 %v16684_v26, %v4894_v3 }
 0x628   : > { %v4901_v14 = vshrl.u32 %v16685_v21, %v4895_v52  ;;  %v4808_v9 = vshrl.u32 %v4790_v12, %v4806_v20  ;;  %v4811_v7 = vadd.s32 127, %v4810_v16  ;;  %v4483_v59 = vadd.s32 536870912, %v4482_v44 }
 0x629   : > { %v4904_v23 = vshrl.u32 %v16686_v11, %v4895_v52  ;;  %v4899_v62 = vor.u32 %v4898_v1, %v4897_v4  ;;  %v4903_v8 = vshll.u32 %v16685_v21, %v4894_v3  ;;  %v4906_v61 = vshll.u32 %v16686_v11, %v4894_v3  ;;  %v14115_v54 = vpop.eup %11948 }
 0x62a   : > { %v4907_v6 = vshrl.u32 %v16687_v18, %v4895_v52  ;;  %v4809_v25 = vor.u32 %v4808_v9, %v4807_v46  ;;  %v4812_v28 = vshll.u32 %v4811_v7, 23  ;;  %v14113_v19 = vshrl.u32 %v4483_v59, 30  ;;  %16798 = vst [vmem:[#allocation8_spill] sm:$0xff] %v14115_v54 }
 0x62b   : > { %v4902_v27 = vor.u32 %v4901_v14, %v4900_v43  ;;  %v4905_v49 = vor.u32 %v4904_v23, %v4903_v8  ;;  %v4909_v20 = vshll.u32 %v16687_v18, %v4894_v3  ;;  %v4910_v16 = vshrl.u32 %v16690_v60, %v4895_v52 }
 0x62c   : > { %16797 = vst [vmem:[#allocation18_spill] sm:$0xff] %v14113_v19  ;;  %v4908_v12 = vor.u32 %v4907_v6, %v4906_v61  ;;  %v14119_v4 = vpop.eup %11950  ;;  %v4813_v1 = vor.u32 4788187, %v4812_v28  ;;  %v4485_v48 = vshll.u32 %v14113_v19, 30  ;;  %v4896_v33 = vshrl.u32 %v16689_v35, %v4895_v52 }
 0x62d   : > { %16799 = vst [vmem:[#allocation17_spill] sm:$0xff] %v14119_v4  ;;  %v4988_v46 = vshrl.u32 %v4987_v53, 23  ;;  %v4816_v9 = vcvt.s32.f32 %v4809_v25  ;;  %v4911_v7 = vor.u32 %v4910_v16, %v4909_v20  ;;  %vm4912_vm5 = vcmp.lt.s32.totalorder %v14101_v38, 1 }
 0x62e   : > { %vm4914_vm6 = vcmp.lt.s32.totalorder %v14101_v38, 3  ;;  %v4814_v43 = vand.u32 2147483647, %v4813_v1  ;;  %v14125_v14 = vsub.s32 %v4482_v44, %v4485_v48  ;;  %vm4915_vm14 = vcmp.lt.s32.totalorder %v14101_v38, 4 }
 0x62f   : > { %v4920_v3 = vsel %vm4912_vm5, %v4899_v62, %v4902_v27  ;;  %v4917_v59 = vsel %vm4915_vm14, %v4905_v49, 2102212464  ;;  %v4921_v23 = vsel %vm4915_vm14, %v4908_v12, 920167782  ;;  %v4924_v52 = vsel %vm4912_vm5, %v4902_v27, %v4905_v49 }
 0x630   : > { %v4925_v53 = vsel %vm4915_vm14, %v4911_v7, 1326507024  ;;  %v4817_v8 = vmul.f32 %v4816_v9, %v4814_v43  ;;  %v4488_v61 = vsub.s32 0, %v14125_v14  ;;  %vm4913_vm2 = vcmp.lt.s32.totalorder %v14101_v38, 2 }
 0x631   : > { %v4922_v48 = vsel %vm4914_vm6, %v4905_v49, %v4921_v23  ;;  %v4926_v6 = vsel %vm4914_vm6, %v4908_v12, %v4925_v53  ;;  %v10824_v25 = vadd.s32 4294967169, %v4988_v46  ;;  %v16800_v28 = vand.u32 2147483647, %v14055_v31 }
 0x632   : > { %v4923_v44 = vsel %vm4913_vm2, %v4920_v3, %v4922_v48  ;;  %v10802_v16 = vmin.u32 %v4488_v61, %v14125_v14  ;;  %v4916_v1 = vsel %vm4912_vm5, %v4896_v33, %v4899_v62  ;;  %v4918_v9 = vsel %vm4914_vm6, %v4902_v27, %v4917_v59 }
 0x633   : > { %v4991_v20 = vand.u32 8388607, %v16800_v28  ;;  %v4927_v49 = vsel %vm4913_vm2, %v4924_v52, %v4926_v6  ;;  %v14154_v12 = vmul.u32.u64.low %v14095_v0, %v4923_v44  ;;  %v14155_v46 = vmul.u32.u64.high %v14095_v0, %v4923_v44, %v14154_v12 }
 0x634   : > { %v14150_v7 = vmul.u32.u64.low %v14095_v0, %v4927_v49  ;;  %v14151_v43 = vmul.u32.u64.high %v14095_v0, %v4927_v49, %v14150_v7  ;;  %11952 = vsinq.f32 %v14029_v30  ;;  %v4818_v3 = vxor.u32 2147483648, %v4817_v8 }
 0x635   : > { %v4490_v23 = vclz %v10802_v16  ;;  %v4994_v33 = vadd.s32 1, %v10824_v25  ;;  %11954 = vcosq.f32 %v14090_v56  ;;  %vm4736_vm8 = vcmp.lt.s32.totalorder %v13874_v55, 0 }
 0x636   : > { %v4919_v62 = vsel %vm4913_vm2, %v4916_v1, %v4918_v9  ;;  %11956 = vsinq.f32 %v14090_v56  ;;  %v16801_v27 = vand.u32 2147483647, %v13874_v55  ;;  %vm4937_vm13 = vc.u32 %v14151_v43, %v14154_v12 }
 0x637   : > { %v10803_v52 = vadd.s32 4294967294, %v4490_v23  ;;  %vm4995_vm3 = vcmp.gt.s32.totalorder %v4994_v33, 0  ;;  %v4938_v30 = vadd.s32 1, %v14155_v46  ;;  %v4992_v53 = vor.u32 8388608, %v4991_v20 }
 0x638   : > { %vm14166_vm15 = vcmp.le.f32.partialorder %v16801_v27, 0.7853982  ;;  %v14175_v38 = vadd.f32 %v13811_v29, %v13705_v15  ;;  %v4819_v56 = vsel %vm4736_vm8, %v4818_v3, %v4817_v8  ;;  %v4935_v61 = vmul.u32 %v14095_v0, %v4919_v62 }
 0x639   : > { %vm10804_vm5 = vcmp.lt.s32.totalorder %v10803_v52, 0  ;;  %v4996_v48 = vsel %vm4995_vm3, %v4994_v33, 0  ;;  %v4939_v6 = vsel %vm4937_vm13, %v4938_v30, %v14155_v46  ;;  %v14183_v28 = vadd.f32 %v13818_v37, %v13705_v15 }
 0x63a   : > { %v4493_v44 = vsel %vm10804_vm5, 0, %v10803_v52  ;;  %v4998_v25 = vand.u32 31, %v4996_v48  ;;  %v4478_v20 = vadd.s32 %v14069_v57, %v14075_v51  ;;  %v4940_v1 = vadd.s32 %v4939_v6, %v4935_v61 }
 0x63b   : > { %v4494_v29 = vsub.s32 32, %v4493_v44  ;;  %v4498_v16 = vsub.s32 4294967266, %v4493_v44  ;;  %v14190_v8 = vsel %vm14166_vm15, %v13874_v55, %v4819_v56  ;;  %v14192_v9 = vshll.u32 %v4992_v53, 8 }
 0x63c   : > { %v4999_v0 = vsub.s32 32, %v4998_v25  ;;  %v5195_v49 = vand.u32 2139095040, %v14175_v38  ;;  %v4495_v7 = vshll.u32 %v14125_v14, %v4493_v44  ;;  %v4941_v3 = vadd.s32 536870912, %v4940_v1 }
 0x63d   : > { %v4496_v37 = vshrl.u32 %v4478_v20, %v4494_v29  ;;  %v4499_v46 = vadd.s32 127, %v4498_v16  ;;  %v5001_v57 = vshll.u32 %v16689_v35, %v4998_v25  ;;  %vm4882_vm6 = vcmp.lt.s32.totalorder %v13956_v24, 0 }
 0x63e   : > { %v5002_v51 = vshrl.u32 %v16684_v26, %v4999_v0  ;;  %v5005_v23 = vshrl.u32 %v16685_v21, %v4999_v0  ;;  %v5008_v33 = vshrl.u32 %v16686_v11, %v4999_v0  ;;  %v14200_v62 = vpop.eup %11952  ;;  %v4942_v52 = vshrl.u32 %v4941_v3, 30 }
 0x63f   : > { %16804 = vst [vmem:[#allocation15_spill] sm:$0xff] %v14200_v62  ;;  %v4500_v27 = vshll.u32 %v4499_v46, 23  ;;  %v5004_v30 = vshll.u32 %v16684_v26, %v4998_v25  ;;  %v5011_v14 = vshrl.u32 %v16687_v18, %v4999_v0  ;;  %v14205_v53 = vpop.eup %11954  ;;  %v4497_v56 = vor.u32 %v4496_v37, %v4495_v7 }
 0x640   : > { %v4997_v61 = vshrl.u32 %v4996_v48, 5  ;;  %v5007_v44 = vshll.u32 %v16685_v21, %v4998_v25  ;;  %v5010_v6 = vshll.u32 %v16686_v11, %v4998_v25  ;;  %v14209_v20 = vpop.eup %11956  ;;  %v4943_v16 = vshll.u32 %v4942_v52, 30 }
 0x641   : > { %v4501_v29 = vor.u32 4788187, %v4500_v27  ;;  %v5003_v46 = vor.u32 %v5002_v51, %v5001_v57  ;;  %v5006_v4 = vor.u32 %v5005_v23, %v5004_v30  ;;  %v5013_v42 = vshll.u32 %v16687_v18, %v4998_v25 }
 0x642   : > { %v5009_v62 = vor.u32 %v5008_v33, %v5007_v44  ;;  %v5012_v3 = vor.u32 %v5011_v14, %v5010_v6  ;;  %v5014_v36 = vshrl.u32 %v16690_v60, %v4999_v0  ;;  %11958 = vcosq.f32 %v14190_v8 }
 0x643   : > { %v14214_v7 = vsub.s32 %v4940_v1, %v4943_v16  ;;  %v5196_v37 = vshrl.u32 %v5195_v49, 23  ;;  %v4504_v63 = vcvt.s32.f32 %v4497_v56  ;;  %v16805_v19 = vand.u32 2147483647, %v13956_v24 }
 0x644   : > { %v4966_v57 = vsub.s32 4, %v4942_v52  ;;  %v5000_v51 = vshrl.u32 %v16689_v35, %v4999_v0  ;;  %v5015_v25 = vor.u32 %v5014_v36, %v5013_v42  ;;  %v4502_v23 = vand.u32 2147483647, %v4501_v29 }
 0x645   : > { %vm14219_vm14 = vcmp.le.f32.partialorder %v16805_v19, 0.7853982  ;;  %v4946_v33 = vsub.s32 0, %v14214_v7  ;;  %vm5016_vm2 = vcmp.lt.s32.totalorder %v4997_v61, 1  ;;  %vm5019_vm3 = vcmp.lt.s32.totalorder %v4997_v61, 4 }
 0x646   : > { %vm5018_vm13 = vcmp.lt.s32.totalorder %v4997_v61, 3  ;;  %v5021_v1 = vsel %vm5019_vm3, %v5009_v62, 2102212464  ;;  %v5024_v49 = vsel %vm5016_vm2, %v5003_v46, %v5006_v4  ;;  %v5025_v30 = vsel %vm5019_vm3, %v5012_v3, 920167782 }
 0x647   : > { %v10821_v14 = vmin.u32 %v4946_v33, %v14214_v7  ;;  %vm5017_vm5 = vcmp.lt.s32.totalorder %v4997_v61, 2  ;;  %v5026_v19 = vsel %vm5018_vm13, %v5009_v62, %v5025_v30  ;;  %v5028_v56 = vsel %vm5016_vm2, %v5006_v4, %v5009_v62 }
 0x648   : > { %v14231_v36 = vsel %vm4882_vm6, %v4966_v57, %v4942_v52  ;;  %v5027_v42 = vsel %vm5017_vm5, %v5024_v49, %v5026_v19  ;;  %v5029_v0 = vsel %vm5019_vm3, %v5015_v25, 1326507024  ;;  %v10832_v44 = vadd.s32 4294967169, %v5196_v37 }
 0x649   : > { %vm16598_vm12 = vcmp.lt.s32.totalorder %v13949_v50, 0  ;;  %v4948_v6 = vclz %v10821_v14  ;;  %v5020_v29 = vsel %vm5016_vm2, %v5000_v51, %v5003_v46  ;;  %v5022_v16 = vsel %vm5018_vm13, %v5006_v4, %v5021_v1 }
 0x64a   : > { %v5030_v33 = vsel %vm5018_vm13, %v5012_v3, %v5029_v0  ;;  %v4505_v30 = vmul.f32 %v4504_v63, %v4502_v23  ;;  %v14240_v48 = vmul.u32.u64.low %v14192_v9, %v5027_v42  ;;  %v14241_v52 = vmul.u32.u64.high %v14192_v9, %v5027_v42, %v14240_v48 }
 0x64b   : > { %v5031_v62 = vsel %vm5017_vm5, %v5028_v56, %v5030_v33  ;;  %v10822_v57 = vadd.s32 4294967294, %v4948_v6  ;;  %v16808_v49 = vand.u32 2147483647, %v14175_v38  ;;  %11960 = vsinq.f32 %v14190_v8 }
 0x64c   : > { %v14245_v37 = vmul.u32.u64.low %v14192_v9, %v5031_v62  ;;  %v14246_v25 = vmul.u32.u64.high %v14192_v9, %v5031_v62, %v14245_v37  ;;  %v5023_v4 = vsel %vm5017_vm5, %v5020_v29, %v5022_v16  ;;  %v5202_v63 = vadd.s32 1, %v10832_v44  ;;  %v14253_v51 = vpop.eup %11958 }
 0x64d   : > { %v5199_v46 = vand.u32 8388607, %v16808_v49  ;;  %v16586_v3 = vand.u32 2147483647, %v14183_v28  ;;  %v4936_v23 = vadd.s32 %v14154_v12, %v14151_v43  ;;  %vm10823_vm2 = vcmp.lt.s32.totalorder %v10822_v57, 0 }
 0x64e   : > { %v5299_v14 = vand.u32 2139095040, %v14183_v28  ;;  %v4506_v19 = vxor.u32 2147483648, %v4505_v30  ;;  %v4951_v56 = vsel %vm10823_vm2, 0, %v10822_v57  ;;  %v5042_v8 = vadd.s32 1, %v14241_v52 }
 0x64f   : > { %vm5203_vm3 = vcmp.gt.s32.totalorder %v5202_v63, 0  ;;  %v4952_v61 = vsub.s32 32, %v4951_v56  ;;  %v4956_v42 = vsub.s32 4294967266, %v4951_v56  ;;  %v5039_v0 = vmul.u32 %v14192_v9, %v5023_v4 }
 0x650   : > { %v5200_v44 = vor.u32 8388608, %v5199_v46  ;;  %v4953_v6 = vshll.u32 %v14214_v7, %v4951_v56  ;;  %vm5041_vm13 = vc.u32 %v14246_v25, %v14240_v48  ;;  %v5204_v43 = vsel %vm5203_vm3, %v5202_v63, 0 }
 0x651   : > { %v5300_v12 = vshrl.u32 %v5299_v14, 23  ;;  %v4954_v29 = vshrl.u32 %v4936_v23, %v4952_v61  ;;  %v4957_v16 = vadd.s32 127, %v4956_v42  ;;  %v5043_v33 = vsel %vm5041_vm13, %v5042_v8, %v14241_v52 }
 0x652   : > { %v5205_v62 = vshrl.u32 %v5204_v43, 5  ;;  %v4507_v57 = vsel %vm16598_vm12, %v4506_v19, %v4505_v30  ;;  %v5044_v37 = vadd.s32 %v5043_v33, %v5039_v0  ;;  %v5206_v49 = vand.u32 31, %v5204_v43 }
 0x653   : > { %v14271_v9 = vand.u32 8388607, %v16586_v3  ;;  %v4955_v7 = vor.u32 %v4954_v29, %v4953_v6  ;;  %v4958_v46 = vshll.u32 %v4957_v16, 23  ;;  %v14273_v4 = vshll.u32 %v5200_v44, 8 }
 0x654   : > { %v10836_v63 = vadd.s32 4294967169, %v5300_v12  ;;  %v5045_v14 = vadd.s32 536870912, %v5044_v37  ;;  %v5207_v23 = vsub.s32 32, %v5206_v49  ;;  %v5209_v56 = vshll.u32 %v16689_v35, %v5206_v49 }
 0x655   : > { %vm5224_vm5 = vcmp.lt.s32.totalorder %v5205_v62, 1  ;;  %v16809_v52 = vand.u32 2147483647, %v13949_v50  ;;  %v4959_v19 = vor.u32 4788187, %v4958_v46  ;;  %v4962_v8 = vcvt.s32.f32 %v4955_v7  ;;  %v14284_v0 = vpop.eup %11960 }
 0x656   : > { %v5212_v61 = vshll.u32 %v16684_v26, %v5206_v49  ;;  %v5215_v42 = vshll.u32 %v16685_v21, %v5206_v49  ;;  %v14286_v44 = vshrl.u32 %v5045_v14, 30  ;;  %v5210_v6 = vshrl.u32 %v16684_v26, %v5207_v23 }
 0x657   : > { %vm14278_vm2 = vcmp.le.f32.partialorder %v16809_v52, 0.7853982  ;;  %v5213_v43 = vshrl.u32 %v16685_v21, %v5207_v23  ;;  %v5218_v12 = vshll.u32 %v16686_v11, %v5206_v49  ;;  %v4960_v29 = vand.u32 2147483647, %v4959_v19 }
 0x658   : > { %v5216_v16 = vshrl.u32 %v16686_v11, %v5207_v23  ;;  %v5219_v33 = vshrl.u32 %v16687_v18, %v5207_v23  ;;  %v5221_v7 = vshll.u32 %v16687_v18, %v5206_v49  ;;  %v5047_v46 = vshll.u32 %v14286_v44, 30 }
 0x659   : > { %v5211_v52 = vor.u32 %v5210_v6, %v5209_v56  ;;  %v5214_v3 = vor.u32 %v5213_v43, %v5212_v61  ;;  %v5222_v14 = vshrl.u32 %v16690_v60, %v5207_v23  ;;  %v4963_v1 = vmul.f32 %v4962_v8, %v4960_v29 }
 0x65a   : > { %v5208_v41 = vshrl.u32 %v16689_v35, %v5207_v23  ;;  %v5217_v54 = vor.u32 %v5216_v16, %v5215_v42  ;;  %v5220_v34 = vor.u32 %v5219_v33, %v5218_v12  ;;  %v14297_v13 = vsub.s32 %v5044_v37, %v5047_v46 }
 0x65b   : > { %v5223_v19 = vor.u32 %v5222_v14, %v5221_v7  ;;  %vm5226_vm3 = vcmp.lt.s32.totalorder %v5205_v62, 3  ;;  %vm5227_vm13 = vcmp.lt.s32.totalorder %v5205_v62, 4  ;;  %v4964_v32 = vxor.u32 2147483648, %v4963_v1 }
 0x65c   : > { %v5229_v22 = vsel %vm5227_vm13, %v5217_v54, 2102212464  ;;  %v5232_v49 = vsel %vm5224_vm5, %v5211_v52, %v5214_v3  ;;  %v5233_v10 = vsel %vm5227_vm13, %v5220_v34, 920167782  ;;  %v5050_v56 = vsub.s32 0, %v14297_v13 }
 0x65d   : > { %vm5225_vm1 = vcmp.lt.s32.totalorder %v5205_v62, 2  ;;  %v5234_v61 = vsel %vm5226_vm3, %v5217_v54, %v5233_v10  ;;  %v5236_v8 = vsel %vm5224_vm5, %v5214_v3, %v5217_v54  ;;  %v5228_v23 = vsel %vm5224_vm5, %v5208_v41, %v5211_v52 }
 0x65e   : > { %v5230_v37 = vsel %vm5226_vm3, %v5214_v3, %v5229_v22  ;;  %v5235_v42 = vsel %vm5225_vm1, %v5232_v49, %v5234_v61  ;;  %v5237_v6 = vsel %vm5227_vm13, %v5223_v19, 1326507024  ;;  %v4510_v43 = vsel %vm14278_vm2, %v13949_v50, %v4507_v57 }
 0x65f   : > { %v4965_v12 = vsel %vm4882_vm6, %v4964_v32, %v4963_v1  ;;  %v10825_v29 = vmin.u32 %v5050_v56, %v14297_v13  ;;  %v5238_v16 = vsel %vm5226_vm3, %v5220_v34, %v5237_v6  ;;  %v5304_v22 = vor.u32 8388608, %v14271_v9 }
 0x660   : > { %v5239_v10 = vsel %vm5225_vm1, %v5236_v8, %v5238_v16  ;;  %v14313_v54 = vmul.u32.u64.low %v14273_v4, %v5235_v42  ;;  %v14314_v33 = vmul.u32.u64.high %v14273_v4, %v5235_v42, %v14313_v54  ;;  %v5231_v3 = vsel %vm5225_vm1, %v5228_v23, %v5230_v37 }
 0x661   : > { %v5052_v41 = vclz %v10825_v29  ;;  %v14319_v7 = vmul.u32.u64.low %v14273_v4, %v5239_v10  ;;  %v14320_v57 = vmul.u32.u64.high %v14273_v4, %v5239_v10, %v14319_v7  ;;  %11962 = vcosq.f32 %v4510_v43 }
 0x662   : > { %v4968_v32 = vsel %vm14219_vm14, %v13956_v24, %v4965_v12  ;;  %v5306_v34 = vadd.s32 1, %v10836_v63  ;;  %11964 = vsinq.f32 %v4510_v43  ;;  %v16812_v1 = vsel %vm14219_vm14, 0, %v14231_v36 }
 0x663   : > { %v14329_v62 = vadd.s32 3, %v16812_v1  ;;  %v5040_v9 = vadd.s32 %v14240_v48, %v14246_v25  ;;  %v10826_v46 = vadd.s32 4294967294, %v5052_v41  ;;  %v5247_v52 = vmul.u32 %v14273_v4, %v5231_v3 }
 0x664   : > { %v5250_v14 = vadd.s32 1, %v14314_v33  ;;  %vm5307_vm1 = vcmp.gt.s32.totalorder %v5306_v34, 0  ;;  %v14335_v19 = vshll.u32 %v5304_v22, 8  ;;  %11966 = vcosq.f32 %v4968_v32 }
 0x665   : > { %vm10827_vm6 = vcmp.lt.s32.totalorder %v10826_v46, 0  ;;  %vm5249_vm5 = vc.u32 %v14320_v57, %v14313_v54  ;;  %v5308_v27 = vsel %vm5307_vm1, %v5306_v34, 0  ;;  %11968 = vsinq.f32 %v4968_v32 }
 0x666   : > { %v5055_v36 = vsel %vm10827_vm6, 0, %v10826_v46  ;;  %v5251_v63 = vsel %vm5249_vm5, %v5250_v14, %v14314_v33  ;;  %v5310_v49 = vand.u32 31, %v5308_v27  ;;  %v14342_v4 = vadd.f32 %v13869_v2, %v13705_v15 }
 0x667   : > { %v5056_v48 = vsub.s32 32, %v5055_v36  ;;  %v5060_v25 = vsub.s32 4294967266, %v5055_v36  ;;  %v5252_v56 = vadd.s32 %v5251_v63, %v5247_v52  ;;  %v5057_v61 = vshll.u32 %v14297_v13, %v5055_v36 }
 0x668   : > { %v5311_v8 = vsub.s32 32, %v5310_v49  ;;  %v14347_v23 = vadd.f32 %v13941_v40, %v13695_v58  ;;  %v14350_v37 = vadd.s32 128, %v16735_v5  ;;  %v5313_v12 = vshll.u32 %v16689_v35, %v5310_v49 }
 0x669   : > { %v5058_v42 = vshrl.u32 %v5040_v9, %v5056_v48  ;;  %v5061_v6 = vadd.s32 127, %v5060_v25  ;;  %v5253_v43 = vadd.s32 536870912, %v5252_v56  ;;  %vm5194_vm14 = vcmp.lt.s32.totalorder %v14175_v38, 0 }
 0x66a   : > { %v5314_v15 = vshrl.u32 %v16684_v26, %v5311_v8  ;;  %v5316_v2 = vshll.u32 %v16684_v26, %v5310_v49  ;;  %v5317_v13 = vshrl.u32 %v16685_v21, %v5311_v8  ;;  %v5320_v29 = vshrl.u32 %v16686_v11, %v5311_v8 }
 0x66b   : > { %v5059_v58 = vor.u32 %v5058_v42, %v5057_v61  ;;  %v5062_v40 = vshll.u32 %v5061_v6, 23  ;;  %v5254_v16 = vshrl.u32 %v5253_v43, 30  ;;  %v5323_v10 = vshrl.u32 %v16687_v18, %v5311_v8  ;;  %v14359_v33 = vpop.eup %11962 }
 0x66c   : > { %v5309_v22 = vshrl.u32 %v5308_v27, 5  ;;  %v5319_v41 = vshll.u32 %v16685_v21, %v5310_v49  ;;  %v5322_v3 = vshll.u32 %v16686_v11, %v5310_v49  ;;  %v14364_v32 = vpop.eup %11964  ;;  %v16813_v1 = vand.u32 2147483647, %v14175_v38 }
 0x66d   : > { %v5063_v34 = vor.u32 4788187, %v5062_v40  ;;  %v5255_v46 = vshll.u32 %v5254_v16, 30  ;;  %v5315_v52 = vor.u32 %v5314_v15, %v5313_v12  ;;  %v5318_v14 = vor.u32 %v5317_v13, %v5316_v2 }
 0x66e   : > { %vm14368_vm3 = vcmp.le.f32.partialorder %v16813_v1, 0.7853982  ;;  %v5321_v36 = vor.u32 %v5320_v29, %v5319_v41  ;;  %v5324_v27 = vor.u32 %v5323_v10, %v5322_v3  ;;  %v5325_v63 = vshll.u32 %v16687_v18, %v5310_v49  ;;  %v14374_v25 = vpop.eup %11966 }
 0x66f   : > { %v5326_v48 = vshrl.u32 %v16690_v60, %v5311_v8  ;;  %16816 = vst [vmem:[#allocation23_spill] sm:$0xff] %v14374_v25  ;;  %vm4986_vm13 = vcmp.lt.s32.totalorder %v14055_v31, 0  ;;  %v5064_v61 = vand.u32 2147483647, %v5063_v34  ;;  %v5066_v42 = vcvt.s32.f32 %v5059_v58  ;;  %v14379_v40 = vpop.eup %11968 }
 0x670   : > { %v14377_v6 = vsub.s32 %v5252_v56, %v5255_v46  ;;  %v5278_v43 = vsub.s32 4, %v5254_v16  ;;  %v5312_v12 = vshrl.u32 %v16689_v35, %v5311_v8  ;;  %vm5328_vm1 = vcmp.lt.s32.totalorder %v5309_v22, 1 }
 0x671   : > { %v5327_v15 = vor.u32 %v5326_v48, %v5325_v63  ;;  %v5067_v49 = vmul.f32 %v5066_v42, %v5064_v61  ;;  %vm5329_vm6 = vcmp.lt.s32.totalorder %v5309_v22, 2  ;;  %vm5331_vm5 = vcmp.lt.s32.totalorder %v5309_v22, 4 }
 0x672   : > { %v5258_v13 = vsub.s32 0, %v14377_v6  ;;  %v16817_v29 = vand.u32 2147483647, %v14055_v31  ;;  %vm5330_vm11 = vcmp.lt.s32.totalorder %v5309_v22, 3  ;;  %v5333_v56 = vsel %vm5331_vm5, %v5321_v36, 2102212464 }
 0x673   : > { %v5336_v10 = vsel %vm5328_vm1, %v5315_v52, %v5318_v14  ;;  %v5337_v8 = vsel %vm5331_vm5, %v5324_v27, 920167782  ;;  %v5279_v3 = vsel %vm5194_vm14, %v5278_v43, %v5254_v16  ;;  %v5340_v1 = vsel %vm5328_vm1, %v5318_v14, %v5321_v36 }
 0x674   : > { %vm14386_vm12 = vcmp.le.f32.partialorder %v16817_v29, 0.7853982  ;;  %v10833_v41 = vmin.u32 %v5258_v13, %v14377_v6  ;;  %v5338_v34 = vsel %vm5330_vm11, %v5321_v36, %v5337_v8  ;;  %v5068_v46 = vxor.u32 2147483648, %v5067_v49 }
 0x675   : > { %v5332_v63 = vsel %vm5328_vm1, %v5312_v12, %v5315_v52  ;;  %v5339_v48 = vsel %vm5329_vm6, %v5336_v10, %v5338_v34  ;;  %v5341_v61 = vsel %vm5331_vm5, %v5327_v15, 1326507024  ;;  %v5334_v29 = vsel %vm5330_vm11, %v5318_v14, %v5333_v56 }
 0x676   : > { %v5260_v42 = vclz %v10833_v41  ;;  %v5342_v7 = vsel %vm5330_vm11, %v5324_v27, %v5341_v61  ;;  %v5403_v2 = vand.u32 2139095040, %v14342_v4  ;;  %v5281_v13 = vsel %vm14368_vm3, 0, %v5279_v3 }
 0x677   : > { %v5343_v25 = vsel %vm5329_vm6, %v5340_v1, %v5342_v7  ;;  %v14402_v16 = vmul.u32.u64.low %v14335_v19, %v5339_v48  ;;  %v14403_v43 = vmul.u32.u64.high %v14335_v19, %v5339_v48, %v14402_v16  ;;  %v5069_v27 = vsel %vm4986_vm13, %v5068_v46, %v5067_v49 }
 0x678   : > { %v10834_v36 = vadd.s32 4294967294, %v5260_v42  ;;  %v14407_v52 = vmul.u32.u64.low %v14335_v19, %v5343_v25  ;;  %v14408_v12 = vmul.u32.u64.high %v14335_v19, %v5343_v25, %v14407_v52  ;;  %v5335_v15 = vsel %vm5329_vm6, %v5332_v63, %v5334_v29 }
 0x679   : > { %v5404_v56 = vshrl.u32 %v5403_v2, 23  ;;  %v16820_v7 = vand.u32 2147483647, %v14342_v4  ;;  %v5248_v8 = vadd.s32 %v14313_v54, %v14320_v57  ;;  %v14418_v41 = vadd.s32 3, %v5281_v13 }
 0x67a   : > { %vm10835_vm11 = vcmp.lt.s32.totalorder %v10834_v36, 0  ;;  %v5091_v25 = vand.u32 2139095040, %v14347_v23  ;;  %v5354_v34 = vadd.s32 1, %v14403_v43  ;;  %v16601_v49 = vand.u32 2147483647, %v14347_v23 }
 0x67b   : > { %v5407_v10 = vand.u32 8388607, %v16820_v7  ;;  %16821 = vst [vmem:[#allocation22_spill] sm:$0xff] %v14418_v41  ;;  %v5263_v3 = vsel %vm10835_vm11, 0, %v10834_v36  ;;  %v10840_v1 = vadd.s32 4294967169, %v5404_v56  ;;  %v14426_v22 = vsel %vm14386_vm12, %v14055_v31, %v5069_v27 }
 0x67c   : > { %v5264_v2 = vsub.s32 32, %v5263_v3  ;;  %v5268_v46 = vsub.s32 4294967266, %v5263_v3  ;;  %v5351_v54 = vmul.u32 %v14335_v19, %v5335_v15  ;;  %v5265_v57 = vshll.u32 %v14377_v6, %v5263_v3 }
 0x67d   : > { %vm5353_vm1 = vc.u32 %v14408_v12, %v14402_v16  ;;  %v5408_v63 = vor.u32 8388608, %v5407_v10  ;;  %v5410_v48 = vadd.s32 1, %v10840_v1  ;;  %v5092_v13 = vshrl.u32 %v5091_v25, 23 }
 0x67e   : > { %v5266_v61 = vshrl.u32 %v5248_v8, %v5264_v2  ;;  %v5269_v42 = vadd.s32 127, %v5268_v46  ;;  %v5355_v29 = vsel %vm5353_vm1, %v5354_v34, %v14403_v43  ;;  %v14435_v52 = vand.u32 8388607, %v16601_v49 }
 0x67f   : > { %v5356_v36 = vadd.s32 %v5355_v29, %v5351_v54  ;;  %vm5411_vm6 = vcmp.gt.s32.totalorder %v5410_v48, 0  ;;  %v16822_v19 = vsub.s32 4, %v13958_v39  ;;  %v10828_v7 = vadd.s32 4294967169, %v5092_v13 }
 0x680   : > { %v5267_v27 = vor.u32 %v5266_v61, %v5265_v57  ;;  %v5270_v15 = vshll.u32 %v5269_v42, 23  ;;  %v5412_v56 = vsel %vm5411_vm6, %v5410_v48, 0  ;;  %11970 = vcosq.f32 %v14426_v22 }
 0x681   : > { %v4717_v6 = vsel %vm4632_vm0, %v16822_v19, %v13958_v39  ;;  %v5357_v43 = vadd.s32 536870912, %v5356_v36  ;;  %v5414_v10 = vand.u32 31, %v5412_v56  ;;  %v14443_v8 = vshll.u32 %v5408_v63, 8 }
 0x682   : > { %v5271_v25 = vor.u32 4788187, %v5270_v15  ;;  %v5413_v3 = vshrl.u32 %v5412_v56, 5  ;;  %v4719_v1 = vsel %vm14080_vm4, 0, %v4717_v6  ;;  %v5274_v2 = vcvt.s32.f32 %v5267_v27 }
 0x683   : > { %v14448_v46 = vshrl.u32 %v5357_v43, 30  ;;  %v5415_v39 = vsub.s32 32, %v5414_v10  ;;  %v5098_v54 = vadd.s32 1, %v10828_v7  ;;  %v5417_v48 = vshll.u32 %v16689_v35, %v5414_v10 }
 0x684   : > { %v5272_v57 = vand.u32 2147483647, %v5271_v25  ;;  %v5420_v61 = vshll.u32 %v16684_v26, %v5414_v10  ;;  %v5423_v63 = vshll.u32 %v16685_v21, %v5414_v10  ;;  %v5426_v17 = vshll.u32 %v16686_v11, %v5414_v10 }
 0x685   : > { %v5359_v42 = vshll.u32 %v14448_v46, 30  ;;  %v5418_v29 = vshrl.u32 %v16684_v26, %v5415_v39  ;;  %v5421_v13 = vshrl.u32 %v16685_v21, %v5415_v39  ;;  %v5424_v6 = vshrl.u32 %v16686_v11, %v5415_v39 }
 0x686   : > { %v5275_v19 = vmul.f32 %v5274_v2, %v5272_v57  ;;  %v5427_v27 = vshrl.u32 %v16687_v18, %v5415_v39  ;;  %v5430_v15 = vshrl.u32 %v16690_v60, %v5415_v39  ;;  %v5429_v25 = vshll.u32 %v16687_v18, %v5414_v10 }
 0x687   : > { %v14460_v56 = vsub.s32 %v5356_v36, %v5359_v42  ;;  %v5419_v7 = vor.u32 %v5418_v29, %v5417_v48  ;;  %v5422_v43 = vor.u32 %v5421_v13, %v5420_v61  ;;  %v5416_v14 = vshrl.u32 %v16689_v35, %v5415_v39 }
 0x688   : > { %v5276_v49 = vxor.u32 2147483648, %v5275_v19  ;;  %v5425_v34 = vor.u32 %v5424_v6, %v5423_v63  ;;  %v5428_v41 = vor.u32 %v5427_v27, %v5426_v17  ;;  %v5431_v2 = vor.u32 %v5430_v15, %v5429_v25 }
 0x689   : > { %v5362_v24 = vsub.s32 0, %v14460_v56  ;;  %vm5432_vm0 = vcmp.lt.s32.totalorder %v5413_v3, 1  ;;  %vm5435_vm4 = vcmp.lt.s32.totalorder %v5413_v3, 4  ;;  %vm5434_vm5 = vcmp.lt.s32.totalorder %v5413_v3, 3 }
 0x68a   : > { %v5277_v57 = vsel %vm5194_vm14, %v5276_v49, %v5275_v19  ;;  %v5437_v36 = vsel %vm5435_vm4, %v5425_v34, 2102212464  ;;  %v5440_v48 = vsel %vm5432_vm0, %v5419_v7, %v5422_v43  ;;  %v14468_v61 = vpop.eup %11970  ;;  %v5436_v42 = vsel %vm5432_vm0, %v5416_v14, %v5419_v7 }
 0x68b   : > { %v10837_v10 = vmin.u32 %v5362_v24, %v14460_v56  ;;  %v5438_v39 = vsel %vm5434_vm5, %v5422_v43, %v5437_v36  ;;  %v5441_v63 = vsel %vm5435_vm4, %v5428_v41, 920167782  ;;  %vm5433_vm11 = vcmp.lt.s32.totalorder %v5413_v3, 2 }
 0x68c   : > { %v5442_v29 = vsel %vm5434_vm5, %v5425_v34, %v5441_v63  ;;  %v5444_v13 = vsel %vm5432_vm0, %v5422_v43, %v5425_v34  ;;  %v4723_v17 = vadd.s32 3, %v4719_v1  ;;  %v14477_v49 = vsel %vm14368_vm3, %v14175_v38, %v5277_v57 }
 0x68d   : > { %v5364_v19 = vclz %v10837_v10  ;;  %v5443_v6 = vsel %vm5433_vm11, %v5440_v48, %v5442_v29  ;;  %v5445_v27 = vsel %vm5435_vm4, %v5431_v2, 1326507024  ;;  %v5439_v24 = vsel %vm5433_vm11, %v5436_v42, %v5438_v39 }
 0x68e   : > { %v5446_v14 = vsel %vm5434_vm5, %v5428_v41, %v5445_v27  ;;  %v14482_v15 = vmul.u32.u64.low %v14443_v8, %v5443_v6  ;;  %v14483_v7 = vmul.u32.u64.high %v14443_v8, %v5443_v6, %v14482_v15  ;;  %11972 = vsinq.f32 %v14426_v22 }
 0x68f   : > { %v10838_v34 = vadd.s32 4294967294, %v5364_v19  ;;  %v5447_v1 = vsel %vm5433_vm11, %v5444_v13, %v5446_v14  ;;  %vm5099_vm14 = vcmp.gt.s32.totalorder %v5098_v54, 0  ;;  %v5352_v9 = vadd.s32 %v14402_v16, %v14408_v12 }
 0x690   : > { %v14490_v43 = vmul.u32.u64.low %v14443_v8, %v5447_v1  ;;  %v14491_v25 = vmul.u32.u64.high %v14443_v8, %v5447_v1, %v14490_v43  ;;  %v5100_v2 = vsel %vm5099_vm14, %v5098_v54, 0  ;;  %11974 = vcosq.f32 %v14477_v49 }
 0x691   : > { %vm10839_vm3 = vcmp.lt.s32.totalorder %v10838_v34, 0  ;;  %v5455_v41 = vmul.u32 %v14443_v8, %v5439_v24  ;;  %v5102_v3 = vand.u32 31, %v5100_v2  ;;  %v5458_v22 = vadd.s32 1, %v14483_v7 }
 0x692   : > { %v5367_v57 = vsel %vm10839_vm3, 0, %v10838_v34  ;;  %v16823_v36 = vor.u32 8388608, %v14435_v52  ;;  %v14500_v10 = vand.u32 3, %v4723_v17  ;;  %v5101_v42 = vshrl.u32 %v5100_v2, 5 }
 0x693   : > { %v5368_v16 = vsub.s32 32, %v5367_v57  ;;  %v5372_v12 = vsub.s32 4294967266, %v5367_v57  ;;  %v5103_v39 = vsub.s32 32, %v5102_v3  ;;  %v5369_v54 = vshll.u32 %v14460_v56, %v5367_v57 }
 0x694   : > { %v14498_v48 = vshll.u32 %v16823_v36, 8  ;;  %vm5457_vm1 = vc.u32 %v14491_v25, %v14482_v15  ;;  %v5105_v8 = vshll.u32 %v16689_v35, %v5102_v3  ;;  %v5108_v17 = vshll.u32 %v16684_v26, %v5102_v3 }
 0x695   : > { %v5370_v29 = vshrl.u32 %v5352_v9, %v5368_v16  ;;  %v5373_v13 = vadd.s32 127, %v5372_v12  ;;  %v5459_v52 = vsel %vm5457_vm1, %v5458_v22, %v14483_v7  ;;  %v5104_v6 = vshrl.u32 %v16689_v35, %v5103_v39 }
 0x696   : > { %v5460_v19 = vadd.s32 %v5459_v52, %v5455_v41  ;;  %v5106_v27 = vshrl.u32 %v16684_v26, %v5103_v39  ;;  %v5109_v56 = vshrl.u32 %v16685_v21, %v5103_v39  ;;  %v5111_v34 = vshll.u32 %v16685_v21, %v5102_v3 }
 0x697   : > { %v5371_v24 = vor.u32 %v5370_v29, %v5369_v54  ;;  %v5374_v14 = vshll.u32 %v5373_v13, 23  ;;  %v5112_v1 = vshrl.u32 %v16686_v11, %v5103_v39  ;;  %vm16605_vm6 = vcmp.lt.s32.totalorder %v14183_v28, 0 }
 0x698   : > { %v5461_v9 = vadd.s32 536870912, %v5460_v19  ;;  %v5107_v43 = vor.u32 %v5106_v27, %v5105_v8  ;;  %v5114_v7 = vshll.u32 %v16686_v11, %v5102_v3  ;;  %v5115_v2 = vshrl.u32 %v16687_v18, %v5103_v39  ;;  %v14518_v41 = vpop.eup %11972 }
 0x699   : > { %vm4726_vm0 = vcmp.eq.s32.totalorder %v14500_v10, 0  ;;  %v16824_v57 = vand.u32 2147483647, %v14183_v28  ;;  %v5375_v36 = vor.u32 4788187, %v5374_v14  ;;  %v5378_v16 = vcvt.s32.f32 %v5371_v24 }
 0x69a   : > { %v5110_v12 = vor.u32 %v5109_v56, %v5108_v17  ;;  %v5113_v54 = vor.u32 %v5112_v1, %v5111_v34  ;;  %v14526_v29 = vshrl.u32 %v5461_v9, 30  ;;  %v5116_v8 = vor.u32 %v5115_v2, %v5114_v7  ;;  %v14530_v27 = vpop.eup %11974 }
 0x69b   : > { %vm14522_vm4 = vcmp.le.f32.partialorder %v16824_v57, 0.7853982  ;;  %v5117_v13 = vshll.u32 %v16687_v18, %v5102_v3  ;;  %v5118_v52 = vshrl.u32 %v16690_v60, %v5103_v39  ;;  %v5376_v63 = vand.u32 2147483647, %v5375_v36 }
 0x69c   : > { %vm5120_vm5 = vcmp.lt.s32.totalorder %v5101_v42, 1  ;;  %vm5122_vm11 = vcmp.lt.s32.totalorder %v5101_v42, 3  ;;  %vm5123_vm14 = vcmp.lt.s32.totalorder %v5101_v42, 4  ;;  %v5463_v57 = vshll.u32 %v14526_v29, 30 }
 0x69d   : > { %v5119_v11 = vor.u32 %v5118_v52, %v5117_v13  ;;  %v5124_v14 = vsel %vm5120_vm5, %v5104_v6, %v5107_v43  ;;  %v5125_v17 = vsel %vm5123_vm14, %v5113_v54, 2102212464  ;;  %vm4722_vm3 = vweird.f32 %v13727_v45 }
 0x69e   : > { %v5379_v56 = vmul.f32 %v5378_v16, %v5376_v63  ;;  %v5126_v24 = vsel %vm5122_vm11, %v5110_v12, %v5125_v17  ;;  %v5128_v3 = vsel %vm5120_vm5, %v5107_v43, %v5110_v12  ;;  %v5129_v39 = vsel %vm5123_vm14, %v5116_v8, 920167782 }
 0x69f   : > { %v14537_v34 = vsub.s32 %v5460_v19, %v5463_v57  ;;  %vm5121_vm1 = vcmp.lt.s32.totalorder %v5101_v42, 2  ;;  %v5130_v1 = vsel %vm5122_vm11, %v5113_v54, %v5129_v39  ;;  %v5132_v9 = vsel %vm5120_vm5, %v5110_v12, %v5113_v54 }
 0x6a0   : > { %v5380_v7 = vxor.u32 2147483648, %v5379_v56  ;;  %v5127_v2 = vsel %vm5121_vm1, %v5124_v14, %v5126_v24  ;;  %v5131_v36 = vsel %vm5121_vm1, %v5128_v3, %v5130_v1  ;;  %v5133_v6 = vsel %vm5123_vm14, %v5119_v11, 1326507024 }
 0x6a1   : > { %v5466_v13 = vsub.s32 0, %v14537_v34  ;;  %v5134_v63 = vsel %vm5122_vm11, %v5116_v8, %v5133_v6  ;;  %v14544_v16 = vmul.u32.u64.low %v14498_v48, %v5131_v36  ;;  %v14545_v43 = vmul.u32.u64.high %v14498_v48, %v5131_v36, %v14544_v16  ;;  %v16829_v6 = vld [vmem:[#allocation4_spill] sm:$0xff] }
 0x6a2   : > { %v5381_v19 = vsel %vm16605_vm6, %v5380_v7, %v5379_v56  ;;  %v5135_v52 = vsel %vm5121_vm1, %v5132_v9, %v5134_v63  ;;  %v16827_v12 = vxor.u32 2147483648, %v14209_v20  ;;  %vm4729_vm5 = vcmp.eq.s32.totalorder %v14500_v10, 2 }
 0x6a3   : > { %v14559_v11 = vsel %vm14522_vm4, %v14183_v28, %v5381_v19  ;;  %v10841_v42 = vmin.u32 %v5466_v13, %v14537_v34  ;;  %v14563_v8 = vmul.u32.u64.low %v14498_v48, %v5135_v52  ;;  %v14564_v57 = vmul.u32.u64.high %v14498_v48, %v5135_v52, %v14563_v8  ;;  %v16830_v52 = vld [vmem:[#allocation6_spill] sm:$0xff] }
 0x6a4   : > { %v4728_v54 = vsel %vm4726_vm0, %v14205_v53, %v16827_v12  ;;  %11976 = vsinq.f32 %v14477_v49  ;;  %vm4725_vm11 = vcmp.lt.s32.totalorder %v14500_v10, 2  ;;  %v16828_v14 = vxor.u32 2147483648, %v14205_v53 }
 0x6a5   : > { %v4820_v56 = vsub.s32 4, %v14042_v47  ;;  %v5456_v24 = vadd.s32 %v14482_v15, %v14491_v25  ;;  %v5468_v3 = vclz %v10841_v42  ;;  %v5146_v39 = vadd.s32 1, %v14545_v43 }
 0x6a6   : > { %v4731_v17 = vsel %vm4729_vm5, %v16828_v14, %v14209_v20  ;;  %11978 = vcosq.f32 %v14559_v11  ;;  %v5143_v9 = vmul.u32 %v14498_v48, %v5127_v2  ;;  %vm5145_vm0 = vc.u32 %v14564_v57, %v14544_v16 }
 0x6a7   : > { %v4732_v1 = vsel %vm4725_vm11, %v4728_v54, %v4731_v17  ;;  %v4821_v53 = vsel %vm4736_vm8, %v4820_v56, %v14042_v47  ;;  %v10842_v20 = vadd.s32 4294967294, %v5468_v3  ;;  %vm4826_vm14 = vweird.f32 %v13874_v55 }
 0x6a8   : > { %v4733_v49 = vsel %vm4722_vm3, nan, %v4732_v1  ;;  %v4823_v15 = vsel %vm14166_vm15, 0, %v4821_v53  ;;  %v4831_v25 = vxor.u32 2147483648, %v14284_v0  ;;  %v5147_v48 = vsel %vm5145_vm0, %v5146_v39, %v14545_v43 }
 0x6a9   : > { %v4827_v10 = vadd.s32 3, %v4823_v15  ;;  %v4834_v7 = vxor.u32 2147483648, %v14253_v51  ;;  %v4853_v2 = vmul.u32 2, %v14350_v37  ;;  %vm10843_vm3 = vcmp.lt.s32.totalorder %v10842_v20, 0 }
 0x6aa   : > { %v5148_v47 = vadd.s32 %v5147_v48, %v5143_v9  ;;  %v4842_v36 = vmul.f32 %v4733_v49, %v4733_v49  ;;  %v4854_v13 = vmul.u32 2, %v16829_v6  ;;  %v5471_v63 = vsel %vm10843_vm3, 0, %v10842_v20 }
 0x6ab   : > { %v4828_v19 = vand.u32 3, %v4827_v10  ;;  %v4857_v59 = vadd.s32 4294967292, %v4853_v2  ;;  %v4404_v12 = vsub.s32 4, %v16830_v52  ;;  %v5472_v54 = vsub.s32 32, %v5471_v63 }
 0x6ac   : > { %v5473_v43 = vshll.u32 %v14537_v34, %v5471_v63  ;;  %v5476_v42 = vsub.s32 4294967266, %v5471_v63  ;;  %v5149_v8 = vadd.s32 536870912, %v5148_v47  ;;  %v4858_v14 = vadd.s32 4294967292, %v4854_v13 }
 0x6ad   : > { %vm4829_vm8 = vcmp.lt.s32.totalorder %v4828_v19, 2  ;;  %vm4830_vm15 = vcmp.eq.s32.totalorder %v4828_v19, 0  ;;  %vm4833_vm1 = vcmp.eq.s32.totalorder %v4828_v19, 2  ;;  %v5474_v17 = vshrl.u32 %v5456_v24, %v5472_v54 }
 0x6ae   : > { %v5477_v56 = vadd.s32 127, %v5476_v42  ;;  %v14598_v3 = vshrl.u32 %v5149_v8, 30  ;;  %v4832_v39 = vsel %vm4830_vm15, %v14253_v51, %v4831_v25  ;;  %v14601_v1 = vpop.eup %11976  ;;  %v4835_v9 = vsel %vm4833_vm1, %v4834_v7, %v14284_v0  ;;  %v16831_v0 = vld [vmem:[#allocation10_spill] sm:$0xff] }
 0x6af   : > { %vm4860_vm5 = vcmp.ge.s32.totalorder %v4857_v59, 0  ;;  %vm4861_vm11 = vcmp.ge.s32.totalorder %v4858_v14, 0  ;;  %vm4863_vm0 = vcmp.lt.s32.totalorder %v4857_v59, 512  ;;  %v5475_v34 = vor.u32 %v5474_v17, %v5473_v43 }
 0x6b0   : > { %v5478_v49 = vshll.u32 %v5477_v56, 23  ;;  %v5151_v53 = vshll.u32 %v14598_v3, 30  ;;  %v4836_v20 = vsel %vm4829_vm8, %v4832_v39, %v4835_v9  ;;  %vm4866_vm3 = vmand %vm4860_vm5, %vm4863_vm0  ;;  %v14606_v24 = vpop.eup %11978  ;;  %vm5402_vm6 = vcmp.lt.s32.totalorder %v14342_v4, 0  ;;  %v16839_v56 = vld [vmem:[#allocation19_spill] sm:$0xff]  ;;  %v16840_v9 = vld [vmem:[#allocation18_spill] sm:$0xff] }
 0x6b1   : > { %v4837_v51 = vsel %vm4826_vm14, nan, %v4836_v20  ;;  %v4848_v15 = vadd.f32 %v4842_v36, %v13727_v45  ;;  %vm4864_vm15 = vcmp.lt.s32.totalorder %v4858_v14, 512  ;;  %vm16832_vm1 = vcmp.lt.s32.totalorder %v16831_v0, 0  ;;  %v16838_v14 = vld [vmem:[#allocation8_spill] sm:$0xff] }
 0x6b2   : > { %v4405_v25 = vsel %vm16832_vm1, %v4404_v12, %v16830_v52  ;;  %11980 = vsinq.f32 %v14559_v11  ;;  %v16833_v48 = vand.u32 2147483647, %v14342_v4  ;;  %v5479_v7 = vor.u32 4788187, %v5478_v49  ;;  %vm4867_vm14 = vmand %vm4861_vm11, %vm4864_vm15 }
 0x6b3   : > { %v14622_v63 = vsub.s32 %v5148_v47, %v5151_v53  ;;  %v4843_v19 = vmul.f32 %v4837_v51, %v4837_v51  ;;  %v5482_v45 = vcvt.s32.f32 %v5475_v34  ;;  %v16836_v36 = vmov 0.0  }
 0x6b4   : > { %vm14618_vm8 = vcmp.le.f32.partialorder %v16833_v48, 0.7853982  ;;  %v14626_v59 = vsel %vm4866_vm3, 1.0, %v16836_v36  ;;  %v14629_v52 = vsel %vm4867_vm14, 1.0, %v16836_v36  ;;  %v4407_v12 = vsel %vm13971_vm9, 0, %v4405_v25 }
 0x6b5   : > { %v5480_v54 = vand.u32 2147483647, %v5479_v7  ;;  %v5154_v43 = vsub.s32 0, %v14622_v63  ;;  %v4849_v42 = vadd.f32 %v4843_v19, %v13874_v55  ;;  %v4411_v47 = vadd.s32 3, %v4407_v12 }
 0x6b6   : > { %v4878_v8 = vmul.f32 %v14626_v59, %v4848_v15  ;;  %v4415_v17 = vxor.u32 2147483648, %v16838_v14  ;;  %v4418_v39 = vxor.u32 2147483648, %v16839_v56  ;;  %v4508_v34 = vsub.s32 4, %v16840_v9  ;;  %v16842_v15 = vld [vmem:[#allocation9_spill] sm:$0xff] }
 0x6b7   : > { %v5483_v49 = vmul.f32 %v5482_v45, %v5480_v54  ;;  %v10829_v53 = vmin.u32 %v5154_v43, %v14622_v63  ;;  %v4879_v20 = vmul.f32 %v14629_v52, %v4849_v42  ;;  %v4412_v51 = vand.u32 3, %v4411_v47 }
 0x6b8   : > { %v5144_v25 = vadd.s32 %v14544_v16, %v14564_v57  ;;  %vm4410_vm9 = vweird.f32 %v16831_v0  ;;  %vm16841_vm5 = vcmp.lt.s32.totalorder %v13949_v50, 0  ;;  %v4300_v48 = vsub.s32 4, %v16842_v15  ;;  %v16843_v16 = vld [vmem:[#allocation7_spill] sm:$0xff] }
 0x6b9   : > { %v4509_v55 = vsel %vm16841_vm5, %v4508_v34, %v16840_v9  ;;  %v5484_v7 = vxor.u32 2147483648, %v5483_v49  ;;  %v5156_v19 = vclz %v10829_v53  ;;  %v14648_v11 = vpack.i.bf16 %v4879_v20, %v4878_v8 }
 0x6ba   : > { %vm4413_vm11 = vcmp.lt.s32.totalorder %v4412_v51, 2  ;;  %vm4414_vm0 = vcmp.eq.s32.totalorder %v4412_v51, 0  ;;  %vm4417_vm3 = vcmp.eq.s32.totalorder %v4412_v51, 2  ;;  %v4511_v45 = vsel %vm14278_vm2, 0, %v4509_v55 }
 0x6bb   : > { %vm16844_vm15 = vcmp.lt.s32.totalorder %v16843_v16, 0  ;;  %v5485_v12 = vsel %vm5402_vm6, %v5484_v7, %v5483_v49  ;;  %v10830_v54 = vadd.s32 4294967294, %v5156_v19  ;;  %11850 = vrot.lane.b32.xlu0 %v14648_v11, %s12097_s25  ;;  %v4416_v43 = vsel %vm4414_vm0, %v16839_v56, %v4415_v17 }
 0x6bc   : > { %v4301_v57 = vsel %vm16844_vm15, %v4300_v48, %v16842_v15  ;;  %v4419_v42 = vsel %vm4417_vm3, %v4418_v39, %v16838_v14  ;;  %v5488_v30 = vsel %vm14618_vm8, %v14342_v4, %v5485_v12  ;;  %v4515_v8 = vadd.s32 3, %v4511_v45  ;;  %v14666_v53 = vpop.eup %11980 }
 0x6bd   : > { %v4420_v47 = vsel %vm4413_vm11, %v4416_v43, %v4419_v42  ;;  %v4303_v34 = vsel %vm13901_vm7, 0, %v4301_v57  ;;  %vm10831_vm2 = vcmp.lt.s32.totalorder %v10830_v54, 0  ;;  %v4519_v20 = vxor.u32 2147483648, %v14364_v32  ;;  %v16846_v42 = vld [vmem:[#allocation13_spill] sm:$0xff] }
 0x6be   : > { %v4421_v49 = vsel %vm4410_vm9, nan, %v4420_v47  ;;  %v4522_v17 = vxor.u32 2147483648, %v14359_v33  ;;  %v5159_v14 = vsel %vm10831_vm2, 0, %v10830_v54  ;;  %vm4514_vm1 = vweird.f32 %v13949_v50 }
 0x6bf   : > { %v4516_v56 = vand.u32 3, %v4515_v8  ;;  %v4839_v39 = vmul.f32 %v4421_v49, %v4421_v49  ;;  %11982 = vcosq.f32 %v5488_v30  ;;  %v5160_v51 = vsub.s32 32, %v5159_v14 }
 0x6c0   : > { %v5164_v55 = vsub.s32 4294967266, %v5159_v14  ;;  %v4307_v15 = vadd.s32 3, %v4303_v34  ;;  %v5161_v48 = vshll.u32 %v14622_v63, %v5159_v14  ;;  %v4311_v47 = vxor.u32 2147483648, %v16846_v42  ;;  %v16847_v34 = vld [vmem:[#allocation21_spill] sm:$0xff] }
 0x6c1   : > { %vm4517_vm7 = vcmp.lt.s32.totalorder %v4516_v56, 2  ;;  %vm4518_vm14 = vcmp.eq.s32.totalorder %v4516_v56, 0  ;;  %vm4521_vm5 = vcmp.eq.s32.totalorder %v4516_v56, 2  ;;  %v5162_v7 = vshrl.u32 %v5144_v25, %v5160_v51 }
 0x6c2   : > { %v5165_v19 = vadd.s32 127, %v5164_v55  ;;  %v4520_v45 = vsel %vm4518_vm14, %v14359_v33, %v4519_v20  ;;  %v4523_v57 = vsel %vm4521_vm5, %v4522_v17, %v14364_v32  ;;  %v4845_v54 = vadd.f32 %v4839_v39, %v16831_v0  ;;  %v16851_v39 = vld [vmem:[#allocation16_spill] sm:$0xff]  ;;  %v14815_v32 = vld [vmem:[%s16502_s5 + $0x18] sm:$0xff] }
 0x6c3   : > { %v4524_v12 = vsel %vm4517_vm7, %v4520_v45, %v4523_v57  ;;  %v4308_v43 = vand.u32 3, %v4307_v15  ;;  %v5163_v8 = vor.u32 %v5162_v7, %v5161_v48  ;;  %v4314_v49 = vxor.u32 2147483648, %v16847_v34  ;;  %v16852_v45 = vld [vmem:[#allocation11_spill] sm:$0xff] }
 0x6c4   : > { %v5166_v9 = vshll.u32 %v5165_v19, 23  ;;  %v4525_v63 = vsel %vm4514_vm1, nan, %v4524_v12  ;;  %vm5090_vm9 = vcmp.lt.s32.totalorder %v14347_v23, 0  ;;  %vm4306_vm11 = vweird.f32 %v16843_v16 }
 0x6c5   : > { %v4840_v25 = vmul.f32 %v4525_v63, %v4525_v63  ;;  %vm4310_vm0 = vcmp.eq.s32.totalorder %v4308_v43, 0  ;;  %vm4313_vm3 = vcmp.eq.s32.totalorder %v4308_v43, 2  ;;  %v16848_v33 = vand.u32 2147483647, %v14347_v23  ;;  %v16856_v63 = vld [vmem:[#allocation17_spill] sm:$0xff] }
 0x6c6   : > { %v5167_v0 = vor.u32 4788187, %v5166_v9  ;;  %vm4309_vm2 = vcmp.lt.s32.totalorder %v4308_v43, 2  ;;  %v4312_v20 = vsel %vm4310_vm0, %v16847_v34, %v4311_v47  ;;  %v4315_v17 = vsel %vm4313_vm3, %v4314_v49, %v16846_v42 }
 0x6c7   : > { %vm14685_vm15 = vcmp.le.f32.partialorder %v16848_v33, 0.7853982  ;;  %11984 = vsinq.f32 %v5488_v30  ;;  %v4846_v14 = vadd.f32 %v4840_v25, %v13949_v50  ;;  %v4316_v56 = vsel %vm4309_vm2, %v4312_v20, %v4315_v17 }
 0x6c8   : > { %v4612_v51 = vsub.s32 4, %v16851_v39  ;;  %v5168_v55 = vand.u32 2147483647, %v5167_v0  ;;  %v5170_v15 = vcvt.s32.f32 %v5163_v8  ;;  %v4875_v48 = vmul.f32 %v14626_v59, %v4845_v54  ;;  %v16855_v8 = vld [vmem:[#allocation15_spill] sm:$0xff] }
 0x6c9   : > { %v4317_v7 = vsel %vm4306_vm11, nan, %v4316_v56  ;;  %v4876_v19 = vmul.f32 %v14629_v52, %v4846_v14  ;;  %vm16853_vm1 = vcmp.lt.s32.totalorder %v16852_v45, 0  ;;  %vm4618_vm7 = vweird.f32 %v16852_v45  ;;  %v14700_v50 = vpop.eup %11982 }
 0x6ca   : > { %v4613_v57 = vsel %vm16853_vm1, %v4612_v51, %v16851_v39  ;;  %v4838_v12 = vmul.f32 %v4317_v7, %v4317_v7  ;;  %v4852_v30 = vmul.u32 2, %v16735_v5  ;;  %v5171_v43 = vmul.f32 %v5170_v15, %v5168_v55 }
 0x6cb   : > { %v4615_v47 = vsel %vm13995_vm10, 0, %v4613_v57  ;;  %v4623_v59 = vxor.u32 2147483648, %v16855_v8  ;;  %v5070_v54 = vsub.s32 4, %v14286_v44  ;;  %v14706_v52 = vpack.i.bf16 %v4876_v19, %v4875_v48 }
 0x6cc   : > { %v4619_v9 = vadd.s32 3, %v4615_v47  ;;  %v4626_v34 = vxor.u32 2147483648, %v16856_v63  ;;  %v4856_v49 = vadd.s32 4294967292, %v4852_v30  ;;  %v5172_v25 = vxor.u32 2147483648, %v5171_v43 }
 0x6cd   : > { %v4844_v33 = vadd.f32 %v4838_v12, %v16843_v16  ;;  %v5071_v0 = vsel %vm4986_vm13, %v5070_v54, %v14286_v44  ;;  %v5081_v20 = vxor.u32 2147483648, %v14518_v41  ;;  %11855 = vrot.lane.b32.xlu1 %v14706_v52, %s12097_s25  ;;  %v5084_v39 = vxor.u32 2147483648, %v14468_v61 }
 0x6ce   : > { %v4620_v17 = vand.u32 3, %v4619_v9  ;;  %vm4859_vm10 = vcmp.ge.s32.totalorder %v4856_v49, 0  ;;  %vm4862_vm14 = vcmp.lt.s32.totalorder %v4856_v49, 512  ;;  %v5073_v14 = vsel %vm14386_vm12, 0, %v5071_v0 }
 0x6cf   : > { %v5173_v56 = vsel %vm5090_vm9, %v5172_v25, %v5171_v43  ;;  %vm4865_vm5 = vmand %vm4859_vm10, %vm4862_vm14  ;;  %v5077_v16 = vadd.s32 3, %v5073_v14  ;;  %v5382_v44 = vsub.s32 4, %v14448_v46  ;;  %vm5076_vm12 = vweird.f32 %v14055_v31 }
 0x6d0   : > { %v5176_v51 = vsel %vm14685_vm15, %v14347_v23, %v5173_v56  ;;  %vm4621_vm13 = vcmp.lt.s32.totalorder %v4620_v17, 2  ;;  %vm4622_vm11 = vcmp.eq.s32.totalorder %v4620_v17, 0  ;;  %vm4625_vm0 = vcmp.eq.s32.totalorder %v4620_v17, 2 }
 0x6d1   : > { %11986 = vcosq.f32 %v5176_v51  ;;  %v4624_v58 = vsel %vm4622_vm11, %v16856_v63, %v4623_v59  ;;  %v4627_v55 = vsel %vm4625_vm0, %v4626_v34, %v16855_v8  ;;  %v10817_v15 = vsel %vm4865_vm5, 1.0, %v16836_v36  ;;  %v14730_v48 = vpop.eup %11984 }
 0x6d2   : > { %11988 = vsinq.f32 %v5176_v51  ;;  %v4628_v7 = vsel %vm4621_vm13, %v4624_v58, %v4627_v55  ;;  %v5078_v19 = vand.u32 3, %v5077_v16  ;;  %v4874_v12 = vmul.f32 %v10817_v15, %v4844_v33  ;;  %v16860_v55 = vld [vmem:[#allocation22_spill] sm:$0xff] }
 0x6d3   : > { %v4629_v57 = vsel %vm4618_vm7, nan, %v4628_v7  ;;  %vm16857_vm3 = vcmp.lt.s32.totalorder %v14183_v28, 0  ;;  %v5393_v42 = vxor.u32 2147483648, %v14666_v53  ;;  %vm5388_vm14 = vweird.f32 %v14183_v28 }
 0x6d4   : > { %v5383_v43 = vsel %vm16857_vm3, %v5382_v44, %v14448_v46  ;;  %v4841_v47 = vmul.f32 %v4629_v57, %v4629_v57  ;;  %vm5079_vm2 = vcmp.lt.s32.totalorder %v5078_v19, 2  ;;  %vm5080_vm1 = vcmp.eq.s32.totalorder %v5078_v19, 0  ;;  %v16859_v44 = vld [vmem:[#allocation23_spill] sm:$0xff] }
 0x6d5   : > { %vm5083_vm10 = vcmp.eq.s32.totalorder %v5078_v19, 2  ;;  %v5082_v8 = vsel %vm5080_vm1, %v14468_v61, %v5081_v20  ;;  %v5385_v54 = vsel %vm14522_vm4, 0, %v5383_v43  ;;  %v5519_v9 = vadd.s32 4294967293, %v4853_v2 }
 0x6d6   : > { %v5085_v59 = vsel %vm5083_vm10, %v5084_v39, %v14518_v41  ;;  %v4847_v46 = vadd.f32 %v4841_v47, %v16852_v45  ;;  %v5389_v34 = vadd.s32 3, %v5385_v54  ;;  %v5396_v49 = vxor.u32 2147483648, %v14606_v24  ;;  %v16858_v45 = vld [vmem:[#allocation20_spill] sm:$0xff] }
 0x6d7   : > { %v5086_v63 = vsel %vm5079_vm2, %v5082_v8, %v5085_v59  ;;  %vm5522_vm7 = vcmp.ge.s32.totalorder %v5519_v9, 0  ;;  %vm5525_vm5 = vcmp.lt.s32.totalorder %v5519_v9, 512  ;;  %v4974_v61 = vand.u32 3, %v14329_v62 }
 0x6d8   : > { %v5087_v25 = vsel %vm5076_vm12, nan, %v5086_v63  ;;  %v4877_v41 = vmul.f32 %v10817_v15, %v4847_v46  ;;  %v5390_v33 = vand.u32 3, %v5389_v34  ;;  %vm5528_vm4 = vmand %vm5522_vm7, %vm5525_vm5  ;;  %v4977_v0 = vxor.u32 2147483648, %v14379_v40 }
 0x6d9   : > { %v5505_v22 = vmul.f32 %v5087_v25, %v5087_v25  ;;  %v10845_v2 = vsel %vm5528_vm4, 1.0, %v16836_v36  ;;  %vm4972_vm13 = vweird.f32 %v16858_v45  ;;  %vm4975_vm11 = vcmp.lt.s32.totalorder %v4974_v61, 2 }
 0x6da   : > { %vm4976_vm0 = vcmp.eq.s32.totalorder %v4974_v61, 0  ;;  %v14754_v20 = vpack.i.bf16 %v4877_v41, %v4874_v12  ;;  %vm5392_vm3 = vcmp.eq.s32.totalorder %v5390_v33, 0  ;;  %vm5395_vm12 = vcmp.eq.s32.totalorder %v5390_v33, 2 }
 0x6db   : > { %vm4979_vm2 = vcmp.eq.s32.totalorder %v4974_v61, 2  ;;  %v14756_v17 = vpop.eup %11986  ;;  %vm5391_vm1 = vcmp.lt.s32.totalorder %v5390_v33, 2  ;;  %v5394_v62 = vsel %vm5392_vm3, %v14606_v24, %v5393_v42  ;;  %v5397_v14 = vsel %vm5395_vm12, %v5396_v49, %v14666_v53 }
 0x6dc   : > { %v5511_v56 = vadd.f32 %v5505_v22, %v14055_v31  ;;  %v14761_v16 = vpop.eup %11988  ;;  %11860 = vrot.lane.b32.xlu1 %v14754_v20, %s12097_s25  ;;  %v5398_v39 = vsel %vm5391_vm1, %v5394_v62, %v5397_v14  ;;  %v4978_v51 = vsel %vm4976_vm0, %v16859_v44, %v4977_v0  ;;  %v4980_v58 = vxor.u32 2147483648, %v16859_v44 }
 0x6dd   : > { %v5286_v15 = vand.u32 3, %v16860_v55  ;;  %v5399_v7 = vsel %vm5388_vm14, nan, %v5398_v39  ;;  %vm5284_vm10 = vweird.f32 %v14175_v38  ;;  %v5289_v24 = vxor.u32 2147483648, %v14601_v1 }
 0x6de   : > { %v5292_v31 = vxor.u32 2147483648, %v14530_v27  ;;  %v5508_v53 = vmul.f32 %v5399_v7, %v5399_v7  ;;  %v4981_v19 = vsel %vm4979_vm2, %v4980_v58, %v14379_v40  ;;  %v5518_v43 = vadd.s32 4294967293, %v4852_v30 }
 0x6df   : > { %vm5287_vm7 = vcmp.lt.s32.totalorder %v5286_v15, 2  ;;  %vm5288_vm5 = vcmp.eq.s32.totalorder %v5286_v15, 0  ;;  %v4982_v57 = vsel %vm4975_vm11, %v4978_v51, %v4981_v19  ;;  %vm5291_vm4 = vcmp.eq.s32.totalorder %v5286_v15, 2 }
 0x6e0   : > { %v5290_v12 = vsel %vm5288_vm5, %v14530_v27, %v5289_v24  ;;  %v5514_v42 = vadd.f32 %v5508_v53, %v14183_v28  ;;  %v4983_v47 = vsel %vm4972_vm13, nan, %v4982_v57  ;;  %v5293_v8 = vsel %vm5291_vm4, %v5292_v31, %v14601_v1 }
 0x6e1   : > { %v5486_v59 = vsub.s32 4, %v14526_v29  ;;  %v5294_v40 = vsel %vm5287_vm7, %v5290_v12, %v5293_v8  ;;  %v5504_v54 = vmul.f32 %v4983_v47, %v4983_v47  ;;  %vm5521_vm14 = vcmp.ge.s32.totalorder %v5518_v43, 0 }
 0x6e2   : > { %vm5524_vm0 = vcmp.lt.s32.totalorder %v5518_v43, 512  ;;  %v14784_v9 = vmul.f32 %v10845_v2, %v5511_v56  ;;  %v5540_v27 = vmul.f32 %v10845_v2, %v5514_v42  ;;  %v5295_v46 = vsel %vm5284_vm10, nan, %v5294_v40 }
 0x6e3   : > { %vm5527_vm11 = vmand %vm5521_vm14, %vm5524_vm0  ;;  %v5487_v28 = vsel %vm5402_vm6, %v5486_v59, %v14526_v29  ;;  %v5507_v30 = vmul.f32 %v5295_v46, %v5295_v46  ;;  %v5510_v1 = vadd.f32 %v5504_v54, %v16858_v45  ;;  %v5497_v61 = vxor.u32 2147483648, %v14730_v48 }
 0x6e4   : > { %v10844_v63 = vsel %vm5527_vm11, 1.0, %v16836_v36  ;;  %v5489_v34 = vsel %vm14618_vm8, 0, %v5487_v28  ;;  %v11390_v49 = vpack.c.bf16 %v5540_v27, %v14784_v9  ;;  %v5500_v33 = vxor.u32 2147483648, %v14700_v50 }
 0x6e5   : > { %v5493_v25 = vadd.s32 3, %v5489_v34  ;;  %v5513_v41 = vadd.f32 %v5507_v30, %v14175_v38  ;;  %v5520_v29 = vadd.s32 4294967293, %v4854_v13  ;;  %v5174_v22 = vsub.s32 4, %v14598_v3  ;;  %v14851_v34 = vld [vmem:[%s16502_s5 + $0x8] sm:$0xff] }
 0x6e6   : > { %11391 = vmatprep.subr.bf16.mxu0 %v11390_v49  ;;  %v5536_v0 = vmul.f32 %v10844_v63, %v5510_v1  ;;  %vm5492_vm2 = vweird.f32 %v14342_v4  ;;  %v5185_v44 = vxor.u32 2147483648, %v14761_v16  ;;  %v5188_v51 = vxor.u32 2147483648, %v14756_v17 }
 0x6e7   : > { %v5494_v2 = vand.u32 3, %v5493_v25  ;;  %v5539_v45 = vmul.f32 %v10844_v63, %v5513_v41  ;;  %vm5523_vm6 = vcmp.ge.s32.totalorder %v5520_v29, 0  ;;  %vm5526_vm8 = vcmp.lt.s32.totalorder %v5520_v29, 512  ;;  %v14864_v25 = vld [vmem:[%s16502_s5 + $0x10] sm:$0xff] }
 0x6e8   : > { %v5175_v10 = vsel %vm5090_vm9, %v5174_v22, %v14598_v3  ;;  %vm5529_vm1 = vmand %vm5523_vm6, %vm5526_vm8  ;;  %vm5546_vm9 = vcmask 130048   ;;  %v16861_v58 = vmov 0.0|0.0   ;;  %vm16862_vm5 = vmmov 0  }
 0x6e9   : > { %vm5496_vm13 = vcmp.eq.s32.totalorder %v5494_v2, 0  ;;  %vm5499_vm3 = vcmp.eq.s32.totalorder %v5494_v2, 2  ;;  %v5177_v38 = vsel %vm14685_vm15, 0, %v5175_v10  ;;  %v11392_v62 = vpack.c.bf16 %v5539_v45, %v5536_v0 }
 0x6ea   : > { %vm5495_vm12 = vcmp.lt.s32.totalorder %v5494_v2, 2  ;;  %v5498_v13 = vsel %vm5496_vm13, %v14700_v50, %v5497_v61  ;;  %v5501_v14 = vsel %vm5499_vm3, %v5500_v33, %v14730_v48  ;;  %v5181_v39 = vadd.s32 3, %v5177_v38 }
 0x6eb   : > { %v5502_v56 = vsel %vm5495_vm12, %v5498_v13, %v5501_v14  ;;  %11393 = vmatpush1.bf16.msra.mxu0 %v11392_v62  ;;  %v10846_v55 = vsel %vm5529_vm1, 1.0, %v16836_v36  ;;  %vm5180_vm4 = vweird.f32 %v14347_v23  ;;  %vm16863_vm14 = vcmask 1039360  }
 0x6ec   : > { %v5503_v3 = vsel %vm5492_vm2, nan, %v5502_v56  ;;  %11394 = vmatprep.subr.bf16.mxu0 %v16861_v58  ;;  %v5182_v48 = vand.u32 3, %v5181_v39  ;;  %vm16864_vm0 = vmmov %vm16863_vm14  ;;  %vm16871_vm2 = vcmask 1031168  }
 0x6ed   : > { %v5509_v50 = vmul.f32 %v5503_v3, %v5503_v3  ;;  %vm16865_vm11 = vmmov %vm16864_vm0 }
 0x6ee   : > { %vm5184_vm15 = vcmp.eq.s32.totalorder %v5182_v48, 0  ;;  %vm5187_vm10 = vcmp.eq.s32.totalorder %v5182_v48, 2  ;;  %10849 = vmatmul.mubr.msk.f32.vlgmr.msra.gmra.mrb[14].mxu0 %vm5546_vm9, %v14815_v32  ;;  %vm5183_vm7 = vcmp.lt.s32.totalorder %v5182_v48, 2  ;;  %vm16866_vm6 = vmmov %vm16864_vm0 }
 0x6ef   : > { %v5515_v15 = vadd.f32 %v5509_v50, %v14342_v4  ;;  %v5186_v7 = vsel %vm5184_vm15, %v14756_v17, %v5185_v44  ;;  %v5189_v24 = vsel %vm5187_vm10, %v5188_v51, %v14761_v16  ;;  %11222 = vmatprep.mubr.msk.f32.mxu0 %vm16862_vm5, %v16836_v36  ;;  %v11874_v16 = vpack.i.bf16 %v5539_v45, %v5536_v0  ;;  %vm16867_vm8 = vmmov %vm16864_vm0 }
 0x6f0   : > { %v5190_v53 = vsel %vm5183_vm7, %v5186_v7, %v5189_v24  ;;  %vm16868_vm13 = vmmov %vm16864_vm0 }
 0x6f1   : > { %v5541_v31 = vmul.f32 %v10846_v55, %v5515_v15  ;;  %v5191_v19 = vsel %vm5180_vm4, nan, %v5190_v53  ;;  %vm16869_vm3 = vmmov %vm16864_vm0 }
 0x6f2   : > { %v5506_v4 = vmul.f32 %v5191_v19, %v5191_v19  ;;  %vm16870_vm12 = vmmov %vm16864_vm0 }
 0x6f3   : > { %v11864_v57 = vpack.i.bf16 %v5541_v31, %v5540_v27  ;;  %vm16872_vm1 = vmmov %vm16871_vm2 }
 0x6f4   : > { %v5512_v12 = vadd.f32 %v5506_v4, %v14347_v23  ;;  %v5863_v23 = vld [vmem:[%s16503_s6] sm:$0xff]  ;;  %vm16873_vm15 = vmmov %vm16872_vm1 }
 0x6f5   : > { %11865 = vrot.lane.b32.xlu1 %v11864_v57, %s12097_s25  ;;  %vm16874_vm10 = vmmov %vm16872_vm1 }
 0x6f6   : > { %v5538_v43 = vmul.f32 %v10846_v55, %v5512_v12  ;;  %v5872_v55 = vld [vmem:[%s16502_s5] sm:$0xff] }
 0x6f8   : > { %v11869_v42 = vpack.i.bf16 %v5538_v43, %v14784_v9  ;;  %v11395_v17 = vpack.c.bf16 %v5541_v31, %v5538_v43 }
 0x6f9   : > { %11880 = vrot.lane.b32.xlu1 %v14706_v52, %s12098_s26 }
 0x6fa   : > { %11870 = vrot.lane.b32.xlu0 %v11869_v42, %s12097_s25  ;;  %11396 = vmatpush3.bf16.msra.mxu0 %v11395_v17 }
 0x6fd   : > { %11890 = vrot.lane.b32.xlu1 %v14754_v20, %s12098_s26  ;;  %11223 = vmatmul.mubr.msk.f32.vlgmr.msra.gmra.mrb[16].mxu0 %vm5546_vm9, %v14815_v32 }
 0x6fe   : > { %11875 = vrot.lane.b32.xlu0 %v11874_v16, %s12097_s25  ;;  %5786 = vmatprep.mubr.f32.mxu0 %v16836_v36 }
 0x702   : > { %11885 = vrot.lane.b32.xlu0 %v14648_v11, %s12098_s26 }
 0x706   : > { %5866 = vperm.xlu0 %11787, %v5863_v23  }
 0x72d   : > { %v11851_v52 = vpop.permute.xlu0 %11850 }
 0x72e   : > { %v11853_v47 = vunpack.i.h.bf16 %v11851_v52  ;;  %v11852_v8 = vunpack.i.l.bf16 %v11851_v52 }
 0x730   : > { %v5712_v54 = vsel %vm16863_vm14, %v11852_v8, %v11853_v47 }
 0x73f   : > { %v11856_v59 = vpop.permute.xlu1 %11855 }
 0x740   : > { %v11858_v20 = vunpack.i.h.bf16 %v11856_v59  ;;  %v11857_v40 = vunpack.i.l.bf16 %v11856_v59 }
 0x742   : > { %v5710_v9 = vsel %vm16864_vm0, %v11857_v40, %v11858_v20  ;;  %v11402_v49 = vpack.c.bf16 %v11853_v47, %v11858_v20 }
 0x743   : > { %v11397_v27 = vpack.c.bf16 %v5712_v54, %v5710_v9 }
 0x745   : > { %11398 = vmatprep.subr.bf16.mxu0 %v11397_v27 }
 0x74e   : > { %v11861_v46 = vpop.permute.xlu1 %11860 }
 0x74f   : > { %v11863_v28 = vunpack.i.h.bf16 %v11861_v46  ;;  %v11862_v11 = vunpack.i.l.bf16 %v11861_v46 }
 0x751   : > { %v5711_v30 = vsel %vm16865_vm11, %v11863_v28, %v11852_v8  ;;  %v5709_v1 = vsel %vm16866_vm6, %v11862_v11, %v11857_v40 }
 0x752   : > { %v11399_v63 = vpack.c.bf16 %v5711_v30, %v5709_v1 }
 0x754   : > { %11400 = vmatpush1.bf16.msra.mxu0 %v11399_v63 }
 0x755   : > { %11401 = vmatprep.subr.bf16.mxu0 %v16861_v58 }
 0x757   : > { %10851 = vmatmul.mubr.msk.f32.vlgmr.msra.gmra.mrb[14].mxu0 %vm5546_vm9, %v14851_v34 }
 0x758   : > { %11403 = vmatpush3.bf16.msra.mxu0 %v11402_v49  ;;  %11229 = vmatprep.mubr.msk.f32.mxu0 %vm16862_vm5, %v16836_v36 }
 0x759   : > { %11405 = vmatprep.subr.bf16.mxu0 %v11397_v27 }
 0x75b   : > { %11230 = vmatmul.mubr.msk.f32.vlgmr.msra.gmra.mrb[18].mxu0 %vm5546_vm9, %v14851_v34 }
 0x75c   : > { %11407 = vmatpush1.bf16.msra.mxu0 %v11399_v63  ;;  %5942 = vmatprep.mubr.f32.mxu0 %v16836_v36 }
 0x75d   : > { %11408 = vmatprep.subr.bf16.mxu0 %v16861_v58 }
 0x75f   : > { %10854 = vmatmul.mubr.msk.f32.vlgmr.msra.gmra.mrb[20].mxu0 %vm5546_vm9, %v14864_v25 }
 0x760   : > { %11410 = vmatpush3.bf16.msra.mxu0 %v11402_v49  ;;  %11236 = vmatprep.mubr.msk.f32.mxu0 %vm16862_vm5, %v16836_v36 }
 0x763   : > { %11237 = vmatmul.mubr.msk.f32.vlgmr.msra.gmra.mrb[22].mxu0 %vm5546_vm9, %v14864_v25 }
 0x764   : > { %6114 = vmatprep.mubr.f32.mxu0 %v16836_v36 }
 0x767   : > { %v11866_v61 = vpop.permute.xlu1 %11865 }
 0x768   : > { %v11868_v41 = vunpack.i.h.bf16 %v11866_v61  ;;  %v11867_v33 = vunpack.i.l.bf16 %v11866_v61 }
 0x76a   : > { %v6040_v2 = vsel %vm16867_vm8, %v11867_v33, %v11868_v41 }
 0x76b   : > { %v11881_v56 = vpop.permute.xlu1 %11880 }
 0x76c   : > { %v11871_v29 = vpop.permute.xlu0 %11870  ;;  %v11883_v50 = vunpack.i.h.bf16 %v11881_v56  ;;  %v11882_v31 = vunpack.i.l.bf16 %v11881_v56 }
 0x76d   : > { %v11873_v22 = vunpack.i.h.bf16 %v11871_v29  ;;  %v11872_v0 = vunpack.i.l.bf16 %v11871_v29 }
 0x76f   : > { %v11416_v45 = vpack.c.bf16 %v11868_v41, %v11873_v22  ;;  %v6038_v10 = vsel %vm16868_vm13, %v11872_v0, %v11873_v22  ;;  %v11891_v7 = vpop.permute.xlu1 %11890 }
 0x770   : > { %v11876_v38 = vpop.permute.xlu0 %11875  ;;  %v11411_v62 = vpack.c.bf16 %v6040_v2, %v6038_v10  ;;  %v11893_v53 = vunpack.i.h.bf16 %v11891_v7  ;;  %v11892_v19 = vunpack.i.l.bf16 %v11891_v7 }
 0x771   : > { %v11878_v13 = vunpack.i.h.bf16 %v11876_v38  ;;  %v11877_v14 = vunpack.i.l.bf16 %v11876_v38  ;;  %11438 = vmatpush3.bf16.msra.mxu1 %v11416_v45 }
 0x772   : > { %11412 = vmatprep.subr.bf16.mxu0 %v11411_v62  ;;  %11443 = vmatprep.subr.bf16.mxu1 %v16861_v58  ;;  %v6632_v4 = vsel %vm16873_vm15, %v11892_v19, %v11882_v31 }
 0x773   : > { %v6037_v39 = vsel %vm16869_vm3, %v11877_v14, %v11872_v0  ;;  %v6039_v44 = vsel %vm16870_vm12, %v11878_v13, %v11867_v33 }
 0x774   : > { %v11413_v3 = vpack.c.bf16 %v6039_v44, %v6037_v39  ;;  %v11886_v51 = vpop.permute.xlu0 %11885  ;;  %11265 = vmatmul.mubr.msk.f32.vlgmr.msra.gmra.mrb[14].mxu1 %vm5546_vm9, %v14864_v25  ;;  %v16875_v44 = vmov 2102212464  }
 0x775   : > { %v11888_v48 = vunpack.i.h.bf16 %v11886_v51  ;;  %11271 = vmatprep.mubr.msk.f32.mxu1 %vm16862_vm5, %v16836_v36  ;;  %v11887_v24 = vunpack.i.l.bf16 %v11886_v51 }
 0x776   : > { %11414 = vmatpush1.bf16.msra.mxu0 %v11413_v3 }
 0x777   : > { %v11444_v15 = vpack.c.bf16 %v11888_v48, %v11883_v50  ;;  %11415 = vmatprep.subr.bf16.mxu0 %v16861_v58  ;;  %v6635_v57 = vsel %vm16871_vm2, %v11887_v24, %v11888_v48  ;;  %v6634_v12 = vsel %vm16874_vm10, %v11893_v53, %v11887_v24 }
 0x778   : > { %v11441_v43 = vpack.c.bf16 %v6634_v12, %v6632_v4 }
 0x779   : > { %10856 = vmatmul.mubr.msk.f32.vlgmr.msra.gmra.mrb[20].mxu0 %vm5546_vm9, %v5872_v55  ;;  %11445 = vmatpush3.bf16.msra.mxu1 %v11444_v15 }
 0x77a   : > { %11417 = vmatpush3.bf16.msra.mxu0 %v11416_v45  ;;  %11243 = vmatprep.mubr.msk.f32.mxu0 %vm16862_vm5, %v16836_v36 }
 0x77b   : > { %11419 = vmatprep.subr.bf16.mxu0 %v11397_v27 }
 0x77c   : > { %11272 = vmatmul.mubr.msk.f32.vlgmr.msra.gmra.mrb[16].mxu1 %vm5546_vm9, %v5872_v55 }
 0x77d   : > { %11244 = vmatmul.mubr.msk.f32.vlgmr.msra.gmra.mrb[24].mxu0 %vm5546_vm9, %v5872_v55  ;;  %8838 = vmatprep.mubr.f32.mxu1 %v16836_v36 }
 0x77e   : > { %11421 = vmatpush1.bf16.msra.mxu0 %v11399_v63  ;;  %6258 = vmatprep.mubr.f32.mxu0 %v16836_v36 }
 0x77f   : > { %11422 = vmatprep.subr.bf16.mxu0 %v16861_v58 }
 0x781   : > { %10858 = vmatmul.mubr.msk.f32.vlgmr.msra.gmra.mrb[26].mxu0 %vm5546_vm9, %v14815_v32 }
 0x782   : > { %11424 = vmatpush3.bf16.msra.mxu0 %v11402_v49  ;;  %11250 = vmatprep.mubr.msk.f32.mxu0 %vm16862_vm5, %v16836_v36 }
 0x783   : > { %11426 = vmatprep.subr.bf16.mxu0 %v11411_v62 }
 0x785   : > { %11251 = vmatmul.mubr.msk.f32.vlgmr.msra.gmra.mrb[28].mxu0 %vm5546_vm9, %v14815_v32  ;;  %v6633_v32 = vsel %vm16872_vm1, %v11882_v31, %v11883_v50  ;;  %v14919_v16 = vpop.permute.xlu0 %5866 }
 0x786   : > { %11428 = vmatpush1.bf16.msra.mxu0 %v11413_v3  ;;  %6399 = vmatprep.mubr.f32.mxu0 %v16836_v36 }
 0x787   : > { %11429 = vmatprep.subr.bf16.mxu0 %v16861_v58  ;;  %v11439_v58 = vpack.c.bf16 %v6635_v57, %v6633_v32 }
 0x789   : > { %10860 = vmatmul.mubr.msk.f32.vlgmr.msra.gmra.mrb[26].mxu0 %vm5546_vm9, %v14851_v34 }
 0x78a   : > { %11431 = vmatpush3.bf16.msra.mxu0 %v11416_v45  ;;  %11257 = vmatprep.mubr.msk.f32.mxu0 %vm16862_vm5, %v16836_v36 }
 0x78b   : > { %11433 = vmatprep.subr.bf16.mxu0 %v11411_v62 }
 0x78d   : > { %11258 = vmatmul.mubr.msk.f32.vlgmr.msra.gmra.mrb[30].mxu0 %vm5546_vm9, %v14851_v34 }
 0x78e   : > { %11435 = vmatpush1.bf16.msra.mxu0 %v11413_v3  ;;  %6543 = vmatprep.mubr.f32.mxu0 %v16836_v36 }
 0x78f   : > { %11440 = vmatprep.subr.bf16.mxu0 %v11439_v58 }
 0x791   : > { %10862 = vmatmul.mubr.msk.f32.vlgmr.msra.gmra.mrb[32].mxu0 %vm5546_vm9, %v14864_v25 }
 0x792   : > { %11442 = vmatpush1.bf16.msra.mxu0 %v11441_v43  ;;  %6706 = vmatprep.mubr.f32.mxu0 %v16836_v36 }
 0x799   : > { %10864 = vmatmul.mubr.msk.f32.vlgmr.msra.gmra.mrb[32].mxu0 %vm5546_vm9, %v5872_v55 }
 0x79a   : > { %8224 = vmatprep.mubr.f32.mxu0 %v16836_v36 }
 0x7d0   : > { %v5687_v42 = vpop.f32.mrb[16].mxu0 }
 0x7d1   : > { %v11224_v17 = vpop.f32.mrb[17].mxu0 }
 0x82a   : > { %v5788_v23 = vpop.f32.mrb[14].mxu0 }
 0x82b   : > { %v14922_v52 = vadd.f32 %v14919_v16, %v5788_v23  ;;  %v5790_v47 = vpop.f32.mrb[15].mxu0 }
 0x82c   : > { %v14925_v8 = vadd.f32 %v14919_v16, %v5790_v47 }
 0x82d   : > { %v16608_v59 = vand.u32 2147483647, %v14922_v52  ;;  %v6789_v20 = vand.u32 2139095040, %v14922_v52 }
 0x82e   : > { %v6893_v40 = vand.u32 2139095040, %v14925_v8  ;;  %v5859_v54 = vpop.f32.mrb[18].mxu0  ;;  %v16609_v11 = vand.u32 2147483647, %v14925_v8 }
 0x82f   : > { %v6790_v9 = vshrl.u32 %v6789_v20, 23  ;;  %v14930_v27 = vadd.f32 %v5859_v54, %v5687_v42  ;;  %v11231_v46 = vpop.f32.mrb[19].mxu0  ;;  %v6793_v28 = vand.u32 8388607, %v16608_v59 }
 0x830   : > { %v6894_v30 = vshrl.u32 %v6893_v40, 23  ;;  %v14937_v25 = vand.u32 8388607, %v16609_v11 }
 0x831   : > { %v10866_v1 = vadd.s32 4294967169, %v6790_v9  ;;  %v6794_v49 = vor.u32 8388608, %v6793_v28 }
 0x832   : > { %v10870_v63 = vadd.s32 4294967169, %v6894_v30  ;;  %v6898_v10 = vor.u32 8388608, %v14937_v25 }
 0x833   : > { %v6796_v34 = vadd.s32 1, %v10866_v1  ;;  %v14941_v45 = vshll.u32 %v6794_v49, 8 }
 0x834   : > { %v6900_v61 = vadd.s32 1, %v10870_v63 }
 0x835   : > { %vm6797_vm9 = vcmp.gt.s32.totalorder %v6796_v34, 0 }
 0x836   : > { %v6798_v41 = vsel %vm6797_vm9, %v6796_v34, 0  ;;  %vm6901_vm7 = vcmp.gt.s32.totalorder %v6900_v61, 0  ;;  %v14939_v33 = vpop.f32.mrb[22].mxu0 }
 0x837   : > { %v6799_v29 = vshrl.u32 %v6798_v41, 5  ;;  %v6800_v22 = vand.u32 31, %v6798_v41  ;;  %v6902_v0 = vsel %vm6901_vm7, %v6900_v61, 0  ;;  %v11238_v2 = vpop.f32.mrb[23].mxu0 }
 0x838   : > { %v14945_v13 = vshrl.u32 %v6902_v0, 5  ;;  %v6904_v14 = vand.u32 31, %v6902_v0 }
 0x839   : > { %v6801_v38 = vsub.s32 32, %v6800_v22  ;;  %v6803_v62 = vshll.u32 %v16689_v35, %v6800_v22  ;;  %v6806_v56 = vshll.u32 %v16684_v26, %v6800_v22  ;;  %v6809_v39 = vshll.u32 %v16685_v21, %v6800_v22 }
 0x83a   : > { %v6812_v3 = vshll.u32 %v16875_v44, %v6800_v22  ;;  %v6815_v51 = vshll.u32 %v16687_v18, %v6800_v22  ;;  %vm6818_vm5 = vcmp.lt.s32.totalorder %v6799_v29, 1  ;;  %vm6819_vm4 = vcmp.lt.s32.totalorder %v6799_v29, 2 }
 0x83b   : > { %v6804_v50 = vshrl.u32 %v16684_v26, %v6801_v38  ;;  %v6807_v48 = vshrl.u32 %v16685_v21, %v6801_v38  ;;  %v6810_v55 = vshrl.u32 %v16875_v44, %v6801_v38  ;;  %v6802_v15 = vshrl.u32 %v16689_v35, %v6801_v38 }
 0x83c   : > { %v6813_v7 = vshrl.u32 %v16687_v18, %v6801_v38  ;;  %v6816_v24 = vshrl.u32 %v16690_v60, %v6801_v38  ;;  %v6905_v57 = vsub.s32 32, %v6904_v14  ;;  %vm6820_vm14 = vcmp.lt.s32.totalorder %v6799_v29, 3 }
 0x83d   : > { %v6805_v31 = vor.u32 %v6804_v50, %v6803_v62  ;;  %v6808_v53 = vor.u32 %v6807_v48, %v6806_v56  ;;  %v6811_v19 = vor.u32 %v6810_v55, %v6809_v39  ;;  %vm6821_vm0 = vcmp.lt.s32.totalorder %v6799_v29, 4 }
 0x83e   : > { %v6814_v32 = vor.u32 %v6813_v7, %v6812_v3  ;;  %v6817_v4 = vor.u32 %v6816_v24, %v6815_v51  ;;  %v6907_v20 = vshll.u32 %v16689_v35, %v6904_v14  ;;  %v6908_v9 = vshrl.u32 %v16684_v26, %v6905_v57 }
 0x83f   : > { %v6822_v12 = vsel %vm6818_vm5, %v6802_v15, %v6805_v31  ;;  %v6823_v58 = vsel %vm6821_vm0, %v6811_v19, 2102212464  ;;  %v6826_v43 = vsel %vm6818_vm5, %v6805_v31, %v6808_v53  ;;  %v6830_v42 = vsel %vm6818_vm5, %v6808_v53, %v6811_v19 }
 0x840   : > { %v6824_v17 = vsel %vm6820_vm14, %v6808_v53, %v6823_v58  ;;  %v6827_v23 = vsel %vm6821_vm0, %v6814_v32, 920167782  ;;  %v6831_v47 = vsel %vm6821_vm0, %v6817_v4, 1326507024  ;;  %v6910_v46 = vshll.u32 %v16684_v26, %v6904_v14 }
 0x841   : > { %v6828_v40 = vsel %vm6820_vm14, %v6811_v19, %v6827_v23  ;;  %v6832_v54 = vsel %vm6820_vm14, %v6814_v32, %v6831_v47  ;;  %v6825_v28 = vsel %vm6819_vm4, %v6822_v12, %v6824_v17  ;;  %v6911_v63 = vshrl.u32 %v16685_v21, %v6905_v57 }
 0x842   : > { %v6829_v30 = vsel %vm6819_vm4, %v6826_v43, %v6828_v40  ;;  %v6833_v1 = vsel %vm6819_vm4, %v6830_v42, %v6832_v54  ;;  %v6909_v41 = vor.u32 %v6908_v9, %v6907_v20  ;;  %v6913_v0 = vshll.u32 %v16685_v21, %v6904_v14 }
 0x843   : > { %v14968_v34 = vmul.u32.u64.low %v14941_v45, %v6833_v1  ;;  %v14969_v49 = vmul.u32.u64.high %v14941_v45, %v6833_v1, %v14968_v34  ;;  %v14972_v25 = vmul.u32.u64.low %v14941_v45, %v6829_v30  ;;  %v14973_v61 = vmul.u32.u64.high %v14941_v45, %v6829_v30, %v14972_v25 }
 0x844   : > { %v6912_v22 = vor.u32 %v6911_v63, %v6910_v46  ;;  %v6914_v2 = vshrl.u32 %v16875_v44, %v6905_v57  ;;  %v6916_v29 = vshll.u32 %v16875_v44, %v6904_v14  ;;  %v6917_v38 = vshrl.u32 %v16687_v18, %v6905_v57 }
 0x845   : > { %v6920_v62 = vshrl.u32 %v16690_v60, %v6905_v57  ;;  %v6938_v56 = vshll.u32 %v6898_v10, 8  ;;  %v6841_v39 = vmul.u32 %v14941_v45, %v6825_v28  ;;  %v6906_v3 = vshrl.u32 %v16689_v35, %v6905_v57 }
 0x846   : > { %v6915_v51 = vor.u32 %v6914_v2, %v6913_v0  ;;  %v6919_v50 = vshll.u32 %v16687_v18, %v6904_v14  ;;  %vm6843_vm11 = vc.u32 %v14969_v49, %v14972_v25  ;;  %v6844_v48 = vadd.s32 1, %v14973_v61 }
 0x847   : > { %v6918_v55 = vor.u32 %v6917_v38, %v6916_v29  ;;  %vm6922_vm6 = vcmp.lt.s32.totalorder %v14945_v13, 1  ;;  %v6616_v15 = vpop.f32.mrb[14].mxu1  ;;  %vm6924_vm8 = vcmp.lt.s32.totalorder %v14945_v13, 3  ;;  %vm6925_vm13 = vcmp.lt.s32.totalorder %v14945_v13, 4 }
 0x848   : > { %v6921_v7 = vor.u32 %v6920_v62, %v6919_v50  ;;  %v6930_v45 = vsel %vm6922_vm6, %v6909_v41, %v6912_v22  ;;  %v11266_v10 = vpop.f32.mrb[15].mxu1  ;;  %v6845_v24 = vsel %vm6843_vm11, %v6844_v48, %v14973_v61  ;;  %v6927_v31 = vsel %vm6925_vm13, %v6915_v51, 2102212464 }
 0x849   : > { %v6931_v14 = vsel %vm6925_vm13, %v6918_v55, 920167782  ;;  %v6934_v53 = vsel %vm6922_vm6, %v6912_v22, %v6915_v51  ;;  %v6846_v19 = vadd.s32 %v6845_v24, %v6841_v39  ;;  %vm6923_vm3 = vcmp.lt.s32.totalorder %v14945_v13, 2 }
 0x84a   : > { %v6932_v57 = vsel %vm6924_vm8, %v6915_v51, %v6931_v14  ;;  %v6935_v32 = vsel %vm6925_vm13, %v6921_v7, 1326507024  ;;  %v6926_v4 = vsel %vm6922_vm6, %v6906_v3, %v6909_v41  ;;  %v6928_v12 = vsel %vm6924_vm8, %v6912_v22, %v6927_v31 }
 0x84b   : > { %v6933_v58 = vsel %vm6923_vm3, %v6930_v45, %v6932_v57  ;;  %v6936_v43 = vsel %vm6924_vm8, %v6918_v55, %v6935_v32  ;;  %v6847_v42 = vadd.s32 536870912, %v6846_v19  ;;  %v6929_v13 = vsel %vm6923_vm3, %v6926_v4, %v6928_v12 }
 0x84c   : > { %v6937_v17 = vsel %vm6923_vm3, %v6934_v53, %v6936_v43  ;;  %v14992_v23 = vmul.u32.u64.low %v6938_v56, %v6933_v58  ;;  %v14993_v47 = vmul.u32.u64.high %v6938_v56, %v6933_v58, %v14992_v23  ;;  %v6116_v20 = vpop.f32.mrb[20].mxu0  ;;  %v15003_v28 = vadd.f32 %v14919_v16, %v14930_v27 }
 0x84d   : > { %v14996_v40 = vmul.u32.u64.low %v6938_v56, %v6937_v17  ;;  %v14997_v54 = vmul.u32.u64.high %v6938_v56, %v6937_v17, %v14996_v40  ;;  %v6118_v9 = vpop.f32.mrb[21].mxu0  ;;  %v14999_v46 = vshrl.u32 %v6847_v42, 30  ;;  %v15006_v30 = vadd.f32 %v6116_v20, %v14919_v16 }
 0x84e   : > { %16876 = vst [vmem:[#allocation6_spill] sm:$0xff] %v15003_v28  ;;  %v6948_v34 = vadd.s32 1, %v14993_v47  ;;  %v6945_v41 = vmul.u32 %v6938_v56, %v6929_v13  ;;  %v6997_v38 = vand.u32 2139095040, %v15003_v28  ;;  %v15019_v3 = vadd.f32 %v6118_v9, %v14919_v16 }
 0x84f   : > { %v6779_v1 = vpop.f32.mrb[16].mxu1  ;;  %v6849_v63 = vshll.u32 %v14999_v46, 30  ;;  %vm6947_vm12 = vc.u32 %v14997_v54, %v14992_v23  ;;  %v7134_v62 = vand.u32 2139095040, %v15006_v30  ;;  %v16606_v7 = vand.u32 2147483647, %v15006_v30 }
 0x850   : > { %v6187_v61 = vpop.f32.mrb[24].mxu0  ;;  %v11273_v0 = vpop.f32.mrb[17].mxu1  ;;  %v6949_v27 = vsel %vm6947_vm12, %v6948_v34, %v14993_v47  ;;  %v6998_v55 = vshrl.u32 %v6997_v38, 23  ;;  %v7238_v24 = vand.u32 2139095040, %v15019_v3  ;;  %v16607_v17 = vand.u32 2147483647, %v15019_v3 }
 0x851   : > { %v11245_v22 = vpop.f32.mrb[25].mxu0  ;;  %v15012_v2 = vsub.s32 %v6846_v19, %v6849_v63  ;;  %v6950_v29 = vadd.s32 %v6949_v27, %v6945_v41  ;;  %v7135_v51 = vshrl.u32 %v7134_v62, 23  ;;  %v15029_v19 = vadd.f32 %v6779_v1, %v6616_v15 }
 0x852   : > { %v15032_v57 = vadd.f32 %v6187_v61, %v14939_v33  ;;  %v10874_v12 = vadd.s32 4294967169, %v6998_v55  ;;  %v7138_v58 = vand.u32 8388607, %v16606_v7  ;;  %v7239_v47 = vshrl.u32 %v7238_v24, 23 }
 0x853   : > { %v6852_v39 = vsub.s32 0, %v15012_v2  ;;  %v6951_v56 = vadd.s32 536870912, %v6950_v29  ;;  %v10881_v45 = vadd.s32 4294967169, %v7135_v51  ;;  %v7242_v61 = vand.u32 8388607, %v16607_v17 }
 0x854   : > { %v7004_v13 = vadd.s32 1, %v10874_v12  ;;  %v7139_v63 = vor.u32 8388608, %v7138_v58  ;;  %v10885_v34 = vadd.s32 4294967169, %v7239_v47 }
 0x855   : > { %v10867_v50 = vmin.u32 %v6852_v39, %v15012_v2  ;;  %v15022_v48 = vshrl.u32 %v6951_v56, 30  ;;  %v7141_v53 = vadd.s32 1, %v10881_v45 }
 0x856   : > { %vm7005_vm15 = vcmp.gt.s32.totalorder %v7004_v13, 0 }
 0x857   : > { %v6854_v10 = vclz %v10867_v50  ;;  %v6953_v14 = vshll.u32 %v15022_v48, 30  ;;  %vm7142_vm2 = vcmp.gt.s32.totalorder %v7141_v53, 0 }
 0x858   : > { %v15026_v31 = vpop.f32.mrb[28].mxu0  ;;  %v7143_v42 = vsel %vm7142_vm2, %v7141_v53, 0  ;;  %v7245_v53 = vadd.s32 1, %v10885_v34  ;;  %vm6788_vm2 = vcmp.lt.s32.totalorder %v14922_v52, 0 }
 0x859   : > { %v11252_v32 = vpop.f32.mrb[29].mxu0  ;;  %v15034_v4 = vsub.s32 %v6950_v29, %v6953_v14  ;;  %v10868_v43 = vadd.s32 4294967294, %v6854_v10  ;;  %v7145_v40 = vand.u32 31, %v7143_v42  ;;  %v7144_v55 = vshrl.u32 %v7143_v42, 5 }
 0x85a   : > { %vm7246_vm4 = vcmp.gt.s32.totalorder %v7245_v53, 0 }
 0x85b   : > { %v6956_v15 = vsub.s32 0, %v15034_v4  ;;  %v7146_v1 = vsub.s32 32, %v7145_v40  ;;  %vm10869_vm1 = vcmp.lt.s32.totalorder %v10868_v43, 0  ;;  %v7148_v0 = vshll.u32 %v16689_v35, %v7145_v40 }
 0x85c   : > { %v15039_v20 = vpop.f32.mrb[26].mxu0  ;;  %v7151_v62 = vshll.u32 %v16684_v26, %v7145_v40  ;;  %v7154_v39 = vshll.u32 %v16685_v21, %v7145_v40  ;;  %v7157_v45 = vshll.u32 %v16875_v44, %v7145_v40  ;;  %v15058_v32 = vsel %vm10869_vm1, 0, %v10868_v43 }
 0x85d   : > { %v15042_v33 = vpop.f32.mrb[27].mxu0  ;;  %v10871_v9 = vmin.u32 %v6956_v15, %v15034_v4  ;;  %v7149_v27 = vshrl.u32 %v16684_v26, %v7146_v1  ;;  %v7152_v29 = vshrl.u32 %v16685_v21, %v7146_v1  ;;  %v7155_v56 = vshrl.u32 %v16875_v44, %v7146_v1 }
 0x85e   : > { %v7158_v51 = vshrl.u32 %v16687_v18, %v7146_v1  ;;  %v7160_v58 = vshll.u32 %v16687_v18, %v7145_v40  ;;  %v7161_v47 = vshrl.u32 %v16690_v60, %v7146_v1  ;;  %v15062_v15 = vsel %vm7005_vm15, %v7004_v13, 0 }
 0x85f   : > { %v6958_v22 = vclz %v10871_v9  ;;  %v7150_v10 = vor.u32 %v7149_v27, %v7148_v0  ;;  %v7153_v24 = vor.u32 %v7152_v29, %v7151_v62  ;;  %v7156_v14 = vor.u32 %v7155_v56, %v7154_v39 }
 0x860   : > { %v15047_v41 = vpop.f32.mrb[30].mxu0  ;;  %v7159_v12 = vor.u32 %v7158_v51, %v7157_v45  ;;  %v7179_v9 = vshll.u32 %v7139_v63, 8  ;;  %v7162_v42 = vor.u32 %v7161_v47, %v7160_v58  ;;  %vm7163_vm9 = vcmp.lt.s32.totalorder %v7144_v55, 1 }
 0x861   : > { %v11259_v38 = vpop.f32.mrb[31].mxu0  ;;  %v10872_v50 = vadd.s32 4294967294, %v6958_v22  ;;  %v7243_v22 = vor.u32 8388608, %v7242_v61  ;;  %vm7166_vm7 = vcmp.lt.s32.totalorder %v7144_v55, 4  ;;  %v6858_v0 = vsub.s32 32, %v15058_v32 }
 0x862   : > { %v6862_v34 = vsub.s32 4294967266, %v15058_v32  ;;  %v7168_v43 = vsel %vm7166_vm7, %v7156_v14, 2102212464  ;;  %v7171_v27 = vsel %vm7163_vm9, %v7150_v10, %v7153_v24  ;;  %v7147_v29 = vshrl.u32 %v16689_v35, %v7146_v1 }
 0x863   : > { %vm10873_vm10 = vcmp.lt.s32.totalorder %v10872_v50, 0  ;;  %vm7165_vm5 = vcmp.lt.s32.totalorder %v7144_v55, 3  ;;  %v7172_v40 = vsel %vm7166_vm7, %v7159_v12, 920167782  ;;  %vm7164_vm14 = vcmp.lt.s32.totalorder %v7144_v55, 2 }
 0x864   : > { %v15069_v13 = vsel %vm10873_vm10, 0, %v10872_v50  ;;  %v7173_v63 = vsel %vm7165_vm5, %v7156_v14, %v7172_v40  ;;  %v7175_v61 = vsel %vm7163_vm9, %v7153_v24, %v7156_v14  ;;  %v7167_v38 = vsel %vm7163_vm9, %v7147_v29, %v7150_v10 }
 0x865   : > { %v7169_v62 = vsel %vm7165_vm5, %v7153_v24, %v7168_v43  ;;  %v7174_v39 = vsel %vm7164_vm14, %v7171_v27, %v7173_v63  ;;  %v7176_v56 = vsel %vm7166_vm7, %v7162_v42, 1326507024  ;;  %v15073_v51 = vadd.s32 127, %v6862_v34 }
 0x866   : > { %v7177_v45 = vsel %vm7165_vm5, %v7159_v12, %v7176_v56  ;;  %v15075_v58 = vmul.u32.u64.low %v7179_v9, %v7174_v39  ;;  %v15076_v1 = vmul.u32.u64.high %v7179_v9, %v7174_v39, %v15075_v58  ;;  %v6842_v50 = vadd.s32 %v14972_v25, %v14969_v49 }
 0x867   : > { %v6966_v14 = vsub.s32 4294967266, %v15069_v13  ;;  %v7178_v10 = vsel %vm7164_vm14, %v7175_v61, %v7177_v45  ;;  %v15087_v24 = vadd.f32 %v15029_v19, %v14919_v16  ;;  %v7170_v12 = vsel %vm7164_vm14, %v7167_v38, %v7169_v62 }
 0x868   : > { %v15092_v34 = vmul.u32.u64.low %v7179_v9, %v7178_v10  ;;  %v15093_v43 = vmul.u32.u64.high %v7179_v9, %v7178_v10, %v15092_v34  ;;  %v7247_v27 = vsel %vm7246_vm4, %v7245_v53, 0  ;;  %v6946_v49 = vadd.s32 %v14992_v23, %v14997_v54 }
 0x869   : > { %16877 = vst [vmem:[#allocation10_spill] sm:$0xff] %v15087_v24  ;;  %v15099_v25 = vand.u32 31, %v15062_v15  ;;  %v7249_v29 = vand.u32 31, %v7247_v27  ;;  %v15101_v40 = vshll.u32 %v7243_v22, 8  ;;  %v15103_v19 = vshrl.u32 %v6842_v50, %v6858_v0 }
 0x86a   : > { %v6864_v63 = vshll.u32 %v15073_v51, 23  ;;  %v6962_v55 = vsub.s32 32, %v15069_v13  ;;  %v7189_v61 = vadd.s32 1, %v15076_v1  ;;  %v6967_v38 = vadd.s32 127, %v6966_v14 }
 0x86b   : > { %16878 = vst [vmem:[#allocation12_spill] sm:$0xff] %v15099_v25  ;;  %v7186_v62 = vmul.u32 %v7179_v9, %v7170_v12  ;;  %v7250_v53 = vsub.s32 32, %v7249_v29  ;;  %v8024_v39 = vand.u32 2139095040, %v15087_v24  ;;  %vm7188_vm0 = vc.u32 %v15093_v43, %v15075_v58 }
 0x86c   : > { %v15079_v47 = vpop.f32.mrb[32].mxu0  ;;  %v7248_v23 = vshrl.u32 %v7247_v27, 5  ;;  %v7252_v54 = vshll.u32 %v16689_v35, %v7249_v29  ;;  %v7255_v22 = vshll.u32 %v16684_v26, %v7249_v29  ;;  %v7190_v0 = vsel %vm7188_vm0, %v7189_v61, %v15076_v1 }
 0x86d   : > { %v15089_v42 = vpop.f32.mrb[33].mxu0  ;;  %v7253_v56 = vshrl.u32 %v16684_v26, %v7250_v53  ;;  %v7258_v51 = vshll.u32 %v16685_v21, %v7249_v29  ;;  %v7261_v45 = vshll.u32 %v16875_v44, %v7249_v29  ;;  %v7191_v9 = vadd.s32 %v7190_v0, %v7186_v62 }
 0x86e   : > { %v7256_v50 = vshrl.u32 %v16685_v21, %v7250_v53  ;;  %v7259_v14 = vshrl.u32 %v16875_v44, %v7250_v53  ;;  %v7262_v10 = vshrl.u32 %v16687_v18, %v7250_v53  ;;  %v6968_v12 = vshll.u32 %v6967_v38, 23 }
 0x86f   : > { %v7254_v34 = vor.u32 %v7253_v56, %v7252_v54  ;;  %v7264_v27 = vshll.u32 %v16687_v18, %v7249_v29  ;;  %v7265_v7 = vshrl.u32 %v16690_v60, %v7250_v53  ;;  %v7192_v1 = vadd.s32 536870912, %v7191_v9 }
 0x870   : > { %v7257_v61 = vor.u32 %v7256_v50, %v7255_v22  ;;  %v7260_v17 = vor.u32 %v7259_v14, %v7258_v51  ;;  %v7263_v59 = vor.u32 %v7262_v10, %v7261_v45  ;;  %v7251_v11 = vshrl.u32 %v16689_v35, %v7250_v53 }
 0x871   : > { %v7266_v24 = vor.u32 %v7265_v7, %v7264_v27  ;;  %vm7267_vm11 = vcmp.lt.s32.totalorder %v7248_v23, 1  ;;  %v8025_v62 = vshrl.u32 %v8024_v39, 23  ;;  %v15123_v0 = vshrl.u32 %v7192_v1, 30 }
 0x872   : > { %vm7269_vm6 = vcmp.lt.s32.totalorder %v7248_v23, 3  ;;  %vm7270_vm8 = vcmp.lt.s32.totalorder %v7248_v23, 4  ;;  %v7275_v6 = vsel %vm7267_vm11, %v7254_v34, %v7257_v61  ;;  %v7279_v56 = vsel %vm7267_vm11, %v7257_v61, %v7260_v17 }
 0x873   : > { %16879 = vst [vmem:[#allocation8_spill] sm:$0xff] %v15123_v0  ;;  %v7272_v38 = vsel %vm7270_vm8, %v7260_v17, 2102212464  ;;  %v7276_v54 = vsel %vm7270_vm8, %v7263_v59, 920167782  ;;  %v7194_v36 = vshll.u32 %v15123_v0, 30  ;;  %v7271_v53 = vsel %vm7267_vm11, %v7251_v11, %v7254_v34 }
 0x874   : > { %v7280_v29 = vsel %vm7270_vm8, %v7266_v24, 1326507024  ;;  %vm7268_vm13 = vcmp.lt.s32.totalorder %v7248_v23, 2  ;;  %v7277_v22 = vsel %vm7269_vm6, %v7260_v17, %v7276_v54  ;;  %v15132_v45 = vadd.f32 %v15039_v20, %v14919_v16 }
 0x875   : > { %v7281_v51 = vsel %vm7269_vm6, %v7263_v59, %v7280_v29  ;;  %v7278_v7 = vsel %vm7268_vm13, %v7275_v6, %v7277_v22  ;;  %v15134_v50 = vsub.s32 %v7191_v9, %v7194_v36  ;;  %v7273_v24 = vsel %vm7269_vm6, %v7257_v61, %v7272_v38 }
 0x876   : > { %v7282_v39 = vsel %vm7268_vm13, %v7279_v56, %v7281_v51  ;;  %v6964_v17 = vshrl.u32 %v6946_v49, %v6962_v55  ;;  %v15142_v59 = vmul.u32.u64.low %v15101_v40, %v7278_v7  ;;  %v15143_v11 = vmul.u32.u64.high %v15101_v40, %v7278_v7, %v15142_v59 }
 0x877   : > { %v15138_v14 = vmul.u32.u64.low %v15101_v40, %v7282_v39  ;;  %v15139_v10 = vmul.u32.u64.high %v15101_v40, %v7282_v39, %v15138_v14  ;;  %v15148_v6 = vadd.f32 %v15032_v57, %v14919_v16  ;;  %v6859_v36 = vshll.u32 %v15012_v2, %v15058_v32 }
 0x878   : > { %v6865_v20 = vor.u32 4788187, %v6864_v63  ;;  %v6969_v9 = vor.u32 4788187, %v6968_v12  ;;  %v7197_v34 = vsub.s32 0, %v15134_v50  ;;  %v6963_v27 = vshll.u32 %v15034_v4, %v15069_v13 }
 0x879   : > { %16880 = vst [vmem:[#allocation19_spill] sm:$0xff] %v15148_v6  ;;  %v7274_v49 = vsel %vm7268_vm13, %v7271_v53, %v7273_v24  ;;  %v10919_v55 = vadd.s32 4294967169, %v8025_v62  ;;  %v7475_v1 = vand.u32 2139095040, %v15132_v45  ;;  %v6861_v61 = vor.u32 %v15103_v19, %v6859_v36 }
 0x87a   : > { %v15159_v57 = vsub.s32 32, %v15099_v25  ;;  %v10882_v38 = vmin.u32 %v7197_v34, %v15134_v50  ;;  %vm7292_vm3 = vc.u32 %v15139_v10, %v15142_v59  ;;  %v6965_v2 = vor.u32 %v6964_v17, %v6963_v27 }
 0x87b   : > { %v7293_v32 = vadd.s32 1, %v15143_v11  ;;  %v7342_v4 = vand.u32 2139095040, %v15148_v6  ;;  %v6866_v13 = vand.u32 2147483647, %v6865_v20  ;;  %v6970_v63 = vand.u32 2147483647, %v6969_v9 }
 0x87c   : > { %16881 = vst [vmem:[#allocation18_spill] sm:$0xff] %v15159_v57  ;;  %v7290_v23 = vmul.u32 %v15101_v40, %v7274_v49  ;;  %v7199_v12 = vclz %v10882_v38  ;;  %v8031_v62 = vadd.s32 1, %v10919_v55  ;;  %v7476_v54 = vshrl.u32 %v7475_v1, 23 }
 0x87d   : > { %v7294_v19 = vsel %vm7292_vm3, %v7293_v32, %v15143_v11  ;;  %v6868_v56 = vcvt.s32.f32 %v6861_v61  ;;  %v7021_v29 = vshrl.u32 %v16687_v18, %v15159_v57  ;;  %v7024_v22 = vshrl.u32 %v16690_v60, %v15159_v57 }
 0x87e   : > { %v7295_v51 = vadd.s32 %v7294_v19, %v7290_v23  ;;  %v6972_v53 = vcvt.s32.f32 %v6965_v2  ;;  %v15173_v7 = vshrl.u32 %v15062_v15, 5  ;;  %v7343_v39 = vshrl.u32 %v7342_v4, 23 }
 0x87f   : > { %v6869_v24 = vmul.f32 %v6868_v56, %v6866_v13  ;;  %v7020_v40 = vshll.u32 %v16875_v44, %v15099_v25  ;;  %v7023_v14 = vshll.u32 %v16687_v18, %v15099_v25  ;;  %v10883_v36 = vadd.s32 4294967294, %v7199_v12 }
 0x880   : > { %16882 = vst [vmem:[#allocation9_spill] sm:$0xff] %v15173_v7  ;;  %v7296_v17 = vadd.s32 536870912, %v7295_v51  ;;  %v6973_v11 = vmul.f32 %v6972_v53, %v6970_v63  ;;  %vm8032_vm12 = vcmp.gt.s32.totalorder %v8031_v62, 0  ;;  %v10896_v20 = vadd.s32 4294967169, %v7476_v54 }
 0x881   : > { %v15180_v9 = vor.u32 %v7021_v29, %v7020_v40  ;;  %v7025_v34 = vor.u32 %v7024_v22, %v7023_v14  ;;  %vm6892_vm1 = vcmp.lt.s32.totalorder %v14925_v8, 0  ;;  %v10889_v27 = vadd.s32 4294967169, %v7343_v39 }
 0x882   : > { %v15182_v15 = vshrl.u32 %v7296_v17, 30  ;;  %v6976_v49 = vsub.s32 4, %v15022_v48  ;;  %v6870_v1 = vxor.u32 2147483648, %v6869_v24  ;;  %vm7029_vm15 = vcmp.lt.s32.totalorder %v15173_v7, 4 }
 0x883   : > { %16883 = vst [vmem:[#allocation7_spill] sm:$0xff] %v15180_v9  ;;  %v8033_v38 = vsel %vm8032_vm12, %v8031_v62, 0  ;;  %v6974_v2 = vxor.u32 2147483648, %v6973_v11  ;;  %vm10884_vm10 = vcmp.lt.s32.totalorder %v10883_v36, 0  ;;  %v7482_v32 = vadd.s32 1, %v10896_v20 }
 0x884   : > { %16884 = vst [vmem:[#allocation14_spill] sm:$0xff] %v15182_v15  ;;  %v7298_v61 = vshll.u32 %v15182_v15, 30  ;;  %v15191_v4 = vadd.f32 %v15042_v33, %v14919_v16  ;;  %v15196_v13 = vsel %vm7029_vm15, %v15180_v9, 920167782  ;;  %v15200_v63 = vsel %vm7029_vm15, %v7025_v34, 1326507024 }
 0x885   : > { %16886 = vst [vmem:[#allocation21_spill] sm:$0xff] %v15196_v13  ;;  %16887 = vst [vmem:[#allocation16_spill] sm:$0xff] %v15200_v63  ;;  %v16614_v12 = vand.u32 2147483647, %v15132_v45  ;;  %v15205_v19 = vand.u32 31, %v8033_v38  ;;  %v7349_v62 = vadd.s32 1, %v10889_v27  ;;  %v15210_v33 = vsel %vm6892_vm1, %v6976_v49, %v15022_v48 }
 0x886   : > { %16885 = vst [vmem:[#allocation13_spill] sm:$0xff] %v15191_v4  ;;  %v15202_v23 = vsub.s32 %v7295_v51, %v7298_v61  ;;  %vm7483_vm9 = vcmp.gt.s32.totalorder %v7482_v32, 0  ;;  %v15214_v54 = vsel %vm6788_vm2, %v6870_v1, %v6869_v24  ;;  %v15216_v56 = vsel %vm10884_vm10, 0, %v10883_v36 }
 0x887   : > { %16888 = vst [vmem:[#allocation11_spill] sm:$0xff] %v15205_v19  ;;  %16889 = vst [vmem:[#allocation5_spill] sm:$0xff] %v15214_v54  ;;  %v7484_v22 = vsel %vm7483_vm9, %v7482_v32, 0  ;;  %v15221_v51 = vsel %vm6892_vm1, %v6974_v2, %v6973_v11  ;;  %v7187_v53 = vadd.s32 %v15075_v58, %v15093_v43  ;;  %v15228_v40 = vadd.s32 %v15142_v59, %v15139_v10 }
 0x888   : > { %v7301_v29 = vsub.s32 0, %v15202_v23  ;;  %v7486_v39 = vand.u32 31, %v7484_v22  ;;  %v15231_v14 = vshrl.u32 %v8033_v38, 5  ;;  %v7479_v17 = vand.u32 8388607, %v16614_v12 }
 0x889   : > { %v7207_v11 = vsub.s32 4294967266, %v15216_v56  ;;  %v15237_v36 = vsub.s32 32, %v15205_v19  ;;  %vm7350_vm7 = vcmp.gt.s32.totalorder %v7349_v62, 0  ;;  %v7485_v20 = vshrl.u32 %v7484_v22, 5 }
 0x88a   : > { %v10886_v24 = vmin.u32 %v7301_v29, %v15202_v23  ;;  %16890 = vst [vmem:[#allocation15_spill] sm:$0xff] %v15231_v14  ;;  %v7487_v58 = vsub.s32 32, %v7486_v39  ;;  %v7489_v34 = vshll.u32 %v16689_v35, %v7486_v39  ;;  %v7492_v10 = vshll.u32 %v16684_v26, %v7486_v39 }
 0x88b   : > { %16891 = vst [vmem:[#allocation17_spill] sm:$0xff] %v15237_v36  ;;  %v7495_v49 = vshll.u32 %v16685_v21, %v7486_v39  ;;  %v7498_v38 = vshll.u32 %v16875_v44, %v7486_v39  ;;  %v7501_v12 = vshll.u32 %v16687_v18, %v7486_v39  ;;  %v15251_v55 = vshll.u32 %v16875_v44, %v15205_v19 }
 0x88c   : > { %v7303_v43 = vclz %v10886_v24  ;;  %v7490_v59 = vshrl.u32 %v16684_v26, %v7487_v58  ;;  %v7493_v27 = vshrl.u32 %v16685_v21, %v7487_v58  ;;  %v7496_v1 = vshrl.u32 %v16875_v44, %v7487_v58 }
 0x88d   : > { %v7499_v2 = vshrl.u32 %v16687_v18, %v7487_v58  ;;  %v7502_v32 = vshrl.u32 %v16690_v60, %v7487_v58  ;;  %v7351_v48 = vsel %vm7350_vm7, %v7349_v62, 0  ;;  %v7480_v0 = vor.u32 8388608, %v7479_v17 }
 0x88e   : > { %v10887_v61 = vadd.s32 4294967294, %v7303_v43  ;;  %v7491_v29 = vor.u32 %v7490_v59, %v7489_v34  ;;  %v7494_v22 = vor.u32 %v7493_v27, %v7492_v10  ;;  %v7497_v24 = vor.u32 %v7496_v1, %v7495_v49 }
 0x88f   : > { %v7500_v6 = vor.u32 %v7499_v2, %v7498_v38  ;;  %v7203_v43 = vsub.s32 32, %v15216_v56  ;;  %v7503_v15 = vor.u32 %v7502_v32, %v7501_v12  ;;  %v7579_v9 = vand.u32 2139095040, %v15191_v4 }
 0x890   : > { %vm10888_vm5 = vcmp.lt.s32.totalorder %v10887_v61, 0  ;;  %v7208_v63 = vadd.s32 127, %v7207_v11  ;;  %vm7504_vm4 = vcmp.lt.s32.totalorder %v7485_v20, 1  ;;  %vm7507_vm14 = vcmp.lt.s32.totalorder %v7485_v20, 4 }
 0x891   : > { %v15256_v34 = vsel %vm10888_vm5, 0, %v10887_v61  ;;  %vm7506_vm0 = vcmp.lt.s32.totalorder %v7485_v20, 3  ;;  %v7509_v39 = vsel %vm7507_vm14, %v7497_v24, 2102212464  ;;  %v7512_v10 = vsel %vm7504_vm4, %v7491_v29, %v7494_v22 }
 0x892   : > { %v7513_v59 = vsel %vm7507_vm14, %v7500_v6, 920167782  ;;  %v7488_v27 = vshrl.u32 %v16689_v35, %v7487_v58  ;;  %vm7505_vm11 = vcmp.lt.s32.totalorder %v7485_v20, 2  ;;  %v7516_v49 = vsel %vm7504_vm4, %v7494_v22, %v7497_v24 }
 0x893   : > { %v7514_v62 = vsel %vm7506_vm0, %v7497_v24, %v7513_v59  ;;  %v7517_v17 = vsel %vm7507_vm14, %v7503_v15, 1326507024  ;;  %v7520_v12 = vshll.u32 %v7480_v0, 8  ;;  %v7580_v38 = vshrl.u32 %v7579_v9, 23 }
 0x894   : > { %v7515_v1 = vsel %vm7505_vm11, %v7512_v10, %v7514_v62  ;;  %v7311_v11 = vsub.s32 4294967266, %v15256_v34  ;;  %v7508_v61 = vsel %vm7504_vm4, %v7488_v27, %v7491_v29  ;;  %v7510_v2 = vsel %vm7506_vm0, %v7494_v22, %v7509_v39 }
 0x895   : > { %v7518_v32 = vsel %vm7506_vm0, %v7500_v6, %v7517_v17  ;;  %v15262_v7 = vmul.u32.u64.low %v7520_v12, %v7515_v1  ;;  %v15263_v28 = vmul.u32.u64.high %v7520_v12, %v7515_v1, %v15262_v7  ;;  %v10900_v58 = vadd.s32 4294967169, %v7580_v38 }
 0x896   : > { %v7519_v13 = vsel %vm7505_vm11, %v7516_v49, %v7518_v32  ;;  %v15268_v24 = vshll.u32 %v16687_v18, %v15205_v19  ;;  %v15270_v10 = vand.u32 31, %v7351_v48  ;;  %v7205_v15 = vshrl.u32 %v7187_v53, %v7203_v43 }
 0x897   : > { %v15272_v0 = vmul.u32.u64.low %v7520_v12, %v7519_v13  ;;  %v15273_v9 = vmul.u32.u64.high %v7520_v12, %v7519_v13, %v15272_v0  ;;  %v7511_v29 = vsel %vm7505_vm11, %v7508_v61, %v7510_v2  ;;  %v7586_v6 = vadd.s32 1, %v10900_v58 }
 0x898   : > { %v15278_v22 = vadd.f32 %v15047_v41, %v15026_v31  ;;  %v7209_v39 = vshll.u32 %v7208_v63, 23  ;;  %v15280_v59 = vadd.s32 127, %v7311_v11  ;;  %v15284_v27 = vshrl.u32 %v16687_v18, %v15237_v36 }
 0x899   : > { %v15288_v62 = vshrl.u32 %v16690_v60, %v15237_v36  ;;  %v7204_v13 = vshll.u32 %v15134_v50, %v15216_v56  ;;  %v7530_v53 = vadd.s32 1, %v15263_v28  ;;  %v16892_v20 = vand.u32 2147483647, %v15191_v4 }
 0x89a   : > { %vm7587_vm6 = vcmp.gt.s32.totalorder %v7586_v6, 0  ;;  %v15295_v41 = vshrl.u32 %v7351_v48, 5  ;;  %v7527_v63 = vmul.u32 %v7520_v12, %v7511_v29  ;;  %vm7529_vm8 = vc.u32 %v15273_v9, %v15262_v7 }
 0x89b   : > { %v7583_v31 = vand.u32 8388607, %v16892_v20  ;;  %v7588_v43 = vsel %vm7587_vm6, %v7586_v6, 0  ;;  %v15299_v49 = vor.u32 %v7205_v15, %v7204_v13  ;;  %v15302_v1 = vsub.s32 32, %v15270_v10 }
 0x89c   : > { %v7531_v50 = vsel %vm7529_vm8, %v7530_v53, %v15263_v28  ;;  %v7590_v56 = vand.u32 31, %v7588_v43  ;;  %v15305_v17 = vor.u32 4788187, %v7209_v39  ;;  %v7307_v38 = vsub.s32 32, %v15256_v34 }
 0x89d   : > { %v7313_v48 = vshll.u32 %v15280_v59, 23  ;;  %v7532_v11 = vadd.s32 %v7531_v50, %v7527_v63  ;;  %v7584_v12 = vor.u32 8388608, %v7583_v31  ;;  %v7589_v61 = vshrl.u32 %v7588_v43, 5 }
 0x89e   : > { %v7591_v2 = vsub.s32 32, %v7590_v56  ;;  %v15311_v32 = vadd.f32 %v15079_v47, %v14919_v16  ;;  %v7593_v0 = vshll.u32 %v16689_v35, %v7590_v56  ;;  %v7596_v28 = vshll.u32 %v16684_v26, %v7590_v56 }
 0x89f   : > { %v7533_v58 = vadd.s32 536870912, %v7532_v11  ;;  %v7599_v15 = vshll.u32 %v16685_v21, %v7590_v56  ;;  %v7602_v59 = vshll.u32 %v16875_v44, %v7590_v56  ;;  %v7605_v53 = vshll.u32 %v16687_v18, %v7590_v56 }
 0x8a0   : > { %v7594_v29 = vshrl.u32 %v16684_v26, %v7591_v2  ;;  %v7597_v6 = vshrl.u32 %v16685_v21, %v7591_v2  ;;  %v7600_v39 = vshrl.u32 %v16875_v44, %v7591_v2  ;;  %v7603_v47 = vshrl.u32 %v16687_v18, %v7591_v2 }
 0x8a1   : > { %v15320_v13 = vshrl.u32 %v7533_v58, 30  ;;  %v7606_v20 = vshrl.u32 %v16690_v60, %v7591_v2  ;;  %v7624_v50 = vshll.u32 %v7584_v12, 8  ;;  %vm7608_vm13 = vcmp.lt.s32.totalorder %v7589_v61, 1 }
 0x8a2   : > { %v7595_v31 = vor.u32 %v7594_v29, %v7593_v0  ;;  %v7598_v63 = vor.u32 %v7597_v6, %v7596_v28  ;;  %v7601_v43 = vor.u32 %v7600_v39, %v7599_v15  ;;  %v7604_v36 = vor.u32 %v7603_v47, %v7602_v59 }
 0x8a3   : > { %v7535_v19 = vshll.u32 %v15320_v13, 30  ;;  %v7607_v4 = vor.u32 %v7606_v20, %v7605_v53  ;;  %v7592_v25 = vshrl.u32 %v16689_v35, %v7591_v2  ;;  %vm7609_vm3 = vcmp.lt.s32.totalorder %v7589_v61, 2 }
 0x8a4   : > { %vm7611_vm12 = vcmp.lt.s32.totalorder %v7589_v61, 4  ;;  %v7616_v58 = vsel %vm7608_vm13, %v7595_v31, %v7598_v63  ;;  %vm7610_vm1 = vcmp.lt.s32.totalorder %v7589_v61, 3  ;;  %v7620_v28 = vsel %vm7608_vm13, %v7598_v63, %v7601_v43 }
 0x8a5   : > { %v15327_v57 = vsub.s32 %v7532_v11, %v7535_v19  ;;  %v7613_v56 = vsel %vm7611_vm12, %v7601_v43, 2102212464  ;;  %v7617_v5 = vsel %vm7611_vm12, %v7604_v36, 920167782  ;;  %v7612_v54 = vsel %vm7608_vm13, %v7592_v25, %v7595_v31 }
 0x8a6   : > { %v7618_v0 = vsel %vm7610_vm1, %v7601_v43, %v7617_v5  ;;  %v7621_v15 = vsel %vm7611_vm12, %v7607_v4, 1326507024  ;;  %v7614_v29 = vsel %vm7610_vm1, %v7598_v63, %v7613_v56  ;;  %v15338_v19 = vadd.f32 %v15278_v22, %v14919_v16 }
 0x8a7   : > { %v7538_v12 = vsub.s32 0, %v15327_v57  ;;  %v7619_v6 = vsel %vm7609_vm3, %v7616_v58, %v7618_v0  ;;  %v7622_v39 = vsel %vm7610_vm1, %v7604_v36, %v7621_v15  ;;  %v7309_v5 = vshrl.u32 %v15228_v40, %v7307_v38 }
 0x8a8   : > { %v7623_v2 = vsel %vm7609_vm3, %v7620_v28, %v7622_v39  ;;  %v15332_v59 = vmul.u32.u64.low %v7624_v50, %v7619_v6  ;;  %v15333_v47 = vmul.u32.u64.high %v7624_v50, %v7619_v6, %v15332_v59  ;;  %16893 = vst [vmem:[#allocation20_spill] sm:$0xff] %v15338_v19  ;;  %v7211_v53 = vand.u32 2147483647, %v15305_v17 }
 0x8a9   : > { %v10897_v25 = vmin.u32 %v7538_v12, %v15327_v57  ;;  %v15342_v4 = vmul.u32.u64.low %v7624_v50, %v7623_v2  ;;  %v15343_v11 = vmul.u32.u64.high %v7624_v50, %v7623_v2, %v15342_v4  ;;  %vm16650_vm10 = vcmp.lt.s32.totalorder %v15231_v14, 4 }
 0x8aa   : > { %v7366_v36 = vshrl.u32 %v16687_v18, %v15302_v1  ;;  %v7615_v20 = vsel %vm7609_vm3, %v7612_v54, %v7614_v29  ;;  %v7816_v31 = vand.u32 2139095040, %v15311_v32  ;;  %v7308_v22 = vshll.u32 %v15202_v23, %v15256_v34 }
 0x8ab   : > { %v7314_v40 = vor.u32 4788187, %v7313_v48  ;;  %v7369_v38 = vshrl.u32 %v16690_v60, %v15302_v1  ;;  %v7540_v63 = vclz %v10897_v25  ;;  %v7213_v43 = vcvt.s32.f32 %v15299_v49 }
 0x8ac   : > { %v7634_v17 = vadd.s32 1, %v15333_v47  ;;  %v7683_v58 = vand.u32 2139095040, %v15338_v19  ;;  %v7817_v56 = vshrl.u32 %v7816_v31, 23  ;;  %vm7133_vm9 = vcmp.lt.s32.totalorder %v15006_v30, 0 }
 0x8ad   : > { %v7310_v54 = vor.u32 %v7309_v5, %v7308_v22  ;;  %v7631_v61 = vmul.u32 %v7624_v50, %v7615_v20  ;;  %vm7633_vm7 = vc.u32 %v15343_v11, %v15332_v59  ;;  %v16637_v23 = vand.u32 2147483647, %v15311_v32 }
 0x8ae   : > { %v16894_v34 = vand.u32 2147483647, %v14925_v8  ;;  %v7214_v49 = vmul.f32 %v7213_v43, %v7211_v53  ;;  %v10898_v0 = vadd.s32 4294967294, %v7540_v63  ;;  %v7635_v28 = vsel %vm7633_vm7, %v7634_v17, %v15333_v47 }
 0x8af   : > { %v10911_v15 = vadd.s32 4294967169, %v7817_v56  ;;  %v7315_v12 = vand.u32 2147483647, %v7314_v40  ;;  %v15371_v50 = vor.u32 %v15284_v27, %v15251_v55  ;;  %v7365_v29 = vshll.u32 %v16875_v44, %v15270_v10 }
 0x8b0   : > { %vm15364_vm5 = vcmp.le.f32.partialorder %v16894_v34, 0.7853982  ;;  %v7636_v6 = vadd.s32 %v7635_v28, %v7631_v61  ;;  %v8052_v39 = vor.u32 %v15288_v62, %v15268_v24  ;;  %v7368_v2 = vshll.u32 %v16687_v18, %v15270_v10 }
 0x8b1   : > { %16897 = vst [vmem:[#allocation23_spill] sm:$0xff] %v15371_v50  ;;  %v7684_v5 = vshrl.u32 %v7683_v58, 23  ;;  %v7823_v25 = vadd.s32 1, %v10911_v15  ;;  %v7317_v4 = vcvt.s32.f32 %v7310_v54  ;;  %v15379_v47 = vor.u32 %v7366_v36, %v7365_v29 }
 0x8b2   : > { %v7637_v53 = vadd.s32 536870912, %v7636_v6  ;;  %v7820_v55 = vand.u32 8388607, %v16637_v23  ;;  %v7215_v27 = vxor.u32 2147483648, %v7214_v49  ;;  %v7370_v20 = vor.u32 %v7369_v38, %v7368_v2 }
 0x8b3   : > { %16898 = vst [vmem:[#allocation22_spill] sm:$0xff] %v15379_v47  ;;  %vm10899_vm4 = vcmp.lt.s32.totalorder %v10898_v0, 0  ;;  %vm7824_vm14 = vcmp.gt.s32.totalorder %v7823_v25, 0  ;;  %v15383_v31 = vmul.f32 %v7317_v4, %v7315_v12  ;;  %v15388_v24 = vsel %vm16650_vm10, %v15371_v50, 920167782 }
 0x8b4   : > { %16899 = vst [vmem:[#allocation24_spill] sm:$0xff] %v15388_v24  ;;  %v15390_v62 = vshrl.u32 %v7637_v53, 30  ;;  %v7825_v22 = vsel %vm7824_vm14, %v7823_v25, 0  ;;  %v15394_v36 = vsel %vm16650_vm10, %v8052_v39, 1326507024  ;;  %vm7374_vm0 = vcmp.lt.s32.totalorder %v15295_v41, 4 }
 0x8b5   : > { %16900 = vst [vmem:[#allocation25_spill] sm:$0xff] %v15394_v36  ;;  %v10904_v40 = vadd.s32 4294967169, %v7684_v5  ;;  %v15399_v38 = vadd.f32 %v15089_v42, %v14919_v16  ;;  %v15404_v63 = vsel %vm7374_vm0, %v15379_v47, 920167782  ;;  %v15406_v43 = vsel %vm10899_vm4, 0, %v10898_v0 }
 0x8b6   : > { %v7639_v17 = vshll.u32 %v15390_v62, 30  ;;  %v7821_v58 = vor.u32 8388608, %v7820_v55  ;;  %v15411_v56 = vsel %vm7133_vm9, %v7215_v27, %v7214_v49  ;;  %v15415_v54 = vsel %vm7374_vm0, %v7370_v20, 1326507024 }
 0x8b7   : > { %16901 = vst [vmem:[#allocation26_spill] sm:$0xff] %v15415_v54  ;;  %v7827_v16 = vand.u32 31, %v7825_v22  ;;  %v15421_v42 = vsel %vm15364_vm5, %v14925_v8, %v15221_v51  ;;  %v7528_v34 = vadd.s32 %v15262_v7, %v15273_v9  ;;  %v7548_v28 = vsub.s32 4294967266, %v15406_v43 }
 0x8b8   : > { %v15426_v0 = vsub.s32 %v7636_v6, %v7639_v17  ;;  %v7690_v15 = vadd.s32 1, %v10904_v40  ;;  %v7544_v51 = vsub.s32 32, %v15406_v43  ;;  %v15435_v2 = vshll.u32 %v7821_v58, 8 }
 0x8b9   : > { %v7828_v12 = vsub.s32 32, %v7827_v16  ;;  %v7920_v7 = vand.u32 2139095040, %v15399_v38  ;;  %v7826_v9 = vshrl.u32 %v7825_v22, 5  ;;  %v7830_v6 = vshll.u32 %v16689_v35, %v7827_v16 }
 0x8ba   : > { %v7642_v39 = vsub.s32 0, %v15426_v0  ;;  %v7833_v25 = vshll.u32 %v16684_v26, %v7827_v16  ;;  %v7836_v55 = vshll.u32 %v16685_v21, %v7827_v16  ;;  %v7549_v20 = vadd.s32 127, %v7548_v28 }
 0x8bb   : > { %v7831_v5 = vshrl.u32 %v16684_v26, %v7828_v12  ;;  %v7834_v53 = vshrl.u32 %v16685_v21, %v7828_v12  ;;  %v7837_v27 = vshrl.u32 %v16875_v44, %v7828_v12  ;;  %vm7691_vm11 = vcmp.gt.s32.totalorder %v7690_v15, 0 }
 0x8bc   : > { %v10901_v4 = vmin.u32 %v7642_v39, %v15426_v0  ;;  %v7839_v40 = vshll.u32 %v16875_v44, %v7827_v16  ;;  %v7840_v22 = vshrl.u32 %v16687_v18, %v7828_v12  ;;  %v7842_v29 = vshll.u32 %v16687_v18, %v7827_v16 }
 0x8bd   : > { %v7832_v58 = vor.u32 %v7831_v5, %v7830_v6  ;;  %v7835_v23 = vor.u32 %v7834_v53, %v7833_v25  ;;  %v7838_v61 = vor.u32 %v7837_v27, %v7836_v55  ;;  %v7843_v39 = vshrl.u32 %v16690_v60, %v7828_v12 }
 0x8be   : > { %v7644_v17 = vclz %v10901_v4  ;;  %v7841_v49 = vor.u32 %v7840_v22, %v7839_v40  ;;  %v7921_v24 = vshrl.u32 %v7920_v7, 23  ;;  %v7546_v50 = vshrl.u32 %v7528_v34, %v7544_v51 }
 0x8bf   : > { %v15449_v14 = vsel %vm7691_vm11, %v7690_v15, 0  ;;  %vm7848_vm6 = vcmp.lt.s32.totalorder %v7826_v9, 4  ;;  %v7829_v28 = vshrl.u32 %v16689_v35, %v7828_v12  ;;  %v7844_v19 = vor.u32 %v7843_v39, %v7842_v29 }
 0x8c0   : > { %v10902_v36 = vadd.s32 4294967294, %v7644_v17  ;;  %vm7845_vm8 = vcmp.lt.s32.totalorder %v7826_v9, 1  ;;  %v7850_v4 = vsel %vm7848_vm6, %v7838_v61, 2102212464  ;;  %v7550_v6 = vshll.u32 %v7549_v20, 23 }
 0x8c1   : > { %vm7847_vm3 = vcmp.lt.s32.totalorder %v7826_v9, 3  ;;  %v7853_v5 = vsel %vm7845_vm8, %v7832_v58, %v7835_v23  ;;  %v7849_v16 = vsel %vm7845_vm8, %v7829_v28, %v7832_v58  ;;  %v7854_v34 = vsel %vm7848_vm6, %v7841_v49, 920167782 }
 0x8c2   : > { %vm10903_vm13 = vcmp.lt.s32.totalorder %v10902_v36, 0  ;;  %v7851_v7 = vsel %vm7847_vm3, %v7835_v23, %v7850_v4  ;;  %v10915_v15 = vadd.s32 4294967169, %v7921_v24  ;;  %v7545_v51 = vshll.u32 %v15327_v57, %v15406_v43 }
 0x8c3   : > { %vm7846_vm12 = vcmp.lt.s32.totalorder %v7826_v9, 2  ;;  %v7855_v12 = vsel %vm7847_vm3, %v7838_v61, %v7854_v34  ;;  %v16902_v29 = vand.u32 2147483647, %v15399_v38  ;;  %v7647_v53 = vsel %vm10903_vm13, 0, %v10902_v36 }
 0x8c4   : > { %v7856_v55 = vsel %vm7846_vm12, %v7853_v5, %v7855_v12  ;;  %v7857_v27 = vsel %vm7845_vm8, %v7835_v23, %v7838_v61  ;;  %v7858_v20 = vsel %vm7848_vm6, %v7844_v19, 1326507024  ;;  %v15464_v40 = vor.u32 %v7546_v50, %v7545_v51 }
 0x8c5   : > { %v7924_v25 = vand.u32 8388607, %v16902_v29  ;;  %v15466_v22 = vor.u32 4788187, %v7550_v6  ;;  %v7852_v24 = vsel %vm7846_vm12, %v7849_v16, %v7851_v7  ;;  %v7859_v17 = vsel %vm7847_vm3, %v7841_v49, %v7858_v20 }
 0x8c6   : > { %v7860_v57 = vsel %vm7846_vm12, %v7857_v27, %v7859_v17  ;;  %v15470_v43 = vmul.u32.u64.low %v15435_v2, %v7856_v55  ;;  %v15471_v58 = vmul.u32.u64.high %v15435_v2, %v7856_v55, %v15470_v43  ;;  %v7927_v39 = vadd.s32 1, %v10915_v15 }
 0x8c7   : > { %v7648_v36 = vsub.s32 32, %v7647_v53  ;;  %v7652_v28 = vsub.s32 4294967266, %v7647_v53  ;;  %v15475_v23 = vmul.u32.u64.low %v15435_v2, %v7860_v57  ;;  %v15476_v61 = vmul.u32.u64.high %v15435_v2, %v7860_v57, %v15475_v23 }
 0x8c8   : > { %v7632_v50 = vadd.s32 %v15332_v59, %v15343_v11  ;;  %vm7928_vm1 = vcmp.gt.s32.totalorder %v7927_v39, 0  ;;  %11990 = vcosq.f32 %v15421_v42  ;;  %v15485_v4 = vand.u32 31, %v15449_v14 }
 0x8c9   : > { %v7929_v6 = vsel %vm7928_vm1, %v7927_v39, 0  ;;  %v7649_v5 = vshll.u32 %v15426_v0, %v7647_v53  ;;  %v7868_v16 = vmul.u32 %v15435_v2, %v7852_v24  ;;  %v7871_v7 = vadd.s32 1, %v15471_v58 }
 0x8ca   : > { %16903 = vst [vmem:[#allocation27_spill] sm:$0xff] %v15485_v4  ;;  %v7931_v34 = vand.u32 31, %v7929_v6  ;;  %v7650_v15 = vshrl.u32 %v7632_v50, %v7648_v36  ;;  %v7653_v59 = vadd.s32 127, %v7652_v28  ;;  %vm7870_vm7 = vc.u32 %v15476_v61, %v15470_v43 }
 0x8cb   : > { %v7925_v11 = vor.u32 8388608, %v7924_v25  ;;  %v7872_v51 = vsel %vm7870_vm7, %v7871_v7, %v15471_v58  ;;  %11992 = vsinq.f32 %v15421_v42  ;;  %v16904_v0 = vsel %vm15364_vm5, 0, %v15210_v33 }
 0x8cc   : > { %v7932_v12 = vsub.s32 32, %v7931_v34  ;;  %v6983_v29 = vadd.s32 3, %v16904_v0  ;;  %v7873_v2 = vadd.s32 %v7872_v51, %v7868_v16  ;;  %v7930_v53 = vshrl.u32 %v7929_v6, 5 }
 0x8cd   : > { %v7934_v55 = vshll.u32 %v16689_v35, %v7931_v34  ;;  %v7937_v27 = vshll.u32 %v16684_v26, %v7931_v34  ;;  %v7940_v24 = vshll.u32 %v16685_v21, %v7931_v34  ;;  %v7943_v48 = vshll.u32 %v16875_v44, %v7931_v34 }
 0x8ce   : > { %v7935_v20 = vshrl.u32 %v16684_v26, %v7932_v12  ;;  %v7938_v25 = vshrl.u32 %v16685_v21, %v7932_v12  ;;  %v7941_v17 = vshrl.u32 %v16875_v44, %v7932_v12  ;;  %v7874_v42 = vadd.s32 536870912, %v7873_v2 }
 0x8cf   : > { %v7944_v33 = vshrl.u32 %v16687_v18, %v7932_v12  ;;  %v7946_v57 = vshll.u32 %v16687_v18, %v7931_v34  ;;  %v7947_v28 = vshrl.u32 %v16690_v60, %v7932_v12  ;;  %v15508_v23 = vor.u32 %v7650_v15, %v7649_v5 }
 0x8d0   : > { %v7936_v58 = vor.u32 %v7935_v20, %v7934_v55  ;;  %v7939_v39 = vor.u32 %v7938_v25, %v7937_v27  ;;  %v7942_v36 = vor.u32 %v7941_v17, %v7940_v24  ;;  %v7654_v50 = vshll.u32 %v7653_v59, 23 }
 0x8d1   : > { %v15510_v6 = vshrl.u32 %v7874_v42, 30  ;;  %v7945_v16 = vor.u32 %v7944_v33, %v7943_v48  ;;  %v7933_v51 = vshrl.u32 %v16689_v35, %v7932_v12  ;;  %v7948_v0 = vor.u32 %v7947_v28, %v7946_v57 }
 0x8d2   : > { %v11991_v7 = vpop.eup %11990  ;;  %v7965_v19 = vshll.u32 %v7925_v11, 8  ;;  %v6984_v9 = vand.u32 3, %v6983_v29  ;;  %vm7949_vm5 = vcmp.lt.s32.totalorder %v7930_v53, 1  ;;  %vm7952_vm4 = vcmp.lt.s32.totalorder %v7930_v53, 4 }
 0x8d3   : > { %16905 = vst [vmem:[#allocation28_spill] sm:$0xff] %v15510_v6  ;;  %v7876_v49 = vshll.u32 %v15510_v6, 30  ;;  %v15515_v34 = vmul.u32 4, %v14350_v37  ;;  %vm7951_vm14 = vcmp.lt.s32.totalorder %v7930_v53, 3  ;;  %v7953_v5 = vsel %vm7949_vm5, %v7933_v51, %v7936_v58 }
 0x8d4   : > { %v7954_v15 = vsel %vm7952_vm4, %v7942_v36, 2102212464  ;;  %v7957_v59 = vsel %vm7949_vm5, %v7936_v58, %v7939_v39  ;;  %v16906_v55 = vand.u32 2147483647, %v14922_v52  ;;  %vm7950_vm6 = vcmp.lt.s32.totalorder %v7930_v53, 2 }
 0x8d5   : > { %v15526_v11 = vsub.s32 %v7873_v2, %v7876_v49  ;;  %v7955_v29 = vsel %vm7951_vm14, %v7939_v39, %v7954_v15  ;;  %v7958_v37 = vsel %vm7952_vm4, %v7945_v16, 920167782  ;;  %vm6982_vm8 = vweird.f32 %v14925_v8  ;;  %v11993_v27 = vpop.eup %11992 }
 0x8d6   : > { %vm15522_vm11 = vcmp.le.f32.partialorder %v16906_v55, 0.7853982  ;;  %v7956_v20 = vsel %vm7950_vm6, %v7953_v5, %v7955_v29  ;;  %v7959_v25 = vsel %vm7951_vm14, %v7942_v36, %v7958_v37  ;;  %v7961_v24 = vsel %vm7949_vm5, %v7939_v39, %v7942_v36  ;;  %v16909_v37 = vld [vmem:[#allocation5_spill] sm:$0xff] }
 0x8d7   : > { %v7962_v17 = vsel %vm7952_vm4, %v7948_v0, 1326507024  ;;  %vm7237_vm13 = vcmp.lt.s32.totalorder %v15019_v3, 0  ;;  %v7879_v49 = vsub.s32 0, %v15526_v11  ;;  %v7960_v2 = vsel %vm7950_vm6, %v7957_v59, %v7959_v25 }
 0x8d8   : > { %v7963_v42 = vsel %vm7951_vm14, %v7945_v16, %v7962_v17  ;;  %v6990_v48 = vxor.u32 2147483648, %v11991_v7  ;;  %v7655_v33 = vor.u32 4788187, %v7654_v50  ;;  %v7972_v36 = vmul.u32 %v7965_v19, %v7956_v20 }
 0x8d9   : > { %v7964_v57 = vsel %vm7950_vm6, %v7961_v24, %v7963_v42  ;;  %v15537_v58 = vmul.u32.u64.low %v7965_v19, %v7960_v2  ;;  %v15538_v28 = vmul.u32.u64.high %v7965_v19, %v7960_v2, %v15537_v58  ;;  %v10912_v51 = vmin.u32 %v7879_v49, %v15526_v11 }
 0x8da   : > { %v15542_v5 = vmul.u32.u64.low %v7965_v19, %v7964_v57  ;;  %v15543_v39 = vmul.u32.u64.high %v7965_v19, %v7964_v57, %v15542_v5  ;;  %vm7474_vm3 = vcmp.lt.s32.totalorder %v15132_v45, 0  ;;  %v6987_v0 = vxor.u32 2147483648, %v11993_v27  ;;  %v16914_v57 = vld [vmem:[#allocation3_spill] sm:$0xff] }
 0x8db   : > { %vm6989_vm12 = vcmp.eq.s32.totalorder %v6984_v9, 2  ;;  %v7111_v53 = vadd.s32 4294967292, %v15515_v34  ;;  %v6872_v16 = vsub.s32 4, %v14999_v46  ;;  %v7881_v50 = vclz %v10912_v51 }
 0x8dc   : > { %vm6985_vm1 = vcmp.lt.s32.totalorder %v6984_v9, 2  ;;  %vm6986_vm7 = vcmp.eq.s32.totalorder %v6984_v9, 0  ;;  %v6991_v15 = vsel %vm6989_vm12, %v6990_v48, %v11993_v27  ;;  %v7975_v59 = vadd.s32 1, %v15538_v28 }
 0x8dd   : > { %v6988_v55 = vsel %vm6986_vm7, %v11991_v7, %v6987_v0  ;;  %vm7114_vm5 = vcmp.ge.s32.totalorder %v7111_v53, 0  ;;  %vm7117_vm4 = vcmp.lt.s32.totalorder %v7111_v53, 1024  ;;  %v10913_v29 = vadd.s32 4294967294, %v7881_v50 }
 0x8de   : > { %vm7974_vm14 = vc.u32 %v15543_v39, %v15537_v58  ;;  %v6992_v19 = vsel %vm6985_vm1, %v6988_v55, %v6991_v15  ;;  %v6874_v20 = vsel %vm15522_vm11, %v14922_v52, %v16909_v37  ;;  %v16910_v25 = vand.u32 2147483647, %v15466_v22  ;;  %vm7120_vm6 = vmand %vm7114_vm5, %vm7117_vm4 }
 0x8df   : > { %v16911_v9 = vcvt.s32.f32 %v15464_v40  ;;  %v7976_v24 = vsel %vm7974_vm14, %v7975_v59, %v15538_v28  ;;  %v6993_v7 = vsel %vm6982_vm8, nan, %v6992_v19  ;;  %v6873_v17 = vsel %vm6788_vm2, %v6872_v16, %v14999_v46 }
 0x8e0   : > { %v7656_v49 = vand.u32 2147483647, %v7655_v33  ;;  %vm10914_vm12 = vcmp.lt.s32.totalorder %v10913_v29, 0  ;;  %v7977_v2 = vadd.s32 %v7976_v24, %v7972_v36  ;;  %v7099_v42 = vmul.f32 %v6993_v7, %v6993_v7 }
 0x8e1   : > { %v7555_v27 = vmul.f32 %v16911_v9, %v16910_v25  ;;  %v16912_v22 = vxor.u32 2147483648, %v15383_v31  ;;  %v15573_v48 = vsub.s32 32, %v15485_v4  ;;  %11994 = vcosq.f32 %v6874_v20 }
 0x8e2   : > { %v15576_v28 = vmul.u32 4, %v16914_v57  ;;  %v7658_v46 = vcvt.s32.f32 %v15508_v23  ;;  %v7978_v33 = vadd.s32 536870912, %v7977_v2  ;;  %v16915_v51 = vmov 0.0  }
 0x8e3   : > { %v15570_v40 = vsel %vm7237_vm13, %v16912_v22, %v15383_v31  ;;  %16913 = vst [vmem:[#allocation5_spill] sm:$0xff] %v15573_v48  ;;  %v10879_v5 = vsel %vm7120_vm6, 1.0, %v16915_v51  ;;  %v6875_v36 = vsel %vm15522_vm11, 0, %v6873_v17  ;;  %v7556_v0 = vxor.u32 2147483648, %v7555_v27  ;;  %v16921_v22 = vld [vmem:[#allocation12_spill] sm:$0xff] }
 0x8e4   : > { %v15582_v53 = vsel %vm10914_vm12, 0, %v10913_v29  ;;  %v7102_v31 = vadd.f32 %v7099_v42, %v14925_v8  ;;  %11996 = vsinq.f32 %v6874_v20  ;;  %v16916_v16 = vsub.s32 4, %v15320_v13 }
 0x8e5   : > { %v15592_v23 = vmul.f32 %v7658_v46, %v7656_v49  ;;  %v15595_v15 = vshrl.u32 %v15449_v14, 5  ;;  %v15597_v12 = vshrl.u32 %v7978_v33, 30  ;;  %v15601_v59 = vshll.u32 %v16875_v44, %v15485_v4 }
 0x8e6   : > { %v15590_v50 = vsel %vm7474_vm3, %v16916_v16, %v15320_v13  ;;  %v15603_v8 = vmul.f32 %v10879_v5, %v7102_v31  ;;  %v6879_v55 = vadd.s32 3, %v6875_v36  ;;  %v7110_v29 = vadd.s32 4294967292, %v15576_v28 }
 0x8e7   : > { %16917 = vst [vmem:[#allocation3_spill] sm:$0xff] %v15590_v50  ;;  %16918 = vst [vmem:[#allocation29_spill] sm:$0xff] %v15597_v12  ;;  %v15609_v13 = vshll.u32 %v16687_v18, %v15485_v4  ;;  %v7889_v14 = vsub.s32 4294967266, %v15582_v53  ;;  %v7980_v37 = vshll.u32 %v15597_v12, 30  ;;  %v15615_v20 = vsel %vm7474_vm3, %v7556_v0, %v7555_v27 }
 0x8e8   : > { %16919 = vst [vmem:[#allocation30_spill] sm:$0xff] %v15603_v8  ;;  %v15619_v25 = vshrl.u32 %v16687_v18, %v15573_v48  ;;  %v15623_v9 = vshrl.u32 %v16690_v60, %v15573_v48  ;;  %v7869_v24 = vadd.s32 %v15470_v43, %v15476_v61  ;;  %8390 = vrot.lane.b32.xlu1 %v15603_v8, %s12097_s25  ;;  %v7885_v17 = vsub.s32 32, %v15582_v53  ;;  %v16920_v60 = vld [vmem:[#allocation18_spill] sm:$0xff] }
 0x8e9   : > { %v7886_v27 = vshll.u32 %v15526_v11, %v15582_v53  ;;  %v15633_v49 = vsub.s32 %v7977_v2, %v7980_v37  ;;  %vm6878_vm2 = vweird.f32 %v14922_v52  ;;  %v6880_v18 = vand.u32 3, %v6879_v55  ;;  %v16922_v2 = vld [vmem:[#allocation6_spill] sm:$0xff] }
 0x8ea   : > { %vm7113_vm11 = vcmp.ge.s32.totalorder %v7110_v29, 0  ;;  %vm7116_vm8 = vcmp.lt.s32.totalorder %v7110_v29, 1024  ;;  %v7012_v43 = vshrl.u32 %v16684_v26, %v16920_v60  ;;  %v7890_v61 = vadd.s32 127, %v7889_v14 }
 0x8eb   : > { %v7983_v42 = vsub.s32 0, %v15633_v49  ;;  %v7014_v57 = vshll.u32 %v16684_v26, %v16921_v22  ;;  %v7015_v46 = vshrl.u32 %v16685_v21, %v16920_v60  ;;  %v11995_v11 = vpop.eup %11994  ;;  %v16923_v33 = vand.u32 2147483647, %v16922_v2  ;;  %vm7119_vm3 = vmand %vm7113_vm11, %vm7116_vm8 }
 0x8ec   : > { %v7011_v36 = vshll.u32 %v16689_v35, %v16921_v22  ;;  %v7017_v0 = vshll.u32 %v16685_v21, %v16921_v22  ;;  %v7018_v53 = vshrl.u32 %v16875_v44, %v16920_v60  ;;  %v7887_v31 = vshrl.u32 %v7869_v24, %v7885_v17  ;;  %v16924_v24 = vld [vmem:[#allocation9_spill] sm:$0xff] }
 0x8ed   : > { %v7001_v5 = vand.u32 8388607, %v16923_v33  ;;  %v10916_v16 = vmin.u32 %v7983_v42, %v15633_v49  ;;  %v6886_v55 = vxor.u32 2147483648, %v11995_v11  ;;  %v7016_v14 = vor.u32 %v7015_v46, %v7014_v57 }
 0x8ee   : > { %v11997_v37 = vpop.eup %11996  ;;  %vm6881_vm1 = vcmp.lt.s32.totalorder %v6880_v18, 2  ;;  %vm6885_vm7 = vcmp.eq.s32.totalorder %v6880_v18, 2  ;;  %v7013_v33 = vor.u32 %v7012_v43, %v7011_v36  ;;  %v7019_v19 = vor.u32 %v7018_v53, %v7017_v0 }
 0x8ef   : > { %v7985_v7 = vclz %v10916_v16  ;;  %vm6882_vm5 = vcmp.eq.s32.totalorder %v6880_v18, 0  ;;  %v6883_v8 = vxor.u32 2147483648, %v11997_v37  ;;  %v6887_v48 = vsel %vm6885_vm7, %v6886_v55, %v11997_v37  ;;  %v16930_v18 = vld [vmem:[#allocation16_spill] sm:$0xff] }
 0x8f0   : > { %v7891_v22 = vshll.u32 %v7890_v61, 23  ;;  %v10878_v4 = vsel %vm7119_vm3, 1.0, %v16915_v51  ;;  %v7002_v50 = vor.u32 8388608, %v7001_v5  ;;  %vm7026_vm4 = vcmp.lt.s32.totalorder %v16924_v24, 1  ;;  %v16929_v5 = vld [vmem:[#allocation13_spill] sm:$0xff] }
 0x8f1   : > { %v10917_v17 = vadd.s32 4294967294, %v7985_v7  ;;  %v6884_v42 = vsel %vm6882_vm5, %v11995_v11, %v6883_v8  ;;  %vm7028_vm14 = vcmp.lt.s32.totalorder %v16924_v24, 3  ;;  %v7038_v29 = vsel %vm7026_vm4, %v7016_v14, %v7019_v19  ;;  %v16928_v8 = vld [vmem:[#allocation21_spill] sm:$0xff] }
 0x8f2   : > { %v16925_v43 = vand.u32 2147483647, %v15132_v45  ;;  %v6888_v61 = vsel %vm6881_vm1, %v6884_v42, %v6887_v48  ;;  %v7010_v46 = vshrl.u32 %v16689_v35, %v16920_v60  ;;  %v7034_v7 = vsel %vm7026_vm4, %v7013_v33, %v7016_v14  ;;  %v16931_v48 = vld [vmem:[#allocation7_spill] sm:$0xff] }
 0x8f3   : > { %v7036_v11 = vsel %vm7028_vm14, %v7019_v19, %v16928_v8  ;;  %vm7578_vm12 = vcmp.lt.s32.totalorder %v16929_v5, 0  ;;  %vm10918_vm11 = vcmp.lt.s32.totalorder %v10917_v17, 0  ;;  %v6889_v36 = vsel %vm6878_vm2, nan, %v6888_v61 }
 0x8f4   : > { %vm15660_vm6 = vcmp.le.f32.partialorder %v16925_v43, 0.7853982  ;;  %vm7027_vm8 = vcmp.lt.s32.totalorder %v16924_v24, 2  ;;  %v7040_v60 = vsel %vm7028_vm14, %v16931_v48, %v16930_v18  ;;  %v7988_v0 = vsel %vm10918_vm11, 0, %v10917_v17 }
 0x8f5   : > { %v7098_v53 = vmul.f32 %v6889_v36, %v6889_v36  ;;  %v7031_v16 = vsel %vm7029_vm15, %v7019_v19, 2102212464  ;;  %v7041_v55 = vsel %vm7027_vm8, %v7038_v29, %v7040_v60  ;;  %v7989_v37 = vsub.s32 32, %v7988_v0 }
 0x8f6   : > { %v7993_v42 = vsub.s32 4294967266, %v7988_v0  ;;  %v7037_v43 = vsel %vm7027_vm8, %v7034_v7, %v7036_v11  ;;  %v7042_v61 = vshll.u32 %v7002_v50, 8  ;;  %v7888_v8 = vor.u32 %v7887_v31, %v7886_v27 }
 0x8f7   : > { %v7973_v47 = vadd.s32 %v15537_v58, %v15543_v39  ;;  %v7101_v18 = vadd.f32 %v7098_v53, %v14922_v52  ;;  %v7030_v17 = vsel %vm7026_vm4, %v7010_v46, %v7013_v33  ;;  %v7032_v19 = vsel %vm7028_vm14, %v7016_v14, %v7031_v16 }
 0x8f8   : > { %v7994_v36 = vadd.s32 127, %v7993_v42  ;;  %v15693_v29 = vmul.u32.u64.low %v7042_v61, %v7041_v55  ;;  %v15694_v48 = vmul.u32.u64.high %v7042_v61, %v7041_v55, %v15693_v29  ;;  %v7892_v60 = vor.u32 4788187, %v7891_v22 }
 0x8f9   : > { %v15696_v54 = vmul.f32 %v10878_v4, %v7101_v18  ;;  %v15698_v50 = vmul.u32.u64.low %v7042_v61, %v7037_v43  ;;  %v15699_v27 = vmul.u32.u64.high %v7042_v61, %v7037_v43, %v15698_v50  ;;  %v16933_v58 = vand.u32 2147483647, %v16929_v5  ;;  %v16939_v4 = vld [vmem:[#allocation14_spill] sm:$0xff] }
 0x8fa   : > { %v7991_v39 = vshrl.u32 %v7973_v47, %v7989_v37  ;;  %v7995_v31 = vshll.u32 %v7994_v36, 23  ;;  %v16936_v14 = vand.u32 2147483647, %v15019_v3  ;;  %v7321_v22 = vsub.s32 4, %v16939_v4  ;;  %v16940_v47 = vld [vmem:[#allocation4_spill] sm:$0xff] }
 0x8fb   : > { %16932 = vst [vmem:[#allocation18_spill] sm:$0xff] %v15696_v54  ;;  %vm15704_vm15 = vcmp.le.f32.partialorder %v16933_v58, 0.7853982  ;;  %v15717_v46 = vor.u32 %v15619_v25, %v15601_v59  ;;  %8388 = vrot.lane.b32.xlu1 %v15696_v54, %s12097_s25  ;;  %v7033_v7 = vsel %vm7027_vm8, %v7030_v17, %v7032_v19  ;;  %v15724_v11 = vmul.u32 4, %v16940_v47 }
 0x8fc   : > { %vm15710_vm2 = vcmp.le.f32.partialorder %v16936_v14, 0.7853982  ;;  %v7560_v59 = vsel %vm15660_vm6, %v15132_v45, %v15615_v20  ;;  %vm16656_vm3 = vcmp.lt.s32.totalorder %v15595_v15, 4  ;;  %v7990_v25 = vshll.u32 %v15633_v49, %v7988_v0 }
 0x8fd   : > { %v7323_v53 = vsel %vm15710_vm2, %v15019_v3, %v15570_v40  ;;  %v7996_v16 = vor.u32 4788187, %v7995_v31  ;;  %vm7051_vm1 = vc.u32 %v15694_v48, %v15698_v50  ;;  %v16941_v24 = vxor.u32 2147483648, %v15592_v23 }
 0x8fe   : > { %v7893_v40 = vand.u32 2147483647, %v7892_v60  ;;  %v7052_v37 = vadd.s32 1, %v15699_v27  ;;  %v7322_v20 = vsel %vm7237_vm13, %v7321_v22, %v16939_v4  ;;  %v7895_v42 = vcvt.s32.f32 %v7888_v8 }
 0x8ff   : > { %v7661_v55 = vsel %vm7578_vm12, %v16941_v24, %v15592_v23  ;;  %v7992_v43 = vor.u32 %v7991_v39, %v7990_v25  ;;  %v7049_v49 = vmul.u32 %v7042_v61, %v7033_v7  ;;  %11998 = vcosq.f32 %v7323_v53  ;;  %v16945_v61 = vld [vmem:[#allocation8_spill] sm:$0xff] }
 0x900   : > { %v7053_v0 = vsel %vm7051_vm1, %v7052_v37, %v15699_v27  ;;  %v7112_v18 = vadd.s32 4294967292, %v15724_v11  ;;  %12000 = vsinq.f32 %v7323_v53  ;;  %v16942_v17 = vand.u32 2147483647, %v15006_v30 }
 0x901   : > { %vm16649_vm5 = vcmp.lt.s32.totalorder %v15311_v32, 0  ;;  %v7997_v36 = vand.u32 2147483647, %v7996_v16  ;;  %v7054_v19 = vadd.s32 %v7053_v0, %v7049_v49  ;;  %v7324_v8 = vsel %vm15710_vm2, 0, %v7322_v20 }
 0x902   : > { %vm15751_vm7 = vcmp.le.f32.partialorder %v16942_v17, 0.7853982  ;;  %v7217_v29 = vsub.s32 4, %v16945_v61  ;;  %12002 = vcosq.f32 %v7560_v59  ;;  %v7711_v60 = vor.u32 %v15623_v9, %v15609_v13 }
 0x903   : > { %v7896_v27 = vmul.f32 %v7895_v42, %v7893_v40  ;;  %v7219_v58 = vsel %vm15751_vm7, %v15006_v30, %v15411_v56  ;;  %12004 = vsinq.f32 %v7560_v59  ;;  %v7999_v39 = vcvt.s32.f32 %v7992_v43 }
 0x904   : > { %v7055_v31 = vadd.s32 536870912, %v7054_v19  ;;  %v7218_v14 = vsel %vm7133_vm9, %v7217_v29, %v16945_v61  ;;  %v7664_v33 = vsel %vm15704_vm15, %v16929_v5, %v7661_v55  ;;  %vm16655_vm13 = vcmp.lt.s32.totalorder %v15399_v38, 0  ;;  %v16951_v29 = vld [vmem:[#allocation19_spill] sm:$0xff] }
 0x905   : > { %vm7115_vm4 = vcmp.ge.s32.totalorder %v7112_v18, 0  ;;  %v7328_v13 = vadd.s32 3, %v7324_v8  ;;  %v7220_v9 = vsel %vm15751_vm7, 0, %v7218_v14  ;;  %v8000_v4 = vmul.f32 %v7999_v39, %v7997_v36 }
 0x906   : > { %v7056_v56 = vshrl.u32 %v7055_v31, 30  ;;  %vm7118_vm14 = vcmp.lt.s32.totalorder %v7112_v18, 1024  ;;  %12006 = vcosq.f32 %v7219_v58  ;;  %v16946_v22 = vsub.s32 4, %v15390_v62 }
 0x907   : > { %v15784_v47 = vsel %vm16656_vm3, %v15717_v46, 920167782  ;;  %v7897_v53 = vxor.u32 2147483648, %v7896_v27  ;;  %12008 = vsinq.f32 %v7219_v58  ;;  %v15788_v59 = vsel %vm16656_vm3, %v7711_v60, 1326507024  ;;  %vm7121_vm9 = vmand %vm7115_vm4, %vm7118_vm14 }
 0x908   : > { %v15779_v7 = vsel %vm7578_vm12, %v16946_v22, %v15390_v62  ;;  %12010 = vcosq.f32 %v7664_v33  ;;  %v7057_v25 = vshll.u32 %v7056_v56, 30  ;;  %v7224_v16 = vadd.s32 3, %v7220_v9 }
 0x909   : > { %12012 = vsinq.f32 %v7664_v33  ;;  %v7329_v55 = vand.u32 3, %v7328_v13  ;;  %v11999_v40 = vpop.eup %11998  ;;  %v8001_v37 = vxor.u32 2147483648, %v8000_v4  ;;  %v16947_v20 = vand.u32 2147483647, %v16922_v2 }
 0x90a   : > { %vm16657_vm11 = vcmp.lt.s32.totalorder %v16922_v2, 0  ;;  %v15800_v43 = vsub.s32 %v7054_v19, %v7057_v25  ;;  %v15803_v49 = vadd.s32 4294967293, %v15515_v34  ;;  %v12001_v0 = vpop.eup %12000  ;;  %v15807_v18 = vsel %vm16649_vm5, %v7897_v53, %v7896_v27 }
 0x90b   : > { %vm15795_vm12 = vcmp.le.f32.partialorder %v16947_v20, 0.7853982  ;;  %16950 = vst [vmem:[#allocation12_spill] sm:$0xff] %v15807_v18  ;;  %v15811_v17 = vadd.s32 %v15698_v50, %v15694_v48  ;;  %v7080_v23 = vsub.s32 4, %v7056_v56  ;;  %v15814_v36 = vadd.s32 4294967293, %v15576_v28 }
 0x90c   : > { %v7060_v8 = vsub.s32 0, %v15800_v43  ;;  %v15818_v19 = vsel %vm7121_vm9, 1.0, %v16915_v51  ;;  %v15820_v61 = vand.u32 3, %v7224_v16  ;;  %v16651_v60 = vand.u32 2147483647, %v16951_v29  ;;  %v15823_v58 = vpop.eup %12002 }
 0x90d   : > { %vm7330_vm8 = vcmp.lt.s32.totalorder %v7329_v55, 2  ;;  %v7332_v27 = vxor.u32 2147483648, %v12001_v0  ;;  %v7335_v39 = vxor.u32 2147483648, %v11999_v40  ;;  %v7357_v48 = vshrl.u32 %v16684_v26, %v15302_v1  ;;  %v15827_v50 = vpop.eup %12004 }
 0x90e   : > { %v15831_v31 = vsel %vm16655_vm13, %v8001_v37, %v8000_v4  ;;  %v10875_v14 = vmin.u32 %v7060_v8, %v15800_v43  ;;  %vm7331_vm2 = vcmp.eq.s32.totalorder %v7329_v55, 0  ;;  %vm7334_vm1 = vcmp.eq.s32.totalorder %v7329_v55, 2 }
 0x90f   : > { %vm7455_vm7 = vcmp.ge.s32.totalorder %v15803_v49, 0  ;;  %vm7458_vm4 = vcmp.lt.s32.totalorder %v15803_v49, 1024  ;;  %v15838_v33 = vsel %vm16657_vm11, %v7080_v23, %v7056_v56  ;;  %v7356_v13 = vshll.u32 %v16689_v35, %v15270_v10 }
 0x910   : > { %v7360_v9 = vshrl.u32 %v16685_v21, %v15302_v1  ;;  %v12007_v4 = vpop.eup %12006  ;;  %v7062_v22 = vclz %v10875_v14  ;;  %vm7227_vm5 = vcmp.eq.s32.totalorder %v15820_v61, 0  ;;  %v7346_v53 = vand.u32 8388607, %v16651_v60 }
 0x911   : > { %v7359_v56 = vshll.u32 %v16684_v26, %v15270_v10  ;;  %v12009_v25 = vpop.eup %12008  ;;  %v7333_v16 = vsel %vm7331_vm2, %v11999_v40, %v7332_v27  ;;  %v7336_v37 = vsel %vm7334_vm1, %v7335_v39, %v12001_v0  ;;  %v7231_v20 = vxor.u32 2147483648, %v12007_v4 }
 0x912   : > { %v7358_v23 = vor.u32 %v7357_v48, %v7356_v13  ;;  %v15852_v8 = vpop.eup %12010  ;;  %v10876_v24 = vadd.s32 4294967294, %v7062_v22  ;;  %v7362_v14 = vshll.u32 %v16685_v21, %v15270_v10  ;;  %v7363_v60 = vshrl.u32 %v16875_v44, %v15302_v1 }
 0x913   : > { %v7361_v62 = vor.u32 %v7360_v9, %v7359_v56  ;;  %v15858_v54 = vpop.eup %12012  ;;  %v16952_v6 = vand.u32 2147483647, %v15399_v38  ;;  %v7083_v0 = vsel %vm15795_vm12, 0, %v15838_v33  ;;  %v7228_v27 = vxor.u32 2147483648, %v12009_v25 }
 0x914   : > { %vm7230_vm1 = vcmp.eq.s32.totalorder %v15820_v61, 2  ;;  %v7355_v10 = vshrl.u32 %v16689_v35, %v15302_v1  ;;  %vm10877_vm13 = vcmp.lt.s32.totalorder %v10876_v24, 0  ;;  %vm7327_vm3 = vweird.f32 %v15019_v3 }
 0x915   : > { %vm15862_vm2 = vcmp.le.f32.partialorder %v16952_v6, 0.7853982  ;;  %v7337_v39 = vsel %vm7330_vm8, %v7333_v16, %v7336_v37  ;;  %v7347_v48 = vor.u32 8388608, %v7346_v53  ;;  %v7364_v6 = vor.u32 %v7363_v60, %v7362_v14  ;;  %v16955_v14 = vld [vmem:[#allocation26_spill] sm:$0xff] }
 0x916   : > { %v7065_v13 = vsel %vm10877_vm13, 0, %v10876_v24  ;;  %vm7223_vm11 = vweird.f32 %v15006_v30  ;;  %v7232_v9 = vsel %vm7230_vm1, %v7231_v20, %v12009_v25  ;;  %vm7371_vm14 = vcmp.lt.s32.totalorder %v15295_v41, 1  ;;  %vm7461_vm13 = vmand %vm7455_vm7, %vm7458_vm4 }
 0x917   : > { %vm7372_vm9 = vcmp.lt.s32.totalorder %v15295_v41, 2  ;;  %v7066_v33 = vsub.s32 32, %v7065_v13  ;;  %v7070_v22 = vsub.s32 4294967266, %v7065_v13  ;;  %vm7373_vm10 = vcmp.lt.s32.totalorder %v15295_v41, 3 }
 0x918   : > { %v7379_v1 = vsel %vm7371_vm14, %v7358_v23, %v7361_v62  ;;  %v7229_v56 = vsel %vm7227_vm5, %v12007_v4, %v7228_v27  ;;  %v7376_v55 = vsel %vm7374_vm0, %v7364_v6, 2102212464  ;;  %v7381_v24 = vsel %vm7373_vm10, %v7364_v6, %v15404_v63  ;;  %v16956_v27 = vld [vmem:[#allocation22_spill] sm:$0xff] }
 0x919   : > { %v7383_v60 = vsel %vm7371_vm14, %v7361_v62, %v7364_v6  ;;  %v7067_v53 = vshll.u32 %v15800_v43, %v7065_v13  ;;  %v7068_v25 = vshrl.u32 %v15811_v17, %v7066_v33  ;;  %v7071_v16 = vadd.s32 127, %v7070_v22 }
 0x91a   : > { %v7375_v37 = vsel %vm7371_vm14, %v7355_v10, %v7358_v23  ;;  %v7377_v20 = vsel %vm7373_vm10, %v7361_v62, %v7376_v55  ;;  %v7382_v4 = vsel %vm7372_vm9, %v7379_v1, %v7381_v24  ;;  %v7385_v18 = vsel %vm7373_vm10, %v16956_v27, %v16955_v14 }
 0x91b   : > { %v7387_v63 = vshll.u32 %v7347_v48, 8  ;;  %v7069_v6 = vor.u32 %v7068_v25, %v7067_v53  ;;  %v7072_v12 = vshll.u32 %v7071_v16, 23  ;;  %vm16957_vm0 = vcmp.lt.s32.totalorder %v15820_v61, 2 }
 0x91c   : > { %v7233_v43 = vsel %vm16957_vm0, %v7229_v56, %v7232_v9  ;;  %vm16958_vm5 = vcmp.lt.s32.totalorder %v15814_v36, 1024  ;;  %vm16959_vm8 = vcmp.ge.s32.totalorder %v15814_v36, 0  ;;  %v7386_v62 = vsel %vm7372_vm9, %v7383_v60, %v7385_v18 }
 0x91d   : > { %vm7460_vm14 = vmand %vm16959_vm8, %vm16958_vm5  ;;  %v15901_v49 = vmul.u32.u64.low %v7387_v63, %v7386_v62  ;;  %v15902_v17 = vmul.u32.u64.high %v7387_v63, %v7386_v62, %v15901_v49  ;;  %v15904_v23 = vmul.u32.u64.low %v7387_v63, %v7382_v4  ;;  %v15905_v10 = vmul.u32.u64.high %v7387_v63, %v7382_v4, %v15904_v23 }
 0x91e   : > { %v15912_v61 = vsel %vm15862_vm2, %v15399_v38, %v15831_v31  ;;  %v7073_v48 = vor.u32 4788187, %v7072_v12  ;;  %v15915_v36 = vsel %vm7461_vm13, 1.0, %v16915_v51  ;;  %v7378_v18 = vsel %vm7372_vm9, %v7375_v37, %v7377_v20  ;;  %v16960_v20 = vld [vmem:[#allocation3_spill] sm:$0xff] }
 0x91f   : > { %v7087_v13 = vadd.s32 3, %v7083_v0  ;;  %v7338_v9 = vsel %vm7327_vm3, nan, %v7337_v39  ;;  %v15922_v33 = vsel %vm7460_vm14, 1.0, %v16915_v51  ;;  %v7665_v22 = vsel %vm15704_vm15, 0, %v15779_v7 }
 0x920   : > { %v7074_v31 = vand.u32 2147483647, %v7073_v48  ;;  %v7076_v1 = vcvt.s32.f32 %v7069_v6  ;;  %v7234_v12 = vsel %vm7223_vm11, nan, %v7233_v43  ;;  %v7669_v56 = vadd.s32 3, %v7665_v22 }
 0x921   : > { %v7394_v55 = vmul.u32 %v7387_v63, %v7378_v18  ;;  %vm7396_vm10 = vc.u32 %v15902_v17, %v15904_v23  ;;  %v7397_v41 = vadd.s32 1, %v15905_v10  ;;  %v7673_v0 = vxor.u32 2147483648, %v15858_v54 }
 0x922   : > { %v7077_v39 = vmul.f32 %v7076_v1, %v7074_v31  ;;  %v7670_v24 = vand.u32 3, %v7669_v56  ;;  %v7676_v60 = vxor.u32 2147483648, %v15852_v8  ;;  %v7793_v52 = vadd.s32 4294967294, %v15515_v34 }
 0x923   : > { %v7444_v7 = vmul.f32 %v7338_v9, %v7338_v9  ;;  %v7443_v53 = vmul.f32 %v7234_v12, %v7234_v12  ;;  %v7398_v25 = vsel %vm7396_vm10, %v7397_v41, %v15905_v10  ;;  %vm7668_vm15 = vweird.f32 %v16929_v5 }
 0x924   : > { %v7078_v16 = vxor.u32 2147483648, %v7077_v39  ;;  %v7399_v37 = vadd.s32 %v7398_v25, %v7394_v55  ;;  %vm7671_vm3 = vcmp.lt.s32.totalorder %v7670_v24, 2  ;;  %v7561_v4 = vsel %vm15660_vm6, 0, %v16960_v20  ;;  %v16964_v20 = vld [vmem:[#allocation5_spill] sm:$0xff] }
 0x925   : > { %vm7672_vm11 = vcmp.eq.s32.totalorder %v7670_v24, 0  ;;  %vm7675_vm7 = vcmp.eq.s32.totalorder %v7670_v24, 2  ;;  %vm7796_vm4 = vcmp.ge.s32.totalorder %v7793_v52, 0  ;;  %vm7799_vm9 = vcmp.lt.s32.totalorder %v7793_v52, 1024 }
 0x926   : > { %vm16961_vm1 = vcmp.lt.s32.totalorder %v16922_v2, 0  ;;  %v7400_v27 = vadd.s32 536870912, %v7399_v37  ;;  %v7674_v63 = vsel %vm7672_vm11, %v15852_v8, %v7673_v0  ;;  %v7677_v6 = vsel %vm7675_vm7, %v7676_v60, %v15858_v54  ;;  %vm7802_vm13 = vmand %vm7796_vm4, %vm7799_vm9 }
 0x927   : > { %v7079_v14 = vsel %vm16961_vm1, %v7078_v16, %v7077_v39  ;;  %v7678_v62 = vsel %vm7671_vm3, %v7674_v63, %v7677_v6  ;;  %v7565_v57 = vadd.s32 3, %v7561_v4  ;;  %v7569_v49 = vxor.u32 2147483648, %v15827_v50  ;;  %v16962_v39 = vld [vmem:[#allocation20_spill] sm:$0xff]  ;;  %v16963_v16 = vld [vmem:[#allocation27_spill] sm:$0xff] }
 0x928   : > { %v7082_v43 = vsel %vm15795_vm12, %v16922_v2, %v7079_v14  ;;  %v7401_v10 = vshrl.u32 %v7400_v27, 30  ;;  %v7679_v48 = vsel %vm7668_vm15, nan, %v7678_v62  ;;  %v7572_v18 = vxor.u32 2147483648, %v15823_v58  ;;  %v10926_v62 = vld [vmem:[%s16504_s7 + $0x2] sm:$0x3] }
 0x929   : > { %12014 = vcosq.f32 %v7082_v43  ;;  %v7785_v8 = vmul.f32 %v7679_v48, %v7679_v48  ;;  %v7566_v9 = vand.u32 3, %v7565_v57  ;;  %v7792_v54 = vadd.s32 4294967294, %v15576_v28 }
 0x92a   : > { %12016 = vsinq.f32 %v7082_v43  ;;  %v15952_v22 = vand.u32 3, %v7087_v13  ;;  %v7447_v42 = vadd.f32 %v7444_v7, %v15019_v3  ;;  %v7402_v31 = vshll.u32 %v7401_v10, 30 }
 0x92b   : > { %v10909_v1 = vsel %vm7802_vm13, 1.0, %v16915_v51  ;;  %v7446_v12 = vadd.f32 %v7443_v53, %v15006_v30  ;;  %v7788_v56 = vadd.f32 %v7785_v8, %v16929_v5  ;;  %vm7568_vm6 = vcmp.eq.s32.totalorder %v7566_v9, 0 }
 0x92c   : > { %vm7571_vm12 = vcmp.eq.s32.totalorder %v7566_v9, 2  ;;  %vm7341_vm0 = vcmp.lt.s32.totalorder %v16951_v29, 0  ;;  %v15959_v55 = vsub.s32 %v7399_v37, %v7402_v31  ;;  %vm7567_vm5 = vcmp.lt.s32.totalorder %v7566_v9, 2 }
 0x92d   : > { %v7570_v41 = vsel %vm7568_vm6, %v15823_v58, %v7569_v49  ;;  %v7573_v13 = vsel %vm7571_vm12, %v7572_v18, %v15827_v50  ;;  %v15963_v0 = vmul.f32 %v10909_v1, %v7788_v56  ;;  %vm7564_vm8 = vweird.f32 %v15132_v45 }
 0x92e   : > { %v7574_v3 = vsel %vm7567_vm5, %v7570_v41, %v7573_v13  ;;  %vm7795_vm14 = vcmp.ge.s32.totalorder %v7792_v54, 0  ;;  %v7405_v30 = vsub.s32 0, %v15959_v55  ;;  %vm7798_vm10 = vcmp.lt.s32.totalorder %v7792_v54, 1024 }
 0x92f   : > { %v7575_v5 = vsel %vm7564_vm8, nan, %v7574_v3  ;;  %v7680_v24 = vand.u32 2147483647, %v16962_v39  ;;  %vm7086_vm15 = vweird.f32 %v16922_v2  ;;  %vm7089_vm3 = vcmp.lt.s32.totalorder %v15952_v22, 2  ;;  %8160 = vmatprep.subr.mxu0 %v15963_v0  ;;  %vm7801_vm4 = vmand %vm7795_vm14, %vm7798_vm10 }
 0x930   : > { %vm7090_vm11 = vcmp.eq.s32.totalorder %v15952_v22, 0  ;;  %vm7093_vm7 = vcmp.eq.s32.totalorder %v15952_v22, 2  ;;  %v7784_v58 = vmul.f32 %v7575_v5, %v7575_v5  ;;  %v15974_v50 = vmul.f32 %v15915_v36, %v7447_v42 }
 0x931   : > { %v15977_v60 = vmul.f32 %v15922_v33, %v7446_v12  ;;  %v10890_v52 = vmin.u32 %v7405_v30, %v15959_v55  ;;  %v10908_v7 = vsel %vm7801_vm4, 1.0, %v16915_v51  ;;  %v7425_v53 = vsub.s32 4, %v7401_v10 }
 0x932   : > { %v7787_v25 = vadd.f32 %v7784_v58, %v15132_v45  ;;  %v7697_v37 = vshll.u32 %v16689_v35, %v16963_v16  ;;  %v7698_v4 = vshrl.u32 %v16684_v26, %v16964_v20  ;;  %v7395_v36 = vadd.s32 %v15904_v23, %v15902_v17 }
 0x933   : > { %v12015_v14 = vpop.eup %12014  ;;  %v7407_v27 = vclz %v10890_v52  ;;  %v7687_v33 = vand.u32 8388607, %v7680_v24  ;;  %v7700_v63 = vshll.u32 %v16684_v26, %v16963_v16  ;;  %v7701_v49 = vshrl.u32 %v16685_v21, %v16964_v20 }
 0x934   : > { %v12017_v6 = vpop.eup %12016  ;;  %v7094_v43 = vxor.u32 2147483648, %v12015_v14  ;;  %v15992_v45 = vmul.f32 %v10908_v7, %v7787_v25  ;;  %v7699_v57 = vor.u32 %v7698_v4, %v7697_v37  ;;  %v7703_v48 = vshll.u32 %v16685_v21, %v16963_v16 }
 0x935   : > { %v7091_v17 = vxor.u32 2147483648, %v12017_v6  ;;  %v10891_v23 = vadd.s32 4294967294, %v7407_v27  ;;  %v7704_v18 = vshrl.u32 %v16875_v44, %v16964_v20  ;;  %v16007_v9 = vsel %vm7341_vm0, %v7425_v53, %v7401_v10 }
 0x936   : > { %v7095_v8 = vsel %vm7093_vm7, %v7094_v43, %v12017_v6  ;;  %8161 = vmatpush1.msra.mxu0 %v15992_v45  ;;  %v7696_v54 = vshrl.u32 %v16689_v35, %v16964_v20  ;;  %v7702_v42 = vor.u32 %v7701_v49, %v7700_v63  ;;  %v16965_v1 = vand.u32 2147483647, %v16951_v29 }
 0x937   : > { %v7092_v31 = vsel %vm7090_vm11, %v12015_v14, %v7091_v17  ;;  %vm10892_vm1 = vcmp.lt.s32.totalorder %v10891_v23, 0  ;;  %8234 = vmatprep.subr.mxu0 %v15974_v50  ;;  %vm16968_vm13 = vcmask 64512   ;;  %v7688_v10 = vor.u32 8388608, %v7687_v33 }
 0x938   : > { %vm16016_vm9 = vcmp.le.f32.partialorder %v16965_v1, 0.7853982  ;;  %10927 = vmatmul.mubr.msk.f32.vlgmr.msra.gmra.mrb[34].mxu0 %vm16968_vm13, %v10926_v62  ;;  %v7705_v56 = vor.u32 %v7704_v18, %v7703_v48  ;;  %v7096_v41 = vsel %vm7089_vm3, %v7092_v31, %v7095_v8  ;;  %v7410_v13 = vsel %vm10892_vm1, 0, %v10891_v23  ;;  %vm16973_vm10 = vmmov %vm16968_vm13 }
 0x939   : > { %8235 = vmatpush1.msra.mxu0 %v15977_v60  ;;  %vm7712_vm6 = vcmp.lt.s32.totalorder %v15595_v15, 1  ;;  %vm7714_vm12 = vcmp.lt.s32.totalorder %v15595_v15, 3  ;;  %8298 = vmatprep.mubr.f32.mxu0 %v16915_v51  ;;  %v16969_v3 = vand.u32 2147483647, %v15311_v32  ;;  %v7097_v5 = vsel %vm7086_vm15, nan, %v7096_v41 }
 0x93a   : > { %v7411_v22 = vsub.s32 32, %v7410_v13  ;;  %v7415_v58 = vsub.s32 4294967266, %v7410_v13  ;;  %v7720_v52 = vsel %vm7712_vm6, %v7699_v57, %v7702_v42  ;;  %v7100_v7 = vmul.f32 %v7097_v5, %v7097_v5 }
 0x93b   : > { %vm16030_vm5 = vcmp.le.f32.partialorder %v16969_v3, 0.7853982  ;;  %vm7713_vm8 = vcmp.lt.s32.totalorder %v15595_v15, 2  ;;  %v7722_v53 = vsel %vm7714_vm12, %v7705_v56, %v15784_v47  ;;  %v7724_v25 = vsel %vm7712_vm6, %v7702_v42, %v7705_v56 }
 0x93c   : > { %v7412_v16 = vshll.u32 %v15959_v55, %v7410_v13  ;;  %v7413_v37 = vshrl.u32 %v7395_v36, %v7411_v22  ;;  %v7416_v20 = vadd.s32 127, %v7415_v58  ;;  %vm16972_vm14 = vcmp.lt.s32.totalorder %v15595_v15, 4  ;;  %v8154_v55 = vld [vmem:[%s16504_s7] sm:$0x3]  ;;  %v16979_v13 = vld [vmem:[#allocation12_spill] sm:$0xff] }
 0x93d   : > { %v7717_v4 = vsel %vm16972_vm14, %v7705_v56, 2102212464  ;;  %v7103_v14 = vadd.f32 %v7100_v7, %v16922_v2  ;;  %v7723_v27 = vsel %vm7713_vm8, %v7720_v52, %v7722_v53  ;;  %v7726_v47 = vsel %vm7714_vm12, %v15717_v46, %v15788_v59  ;;  %v16978_v56 = vld [vmem:[#allocation17_spill] sm:$0xff] }
 0x93e   : > { %v7728_v33 = vshll.u32 %v7688_v10, 8  ;;  %v7414_v36 = vor.u32 %v7413_v37, %v7412_v16  ;;  %v7417_v63 = vshll.u32 %v7416_v20, 23  ;;  %v7716_v6 = vsel %vm7712_vm6, %v7696_v54, %v7699_v57  ;;  %v16974_v57 = vld [vmem:[#allocation29_spill] sm:$0xff]  ;;  %v16977_v54 = vld [vmem:[#allocation10_spill] sm:$0xff] }
 0x93f   : > { %v7727_v2 = vsel %vm7713_vm8, %v7724_v25, %v7726_v47  ;;  %v16062_v43 = vmul.f32 %v15818_v19, %v7103_v14  ;;  %v7718_v62 = vsel %vm7714_vm12, %v7702_v42, %v7717_v4  ;;  %v16070_v17 = vadd.s32 4294967293, %v15724_v11 }
 0x940   : > { %v16066_v46 = vmul.u32.u64.low %v7728_v33, %v7727_v2  ;;  %v16067_v59 = vmul.u32.u64.high %v7728_v33, %v7727_v2, %v16066_v46  ;;  %v7418_v49 = vor.u32 4788187, %v7417_v63  ;;  %10928 = vmatmul.mubr.msk.f32.vlgmr.msra.gmra.mrb[34].mxu0 %vm16973_vm10, %v8154_v55  ;;  %v16975_v19 = vsub.s32 4, %v16974_v57  ;;  %v16982_v63 = vld [vmem:[#allocation25_spill] sm:$0xff] }
 0x941   : > { %v16072_v23 = vmul.u32.u64.low %v7728_v33, %v7723_v27  ;;  %v16073_v48 = vmul.u32.u64.high %v7728_v33, %v7723_v27, %v16072_v23  ;;  %vm16976_vm15 = vcmp.lt.s32.totalorder %v15399_v38, 0  ;;  %12018 = vcosq.f32 %v15912_v61  ;;  %8392 = vrot.lane.b32.xlu0 %v16062_v43, %s12097_s25  ;;  %8374 = vmatprep.mubr.f32.mxu0 %v16915_v51  ;;  %v16985_v46 = vld [vmem:[#allocation24_spill] sm:$0xff] }
 0x942   : > { %v16082_v18 = vsel %vm16976_vm15, %v16975_v19, %v16974_v57  ;;  %v7428_v8 = vsel %vm16016_vm9, 0, %v16007_v9  ;;  %v8021_v42 = vand.u32 2147483647, %v16977_v54  ;;  %v7419_v31 = vand.u32 2147483647, %v7418_v49  ;;  %v16980_v9 = vld [vmem:[#allocation11_spill] sm:$0xff] }
 0x943   : > { %v7421_v1 = vcvt.s32.f32 %v7414_v36  ;;  %v7719_v10 = vsel %vm7713_vm8, %v7716_v6, %v7718_v62  ;;  %v8039_v41 = vshrl.u32 %v16684_v26, %v16978_v56  ;;  %v7901_v3 = vsel %vm16030_vm5, %v15311_v32, %v16979_v13  ;;  %v16983_v6 = vld [vmem:[#allocation23_spill] sm:$0xff] }
 0x944   : > { %12020 = vsinq.f32 %v15912_v61  ;;  %vm7737_vm3 = vc.u32 %v16067_v59, %v16072_v23  ;;  %v8038_v5 = vshll.u32 %v16689_v35, %v16980_v9  ;;  %v7432_v58 = vadd.s32 3, %v7428_v8 }
 0x945   : > { %v7422_v22 = vmul.f32 %v7421_v1, %v7419_v31  ;;  %vm7456_vm11 = vcmp.ge.s32.totalorder %v16070_v17, 0  ;;  %v7738_v15 = vadd.s32 1, %v16073_v48  ;;  %v8028_v52 = vand.u32 8388607, %v8021_v42  ;;  %8481 = vrot.lane.b32.xlu0 %v15974_v50, %s12097_s25 }
 0x946   : > { %v7735_v7 = vmul.u32 %v7728_v33, %v7719_v10  ;;  %v8040_v61 = vor.u32 %v8039_v41, %v8038_v5  ;;  %v8041_v53 = vshll.u32 %v16684_v26, %v16980_v9  ;;  %v8042_v25 = vshrl.u32 %v16685_v21, %v16978_v56  ;;  %v16981_v33 = vld [vmem:[#allocation15_spill] sm:$0xff] }
 0x947   : > { %v7423_v16 = vxor.u32 2147483648, %v7422_v22  ;;  %v7739_v37 = vsel %vm7737_vm3, %v7738_v15, %v16073_v48  ;;  %v8044_v20 = vshll.u32 %v16685_v21, %v16980_v9  ;;  %v8045_v4 = vshrl.u32 %v16875_v44, %v16978_v56 }
 0x948   : > { %v7740_v14 = vadd.s32 %v7739_v37, %v7735_v7  ;;  %v8029_v27 = vor.u32 8388608, %v8028_v52  ;;  %v8043_v47 = vor.u32 %v8042_v25, %v8041_v53  ;;  %vm8053_vm7 = vcmp.lt.s32.totalorder %v16981_v33, 1  ;;  %v16986_v7 = vld [vmem:[#allocation28_spill] sm:$0xff] }
 0x949   : > { %v7424_v26 = vsel %vm7341_vm0, %v7423_v16, %v7422_v22  ;;  %v8046_v55 = vor.u32 %v8045_v4, %v8044_v20  ;;  %vm8054_vm4 = vcmp.lt.s32.totalorder %v16981_v33, 2  ;;  %vm8055_vm1 = vcmp.lt.s32.totalorder %v16981_v33, 3  ;;  %8479 = vrot.lane.b32.xlu0 %v15977_v60, %s12097_s25 }
 0x94a   : > { %v7427_v21 = vsel %vm16016_vm9, %v16951_v29, %v7424_v26  ;;  %v7741_v44 = vadd.s32 536870912, %v7740_v14  ;;  %v8061_v36 = vsel %vm8053_vm7, %v8040_v61, %v8043_v47  ;;  %v8067_v2 = vsel %vm8055_vm1, %v16983_v6, %v16982_v63 }
 0x94b   : > { %12022 = vcosq.f32 %v7427_v21  ;;  %vm16984_vm0 = vcmp.lt.s32.totalorder %v16981_v33, 4  ;;  %v8063_v49 = vsel %vm8055_vm1, %v8046_v55, %v16985_v46  ;;  %v8065_v12 = vsel %vm8053_vm7, %v8043_v47, %v8046_v55  ;;  %v12019_v48 = vpop.eup %12018 }
 0x94c   : > { %v8058_v62 = vsel %vm16984_vm0, %v8046_v55, 2102212464  ;;  %12024 = vsinq.f32 %v7427_v21  ;;  %v16143_v57 = vshrl.u32 %v7741_v44, 30  ;;  %v8037_v19 = vshrl.u32 %v16689_v35, %v16978_v56 }
 0x94d   : > { %v8064_v8 = vsel %vm8054_vm4, %v8061_v36, %v8063_v49  ;;  %v7433_v31 = vand.u32 3, %v7432_v58  ;;  %vm7459_vm9 = vcmp.lt.s32.totalorder %v16070_v17, 1024  ;;  %v8068_v1 = vsel %vm8054_vm4, %v8065_v12, %v8067_v2 }
 0x94e   : > { %v8069_v10 = vshll.u32 %v8029_v27, 8  ;;  %v12021_v41 = vpop.eup %12020  ;;  %v7743_v13 = vshll.u32 %v16143_v57, 30  ;;  %v8057_v9 = vsel %vm8053_vm7, %v8037_v19, %v8040_v61  ;;  %v8059_v5 = vsel %vm8055_vm1, %v8043_v47, %v8058_v62  ;;  %vm7462_vm13 = vmand %vm7456_vm11, %vm7459_vm9 }
 0x94f   : > { %v8006_v35 = vsel %vm15862_vm2, 0, %v16082_v18  ;;  %v16987_v61 = vsub.s32 4, %v16986_v7  ;;  %vm16988_vm6 = vcmp.lt.s32.totalorder %v15311_v32, 0  ;;  %12026 = vcosq.f32 %v7901_v3 }
 0x950   : > { %v16160_v56 = vmul.u32.u64.low %v8069_v10, %v8068_v1  ;;  %v16161_v22 = vmul.u32.u64.high %v8069_v10, %v8068_v1, %v16160_v56  ;;  %v16163_v58 = vmul.u32.u64.low %v8069_v10, %v8064_v8  ;;  %v16164_v15 = vmul.u32.u64.high %v8069_v10, %v8064_v8, %v16163_v58 }
 0x951   : > { %v16169_v52 = vsub.s32 %v7740_v14, %v7743_v13  ;;  %v7900_v53 = vsel %vm16988_vm6, %v16987_v61, %v16986_v7  ;;  %v8010_v40 = vadd.s32 3, %v8006_v35  ;;  %12028 = vsinq.f32 %v7901_v3 }
 0x952   : > { %vm7431_vm2 = vweird.f32 %v16951_v29  ;;  %v8060_v25 = vsel %vm8054_vm4, %v8057_v9, %v8059_v5  ;;  %vm7434_vm12 = vcmp.lt.s32.totalorder %v7433_v31, 2  ;;  %v10895_v17 = vsel %vm7462_vm13, 1.0, %v16915_v51 }
 0x953   : > { %v7746_v18 = vsub.s32 0, %v16169_v52  ;;  %vm8078_vm8 = vc.u32 %v16161_v22, %v16163_v58  ;;  %v8079_v16 = vadd.s32 1, %v16164_v15  ;;  %vm7435_vm14 = vcmp.eq.s32.totalorder %v7433_v31, 0 }
 0x954   : > { %vm7438_vm10 = vcmp.eq.s32.totalorder %v7433_v31, 2  ;;  %v8011_v3 = vand.u32 3, %v8010_v40  ;;  %v8076_v4 = vmul.u32 %v8069_v10, %v8060_v25  ;;  %v8014_v27 = vxor.u32 2147483648, %v12021_v41 }
 0x955   : > { %v10905_v37 = vmin.u32 %v7746_v18, %v16169_v52  ;;  %v12023_v20 = vpop.eup %12022  ;;  %v8080_v14 = vsel %vm8078_vm8, %v8079_v16, %v16164_v15  ;;  %v8017_v47 = vxor.u32 2147483648, %v12019_v48  ;;  %vm8009_vm15 = vweird.f32 %v15399_v38 }
 0x956   : > { %v12025_v33 = vpop.eup %12024  ;;  %v7439_v26 = vxor.u32 2147483648, %v12023_v20  ;;  %v8134_v21 = vadd.s32 4294967295, %v15515_v34  ;;  %v8081_v36 = vadd.s32 %v8080_v14, %v8076_v4  ;;  %vm8012_vm3 = vcmp.lt.s32.totalorder %v8011_v3, 2 }
 0x957   : > { %v7748_v55 = vclz %v10905_v37  ;;  %v7436_v44 = vxor.u32 2147483648, %v12025_v33  ;;  %v7902_v63 = vsel %vm16030_vm5, 0, %v7900_v53  ;;  %vm8013_vm11 = vcmp.eq.s32.totalorder %v8011_v3, 0 }
 0x958   : > { %v7440_v6 = vsel %vm7438_vm10, %v7439_v26, %v12025_v33  ;;  %vm8016_vm7 = vcmp.eq.s32.totalorder %v8011_v3, 2  ;;  %v8082_v46 = vadd.s32 536870912, %v8081_v36  ;;  %v8015_v49 = vsel %vm8013_vm11, %v12019_v48, %v8014_v27 }
 0x959   : > { %v10906_v2 = vadd.s32 4294967294, %v7748_v55  ;;  %v7437_v62 = vsel %vm7435_vm14, %v12023_v20, %v7436_v44  ;;  %v8018_v12 = vsel %vm8016_vm7, %v8017_v47, %v12021_v41  ;;  %vm8137_vm1 = vcmp.ge.s32.totalorder %v8134_v21, 0  ;;  %v12027_v8 = vpop.eup %12026 }
 0x95a   : > { %v7441_v19 = vsel %vm7434_vm12, %v7437_v62, %v7440_v6  ;;  %v8019_v34 = vsel %vm8012_vm3, %v8015_v49, %v8018_v12  ;;  %v16195_v10 = vshrl.u32 %v8082_v46, 30  ;;  %v7736_v48 = vadd.s32 %v16072_v23, %v16067_v59 }
 0x95b   : > { %vm10907_vm4 = vcmp.lt.s32.totalorder %v10906_v2, 0  ;;  %v7442_v30 = vsel %vm7431_vm2, nan, %v7441_v19  ;;  %v8020_v13 = vsel %vm8009_vm15, nan, %v8019_v34  ;;  %v12029_v9 = vpop.eup %12028  ;;  %vm8140_vm5 = vcmp.lt.s32.totalorder %v8134_v21, 1024 }
 0x95c   : > { %v7751_v1 = vsel %vm10907_vm4, 0, %v10906_v2  ;;  %v7445_v5 = vmul.f32 %v7442_v30, %v7442_v30  ;;  %v8084_v56 = vshll.u32 %v16195_v10, 30  ;;  %v8126_v15 = vmul.f32 %v8020_v13, %v8020_v13  ;;  %vm8143_vm0 = vmand %vm8137_vm1, %vm8140_vm5 }
 0x95d   : > { %v7752_v31 = vsub.s32 32, %v7751_v1  ;;  %v7756_v41 = vsub.s32 4294967266, %v7751_v1  ;;  %v7753_v35 = vshll.u32 %v16169_v52, %v7751_v1  ;;  %v7906_v40 = vadd.s32 3, %v7902_v63 }
 0x95e   : > { %v7448_v7 = vadd.f32 %v7445_v5, %v16951_v29  ;;  %v8085_v18 = vsub.s32 %v8081_v36, %v8084_v56  ;;  %v8129_v25 = vadd.f32 %v8126_v15, %v15399_v38  ;;  %v10924_v59 = vsel %vm8143_vm0, 1.0, %v16915_v51 }
 0x95f   : > { %v7754_v61 = vshrl.u32 %v7736_v48, %v7752_v31  ;;  %v7757_v53 = vadd.s32 127, %v7756_v41  ;;  %v7910_v37 = vxor.u32 2147483648, %v12029_v9  ;;  %v7907_v4 = vand.u32 3, %v7906_v40 }
 0x960   : > { %v16207_v23 = vmul.f32 %v10895_v17, %v7448_v7  ;;  %v8087_v3 = vsub.s32 0, %v8085_v18  ;;  %v16209_v20 = vmul.f32 %v10924_v59, %v8129_v25  ;;  %v7913_v14 = vxor.u32 2147483648, %v12027_v8  ;;  %v8769_v25 = vld [vmem:[%s16504_s7] sm:$0x3] }
 0x961   : > { %v7755_v16 = vor.u32 %v7754_v61, %v7753_v35  ;;  %v7758_v52 = vshll.u32 %v7757_v53, 23  ;;  %v8133_v27 = vadd.s32 4294967295, %v15576_v28  ;;  %vm7909_vm9 = vcmp.eq.s32.totalorder %v7907_v4, 0 }
 0x962   : > { %8483 = vrot.lane.b32.xlu1 %v16207_v23, %s12097_s25  ;;  %v10920_v47 = vmin.u32 %v8087_v3, %v8085_v18  ;;  %8310 = vmatprep.subr.mxu0 %v16209_v20  ;;  %v7911_v33 = vsel %vm7909_vm9, %v12027_v8, %v7910_v37  ;;  %v7766_v26 = vsub.s32 4, %v16143_v57  ;;  %vm7912_vm13 = vcmp.eq.s32.totalorder %v7907_v4, 2  ;;  %v10949_v3 = vld [vmem:[%s16504_s7 + $0xa] sm:$0x3] }
 0x963   : > { %v7759_v29 = vor.u32 4788187, %v7758_v52  ;;  %8774 = vmatprep.subr.mxu1 %v16209_v20  ;;  %v7762_v17 = vcvt.s32.f32 %v7755_v16  ;;  %vm8136_vm6 = vcmp.ge.s32.totalorder %v8133_v27, 0  ;;  %vm7908_vm2 = vcmp.lt.s32.totalorder %v7907_v4, 2 }
 0x964   : > { %v8089_v55 = vclz %v10920_v47  ;;  %v7914_v28 = vsel %vm7912_vm13, %v7913_v14, %v12029_v9  ;;  %vm8139_vm12 = vcmp.lt.s32.totalorder %v8133_v27, 1024  ;;  %vm7905_vm8 = vweird.f32 %v15311_v32 }
 0x965   : > { %v7760_v38 = vand.u32 2147483647, %v7759_v29  ;;  %v7915_v36 = vsel %vm7908_vm2, %v7911_v33, %v7914_v28  ;;  %vm7682_vm14 = vcmp.lt.s32.totalorder %v16962_v39, 0  ;;  %vm8142_vm10 = vmand %vm8136_vm6, %vm8139_vm12  ;;  %vm16226_vm3 = vcmp.le.f32.partialorder %v7680_v24, 0.7853982 }
 0x966   : > { %8572 = vrot.lane.b32.xlu1 %v15963_v0, %s12097_s25  ;;  %v10921_v44 = vadd.s32 4294967294, %v8089_v55  ;;  %v7916_v6 = vsel %vm7905_vm8, nan, %v7915_v36  ;;  %v7767_v2 = vsel %vm7682_vm14, %v7766_v26, %v16143_v57  ;;  %v8077_v12 = vadd.s32 %v16163_v58, %v16161_v22  ;;  %v10940_v58 = vld [vmem:[%s16504_s7 + $0x2] sm:$0x3] }
 0x967   : > { %v7763_v21 = vmul.f32 %v7762_v17, %v7760_v38  ;;  %v8125_v62 = vmul.f32 %v7916_v6, %v7916_v6  ;;  %v10923_v30 = vsel %vm8142_vm10, 1.0, %v16915_v51  ;;  %v7769_v1 = vsel %vm16226_vm3, 0, %v7767_v2 }
 0x968   : > { %vm10922_vm15 = vcmp.lt.s32.totalorder %v10921_v44, 0  ;;  %v7773_v41 = vadd.s32 3, %v7769_v1  ;;  %vm16991_vm11 = vcmask 64512   ;;  %v7794_v56 = vadd.s32 4294967294, %v15724_v11 }
 0x969   : > { %v7764_v63 = vxor.u32 2147483648, %v7763_v21  ;;  %v8092_v19 = vsel %vm10922_vm15, 0, %v10921_v44  ;;  %v8128_v24 = vadd.f32 %v8125_v62, %v15311_v32  ;;  %v10929_v32 = vld [vmem:[%s16504_s7 + $0x4] sm:$0x3]  ;;  %vm16992_vm7 = vmmov %vm16991_vm11  ;;  %v8107_v40 = vsub.s32 4, %v16195_v10 }
 0x96a   : > { %8570 = vrot.lane.b32.xlu1 %v15992_v45, %s12097_s25  ;;  %v8093_v34 = vsub.s32 32, %v8092_v19  ;;  %v8097_v8 = vsub.s32 4294967266, %v8092_v19  ;;  %v8094_v13 = vshll.u32 %v8085_v18, %v8092_v19  ;;  %v7774_v61 = vand.u32 3, %v7773_v41  ;;  %vm16995_vm6 = vmmov %vm16992_vm7  ;;  %v10945_v41 = vld [vmem:[%s16504_s7 + $0x6] sm:$0x3] }
 0x96b   : > { %v7765_v49 = vsel %vm7682_vm14, %v7764_v63, %v7763_v21  ;;  %v16239_v22 = vmul.f32 %v10923_v30, %v8128_v24  ;;  %vm7797_vm4 = vcmp.ge.s32.totalorder %v7794_v56, 0  ;;  %vm8023_vm1 = vcmp.lt.s32.totalorder %v16977_v54, 0 }
 0x96c   : > { %v7768_v57 = vsel %vm16226_vm3, %v16962_v39, %v7765_v49  ;;  %v8095_v9 = vshrl.u32 %v8077_v12, %v8093_v34  ;;  %v8098_v5 = vadd.s32 127, %v8097_v8  ;;  %vm7779_vm5 = vcmp.eq.s32.totalorder %v7774_v61, 2  ;;  %v16996_v34 = vld [vmem:[#allocation30_spill] sm:$0xff] }
 0x96d   : > { %12030 = vcosq.f32 %v7768_v57  ;;  %8311 = vmatpush1.msra.mxu0 %v16239_v22  ;;  %8775 = vmatpush1.msra.mxu1 %v16239_v22  ;;  %vm7800_vm0 = vcmp.lt.s32.totalorder %v7794_v56, 1024  ;;  %vm16263_vm9 = vcmp.le.f32.partialorder %v8021_v42, 0.7853982  ;;  %vm7776_vm13 = vcmp.eq.s32.totalorder %v7774_v61, 0  ;;  %v16997_v8 = vld [vmem:[#allocation18_spill] sm:$0xff] }
 0x96e   : > { %12032 = vsinq.f32 %v7768_v57  ;;  %v8096_v48 = vor.u32 %v8095_v9, %v8094_v13  ;;  %v8099_v31 = vshll.u32 %v8098_v5, 23  ;;  %8848 = vmatprep.subr.mxu1 %v15963_v0  ;;  %10941 = vmatmul.mubr.msk.f32.vlgmr.msra.gmra.mrb[18].mxu1 %vm16991_vm11, %v10940_v58  ;;  %v8108_v14 = vsel %vm8023_vm1, %v8107_v40, %v16195_v10  ;;  %vm7803_vm8 = vmand %vm7797_vm4, %vm7800_vm0 }
 0x96f   : > { %8849 = vmatpush1.msra.mxu1 %v15992_v45  ;;  %8912 = vmatprep.mubr.f32.mxu1 %v16915_v51  ;;  %vm7775_vm2 = vcmp.lt.s32.totalorder %v7774_v61, 2  ;;  %vm7772_vm12 = vweird.f32 %v16962_v39  ;;  %v8110_v10 = vsel %vm16263_vm9, 0, %v8108_v14  ;;  %v10910_v33 = vsel %vm7803_vm8, 1.0, %v16915_v51  ;;  %vm17000_vm0 = vmmov %vm16995_vm6  ;;  %v10935_v61 = vld [vmem:[%s16504_s7 + $0xa] sm:$0x3] }
 0x970   : > { %v8100_v35 = vor.u32 4788187, %v8099_v31  ;;  %v8103_v7 = vcvt.s32.f32 %v8096_v48  ;;  %10930 = vmatmul.mubr.msk.f32.vlgmr.msra.gmra.mrb[34].mxu0 %vm16992_vm7, %v10929_v32  ;;  %v8114_v55 = vadd.s32 3, %v8110_v10  ;;  %v8135_v44 = vadd.s32 4294967295, %v15724_v11  ;;  %v10933_v31 = vld [vmem:[%s16504_s7 + $0x8] sm:$0x3] }
 0x971   : > { %8465 = vmatprep.mubr.f32.mxu0 %v16915_v51  ;;  %vm8113_vm7 = vweird.f32 %v16977_v54  ;;  %v10957_v10 = vld [vmem:[%s16504_s7 + $0x4] sm:$0x3] }
 0x972   : > { %v8101_v15 = vand.u32 2147483647, %v8100_v35  ;;  %v8115_v28 = vand.u32 3, %v8114_v55  ;;  %vm8138_vm10 = vcmp.ge.s32.totalorder %v8135_v44, 0  ;;  %vm8141_vm15 = vcmp.lt.s32.totalorder %v8135_v44, 1024 }
 0x973   : > { %vm8144_vm4 = vmand %vm8138_vm10, %vm8141_vm15 }
 0x974   : > { %v8104_v53 = vmul.f32 %v8103_v7, %v8101_v15  ;;  %vm8120_vm14 = vcmp.eq.s32.totalorder %v8115_v28, 2  ;;  %vm8117_vm3 = vcmp.eq.s32.totalorder %v8115_v28, 0  ;;  %vm8116_vm11 = vcmp.lt.s32.totalorder %v8115_v28, 2  ;;  %vm17008_vm10 = vmmov %vm17000_vm0  ;;  %v10973_v28 = vld [vmem:[%s16504_s7 + $0x6] sm:$0x3] }
 0x975   : > { %v10925_v12 = vsel %vm8144_vm4, 1.0, %v16915_v51  ;;  %vm17009_vm15 = vmmov %vm17000_vm0 }
 0x976   : > { %v8105_v52 = vxor.u32 2147483648, %v8104_v53  ;;  %10942 = vmatmul.mubr.msk.f32.vlgmr.msra.gmra.mrb[18].mxu1 %vm16995_vm6, %v8769_v25  ;;  %vm17013_vm4 = vmmov %vm17000_vm0 }
 0x977   : > { %v12031_v18 = vpop.eup %12030  ;;  %8987 = vmatprep.mubr.f32.mxu1 %v16915_v51 }
 0x978   : > { %v12033_v59 = vpop.eup %12032  ;;  %v7780_v16 = vxor.u32 2147483648, %v12031_v18  ;;  %v8106_v29 = vsel %vm8023_vm1, %v8105_v52, %v8104_v53  ;;  %vm16998_vm1 = vcmask 1039360   ;;  %v10947_v53 = vld [vmem:[%s16504_s7 + $0x8] sm:$0x3] }
 0x979   : > { %v7777_v37 = vxor.u32 2147483648, %v12033_v59  ;;  %v8109_v47 = vsel %vm16263_vm9, %v16977_v54, %v8106_v29  ;;  %vm17001_vm9 = vmmov %vm17000_vm0 }
 0x97a   : > { %v7781_v4 = vsel %vm7779_vm5, %v7780_v16, %v12033_v59  ;;  %12034 = vcosq.f32 %v8109_v47  ;;  %vm16999_vm5 = vmmov %vm16998_vm1 }
 0x97b   : > { %v7778_v27 = vsel %vm7776_vm13, %v12031_v18, %v7777_v37  ;;  %12036 = vsinq.f32 %v8109_v47  ;;  %vm17002_vm13 = vmmov %vm16998_vm1  ;;  %v10937_v37 = vld [vmem:[%s16504_s7 + $0xc] sm:$0x3] }
 0x97c   : > { %v7782_v42 = vsel %vm7775_vm2, %v7778_v27, %v7781_v4  ;;  %vm17003_vm6 = vmmov %vm16998_vm1  ;;  %v10954_v27 = vld [vmem:[%s16504_s7 + $0x2] sm:$0x3] }
 0x97d   : > { %v7783_v38 = vsel %vm7772_vm12, nan, %v7782_v42  ;;  %vm17004_vm2 = vmmov %vm17000_vm0 }
 0x97e   : > { %v7786_v17 = vmul.f32 %v7783_v38, %v7783_v38  ;;  %vm17005_vm12 = vmmov %vm17000_vm0  ;;  %v10951_v38 = vld [vmem:[%s16504_s7 + $0xc] sm:$0x3] }
 0x97f   : > { %vm17006_vm8 = vmmov %vm16998_vm1 }
 0x980   : > { %v7789_v26 = vadd.f32 %v7786_v17, %v16962_v39  ;;  %v9905_v17 = vld [vmem:[%s16504_s7] sm:$0x3] }
 0x982   : > { %v7812_v21 = vmul.f32 %v10910_v33, %v7789_v26  ;;  %v10959_v33 = vld [vmem:[%s16504_s7 + $0x6] sm:$0x3]  ;;  %v10971_v26 = vld [vmem:[%s16504_s7 + $0x4] sm:$0x3] }
 0x984   : > { %8574 = vrot.lane.b32.xlu0 %v7812_v21, %s12097_s25  ;;  %v12035_v36 = vpop.eup %12034 }
 0x985   : > { %v12037_v63 = vpop.eup %12036  ;;  %v8121_v6 = vxor.u32 2147483648, %v12035_v36 }
 0x986   : > { %v8118_v2 = vxor.u32 2147483648, %v12037_v63 }
 0x987   : > { %v8122_v62 = vsel %vm8120_vm14, %v8121_v6, %v12037_v63  ;;  %vm17007_vm14 = vmmov %vm16998_vm1  ;;  %v10963_v6 = vld [vmem:[%s16504_s7 + $0xa] sm:$0x3] }
 0x988   : > { %8663 = vrot.lane.b32.xlu0 %v16209_v20, %s12097_s25  ;;  %v8119_v39 = vsel %vm8117_vm3, %v12035_v36, %v8118_v2  ;;  %vm17010_vm3 = vmmov %vm16998_vm1  ;;  %v10975_v2 = vld [vmem:[%s16504_s7 + $0x8] sm:$0x3] }
 0x989   : > { %v8123_v46 = vsel %vm8116_vm11, %v8119_v39, %v8122_v62  ;;  %vm17011_vm11 = vmmov %vm16998_vm1 }
 0x98a   : > { %v8124_v49 = vsel %vm8113_vm7, nan, %v8123_v46  ;;  %vm17012_vm7 = vmmov %vm17000_vm0 }
 0x98b   : > { %v8127_v11 = vmul.f32 %v8124_v49, %v8124_v49 }
 0x98c   : > { %8661 = vrot.lane.b32.xlu0 %v16239_v22, %s12097_s25 }
 0x98d   : > { %v8130_v19 = vadd.f32 %v8127_v11, %v16977_v54  ;;  %v10450_v54 = vld [vmem:[%s16505_s8] sm:$0x3] }
 0x98f   : > { %v8153_v57 = vmul.f32 %v10925_v12, %v8130_v19  ;;  %v10965_v12 = vld [vmem:[%s16504_s7 + $0xc] sm:$0x3]  ;;  %v10977_v19 = vld [vmem:[%s16504_s7 + $0xa] sm:$0x3] }
 0x990   : > { %9232 = vrot.lane.b32.xlu0 %v16062_v43, %s12098_s26  ;;  %v8747_v43 = vld [vmem:[%s16505_s8] sm:$0x3] }
 0x991   : > { %8665 = vrot.lane.b32.xlu1 %v8153_v57, %s12097_s25  ;;  %s333_s25 = sand.u32 1, %s12076_s30   ;;  %s10990_s30 = sshll.u32 (%p12192_p3), %s12084_s11, 2 }
 0x992   : > { %s10602_s27 = sshll.u32 %s333_s25, 4  ;;  %s10483_s16 = scalar_lea.vmem (%p12192_p3), %s16506_s9, %s10990_s30 }
 0x993   : > { %s16466_s28 = scalar_lea.vmem [#allocation2], %s10602_s27 }
 0x994   : > { %9798 = vrot.lane.b32.xlu0 %v15974_v50, %s12098_s26  ;;  %v9882_v50 = vld [vmem:[%s16505_s8] sm:$0x3] }
 0x995   : > { %9230 = vrot.lane.b32.xlu1 %v16996_v34, %s12098_s26  ;;  %v10979_v34 = vld [vmem:[%s16504_s7 + $0xc] sm:$0x3] }
 0x998   : > { %9796 = vrot.lane.b32.xlu0 %v15977_v60, %s12098_s26  ;;  %v9314_v60 = vld [vmem:[%s16505_s8] sm:$0x3] }
 0x999   : > { %9228 = vrot.lane.b32.xlu1 %v16997_v8, %s12098_s26 }
 0x99c   : > { %10368 = vrot.lane.b32.xlu0 %v7812_v21, %s12098_s26  ;;  %v10961_v21 = vld [vmem:[%s16504_s7 + $0x8] sm:$0x3] }
 0x99d   : > { %9800 = vrot.lane.b32.xlu1 %v16207_v23, %s12098_s26  ;;  %v8391_v23 = vpop.permute.xlu1 %8390 }
 0x9a0   : > { %8750 = vperm.xlu0 %11787, %v8747_v43  }
 0x9a1   : > { %10366 = vrot.lane.b32.xlu1 %v15963_v0, %s12098_s26  ;;  %v8389_v30 = vpop.permute.xlu1 %8388  ;;  %v10931_v0 = vld [vmem:[%s16504_s7 + $0x6] sm:$0x3] }
 0x9a2   : > { %v16328_v13 = vsel %vm16999_vm5, %v8389_v30, %v8391_v23  ;;  %vm17015_vm5 = vmmov %vm17000_vm0 }
 0x9a4   : > { %9885 = vperm.xlu0 %11787, %v9882_v50  }
 0x9a5   : > { %10364 = vrot.lane.b32.xlu1 %v15992_v45, %s12098_s26  ;;  %v10943_v45 = vld [vmem:[%s16504_s7 + $0x4] sm:$0x3] }
 0x9a9   : > { %9317 = vperm.xlu1 %11788, %v9314_v60  }
 0x9ad   : > { %10453 = vperm.xlu1 %11788, %v10450_v54  }
 0x9b3   : > { %v8393_v1 = vpop.permute.xlu0 %8392 }
 0x9b4   : > { %v16319_v24 = vsel %vm16998_vm1, %v8391_v23, %v8393_v1  ;;  %vm17014_vm1 = vcmask 1031168  }
 0x9b5   : > { %8401 = vmatprep.subr.mxu0 %v16319_v24  ;;  %8923 = vmatprep.subr.mxu1 %v16319_v24 }
 0x9b6   : > { %8402 = vmatpush1.msra.mxu0 %v16328_v13  ;;  %8924 = vmatpush1.msra.mxu1 %v16328_v13 }
 0x9b7   : > { %10932 = vmatmul.mubr.msk.f32.vlgmr.msra.gmra.mrb[34].mxu0 %vm17000_vm0, %v10931_v0  ;;  %10944 = vmatmul.mubr.msk.f32.vlgmr.msra.gmra.mrb[18].mxu1 %vm17001_vm9, %v10943_v45  ;;  %v8482_v9 = vpop.permute.xlu0 %8481  ;;  %vm17016_vm0 = vmmov %vm17014_vm1 }
 0x9b8   : > { %8556 = vmatprep.mubr.f32.mxu0 %v16915_v51  ;;  %9064 = vmatprep.mubr.f32.mxu1 %v16915_v51  ;;  %vm17017_vm9 = vmmov %vm17004_vm2 }
 0x9bb   : > { %v8480_v5 = vpop.permute.xlu0 %8479 }
 0x9bc   : > { %v16346_v32 = vsel %vm17003_vm6, %v8480_v5, %v8482_v9  ;;  %vm17019_vm6 = vmmov %vm17004_vm2 }
 0x9d4   : > { %v8484_v58 = vpop.permute.xlu1 %8483 }
 0x9d5   : > { %v8486_v48 = vsel %vm17002_vm13, %v8482_v9, %v8484_v58  ;;  %vm17018_vm13 = vmmov %vm17004_vm2 }
 0x9d6   : > { %8492 = vmatprep.subr.mxu0 %v8486_v48  ;;  %9000 = vmatprep.subr.mxu1 %v8486_v48 }
 0x9d7   : > { %8493 = vmatpush1.msra.mxu0 %v16346_v32  ;;  %9001 = vmatpush1.msra.mxu1 %v16346_v32 }
 0x9d8   : > { %10934 = vmatmul.mubr.msk.f32.vlgmr.msra.gmra.mrb[34].mxu0 %vm17004_vm2, %v10933_v31  ;;  %10946 = vmatmul.mubr.msk.f32.vlgmr.msra.gmra.mrb[18].mxu1 %vm17005_vm12, %v10945_v41  ;;  %v8573_v35 = vpop.permute.xlu1 %8572  ;;  %vm17020_vm12 = vmmov %vm17004_vm2 }
 0x9d9   : > { %8647 = vmatprep.mubr.f32.mxu0 %v16915_v51  ;;  %9141 = vmatprep.mubr.f32.mxu1 %v16915_v51 }
 0x9dc   : > { %v8571_v56 = vpop.permute.xlu1 %8570 }
 0x9dd   : > { %v8576_v40 = vsel %vm17007_vm14, %v8571_v56, %v8573_v35  ;;  %vm17022_vm14 = vmmov %vm17004_vm2 }
 0x9f6   : > { %v8575_v15 = vpop.permute.xlu0 %8574 }
 0x9f7   : > { %v8577_v7 = vsel %vm17006_vm8, %v8573_v35, %v8575_v15  ;;  %vm17021_vm8 = vmmov %vm17004_vm2 }
 0x9f8   : > { %8583 = vmatprep.subr.mxu0 %v8577_v7  ;;  %9077 = vmatprep.subr.mxu1 %v8577_v7 }
 0x9f9   : > { %8584 = vmatpush1.msra.mxu0 %v8576_v40  ;;  %9078 = vmatpush1.msra.mxu1 %v8576_v40 }
 0x9fa   : > { %10936 = vmatmul.mubr.msk.f32.vlgmr.msra.gmra.mrb[34].mxu0 %vm17008_vm10, %v10935_v61  ;;  %10948 = vmatmul.mubr.msk.f32.vlgmr.msra.gmra.mrb[18].mxu1 %vm17009_vm15, %v10947_v53  ;;  %v8664_v18 = vpop.permute.xlu0 %8663  ;;  %vm17023_vm10 = vmmov %vm17004_vm2 }
 0x9fb   : > { %8738 = vmatprep.mubr.f32.mxu0 %v16915_v51  ;;  %9218 = vmatprep.mubr.f32.mxu1 %v16915_v51  ;;  %vm17024_vm15 = vmmov %vm17004_vm2 }
 0x9fe   : > { %v8662_v25 = vpop.permute.xlu0 %8661 }
 0x9ff   : > { %v8667_v16 = vsel %vm17010_vm3, %v8662_v25, %v8664_v18  ;;  %vm17025_vm3 = vmmov %vm17016_vm0 }
 0xa02   : > { %v9233_v4 = vpop.permute.xlu0 %9232 }
 0xa03   : > { %v8666_v59 = vpop.permute.xlu1 %8665 }
 0xa04   : > { %v8668_v52 = vsel %vm17011_vm11, %v8664_v18, %v8666_v59  ;;  %vm17026_vm11 = vmmov %vm17016_vm0 }
 0xa05   : > { %8674 = vmatprep.subr.mxu0 %v8668_v52  ;;  %9154 = vmatprep.subr.mxu1 %v8668_v52 }
 0xa06   : > { %8675 = vmatpush1.msra.mxu0 %v8667_v16  ;;  %9155 = vmatpush1.msra.mxu1 %v8667_v16  ;;  %v9799_v55 = vpop.permute.xlu0 %9798 }
 0xa07   : > { %v9231_v29 = vpop.permute.xlu1 %9230  ;;  %10938 = vmatmul.mubr.msk.f32.vlgmr.msra.gmra.mrb[34].mxu0 %vm17012_vm7, %v10937_v37  ;;  %10950 = vmatmul.mubr.msk.f32.vlgmr.msra.gmra.mrb[18].mxu1 %vm17013_vm4, %v10949_v3  ;;  %vm17027_vm7 = vmmov %vm17004_vm2 }
 0xa08   : > { %9342 = vmatprep.subr.mxu0 %v16319_v24  ;;  %v9235_v14 = vsel %vm17014_vm1, %v9231_v29, %v9233_v4  ;;  %9406 = vmatprep.mubr.f32.mxu0 %v16915_v51  ;;  %vm17028_vm4 = vmmov %vm17004_vm2 }
 0xa09   : > { %9343 = vmatpush1.msra.mxu0 %v16328_v13  ;;  %9241 = vmatprep.subr.mxu1 %v9235_v14  ;;  %vm17029_vm1 = vmmov %vm17016_vm0 }
 0xa0a   : > { %9416 = vmatprep.subr.mxu0 %v16209_v20  ;;  %9305 = vmatprep.mubr.f32.mxu1 %v16915_v51  ;;  %v9337_v20 = vld [vmem:[%s16504_s7] sm:$0x3]  ;;  %v9797_v36 = vpop.permute.xlu0 %9796 }
 0xa0b   : > { %v9229_v47 = vpop.permute.xlu1 %9228  ;;  %10955 = vmatmul.mubr.msk.f32.vlgmr.msra.gmra.mrb[36].mxu0 %vm17015_vm5, %v10954_v27  ;;  %v9802_v46 = vsel %vm17026_vm11, %v9797_v36, %v9799_v55  ;;  %vm17030_vm5 = vmmov %vm17016_vm0 }
 0xa0c   : > { %v9234_v42 = vsel %vm17016_vm0, %v9229_v47, %v9231_v29  ;;  %9417 = vmatpush1.msra.mxu0 %v16239_v22  ;;  %9480 = vmatprep.mubr.f32.mxu0 %v16915_v51  ;;  %v10968_v22 = vld [vmem:[%s16504_s7 + $0x2] sm:$0x3]  ;;  %vm17031_vm0 = vmmov %vm17004_vm2 }
 0xa0d   : > { %9242 = vmatpush1.msra.mxu1 %v9234_v42  ;;  %9491 = vmatprep.subr.mxu0 %v8486_v48 }
 0xa0e   : > { %9910 = vmatprep.subr.mxu1 %v8486_v48  ;;  %v10369_v62 = vpop.permute.xlu0 %10368 }
 0xa0f   : > { %10952 = vmatmul.mubr.msk.f32.vlgmr.msra.gmra.mrb[18].mxu1 %vm17017_vm9, %v10951_v38  ;;  %v9801_v44 = vpop.permute.xlu1 %9800  ;;  %vm17032_vm9 = vmmov %vm17031_vm0 }
 0xa10   : > { %9911 = vmatpush1.msra.mxu1 %v16346_v32  ;;  %9974 = vmatprep.mubr.f32.mxu1 %v16915_v51  ;;  %v9803_v63 = vsel %vm17025_vm3, %v9799_v55, %v9801_v44 }
 0xa11   : > { %9984 = vmatprep.subr.mxu1 %v16319_v24 }
 0xa13   : > { %10956 = vmatmul.mubr.msk.f32.vlgmr.msra.gmra.mrb[36].mxu0 %vm17018_vm13, %v9337_v20  ;;  %10969 = vmatmul.mubr.msk.f32.vlgmr.msra.gmra.mrb[20].mxu1 %vm17019_vm6, %v10968_v22  ;;  %v10367_v39 = vpop.permute.xlu1 %10366  ;;  %vm17033_vm13 = vmmov %vm17031_vm0 }
 0xa14   : > { %9492 = vmatpush1.msra.mxu0 %v16346_v32  ;;  %9985 = vmatpush1.msra.mxu1 %v16328_v13  ;;  %v10371_v49 = vsel %vm17029_vm1, %v10367_v39, %v10369_v62 }
 0xa15   : > { %9568 = vmatprep.subr.mxu0 %v8577_v7  ;;  %10059 = vmatprep.subr.mxu1 %v8577_v7 }
 0xa16   : > { %9555 = vmatprep.mubr.f32.mxu0 %v16915_v51  ;;  %10048 = vmatprep.mubr.f32.mxu1 %v16915_v51 }
 0xa17   : > { %v10365_v11 = vpop.permute.xlu1 %10364 }
 0xa18   : > { %v10370_v57 = vsel %vm17030_vm5, %v10365_v11, %v10367_v39 }
 0xa1b   : > { %10958 = vmatmul.mubr.msk.f32.vlgmr.msra.gmra.mrb[36].mxu0 %vm17004_vm2, %v10957_v10  ;;  %10970 = vmatmul.mubr.msk.f32.vlgmr.msra.gmra.mrb[20].mxu1 %vm17020_vm12, %v9905_v17 }
 0xa1c   : > { %9569 = vmatpush1.msra.mxu0 %v8576_v40  ;;  %10060 = vmatpush1.msra.mxu1 %v8576_v40 }
 0xa1d   : > { %9645 = vmatprep.subr.mxu0 %v8668_v52  ;;  %10136 = vmatprep.subr.mxu1 %v8668_v52 }
 0xa1e   : > { %9632 = vmatprep.mubr.f32.mxu0 %v16915_v51  ;;  %10123 = vmatprep.mubr.f32.mxu1 %v16915_v51 }
 0xa1f   : > { %v8751_v8 = vpop.permute.xlu0 %8750 }
 0xa23   : > { %10960 = vmatmul.mubr.msk.f32.vlgmr.msra.gmra.mrb[36].mxu0 %vm17021_vm8, %v10959_v33  ;;  %10972 = vmatmul.mubr.msk.f32.vlgmr.msra.gmra.mrb[20].mxu1 %vm17022_vm14, %v10971_v26  ;;  %v9886_v48 = vpop.permute.xlu0 %9885 }
 0xa24   : > { %9646 = vmatpush1.msra.mxu0 %v8667_v16  ;;  %10137 = vmatpush1.msra.mxu1 %v8667_v16 }
 0xa25   : > { %9722 = vmatprep.subr.mxu0 %v9235_v14  ;;  %10213 = vmatprep.subr.mxu1 %v9235_v14 }
 0xa26   : > { %9709 = vmatprep.mubr.f32.mxu0 %v16915_v51  ;;  %10200 = vmatprep.mubr.f32.mxu1 %v16915_v51 }
 0xa28   : > { %v9318_v23 = vpop.permute.xlu1 %9317 }
 0xa2b   : > { %10962 = vmatmul.mubr.msk.f32.vlgmr.msra.gmra.mrb[36].mxu0 %vm17023_vm10, %v10961_v21  ;;  %10974 = vmatmul.mubr.msk.f32.vlgmr.msra.gmra.mrb[20].mxu1 %vm17024_vm15, %v10973_v28 }
 0xa2c   : > { %9723 = vmatpush1.msra.mxu0 %v9234_v42  ;;  %10214 = vmatpush1.msra.mxu1 %v9234_v42  ;;  %v10454_v56 = vpop.permute.xlu1 %10453 }
 0xa2d   : > { %9809 = vmatprep.subr.mxu0 %v9803_v63  ;;  %10290 = vmatprep.subr.mxu1 %v9803_v63 }
 0xa2e   : > { %9786 = vmatprep.mubr.f32.mxu0 %v16915_v51  ;;  %10277 = vmatprep.mubr.f32.mxu1 %v16915_v51 }
 0xa33   : > { %10964 = vmatmul.mubr.msk.f32.vlgmr.msra.gmra.mrb[36].mxu0 %vm17027_vm7, %v10963_v6  ;;  %10976 = vmatmul.mubr.msk.f32.vlgmr.msra.gmra.mrb[20].mxu1 %vm17028_vm4, %v10975_v2 }
 0xa34   : > { %9810 = vmatpush1.msra.mxu0 %v9802_v46  ;;  %10291 = vmatpush1.msra.mxu1 %v9802_v46 }
 0xa35   : > { %10377 = vmatprep.subr.mxu1 %v10371_v49  ;;  %9873 = vmatprep.mubr.f32.mxu0 %v16915_v51 }
 0xa36   : > { %10354 = vmatprep.mubr.f32.mxu1 %v16915_v51 }
 0xa3b   : > { %10966 = vmatmul.mubr.msk.f32.vlgmr.msra.gmra.mrb[36].mxu0 %vm17031_vm0, %v10965_v12  ;;  %10978 = vmatmul.mubr.msk.f32.vlgmr.msra.gmra.mrb[20].mxu1 %vm17032_vm9, %v10977_v19 }
 0xa3c   : > { %10378 = vmatpush1.msra.mxu1 %v10370_v57  ;;  %10441 = vmatprep.mubr.f32.mxu1 %v16915_v51 }
 0xa43   : > { %10980 = vmatmul.mubr.msk.f32.vlgmr.msra.gmra.mrb[20].mxu1 %vm17033_vm13, %v10979_v34 }
 0xada   : > { %v8740_v43 = vpop.f32.mrb[34].mxu0 }
 0xadb   : > { %v8753_v50 = vadd.f32 %v8751_v8, %v8740_v43  ;;  %v8742_v60 = vpop.f32.mrb[35].mxu0 }
 0xadc   : > { %v8754_v54 = vadd.f32 %v8751_v8, %v8742_v60 }
 0xadd   : > { %12038 = vtanh.f32 %v8753_v50 }
 0xade   : > { %12040 = vtanh.f32 %v8754_v54 }
 0xae2   : > { %v9307_v30 = vpop.f32.mrb[18].mxu1 }
 0xae3   : > { %v9320_v1 = vadd.f32 %v9318_v23, %v9307_v30  ;;  %v9309_v24 = vpop.f32.mrb[19].mxu1 }
 0xae4   : > { %v9321_v0 = vadd.f32 %v9318_v23, %v9309_v24 }
 0xae5   : > { %12042 = vtanh.f32 %v9320_v1 }
 0xae6   : > { %12044 = vtanh.f32 %v9321_v0 }
 0xae7   : > { %v12039_v51 = vpop.eup %12038 }
 0xae8   : > { %v12041_v45 = vpop.eup %12040 }
 0xae9   : > { %v8759_v13 = vcombine.low %v12039_v51, %v12041_v45 }
 0xaeb   : > { %10939 = vst.sshfl [vmem:[%s16466_s28] sm:$0x33 pattern:$0x76325410] %v8759_v13 }
 0xaef   : > { %v12043_v9 = vpop.eup %12042 }
 0xaf0   : > { %v12045_v5 = vpop.eup %12044 }
 0xaf1   : > { %v9326_v58 = vcombine.low %v12043_v9, %v12045_v5 }
 0xaf2   : > { %v10499_v37 = vld [vmem:[%s16466_s28] sm:$0xf] (%p12192_p3) }
 0xaf3   : > { %10987 = vst.sshfl [vmem:[%s16466_s28 + $0x4] sm:$0x33 pattern:$0x76325410] %v9326_v58  ;;  %10500 = vst [vmem:[%s10483_s16] sm:$0xf] (%p12192_p3), %v10499_v37 }
 0xafa   : > { %v10501_v3 = vld [vmem:[%s16466_s28 + $0x4] sm:$0xf] (%p12192_p3) }
 0xafb   : > { %10502 = vst [vmem:[%s10483_s16 + $0x8] sm:$0xf] (%p12192_p3), %v10501_v3 }
 0xb0e   : > { %v9875_v31 = vpop.f32.mrb[36].mxu0 }
 0xb0f   : > { %v9888_v41 = vadd.f32 %v9886_v48, %v9875_v31  ;;  %v9877_v32 = vpop.f32.mrb[37].mxu0 }
 0xb10   : > { %v9889_v35 = vadd.f32 %v9886_v48, %v9877_v32 }
 0xb11   : > { %12046 = vtanh.f32 %v9888_v41 }
 0xb12   : > { %12048 = vtanh.f32 %v9889_v35 }
 0xb16   : > { %v10443_v15 = vpop.f32.mrb[20].mxu1 }
 0xb17   : > { %v10456_v7 = vadd.f32 %v10454_v56, %v10443_v15  ;;  %v10445_v61 = vpop.f32.mrb[21].mxu1 }
 0xb18   : > { %v10457_v53 = vadd.f32 %v10454_v56, %v10445_v61 }
 0xb19   : > { %12050 = vtanh.f32 %v10456_v7 }
 0xb1a   : > { %12052 = vtanh.f32 %v10457_v53 }
 0xb1b   : > { %v12047_v40 = vpop.eup %12046 }
 0xb1c   : > { %v12049_v18 = vpop.eup %12048 }
 0xb1d   : > { %v9894_v25 = vcombine.low %v12047_v40, %v12049_v18 }
 0xb1f   : > { %10988 = vst.sshfl [vmem:[%s16466_s28 + $0x8] sm:$0x33 pattern:$0x76325410] %v9894_v25 }
 0xb21   : > { %10479 = sbr.rel (!%p12192_p3) target bundleno = 2864 (0xb30), region = 60 }
 0xb23   : > { %v12051_v59 = vpop.eup %12050 }
 0xb24   : > { %v12053_v16 = vpop.eup %12052 }
 0xb25   : > { %v10462_v52 = vcombine.low %v12051_v59, %v12053_v16 }
 0xb26   : > { %v10503_v4 = vld [vmem:[%s16466_s28 + $0x8] sm:$0xf] (%p12192_p3) }
 0xb27   : > { %10989 = vst.sshfl [vmem:[%s16466_s28 + $0xc] sm:$0x33 pattern:$0x76325410] %v10462_v52  ;;  %10504 = vst [vmem:[%s10483_s16 + $0x10] sm:$0xf] (%p12192_p3), %v10503_v4 }
 0xb2e   : > { %v10505_v29 = vld [vmem:[%s16466_s28 + $0xc] sm:$0xf] }
 0xb2f   : > { %10506 = vst [vmem:[%s10483_s16 + $0x18] sm:$0xf] %v10505_v29 }
 0xb30 PF: > { %s19_s13 = sadd.s32 1, %s12092_s13   ;;  %s17034_s30 = smov %s12080_s10 }
 0xb31   : > { %p16_p9 = scmp.ge.s32.totalorder %s19_s13, 4   ;;  %s17035_s10 = smov %s12201_s19 }
 0xb32   : > { %s17036_s11 = smov %s12088_s12  ;;  %s17037_s12 = smov %s17039_s15 }
 0xb33   :  { %18 = sbr.rel (!%p16_p9) target bundleno = 3 (0x3), region = 149 }

</bundles_post_ra>
